<compile_context>
chip_gen: v7x
topology: tpu7x:2x2x1
jax: 0.10.0
libtpu: 0.0.40
codegen_flags: <defaults>
</compile_context>

<pallas_src>
import functools

import jax
import jax.numpy as jnp
import numpy as np
from jax.experimental import pallas as pl
from jax.experimental.pallas import tpu as pltpu


def _deconv_block_kernel(x_ref, g_ref, w_ref, o_ref, xt_ref, *,
                         c_in, c_out, hw_out, n_taps, bb, inv_n, eps, unroll):
    # x_ref : (bb*c_in, hw_in)           bf16  bb samples stacked along sublanes
    # g_ref : (hw_in, n_taps*hw_out)     bf16  0/1 gather matrix (constant)
    # w_ref : (n_taps, c_out, c_in)      bf16  per-tap flipped deconv weights
    # o_ref : (bb, c_out, hw_out)              normalised + ReLU'd output
    # xt_ref: (bb*c_in, n_taps*hw_out)   bf16  VMEM scratch: gathered tap slabs

    # Dilation + padding + im2col + compaction for ALL bb samples in one MXU
    # matmul (M = bb*c_in).  Every gather column selects at most one input
    # element, so the f32 -> bf16 round-trip below is exact.
    xt_ref[...] = jax.lax.dot_general(
        x_ref[...], g_ref[...],
        dimension_numbers=(((1,), (0,)), ((), ())),
        preferred_element_type=jnp.float32).astype(jnp.bfloat16)

    def per_sample(b, carry):
        row = pl.multiple_of(b * c_in, c_in)          # sublane-aligned sample base
        acc = None
        for t in range(n_taps):                       # 9 small, fully aligned matmuls
            xt_t = xt_ref[pl.ds(row, c_in), pl.ds(t * hw_out, hw_out)]
            part = jax.lax.dot_general(
                w_ref[t], xt_t,
                dimension_numbers=(((1,), (0,)), ((), ())),
                preferred_element_type=jnp.float32)   # (c_out, hw_out) f32
            acc = part if acc is None else acc + part

        # InstanceNorm2d(affine=False), biased variance, fused single pass.
        # (ConvTranspose2d bias would be cancelled by the mean subtraction.)
        s1 = jnp.sum(acc, axis=1, keepdims=True)
        s2 = jnp.sum(acc * acc, axis=1, keepdims=True)
        mean = s1 * inv_n
        var = jnp.maximum(s2 * inv_n - mean * mean, 0.0)
        y = (acc - mean) * jax.lax.rsqrt(var + eps)   # rsqrt -> EUP slot

        # ReLU + lane-dense store (hw_out is a multiple of 128).
        o_ref[b] = jnp.maximum(y, 0.0).astype(o_ref.dtype)
        return carry

    jax.lax.fori_loop(0, bb, per_sample, 0, unroll=unroll)


def _gather_matrix(h_in, w_in, h_out, w_out, k, s, pad_lo):
    """0/1 matrix: flat dense input -> per-tap, compact output-domain slabs.

    G[ih*w_in + iw, (kh*k + kw)*hw_out + oh*w_out + ow] = 1 iff the direct-conv
    tap (kh, kw) at output (oh, ow) reads input element (ih, iw) of the
    zero-dilated, padded input.  Each column holds at most one 1.
    """
    hw_in, hw_out = h_in * w_in, h_out * w_out
    g = np.zeros((hw_in, k * k * hw_out), np.float32)
    oh, ow = np.meshgrid(np.arange(h_out), np.arange(w_out), indexing="ij")
    o_idx = oh * w_out + ow
    for kh in range(k):
        for kw in range(k):
            rh = oh + kh - pad_lo                     # = ih * s for real taps
            rw = ow + kw - pad_lo
            ih, iw = rh // s, rw // s
            valid = ((rh >= 0) & (rw >= 0) & (rh % s == 0) & (rw % s == 0)
                     & (ih < h_in) & (iw < w_in))
            rows = (ih * w_in + iw)[valid]
            cols = ((kh * k + kw) * hw_out + o_idx)[valid]
            g[rows, cols] = 1.0
    return g


def deconv_block_forward(x_nchw, w_t, bias=None, *, stride, padding,
                         output_padding, eps=1e-5, samples_per_step=1,
                         out_dtype=None):
    """ConvTranspose2d(k, s, p, op) -> InstanceNorm2d(affine=False) -> ReLU.

    NCHW in / NCHW out.  `bias` is accepted for API parity with the PyTorch
    module but intentionally unused: InstanceNorm2d subtracts the per-(n, c)
    mean, which cancels the per-channel bias exactly.
    """
    del bias  # cancelled by InstanceNorm's mean subtraction (affine=False only)

    n, c_in, h_in, w_in = x_nchw.shape
    c_in_w, c_out, k, k2 = w_t.shape
    assert k == k2 and c_in_w == c_in
    s, p, op = stride, padding, output_padding
    assert k - 1 - p >= 0, "padding > kernel_size - 1 is not supported"
    assert 0 <= op < s, "output_padding must be < stride"

    h_out = (h_in - 1) * s - 2 * p + k + op
    w_out = (w_in - 1) * s - 2 * p + k + op
    pad_lo = k - 1 - p
    hw_in, hw_out, n_taps = h_in * w_in, h_out * w_out, k * k

    bb = samples_per_step
    assert n % bb == 0, "samples_per_step must divide the batch"
    # v7x note: pick bb so that n // bb >= 2, otherwise the 'parallel' batch
    # axis has nothing to shard across the two TensorCores.
    out_dtype = x_nchw.dtype if out_dtype is None else out_dtype

    # Compile-time constant gather matrix (block index never changes).
    g_mat = jnp.asarray(_gather_matrix(h_in, w_in, h_out, w_out, k, s, pad_lo),
                        dtype=jnp.bfloat16)

    # ConvTranspose2d weight (C_in, C_out, kH, kW) -> per-tap direct-conv
    # weights (k*k, C_out, C_in) using the transposed-conv -> direct-conv flip.
    w_stack = (jnp.transpose(w_t[:, :, ::-1, ::-1], (2, 3, 1, 0))
               .reshape(n_taps, c_out, c_in).astype(jnp.bfloat16))

    # Dense input; the channels of one grid step are stacked along sublanes
    # (contiguous reshape, free).
    x_flat = x_nchw.reshape(n * c_in, hw_in).astype(jnp.bfloat16)

    kernel = functools.partial(
        _deconv_block_kernel, c_in=c_in, c_out=c_out, hw_out=hw_out,
        n_taps=n_taps, bb=bb, inv_n=1.0 / hw_out, eps=float(eps),
        # Unroll the per-sample loop only while it is short; keep it rolled
        # for larger samples_per_step so vreg live ranges stay bounded.
        unroll=bb <= 2)

    # Explicit VMEM budget: double-buffered x/out, single-buffered constants,
    # plus the gathered-slab scratch, with 2x headroom.
    out_itemsize = jnp.dtype(out_dtype).itemsize
    vmem_est = (2 * bb * c_in * hw_in * 2                 # x (double-buffered)
                + hw_in * n_taps * hw_out * 2             # gather matrix
                + n_taps * c_out * max(c_in, 128) * 2     # weights (lane-padded)
                + 2 * bb * c_out * hw_out * out_itemsize  # output
                + bb * c_in * n_taps * hw_out * 2)        # xt scratch
    vmem_limit = int(min(100 << 20, max(32 << 20, 2 * vmem_est)))

    out = pl.pallas_call(
        kernel,
        out_shape=jax.ShapeDtypeStruct((n, c_out, hw_out), out_dtype),
        grid_spec=pltpu.PrefetchScalarGridSpec(
            num_scalar_prefetch=0,
            grid=(n // bb,),
            in_specs=[
                pl.BlockSpec((bb * c_in, hw_in), lambda i: (i, 0)),
                # Constant-index operands: single-buffered to save VMEM.
                pl.BlockSpec((hw_in, n_taps * hw_out), lambda i: (0, 0),
                             pipeline_mode=pl.Buffered(1)),
                pl.BlockSpec((n_taps, c_out, c_in), lambda i: (0, 0, 0),
                             pipeline_mode=pl.Buffered(1)),
            ],
            out_specs=pl.BlockSpec((bb, c_out, hw_out), lambda i: (i, 0, 0)),
            scratch_shapes=[
                pltpu.VMEM((bb * c_in, n_taps * hw_out), jnp.bfloat16),
            ],
        ),
        compiler_params=pltpu.CompilerParams(
            dimension_semantics=("parallel",),
            vmem_limit_bytes=vmem_limit),
    )(x_flat, g_mat, w_stack)

    # Contiguous (free) reshape back to NCHW.
    return out.reshape(n, c_out, h_out, w_out)


def _reference(x_nchw, w_t, bias, *, stride, padding, output_padding, eps=1e-5):
    """Pure lax/jnp reference of the full forward pass (incl. the bias)."""
    n, c_in, h_in, w_in = x_nchw.shape
    _, c_out, k, _ = w_t.shape
    s, p, op = stride, padding, output_padding
    x = jnp.transpose(x_nchw, (0, 2, 3, 1))
    w_conv = jnp.transpose(w_t[:, :, ::-1, ::-1], (2, 3, 0, 1))
    pad_lo, pad_hi = k - 1 - p, k - 1 - p + op
    y = jax.lax.conv_general_dilated(
        x, w_conv, window_strides=(1, 1),
        padding=[(pad_lo, pad_hi), (pad_lo, pad_hi)],
        lhs_dilation=(s, s),
        dimension_numbers=("NHWC", "HWIO", "NHWC"),
        precision=jax.lax.Precision.HIGHEST)
    y = y + bias[None, None, None, :]
    mean = jnp.mean(y, axis=(1, 2), keepdims=True)
    var = jnp.mean((y - mean) ** 2, axis=(1, 2), keepdims=True)
    y = jnp.maximum((y - mean) * jax.lax.rsqrt(var + eps), 0.0)
    return jnp.transpose(y, (0, 3, 1, 2))


if __name__ == "__main__":
    # Small CycleGAN-style deconv block: k=3, s=2, p=1, op=1 (2x upsample).
    batch, ch_in, ch_out, spatial = 2, 16, 16, 16
    k, s, p, op = 3, 2, 1, 1

    key = jax.random.PRNGKey(0)
    kx, kw, kb = jax.random.split(key, 3)
    x = jax.random.normal(kx, (batch, ch_in, spatial, spatial), jnp.float32)
    # ConvTranspose2d weight layout: (C_in, C_out, kH, kW); bias: (C_out,)
    w_t = 0.1 * jax.random.normal(kw, (ch_in, ch_out, k, k), jnp.float32)
    bias = 0.1 * jax.random.normal(kb, (ch_out,), jnp.float32)

    # Round inputs to bf16-representable values so the bf16-fed kernel and the
    # f32 reference see identical operands (tight comparison).
    x = x.astype(jnp.bfloat16).astype(jnp.float32)
    w_t = w_t.astype(jnp.bfloat16).astype(jnp.float32)

    ref = _reference(x, w_t, bias, stride=s, padding=p, output_padding=op)

    # bb=1: 2 parallel grid steps (v7x can shard them across its 2 TCs);
    # bb=2: whole batch per step (amortizes per-step overhead on v5e/v6e).
    for bb in (1, 2):
        out = deconv_block_forward(x, w_t, bias, stride=s, padding=p,
                                   output_padding=op, samples_per_step=bb)
        out = jax.block_until_ready(out)
        assert out.shape == (batch, ch_out, 2 * spatial, 2 * spatial)
        np.testing.assert_allclose(np.asarray(out), np.asarray(ref),
                                   rtol=5e-3, atol=5e-3)

    # bf16 output variant (halves the dominant store stream on v5e/v6e).
    out_bf16 = deconv_block_forward(x, w_t, bias, stride=s, padding=p,
                                    output_padding=op, samples_per_step=1,
                                    out_dtype=jnp.bfloat16)
    out_bf16 = jax.block_until_ready(out_bf16)
    np.testing.assert_allclose(np.asarray(out_bf16.astype(jnp.float32)),
                               np.asarray(ref), rtol=2e-2, atol=3e-2)

    print("KERNEL_OK")
</pallas_src>

<mosaic_0001>
module attributes {stable_mosaic.version = 11 : i64} {
  func.func @_deconv_block_kernel(%arg0: i32, %arg1: memref<16x256xbf16, #tpu.memory_space<vmem>>, %arg2: memref<256x9216xbf16, #tpu.memory_space<vmem>>, %arg3: memref<9x16x16xbf16, #tpu.memory_space<vmem>>, %arg4: memref<1x16x1024xf32, #tpu.memory_space<vmem>>, %arg5: memref<16x9216xbf16, #tpu.memory_space<vmem>>) attributes {dimension_semantics = [#tpu.dimension_semantics<parallel>], iteration_bounds = array<i64: 2>, scalar_prefetch = 0 : i64, scratch_operands = 1 : i64, tpu.core_type = #tpu.core_type<tc>, window_params = [{transform_indices = @transform_0, window_bounds = array<i64: 16, 256>}, {pipeline_mode = #tpu.pipeline_mode<synchronous>, transform_indices = @transform_1, window_bounds = array<i64: 256, 9216>}, {pipeline_mode = #tpu.pipeline_mode<synchronous>, transform_indices = @transform_2, window_bounds = array<i64: 9, 16, 16>}, {transform_indices = @transform_3, window_bounds = array<i64: 1, 16, 1024>}]} {
    %c0 = arith.constant 0 : index
    %c0_0 = arith.constant 0 : index
    %0 = vector.load %arg1[%c0, %c0_0] : memref<16x256xbf16, #tpu.memory_space<vmem>>, vector<16x256xbf16>
    %c0_1 = arith.constant 0 : index
    %c0_2 = arith.constant 0 : index
    %1 = vector.load %arg2[%c0_1, %c0_2] : memref<256x9216xbf16, #tpu.memory_space<vmem>>, vector<256x9216xbf16>
    %cst = arith.constant dense<0.000000e+00> : vector<16x9216xf32>
    %2 = tpu.matmul %0, %1, %cst {dimension_numbers = #tpu.dot_dimension_numbers<[1], [0], [0], [1], [0, 0, 1, 1], [], []>} : vector<16x256xbf16>, vector<256x9216xbf16>, vector<16x9216xf32> -> vector<16x9216xf32>
    %3 = arith.truncf %2 : vector<16x9216xf32> to vector<16x9216xbf16>
    %c0_3 = arith.constant 0 : index
    %c0_4 = arith.constant 0 : index
    %4 = vector.load %arg5[%c0_3, %c0_4] : memref<16x9216xbf16, #tpu.memory_space<vmem>>, vector<16x9216xbf16>
    tpu.vector_store %arg5[%c0_3, %c0_4], %3 {strides = array<i32>} : memref<16x9216xbf16, #tpu.memory_space<vmem>>, vector<16x9216xbf16>,
    %c0_i32 = arith.constant 0 : i32
    %c16_i32 = arith.constant 16 : i32
    %5 = arith.muli %c0_i32, %c16_i32 : i32
    %6 = tpu.assume_multiple %5, 16 : i32
    %7 = arith.index_cast %6 : i32 to index
    %c0_5 = arith.constant 0 : index
    %8 = vector.load %arg5[%7, %c0_5] : memref<16x9216xbf16, #tpu.memory_space<vmem>>, vector<16x1024xbf16>
    %c0_6 = arith.constant 0 : index
    %c0_7 = arith.constant 0 : index
    %c0_8 = arith.constant 0 : index
    %9 = vector.load %arg3[%c0_6, %c0_7, %c0_8] : memref<9x16x16xbf16, #tpu.memory_space<vmem>>, vector<1x16x16xbf16>
    %10 = vector.shape_cast %9 : vector<1x16x16xbf16> to vector<16x16xbf16>
    %cst_9 = arith.constant dense<0.000000e+00> : vector<16x1024xf32>
    %11 = tpu.matmul %10, %8, %cst_9 {dimension_numbers = #tpu.dot_dimension_numbers<[1], [0], [0], [1], [0, 0, 1, 1], [], []>} : vector<16x16xbf16>, vector<16x1024xbf16>, vector<16x1024xf32> -> vector<16x1024xf32>
    %12 = arith.index_cast %6 : i32 to index
    %c1024 = arith.constant 1024 : index
    %13 = vector.load %arg5[%12, %c1024] : memref<16x9216xbf16, #tpu.memory_space<vmem>>, vector<16x1024xbf16>
    %c1 = arith.constant 1 : index
    %c0_10 = arith.constant 0 : index
    %c0_11 = arith.constant 0 : index
    %14 = vector.load %arg3[%c1, %c0_10, %c0_11] : memref<9x16x16xbf16, #tpu.memory_space<vmem>>, vector<1x16x16xbf16>
    %15 = vector.shape_cast %14 : vector<1x16x16xbf16> to vector<16x16xbf16>
    %cst_12 = arith.constant dense<0.000000e+00> : vector<16x1024xf32>
    %16 = tpu.matmul %15, %13, %cst_12 {dimension_numbers = #tpu.dot_dimension_numbers<[1], [0], [0], [1], [0, 0, 1, 1], [], []>} : vector<16x16xbf16>, vector<16x1024xbf16>, vector<16x1024xf32> -> vector<16x1024xf32>
    %17 = arith.addf %11, %16 : vector<16x1024xf32>
    %18 = arith.index_cast %6 : i32 to index
    %c2048 = arith.constant 2048 : index
    %19 = vector.load %arg5[%18, %c2048] : memref<16x9216xbf16, #tpu.memory_space<vmem>>, vector<16x1024xbf16>
    %c2 = arith.constant 2 : index
    %c0_13 = arith.constant 0 : index
    %c0_14 = arith.constant 0 : index
    %20 = vector.load %arg3[%c2, %c0_13, %c0_14] : memref<9x16x16xbf16, #tpu.memory_space<vmem>>, vector<1x16x16xbf16>
    %21 = vector.shape_cast %20 : vector<1x16x16xbf16> to vector<16x16xbf16>
    %cst_15 = arith.constant dense<0.000000e+00> : vector<16x1024xf32>
    %22 = tpu.matmul %21, %19, %cst_15 {dimension_numbers = #tpu.dot_dimension_numbers<[1], [0], [0], [1], [0, 0, 1, 1], [], []>} : vector<16x16xbf16>, vector<16x1024xbf16>, vector<16x1024xf32> -> vector<16x1024xf32>
    %23 = arith.addf %17, %22 : vector<16x1024xf32>
    %24 = arith.index_cast %6 : i32 to index
    %c3072 = arith.constant 3072 : index
    %25 = vector.load %arg5[%24, %c3072] : memref<16x9216xbf16, #tpu.memory_space<vmem>>, vector<16x1024xbf16>
    %c3 = arith.constant 3 : index
    %c0_16 = arith.constant 0 : index
    %c0_17 = arith.constant 0 : index
    %26 = vector.load %arg3[%c3, %c0_16, %c0_17] : memref<9x16x16xbf16, #tpu.memory_space<vmem>>, vector<1x16x16xbf16>
    %27 = vector.shape_cast %26 : vector<1x16x16xbf16> to vector<16x16xbf16>
    %cst_18 = arith.constant dense<0.000000e+00> : vector<16x1024xf32>
    %28 = tpu.matmul %27, %25, %cst_18 {dimension_numbers = #tpu.dot_dimension_numbers<[1], [0], [0], [1], [0, 0, 1, 1], [], []>} : vector<16x16xbf16>, vector<16x1024xbf16>, vector<16x1024xf32> -> vector<16x1024xf32>
    %29 = arith.addf %23, %28 : vector<16x1024xf32>
    %30 = arith.index_cast %6 : i32 to index
    %c4096 = arith.constant 4096 : index
    %31 = vector.load %arg5[%30, %c4096] : memref<16x9216xbf16, #tpu.memory_space<vmem>>, vector<16x1024xbf16>
    %c4 = arith.constant 4 : index
    %c0_19 = arith.constant 0 : index
    %c0_20 = arith.constant 0 : index
    %32 = vector.load %arg3[%c4, %c0_19, %c0_20] : memref<9x16x16xbf16, #tpu.memory_space<vmem>>, vector<1x16x16xbf16>
    %33 = vector.shape_cast %32 : vector<1x16x16xbf16> to vector<16x16xbf16>
    %cst_21 = arith.constant dense<0.000000e+00> : vector<16x1024xf32>
    %34 = tpu.matmul %33, %31, %cst_21 {dimension_numbers = #tpu.dot_dimension_numbers<[1], [0], [0], [1], [0, 0, 1, 1], [], []>} : vector<16x16xbf16>, vector<16x1024xbf16>, vector<16x1024xf32> -> vector<16x1024xf32>
    %35 = arith.addf %29, %34 : vector<16x1024xf32>
    %36 = arith.index_cast %6 : i32 to index
    %c5120 = arith.constant 5120 : index
    %37 = vector.load %arg5[%36, %c5120] : memref<16x9216xbf16, #tpu.memory_space<vmem>>, vector<16x1024xbf16>
    %c5 = arith.constant 5 : index
    %c0_22 = arith.constant 0 : index
    %c0_23 = arith.constant 0 : index
    %38 = vector.load %arg3[%c5, %c0_22, %c0_23] : memref<9x16x16xbf16, #tpu.memory_space<vmem>>, vector<1x16x16xbf16>
    %39 = vector.shape_cast %38 : vector<1x16x16xbf16> to vector<16x16xbf16>
    %cst_24 = arith.constant dense<0.000000e+00> : vector<16x1024xf32>
    %40 = tpu.matmul %39, %37, %cst_24 {dimension_numbers = #tpu.dot_dimension_numbers<[1], [0], [0], [1], [0, 0, 1, 1], [], []>} : vector<16x16xbf16>, vector<16x1024xbf16>, vector<16x1024xf32> -> vector<16x1024xf32>
    %41 = arith.addf %35, %40 : vector<16x1024xf32>
    %42 = arith.index_cast %6 : i32 to index
    %c6144 = arith.constant 6144 : index
    %43 = vector.load %arg5[%42, %c6144] : memref<16x9216xbf16, #tpu.memory_space<vmem>>, vector<16x1024xbf16>
    %c6 = arith.constant 6 : index
    %c0_25 = arith.constant 0 : index
    %c0_26 = arith.constant 0 : index
    %44 = vector.load %arg3[%c6, %c0_25, %c0_26] : memref<9x16x16xbf16, #tpu.memory_space<vmem>>, vector<1x16x16xbf16>
    %45 = vector.shape_cast %44 : vector<1x16x16xbf16> to vector<16x16xbf16>
    %cst_27 = arith.constant dense<0.000000e+00> : vector<16x1024xf32>
    %46 = tpu.matmul %45, %43, %cst_27 {dimension_numbers = #tpu.dot_dimension_numbers<[1], [0], [0], [1], [0, 0, 1, 1], [], []>} : vector<16x16xbf16>, vector<16x1024xbf16>, vector<16x1024xf32> -> vector<16x1024xf32>
    %47 = arith.addf %41, %46 : vector<16x1024xf32>
    %48 = arith.index_cast %6 : i32 to index
    %c7168 = arith.constant 7168 : index
    %49 = vector.load %arg5[%48, %c7168] : memref<16x9216xbf16, #tpu.memory_space<vmem>>, vector<16x1024xbf16>
    %c7 = arith.constant 7 : index
    %c0_28 = arith.constant 0 : index
    %c0_29 = arith.constant 0 : index
    %50 = vector.load %arg3[%c7, %c0_28, %c0_29] : memref<9x16x16xbf16, #tpu.memory_space<vmem>>, vector<1x16x16xbf16>
    %51 = vector.shape_cast %50 : vector<1x16x16xbf16> to vector<16x16xbf16>
    %cst_30 = arith.constant dense<0.000000e+00> : vector<16x1024xf32>
    %52 = tpu.matmul %51, %49, %cst_30 {dimension_numbers = #tpu.dot_dimension_numbers<[1], [0], [0], [1], [0, 0, 1, 1], [], []>} : vector<16x16xbf16>, vector<16x1024xbf16>, vector<16x1024xf32> -> vector<16x1024xf32>
    %53 = arith.addf %47, %52 : vector<16x1024xf32>
    %54 = arith.index_cast %6 : i32 to index
    %c8192 = arith.constant 8192 : index
    %55 = vector.load %arg5[%54, %c8192] : memref<16x9216xbf16, #tpu.memory_space<vmem>>, vector<16x1024xbf16>
    %c8 = arith.constant 8 : index
    %c0_31 = arith.constant 0 : index
    %c0_32 = arith.constant 0 : index
    %56 = vector.load %arg3[%c8, %c0_31, %c0_32] : memref<9x16x16xbf16, #tpu.memory_space<vmem>>, vector<1x16x16xbf16>
    %57 = vector.shape_cast %56 : vector<1x16x16xbf16> to vector<16x16xbf16>
    %cst_33 = arith.constant dense<0.000000e+00> : vector<16x1024xf32>
    %58 = tpu.matmul %57, %55, %cst_33 {dimension_numbers = #tpu.dot_dimension_numbers<[1], [0], [0], [1], [0, 0, 1, 1], [], []>} : vector<16x16xbf16>, vector<16x1024xbf16>, vector<16x1024xf32> -> vector<16x1024xf32>
    %59 = arith.addf %53, %58 : vector<16x1024xf32>
    %cst_34 = arith.constant dense<0.000000e+00> : vector<16xf32>
    %60 = vector.multi_reduction <add>, %59, %cst_34 [1] : vector<16x1024xf32> to vector<16xf32>
    %61 = vector.shape_cast %60 : vector<16xf32> to vector<16x1xf32>
    %62 = arith.mulf %59, %59 : vector<16x1024xf32>
    %cst_35 = arith.constant dense<0.000000e+00> : vector<16xf32>
    %63 = vector.multi_reduction <add>, %62, %cst_35 [1] : vector<16x1024xf32> to vector<16xf32>
    %64 = vector.shape_cast %63 : vector<16xf32> to vector<16x1xf32>
    %cst_36 = arith.constant 9.765625E-4 : f32
    %65 = vector.broadcast %cst_36 : f32 to vector<16x1xf32>
    %66 = arith.mulf %61, %65 : vector<16x1xf32>
    %cst_37 = arith.constant 9.765625E-4 : f32
    %67 = vector.broadcast %cst_37 : f32 to vector<16x1xf32>
    %68 = arith.mulf %64, %67 : vector<16x1xf32>
    %69 = arith.mulf %66, %66 : vector<16x1xf32>
    %70 = arith.subf %68, %69 : vector<16x1xf32>
    %cst_38 = arith.constant 0.000000e+00 : f32
    %71 = vector.broadcast %cst_38 : f32 to vector<16x1xf32>
    %72 = arith.maximumf %70, %71 : vector<16x1xf32>
    %73 = vector.broadcast %66 : vector<16x1xf32> to vector<16x1024xf32>
    %74 = arith.subf %59, %73 : vector<16x1024xf32>
    %cst_39 = arith.constant 9.99999974E-6 : f32
    %75 = vector.broadcast %cst_39 : f32 to vector<16x1xf32>
    %76 = arith.addf %72, %75 : vector<16x1xf32>
    %77 = math.rsqrt %76 : vector<16x1xf32>
    %78 = vector.broadcast %77 : vector<16x1xf32> to vector<16x1024xf32>
    %79 = arith.mulf %74, %78 : vector<16x1024xf32>
    %cst_40 = arith.constant 0.000000e+00 : f32
    %80 = vector.broadcast %cst_40 : f32 to vector<16x1024xf32>
    %81 = arith.maximumf %79, %80 : vector<16x1024xf32>
    %82 = arith.index_cast %c0_i32 : i32 to index
    %c0_41 = arith.constant 0 : index
    %c0_42 = arith.constant 0 : index
    %83 = vector.load %arg4[%82, %c0_41, %c0_42] : memref<1x16x1024xf32, #tpu.memory_space<vmem>>, vector<1x16x1024xf32>
    %84 = vector.shape_cast %83 : vector<1x16x1024xf32> to vector<16x1024xf32>
    %85 = vector.shape_cast %81 : vector<16x1024xf32> to vector<1x16x1024xf32>
    tpu.vector_store %arg4[%82, %c0_41, %c0_42], %85 {strides = array<i32>} : memref<1x16x1024xf32, #tpu.memory_space<vmem>>, vector<1x16x1024xf32>,
    %c1_i32 = arith.constant 1 : i32
    return
  }
  func.func @transform_0(%arg0: i32) -> (i32, i32) {
    %c0_i32 = arith.constant 0 : i32
    %c0_i32_0 = arith.constant 0 : i32
    return %arg0, %c0_i32 : i32, i32
  }
  func.func @transform_1(%arg0: i32) -> (i32, i32) {
    %c0_i32 = arith.constant 0 : i32
    %c0_i32_0 = arith.constant 0 : i32
    %c0_i32_1 = arith.constant 0 : i32
    return %c0_i32, %c0_i32_0 : i32, i32
  }
  func.func @transform_2(%arg0: i32) -> (i32, i32, i32) {
    %c0_i32 = arith.constant 0 : i32
    %c0_i32_0 = arith.constant 0 : i32
    %c0_i32_1 = arith.constant 0 : i32
    %c0_i32_2 = arith.constant 0 : i32
    return %c0_i32, %c0_i32_0, %c0_i32_1 : i32, i32, i32
  }
  func.func @transform_3(%arg0: i32) -> (i32, i32, i32) {
    %c0_i32 = arith.constant 0 : i32
    %c0_i32_0 = arith.constant 0 : i32
    %c0_i32_1 = arith.constant 0 : i32
    return %arg0, %c0_i32, %c0_i32_0 : i32, i32, i32
  }
}

</mosaic_0001>

<bundles_post_ra>
// kernel: tpu_custom_call.1
= control target key start
LH: loop header
LB: loop body
LE: loop exit
PB: predicated region body
PF: predicated region fallthrough
CT: control target
= control target key end

     0   :  { %8 = vsyncpa [#allocation4], 0  ;;  %s13621_s0 = inlined_call_operand.hbm [shape: bf16[32,256], index: 0, kind: input, shape index: {}]   ;;  %s13622_s1 = inlined_call_operand.hbm [shape: bf16[256,9216], index: 1, kind: input, shape index: {}]   ;;  %s13623_s2 = inlined_call_operand.hbm [shape: bf16[9,16,16], index: 2, kind: input, shape index: {}]   ;;  %s13624_s3 = inlined_call_operand.hbm [shape: f32[2,16,1024], index: 3, kind: output, shape index: {}]  }
   0x1   :  { %10 = vsyncpa [#allocation4 + $0x1], 0 }
   0x2   :  { %11 = vsyncpa [#allocation7], 0 }
   0x3   :  { %12 = vsyncpa [#allocation5], 0 }
   0x4   :  { %14 = vsyncpa [#allocation5 + $0x1], 0  ;;  %s12549_s12 = smov 0   ;;  %s12551_s13 = smov 0  }
   0x5   :  { %s12553_s14 = smov 0   ;;  %s12555_s15 = smov 0  }
   0x6 LB: > { %s12570_s16 = sadd.s32 4294967295, %s12514_s15   ;;  %s10907_s17 = sadd.s32 4294967294, %s12514_s15   ;;  %s12514_s15 = sphi %s12555_s15, %s13919_s15   ;;  %s12510_s14 = sphi %s12553_s14, %s13918_s14   ;;  %s12506_s13 = sphi %s12551_s13, %s13917_s13   ;;  %s12502_s12 = sphi %s12549_s12, %s13916_s12  }
   0x7   : > { %p40_p0 = scmp.ne.s32.totalorder %s12506_s13, %s12502_s12  ;;  %p13625_p1 = scmp.eq.s32.totalorder %s12570_s16, 0 }
   0x8   : > { %p112_p3 = scmp.eq.s32.totalorder %s10907_s17, 1  ;;  %p10908_p5 = scmp.ge.s32.totalorder %s12514_s15, 1 }
   0x9   : > { %p12579_p4 = por %p13625_p1, %p40_p0  ;;  %p119_p7 = scmp.lt.s32.totalorder %s12514_s15, 3 }
   0xa   : > { %p12584_p6 = por %p112_p3, %p40_p0  ;;  %s12516_s21 = smov [#allocation6]  }
   0xb   : > { %s13701_s18 = scalar_select %p12579_p4, 1, 0 }
   0xc   : > { %s13702_s19 = scalar_select %p12584_p6, 1, 0 }
   0xd   : > { %p12589_p8 = pnand %p10908_p5, %p119_p7  ;;  %s131_s22 = sshll.u32 %s12516_s21, 4  ;;  %s12593_s22 = int_to_ptr.vmem [resolvable:$true] %s131_s22 }
   0xe   : > { %s12517_s24 = smov [#allocation8]   ;;  %s12358_s28 = scalar_lea.hbm %s13622_s1, 147456 }
   0xf   : > { %p12268_p9 = pneg %p12589_p8  ;;  %s144_s25 = sshll.u32 %s12517_s24, 4  ;;  %s12604_s25 = int_to_ptr.vmem [resolvable:$true] %s144_s25 }
  0x10   : > { %p12359_p12 = scmp.ne.s32.totalorder %s13622_s1, %s12358_s28  ;;  %p12365_p5 = scmp.lt.u32.totalorder %s12358_s28, %s13622_s1 }
  0x11   : > { %p12600_p11 = pnand %p12268_p9, %p13625_p1 }
  0x13   : > { %p12360_p13 = pneg %p12600_p11 }
  0x15   : > { %p12361_p0 = pnand %p12360_p13, %p12359_p12 }
  0x17   : > { %p12362_p3 = pneg %p12361_p0 }
  0x19   : > { %p12367_p7 = pnand %p12365_p5, %p12362_p3 }
  0x1b   : > { %12370 = shalt.err (!%p12367_p7)
}
  0x1c   : > { %s12371_s6 = scalar_lea.vmem %s12593_s22, 147456  ;;  %p12379_p2 = scmp.lt.s32.totalorder %s12593_s22, %s12593_s22 }
  0x1d   : > { %p12372_p9 = scmp.ne.s32.totalorder %s12593_s22, %s12371_s6  ;;  %p12380_p12 = scmp.lt.s32.totalorder %s12371_s6, %s12371_s6 }
  0x1f   : > { %p12374_p10 = pnand %p12372_p9, %p12360_p13  ;;  %p12381_p0 = por %p12380_p12, %p12379_p2 }
  0x21   : > { %p12375_p1 = pneg %p12374_p10 }
  0x23   : > { %p12382_p6 = pnand %p12381_p0, %p12375_p1 }
  0x25   : > { %12385 = shalt.err (!%p12382_p6)
}
  0x26   : > { %s12518_s7 = smov 4608   ;;  %s12519_s8 = smov 288  }
  0x27   : > { %12271 = dma.hbm_to_vmem [thread:$0]  (!%p12600_p11), %s13622_s1, 147456, %s12593_s22, [#allocation7], %s12518_s7, %s12518_s7, %s12519_s8  }
  0x28   : > { %s12386_s21 = scalar_lea.hbm %s13623_s2, 1152 }
  0x29   : > { %p12387_p2 = scmp.ne.s32.totalorder %s13623_s2, %s12386_s21  ;;  %p12393_p10 = scmp.lt.u32.totalorder %s12386_s21, %s13623_s2 }
  0x2b   : > { %p12389_p1 = pnand %p12387_p2, %p12360_p13 }
  0x2d   : > { %p12390_p6 = pneg %p12389_p1 }
  0x2f   : > { %p12395_p3 = pnand %p12393_p10, %p12390_p6 }
  0x31   : > { %12398 = shalt.err (!%p12395_p3)
}
  0x32   : > { %s12399_s22 = scalar_lea.vmem %s12604_s25, 1152  ;;  %p12407_p12 = scmp.lt.s32.totalorder %s12604_s25, %s12604_s25 }
  0x33   : > { %p12400_p5 = scmp.ne.s32.totalorder %s12604_s25, %s12399_s22  ;;  %p12408_p0 = scmp.lt.s32.totalorder %s12399_s22, %s12399_s22 }
  0x35   : > { %p12402_p7 = pnand %p12400_p5, %p12360_p13  ;;  %p12409_p2 = por %p12408_p0, %p12407_p12 }
  0x37   : > { %p12403_p9 = pneg %p12402_p7 }
  0x39   : > { %p12410_p1 = pnand %p12409_p2, %p12403_p9 }
  0x3b   : > { %12413 = shalt.err (!%p12410_p1)
}
  0x3c   : > { %s12520_s29 = smov 64   ;;  %s12521_s30 = smov 4  }
  0x3d   : > { %12274 = dma.hbm_to_vmem [thread:$0]  (!%p12600_p11), %s13623_s2, 1152, %s12604_s25, [#allocation7], %s12520_s29, %s12520_s29, %s12521_s30  }
  0x3e   : > { %s12659_s6 = sadd.s32 1, %s12514_s15   ;;  %s27_s8 = sadd.s32 1, %s12510_s14 }
  0x3f   : > { %s24_s7 = ssub.s32 %s12514_s15, %s12659_s6  ;;  %p34_p6 = scmp.ne.s32.totalorder %s12510_s14, %s12506_s13 }
  0x40   : > { %p25_p13 = scmp.eq.s32.totalorder %s24_s7, 0  ;;  %p35_p10 = scmp.eq.s32.totalorder %s12514_s15, 0 }
  0x41   : > { %p13705_p5 = scmp.eq.s32.totalorder %s12570_s16, 1  ;;  %p12285_p9 = scmp.lt.s32.totalorder %s12514_s15, 2 }
  0x42   : > { %s12668_s9 = scalar_select %p25_p13, %s12510_s14, %s27_s8  }
  0x43   : > { %p36_p3 = por %p35_p10, %p34_p6  ;;  %p12672_p7 = por %p13705_p5, %p34_p6 }
  0x44   : > { %s158_s23 = sand.u32 1, %s12510_s14   ;;  %s12126_s25 = sshll.u32 %s12514_s15, 8 }
  0x45   : > { %s13706_s10 = scalar_select %p12672_p7, 1, 0 }
  0x46   : > { %s10912_s11 = sshll.u32 %s158_s23, 4  ;;  %s12682_s24 = scalar_lea.hbm %s13621_s0, %s12126_s25 }
  0x47   : > { %s162_s26 = scalar_lea.vmem [#allocation3], %s10912_s11  ;;  %p12686_p11 = pnand %p12285_p9, %p36_p3 }
  0x48   : > { %s170_s27 = sshll.u32 %s162_s26, 4  ;;  %s12690_s22 = scalar_lea.sflag [#allocation4], %s158_s23  ;;  %s12684_s27 = int_to_ptr.vmem [resolvable:$true] %s170_s27 }
  0x49   : > { %s12414_s29 = scalar_lea.hbm %s12682_s24, 256  ;;  %p12416_p0 = pneg %p12686_p11 }
  0x4a   : > { %p12415_p12 = scmp.ne.s32.totalorder %s12682_s24, %s12414_s29  ;;  %s12419_s5 = scalar_lea.hbm %s13621_s0, 512 }
  0x4b   : > { %p12420_p13 = scmp.lt.u32.totalorder %s12682_s24, %s13621_s0  ;;  %p12421_p6 = scmp.lt.u32.totalorder %s12419_s5, %s12414_s29 }
  0x4c   : > { %p12417_p2 = pnand %p12416_p0, %p12415_p12  ;;  %p12423_p3 = scmp.lt.u32.totalorder %s12414_s29, %s12682_s24 }
  0x4d   : > { %p12422_p10 = por %p12421_p6, %p12420_p13 }
  0x4e   : > { %p12418_p1 = pneg %p12417_p2 }
  0x4f   : > { %p12424_p5 = por %p12423_p3, %p12422_p10 }
  0x51   : > { %p12425_p9 = pnand %p12424_p5, %p12418_p1 }
  0x53   : > { %12428 = shalt.err (!%p12425_p9)
}
  0x54   : > { %s12429_s23 = scalar_lea.vmem %s12684_s27, 256  ;;  %s12522_s11 = smov [#allocation3]  }
  0x55   : > { %p12430_p12 = scmp.ne.s32.totalorder %s12684_s27, %s12429_s23  ;;  %s12434_s25 = sshll.u32 %s12522_s11, 4  ;;  %s12435_s25 = int_to_ptr.vmem [resolvable:$false] %s12434_s25 }
  0x56   : > { %s12436_s17 = scalar_lea.vmem %s12435_s25, 512  ;;  %p12437_p4 = scmp.lt.s32.totalorder %s12684_s27, %s12435_s25 }
  0x57   : > { %p12432_p2 = pnand %p12430_p12, %p12416_p0  ;;  %p12438_p13 = scmp.lt.s32.totalorder %s12436_s17, %s12429_s23 }
  0x59   : > { %p12433_p7 = pneg %p12432_p2  ;;  %p12439_p6 = por %p12438_p13, %p12437_p4 }
  0x5b   : > { %p12440_p10 = pnand %p12439_p6, %p12433_p7 }
  0x5d   : > { %12443 = shalt.err (!%p12440_p10)
}
  0x5e   : > { %s12523_s21 = smov 128   ;;  %s12524_s26 = smov 8  }
  0x5f   : > { %12278 = dma.hbm_to_vmem [thread:$0]  (!%p12686_p11), %s12682_s24, 256, %s12684_s27, %s12690_s22, %s12523_s21, %s12523_s21, %s12524_s26  }
  0x60   : > { %182 = sbr.rel (%p12589_p8) target bundleno = 1897 (0x769), region = 32 }
  0x67   : > { %s12721_s29 = sand.u32 1, %s12506_s13   ;;  %p13708_p4 = scmp.ne.s32.totalorder %s13701_s18, 0 }
  0x68   : > { %s10917_s30 = sshll.u32 %s12721_s29, 4  ;;  %s185_s4 = scalar_lea.sflag [#allocation4], %s12721_s29 }
  0x69   : > { %s12725_s5 = scalar_lea.vmem [#allocation3], %s10917_s30 }
  0x6a   : > { %12489 = dma.done.wait (%p13708_p4), %s185_s4, 256  }
  0x6b   : > { %12491 = vsyncadd (%p13708_p4), %s185_s4, 4294967040  ;;  %p13709_p7 = scmp.eq.s32.totalorder %s12570_s16, 0 }
  0x6d   : > { %12493 = dma.done.wait (%p13709_p7), [#allocation7], 148608   ;;  %p13710_p8 = pmov %p13709_p7 }
  0x6e   : > { %v223_v0 = vld [vmem:[#allocation6] sm:$0xff]  ;;  %v224_v2 = vld [vmem:[#allocation6 + $0x8] sm:$0xff]  ;;  %vm8866_vm0 = vcmask 130048   ;;  %s10920_s18 = sshll.u32 %s12721_s29, 7  ;;  %s12127_s20 = sshll.u32 %s12570_s16, 11 }
  0x6f   : > { %12495 = vsyncadd (%p13710_p8), [#allocation7], 4294818688  ;;  %v259_v1 = vld [vmem:[#allocation6 + $0x120] sm:$0xff]  ;;  %v260_v4 = vld [vmem:[#allocation6 + $0x128] sm:$0xff]  ;;  %s13553_s24 = scalar_lea.vmem [#allocation9], %s10920_s18  ;;  %s13567_s22 = scalar_lea.hbm %s13624_s3, %s12127_s20 }
  0x70   : > { %v10924_v3 = vcombine.high %v223_v0, %v259_v1  ;;  %v10923_v5 = vcombine.low %v223_v0, %v259_v1  ;;  %v295_v6 = vld [vmem:[#allocation6 + $0x240] sm:$0xff]  ;;  %v10926_v8 = vcombine.high %v224_v2, %v260_v4  ;;  %v10925_v9 = vcombine.low %v224_v2, %v260_v4  ;;  %v296_v11 = vld [vmem:[#allocation6 + $0x248] sm:$0xff]  ;;  %s10815_s27 = sshll.u32 %s13553_s24, 4  ;;  %s10802_s7 = scalar_lea.sflag [#allocation5], %s12721_s29  ;;  %s13569_s27 = int_to_ptr.vmem [resolvable:$true] %s10815_s27 }
  0x71   : > { %v331_v7 = vld [vmem:[#allocation6 + $0x360] sm:$0xff]  ;;  %v332_v12 = vld [vmem:[#allocation6 + $0x368] sm:$0xff]  ;;  %s12444_s8 = scalar_lea.vmem %s13569_s27, 2048  ;;  %p13913_p0 = scmp.ne.s32.totalorder %s13706_s10, 0 }
  0x72   : > { %v10996_v10 = vcombine.high %v295_v6, %v331_v7  ;;  %v367_v13 = vld [vmem:[#allocation6 + $0x480] sm:$0xff]  ;;  %7145 = vmatprep.subr.bf16.mxu0 %v10924_v3  ;;  %v10998_v14 = vcombine.high %v296_v11, %v332_v12  ;;  %v368_v16 = vld [vmem:[#allocation6 + $0x488] sm:$0xff]  ;;  %7188 = vmatprep.subr.bf16.mxu1 %v10926_v8  ;;  %v10995_v18 = vcombine.low %v295_v6, %v331_v7  ;;  %p12445_p11 = scmp.ne.s32.totalorder %s13569_s27, %s12444_s8  ;;  %s12526_s23 = smov [#allocation9]  }
  0x73   : > { %v403_v15 = vld [vmem:[#allocation6 + $0x5a0] sm:$0xff]  ;;  %v404_v17 = vld [vmem:[#allocation6 + $0x5a8] sm:$0xff]  ;;  %7146 = vmatpush1.bf16.msra.mxu0 %v10923_v5  ;;  %7189 = vmatpush1.bf16.msra.mxu1 %v10925_v9  ;;  %v10997_v19 = vcombine.low %v296_v11, %v332_v12  ;;  %s12448_s11 = sshll.u32 %s12526_s23, 4  ;;  %s12449_s11 = int_to_ptr.vmem [resolvable:$false] %s12448_s11 }
  0x74   : > { %7147 = vmatprep.subr.bf16.mxu0 %v10996_v10  ;;  %v11068_v20 = vcombine.high %v367_v13, %v403_v15  ;;  %7190 = vmatprep.subr.bf16.mxu1 %v10998_v14  ;;  %v11070_v21 = vcombine.high %v368_v16, %v404_v17  ;;  %v439_v22 = vld [vmem:[#allocation6 + $0x6c0] sm:$0xff]  ;;  %v440_v24 = vld [vmem:[#allocation6 + $0x6c8] sm:$0xff]  ;;  %v11067_v26 = vcombine.low %v367_v13, %v403_v15  ;;  %p12446_p1 = pnand %p12445_p11, %p13913_p0  ;;  %s12450_s25 = scalar_lea.vmem %s12449_s11, 4096 }
  0x75   : > { %v475_v23 = vld [vmem:[#allocation6 + $0x7e0] sm:$0xff]  ;;  %v476_v25 = vld [vmem:[#allocation6 + $0x7e8] sm:$0xff]  ;;  %v11069_v27 = vcombine.low %v368_v16, %v404_v17  ;;  %p12451_p5 = scmp.lt.s32.totalorder %s13569_s27, %s12449_s11  ;;  %p12452_p9 = scmp.lt.s32.totalorder %s12450_s25, %s12444_s8 }
  0x76   : > { %v11140_v28 = vcombine.high %v439_v22, %v475_v23  ;;  %v11142_v29 = vcombine.high %v440_v24, %v476_v25  ;;  %v511_v30 = vld [vmem:[#allocation6 + $0x900] sm:$0xff]  ;;  %v512_v32 = vld [vmem:[#allocation6 + $0x908] sm:$0xff]  ;;  %v11139_v34 = vcombine.low %v439_v22, %v475_v23  ;;  %v11141_v35 = vcombine.low %v440_v24, %v476_v25  ;;  %p12447_p3 = pneg %p12446_p1 }
  0x77   : > { %7148 = vmatpush1.bf16.msra.mxu0 %v10995_v18  ;;  %7191 = vmatpush1.bf16.msra.mxu1 %v10997_v19  ;;  %v547_v31 = vld [vmem:[#allocation6 + $0xa20] sm:$0xff]  ;;  %v548_v33 = vld [vmem:[#allocation6 + $0xa28] sm:$0xff]  ;;  %p12453_p12 = por %p12452_p9, %p12451_p5 }
  0x78   : > { %7149 = vmatprep.subr.bf16.mxu0 %v11068_v20  ;;  %7192 = vmatprep.subr.bf16.mxu1 %v11070_v21  ;;  %v11212_v36 = vcombine.high %v511_v30, %v547_v31  ;;  %v11214_v37 = vcombine.high %v512_v32, %v548_v33  ;;  %v583_v38 = vld [vmem:[#allocation6 + $0xb40] sm:$0xff]  ;;  %v584_v40 = vld [vmem:[#allocation6 + $0xb48] sm:$0xff]  ;;  %v11211_v42 = vcombine.low %v511_v30, %v547_v31 }
  0x79   : > { %v619_v39 = vld [vmem:[#allocation6 + $0xc60] sm:$0xff]  ;;  %v620_v41 = vld [vmem:[#allocation6 + $0xc68] sm:$0xff]  ;;  %v11213_v43 = vcombine.low %v512_v32, %v548_v33  ;;  %p12454_p2 = pnand %p12453_p12, %p12447_p3 }
  0x7a   : > { %v11284_v44 = vcombine.high %v583_v38, %v619_v39  ;;  %v11286_v45 = vcombine.high %v584_v40, %v620_v41  ;;  %v655_v46 = vld [vmem:[#allocation6 + $0xd80] sm:$0xff]  ;;  %v656_v48 = vld [vmem:[#allocation6 + $0xd88] sm:$0xff]  ;;  %v11283_v50 = vcombine.low %v583_v38, %v619_v39  ;;  %v11285_v51 = vcombine.low %v584_v40, %v620_v41 }
  0x7b   : > { %7150 = vmatpush1.bf16.msra.mxu0 %v11067_v26  ;;  %7193 = vmatpush1.bf16.msra.mxu1 %v11069_v27  ;;  %v691_v47 = vld [vmem:[#allocation6 + $0xea0] sm:$0xff]  ;;  %v692_v49 = vld [vmem:[#allocation6 + $0xea8] sm:$0xff] }
  0x7c   : > { %7151 = vmatprep.subr.bf16.mxu0 %v11140_v28  ;;  %7194 = vmatprep.subr.bf16.mxu1 %v11142_v29  ;;  %v11356_v52 = vcombine.high %v655_v46, %v691_v47  ;;  %v11358_v53 = vcombine.high %v656_v48, %v692_v49  ;;  %v727_v54 = vld [vmem:[#allocation6 + $0xfc0] sm:$0xff]  ;;  %v728_v57 = vld [vmem:[#allocation6 + $0xfc8] sm:$0xff]  ;;  %v11355_v59 = vcombine.low %v655_v46, %v691_v47 }
  0x7d   : > { %v763_v55 = vld [vmem:[#allocation6 + $0x10e0] sm:$0xff]  ;;  %v764_v58 = vld [vmem:[#allocation6 + $0x10e8] sm:$0xff]  ;;  %v11357_v60 = vcombine.low %v656_v48, %v692_v49 }
  0x7e   : > { %v12736_v56 = vld [vmem:[%s12725_s5 + $0x4] ss:$8 sps:$4 sm:$0xff]   ;;  %v11428_v61 = vcombine.high %v727_v54, %v763_v55  ;;  %v11430_v62 = vcombine.high %v728_v57, %v764_v58  ;;  %v11427_v3 = vcombine.low %v727_v54, %v763_v55  ;;  %v11429_v4 = vcombine.low %v728_v57, %v764_v58 }
  0x7f   : > { %7152 = vmatpush1.bf16.msra.mxu0 %v11139_v34  ;;  %7195 = vmatpush1.bf16.msra.mxu1 %v11141_v35  ;;  %v799_v63 = vld [vmem:[#allocation6 + $0x1200] sm:$0xff]  ;;  %v800_v1 = vld [vmem:[#allocation6 + $0x1208] sm:$0xff] }
  0x80   : > { %7153 = vmatprep.subr.bf16.mxu0 %v11212_v36  ;;  %7196 = vmatprep.subr.bf16.mxu1 %v11214_v37  ;;  %v835_v0 = vld [vmem:[#allocation6 + $0x1320] sm:$0xff]  ;;  %v836_v2 = vld [vmem:[#allocation6 + $0x1328] sm:$0xff] }
  0x81   : > { %7177 = vmatprep.mubr.bf16.mxu0 %v12736_v56  ;;  %7220 = vmatprep.mubr.bf16.mxu1 %v12736_v56  ;;  %v11500_v5 = vcombine.high %v799_v63, %v835_v0  ;;  %v11502_v6 = vcombine.high %v800_v1, %v836_v2  ;;  %v871_v7 = vld [vmem:[#allocation6 + $0x1440] sm:$0xff]  ;;  %v872_v9 = vld [vmem:[#allocation6 + $0x1448] sm:$0xff]  ;;  %v11499_v11 = vcombine.low %v799_v63, %v835_v0  ;;  %v225_v0 = vld [vmem:[#allocation6 + $0x10] sm:$0xff] }
  0x82   : > { %v907_v8 = vld [vmem:[#allocation6 + $0x1560] sm:$0xff]  ;;  %v908_v10 = vld [vmem:[#allocation6 + $0x1568] sm:$0xff]  ;;  %v11501_v12 = vcombine.low %v800_v1, %v836_v2  ;;  %v261_v1 = vld [vmem:[#allocation6 + $0x130] sm:$0xff] }
  0x83   : > { %7154 = vmatpush1.bf16.msra.mxu0 %v11211_v42  ;;  %7197 = vmatpush1.bf16.msra.mxu1 %v11213_v43  ;;  %v11572_v13 = vcombine.high %v871_v7, %v907_v8  ;;  %v11574_v14 = vcombine.high %v872_v9, %v908_v10  ;;  %v943_v15 = vld [vmem:[#allocation6 + $0x1680] sm:$0xff]  ;;  %v944_v17 = vld [vmem:[#allocation6 + $0x1688] sm:$0xff]  ;;  %v11571_v19 = vcombine.low %v871_v7, %v907_v8  ;;  %v226_v2 = vld [vmem:[#allocation6 + $0x18] sm:$0xff] }
  0x84   : > { %7155 = vmatprep.subr.bf16.mxu0 %v11284_v44  ;;  %7198 = vmatprep.subr.bf16.mxu1 %v11286_v45  ;;  %v979_v16 = vld [vmem:[#allocation6 + $0x17a0] sm:$0xff]  ;;  %v980_v18 = vld [vmem:[#allocation6 + $0x17a8] sm:$0xff]  ;;  %v11573_v20 = vcombine.low %v872_v9, %v908_v10  ;;  %v297_v8 = vld [vmem:[#allocation6 + $0x250] sm:$0xff] }
  0x85   : > { %v11644_v21 = vcombine.high %v943_v15, %v979_v16  ;;  %v11646_v22 = vcombine.high %v944_v17, %v980_v18  ;;  %v1015_v23 = vld [vmem:[#allocation6 + $0x18c0] sm:$0xff]  ;;  %v1016_v25 = vld [vmem:[#allocation6 + $0x18c8] sm:$0xff]  ;;  %v11643_v27 = vcombine.low %v943_v15, %v979_v16  ;;  %v11645_v28 = vcombine.low %v944_v17, %v980_v18  ;;  %v333_v9 = vld [vmem:[#allocation6 + $0x370] sm:$0xff] }
  0x86   : > { %v1051_v24 = vld [vmem:[#allocation6 + $0x19e0] sm:$0xff]  ;;  %v1052_v26 = vld [vmem:[#allocation6 + $0x19e8] sm:$0xff]  ;;  %v11000_v15 = vcombine.high %v297_v8, %v333_v9  ;;  %v369_v16 = vld [vmem:[#allocation6 + $0x490] sm:$0xff] }
  0x87   : > { %7156 = vmatpush1.bf16.msra.mxu0 %v11283_v50  ;;  %7199 = vmatpush1.bf16.msra.mxu1 %v11285_v51  ;;  %v11716_v29 = vcombine.high %v1015_v23, %v1051_v24  ;;  %v11718_v30 = vcombine.high %v1016_v25, %v1052_v26  ;;  %v1087_v31 = vld [vmem:[#allocation6 + $0x1b00] sm:$0xff]  ;;  %v1088_v33 = vld [vmem:[#allocation6 + $0x1b08] sm:$0xff]  ;;  %v11715_v35 = vcombine.low %v1015_v23, %v1051_v24  ;;  %v405_v17 = vld [vmem:[#allocation6 + $0x5b0] sm:$0xff] }
  0x88   : > { %7157 = vmatprep.subr.bf16.mxu0 %v11356_v52  ;;  %7200 = vmatprep.subr.bf16.mxu1 %v11358_v53  ;;  %v1123_v32 = vld [vmem:[#allocation6 + $0x1c20] sm:$0xff]  ;;  %v1124_v34 = vld [vmem:[#allocation6 + $0x1c28] sm:$0xff]  ;;  %v11717_v36 = vcombine.low %v1016_v25, %v1052_v26  ;;  %v11072_v23 = vcombine.high %v369_v16, %v405_v17  ;;  %v441_v24 = vld [vmem:[#allocation6 + $0x6d0] sm:$0xff] }
  0x89   : > { %v11788_v37 = vcombine.high %v1087_v31, %v1123_v32  ;;  %v11790_v38 = vcombine.high %v1088_v33, %v1124_v34  ;;  %v1159_v39 = vld [vmem:[#allocation6 + $0x1d40] sm:$0xff]  ;;  %v1160_v41 = vld [vmem:[#allocation6 + $0x1d48] sm:$0xff]  ;;  %v11787_v43 = vcombine.low %v1087_v31, %v1123_v32  ;;  %v11789_v44 = vcombine.low %v1088_v33, %v1124_v34  ;;  %v477_v25 = vld [vmem:[#allocation6 + $0x7f0] sm:$0xff] }
  0x8a   : > { %v1195_v40 = vld [vmem:[#allocation6 + $0x1e60] sm:$0xff]  ;;  %v1196_v42 = vld [vmem:[#allocation6 + $0x1e68] sm:$0xff]  ;;  %v442_v26 = vld [vmem:[#allocation6 + $0x6d8] sm:$0xff]  ;;  %v11144_v31 = vcombine.high %v441_v24, %v477_v25 }
  0x8b   : > { %7158 = vmatpush1.bf16.msra.mxu0 %v11355_v59  ;;  %7201 = vmatpush1.bf16.msra.mxu1 %v11357_v60  ;;  %v11860_v45 = vcombine.high %v1159_v39, %v1195_v40  ;;  %v11862_v46 = vcombine.high %v1160_v41, %v1196_v42  ;;  %v1231_v47 = vld [vmem:[#allocation6 + $0x1f80] sm:$0xff]  ;;  %v1232_v49 = vld [vmem:[#allocation6 + $0x1f88] sm:$0xff]  ;;  %v11859_v51 = vcombine.low %v1159_v39, %v1195_v40  ;;  %v513_v32 = vld [vmem:[#allocation6 + $0x910] sm:$0xff] }
  0x8c   : > { %7159 = vmatprep.subr.bf16.mxu0 %v11428_v61  ;;  %7202 = vmatprep.subr.bf16.mxu1 %v11430_v62  ;;  %v1267_v48 = vld [vmem:[#allocation6 + $0x20a0] sm:$0xff]  ;;  %v1268_v50 = vld [vmem:[#allocation6 + $0x20a8] sm:$0xff]  ;;  %v11861_v52 = vcombine.low %v1160_v41, %v1196_v42  ;;  %v549_v34 = vld [vmem:[#allocation6 + $0xa30] sm:$0xff] }
  0x8d   : > { %v11932_v53 = vcombine.high %v1231_v47, %v1267_v48  ;;  %v11934_v54 = vcombine.high %v1232_v49, %v1268_v50  ;;  %v1303_v55 = vld [vmem:[#allocation6 + $0x21c0] sm:$0xff]  ;;  %v1304_v58 = vld [vmem:[#allocation6 + $0x21c8] sm:$0xff]  ;;  %v11931_v60 = vcombine.low %v1231_v47, %v1267_v48  ;;  %v11933_v61 = vcombine.low %v1232_v49, %v1268_v50  ;;  %v585_v41 = vld [vmem:[#allocation6 + $0xb50] sm:$0xff] }
  0x8e   : > { %v1339_v57 = vld [vmem:[#allocation6 + $0x22e0] sm:$0xff]  ;;  %v1340_v59 = vld [vmem:[#allocation6 + $0x22e8] sm:$0xff]  ;;  %v11216_v39 = vcombine.high %v513_v32, %v549_v34  ;;  %v621_v42 = vld [vmem:[#allocation6 + $0xc70] sm:$0xff] }
  0x8f   : > { %7160 = vmatpush1.bf16.msra.mxu0 %v11427_v3  ;;  %7203 = vmatpush1.bf16.msra.mxu1 %v11429_v4  ;;  %v12004_v62 = vcombine.high %v1303_v55, %v1339_v57  ;;  %v12006_v63 = vcombine.high %v1304_v58, %v1340_v59  ;;  %v262_v3 = vld [vmem:[#allocation6 + $0x138] sm:$0xff]  ;;  %v12003_v4 = vcombine.low %v1303_v55, %v1339_v57  ;;  %v657_v49 = vld [vmem:[#allocation6 + $0xd90] sm:$0xff] }
  0x90   : > { %7161 = vmatprep.subr.bf16.mxu0 %v11500_v5  ;;  %7204 = vmatprep.subr.bf16.mxu1 %v11502_v6  ;;  %v12005_v5 = vcombine.low %v1304_v58, %v1340_v59  ;;  %v10928_v6 = vcombine.high %v225_v0, %v261_v1  ;;  %v10930_v7 = vcombine.high %v226_v2, %v262_v3  ;;  %v12741_v10 = vld [vmem:[%s12725_s5] ss:$8 sps:$4 sm:$0xff]  }
  0x91   : > { %v11288_v47 = vcombine.high %v585_v41, %v621_v42  ;;  %v693_v50 = vld [vmem:[#allocation6 + $0xeb0] sm:$0xff] }
  0x92   : > { %v11360_v55 = vcombine.high %v657_v49, %v693_v50  ;;  %v729_v58 = vld [vmem:[#allocation6 + $0xfd0] sm:$0xff] }
  0x93   : > { %7162 = vmatpush1.bf16.msra.mxu0 %v11499_v11  ;;  %7205 = vmatpush1.bf16.msra.mxu1 %v11501_v12  ;;  %v298_v11 = vld [vmem:[#allocation6 + $0x258] sm:$0xff]  ;;  %v765_v59 = vld [vmem:[#allocation6 + $0x10f0] sm:$0xff] }
  0x94   : > { %7163 = vmatprep.subr.bf16.mxu0 %v11572_v13  ;;  %7206 = vmatprep.subr.bf16.mxu1 %v11574_v14  ;;  %v334_v12 = vld [vmem:[#allocation6 + $0x378] sm:$0xff]  ;;  %v10927_v13 = vcombine.low %v225_v0, %v261_v1  ;;  %v10929_v14 = vcombine.low %v226_v2, %v262_v3  ;;  %v11432_v0 = vcombine.high %v729_v58, %v765_v59  ;;  %v801_v2 = vld [vmem:[#allocation6 + $0x1210] sm:$0xff] }
  0x95   : > { %v11002_v18 = vcombine.high %v298_v11, %v334_v12  ;;  %v837_v3 = vld [vmem:[#allocation6 + $0x1330] sm:$0xff] }
  0x97   : > { %7164 = vmatpush1.bf16.msra.mxu0 %v11571_v19  ;;  %7207 = vmatpush1.bf16.msra.mxu1 %v11573_v20  ;;  %v370_v19 = vld [vmem:[#allocation6 + $0x498] sm:$0xff] }
  0x98   : > { %7165 = vmatprep.subr.bf16.mxu0 %v11644_v21  ;;  %7208 = vmatprep.subr.bf16.mxu1 %v11646_v22  ;;  %v406_v20 = vld [vmem:[#allocation6 + $0x5b8] sm:$0xff]  ;;  %v10999_v21 = vcombine.low %v297_v8, %v333_v9  ;;  %v11001_v22 = vcombine.low %v298_v11, %v334_v12  ;;  %v11504_v8 = vcombine.high %v801_v2, %v837_v3  ;;  %v873_v11 = vld [vmem:[#allocation6 + $0x1450] sm:$0xff] }
  0x99   : > { %v909_v12 = vld [vmem:[#allocation6 + $0x1570] sm:$0xff] }
  0x9b   : > { %7166 = vmatpush1.bf16.msra.mxu0 %v11643_v27  ;;  %7209 = vmatpush1.bf16.msra.mxu1 %v11645_v28  ;;  %v11074_v27 = vcombine.high %v370_v19, %v406_v20  ;;  %v478_v28 = vld [vmem:[#allocation6 + $0x7f8] sm:$0xff] }
  0x9c   : > { %7167 = vmatprep.subr.bf16.mxu0 %v11716_v29  ;;  %7210 = vmatprep.subr.bf16.mxu1 %v11718_v30  ;;  %v11071_v29 = vcombine.low %v369_v16, %v405_v17  ;;  %v11073_v30 = vcombine.low %v370_v19, %v406_v20  ;;  %v11146_v33 = vcombine.high %v442_v26, %v478_v28  ;;  %v945_v19 = vld [vmem:[#allocation6 + $0x1690] sm:$0xff] }
  0x9d   : > { %v11576_v17 = vcombine.high %v873_v11, %v909_v12  ;;  %v981_v20 = vld [vmem:[#allocation6 + $0x17b0] sm:$0xff] }
  0x9f   : > { %7168 = vmatpush1.bf16.msra.mxu0 %v11715_v35  ;;  %7211 = vmatpush1.bf16.msra.mxu1 %v11717_v36  ;;  %v514_v35 = vld [vmem:[#allocation6 + $0x918] sm:$0xff] }
  0xa0   : > { %7169 = vmatprep.subr.bf16.mxu0 %v11788_v37  ;;  %7212 = vmatprep.subr.bf16.mxu1 %v11790_v38  ;;  %v550_v36 = vld [vmem:[#allocation6 + $0xa38] sm:$0xff]  ;;  %v11143_v37 = vcombine.low %v441_v24, %v477_v25  ;;  %v11145_v38 = vcombine.low %v442_v26, %v478_v28  ;;  %v11648_v25 = vcombine.high %v945_v19, %v981_v20  ;;  %v1053_v28 = vld [vmem:[#allocation6 + $0x19f0] sm:$0xff] }
  0xa1   : > { %v11218_v40 = vcombine.high %v514_v35, %v550_v36 }
  0xa3   : > { %7170 = vmatpush1.bf16.msra.mxu0 %v11787_v43  ;;  %7213 = vmatpush1.bf16.msra.mxu1 %v11789_v44  ;;  %v586_v43 = vld [vmem:[#allocation6 + $0xb58] sm:$0xff] }
  0xa4   : > { %7171 = vmatprep.subr.bf16.mxu0 %v11860_v45  ;;  %7214 = vmatprep.subr.bf16.mxu1 %v11862_v46  ;;  %v622_v44 = vld [vmem:[#allocation6 + $0xc78] sm:$0xff]  ;;  %v11215_v45 = vcombine.low %v513_v32, %v549_v34  ;;  %v11217_v46 = vcombine.low %v514_v35, %v550_v36  ;;  %v1089_v35 = vld [vmem:[#allocation6 + $0x1b10] sm:$0xff] }
  0xa5   : > { %v11290_v48 = vcombine.high %v586_v43, %v622_v44  ;;  %v1125_v36 = vld [vmem:[#allocation6 + $0x1c30] sm:$0xff] }
  0xa7   : > { %7172 = vmatpush1.bf16.msra.mxu0 %v11859_v51  ;;  %7215 = vmatpush1.bf16.msra.mxu1 %v11861_v52  ;;  %v658_v51 = vld [vmem:[#allocation6 + $0xd98] sm:$0xff] }
  0xa8   : > { %7173 = vmatprep.subr.bf16.mxu0 %v11932_v53  ;;  %7216 = vmatprep.subr.bf16.mxu1 %v11934_v54  ;;  %v694_v52 = vld [vmem:[#allocation6 + $0xeb8] sm:$0xff]  ;;  %v11287_v53 = vcombine.low %v585_v41, %v621_v42  ;;  %v11289_v54 = vcombine.low %v586_v43, %v622_v44  ;;  %v11792_v41 = vcombine.high %v1089_v35, %v1125_v36  ;;  %v1161_v43 = vld [vmem:[#allocation6 + $0x1d50] sm:$0xff] }
  0xa9   : > { %v11362_v57 = vcombine.high %v658_v51, %v694_v52  ;;  %v1197_v44 = vld [vmem:[#allocation6 + $0x1e70] sm:$0xff] }
  0xab   : > { %7174 = vmatpush1.bf16.msra.mxu0 %v11931_v60  ;;  %7217 = vmatpush1.bf16.msra.mxu1 %v11933_v61  ;;  %v730_v60 = vld [vmem:[#allocation6 + $0xfd8] sm:$0xff] }
  0xac   : > { %7175 = vmatprep.subr.bf16.mxu0 %v12004_v62  ;;  %7218 = vmatprep.subr.bf16.mxu1 %v12006_v63  ;;  %v766_v61 = vld [vmem:[#allocation6 + $0x10f8] sm:$0xff]  ;;  %v11359_v62 = vcombine.low %v657_v49, %v693_v50  ;;  %v11361_v63 = vcombine.low %v658_v51, %v694_v52  ;;  %v11864_v49 = vcombine.high %v1161_v43, %v1197_v44  ;;  %v1233_v51 = vld [vmem:[#allocation6 + $0x1f90] sm:$0xff] }
  0xad   : > { %v11434_v1 = vcombine.high %v730_v60, %v766_v61  ;;  %v1269_v52 = vld [vmem:[#allocation6 + $0x20b0] sm:$0xff] }
  0xaf   : > { %7176 = vmatpush1.bf16.msra.mxu0 %v12003_v4  ;;  %7219 = vmatpush1.bf16.msra.mxu1 %v12005_v5  ;;  %v802_v4 = vld [vmem:[#allocation6 + $0x1218] sm:$0xff] }
  0xb0   : > { %7231 = vmatprep.subr.bf16.mxu0 %v10928_v6  ;;  %7274 = vmatprep.subr.bf16.mxu1 %v10930_v7  ;;  %v838_v5 = vld [vmem:[#allocation6 + $0x1338] sm:$0xff]  ;;  %v11431_v6 = vcombine.low %v729_v58, %v765_v59  ;;  %v11433_v7 = vcombine.low %v730_v60, %v766_v61  ;;  %v11936_v58 = vcombine.high %v1233_v51, %v1269_v52  ;;  %v1305_v60 = vld [vmem:[#allocation6 + $0x21d0] sm:$0xff] }
  0xb1   : > { %v11506_v9 = vcombine.high %v802_v4, %v838_v5  ;;  %v11505_v16 = vcombine.low %v802_v4, %v838_v5  ;;  %v1341_v61 = vld [vmem:[#allocation6 + $0x22f0] sm:$0xff]  ;;  %v227_v4 = vld [vmem:[#allocation6 + $0x20] sm:$0xff] }
  0xb2   : > { %7178 = vmatmul.mubr.bf16.vlgmr.msra.gmra.mrb[0].mxu0 %v12741_v10  ;;  %7221 = vmatmul.mubr.bf16.vlgmr.msra.gmra.mrb[0].mxu1 %v12741_v10  ;;  %v263_v5 = vld [vmem:[#allocation6 + $0x140] sm:$0xff] }
  0xb3   : > { %7232 = vmatpush1.bf16.msra.mxu0 %v10927_v13  ;;  %7275 = vmatpush1.bf16.msra.mxu1 %v10929_v14  ;;  %v874_v13 = vld [vmem:[#allocation6 + $0x1458] sm:$0xff] }
  0xb4   : > { %7233 = vmatprep.subr.bf16.mxu0 %v11000_v15  ;;  %7276 = vmatprep.subr.bf16.mxu1 %v11002_v18  ;;  %v910_v14 = vld [vmem:[#allocation6 + $0x1578] sm:$0xff]  ;;  %v11503_v15 = vcombine.low %v801_v2, %v837_v3  ;;  %v12008_v2 = vcombine.high %v1305_v60, %v1341_v61 }
  0xb5   : > { %7263 = vmatprep.mubr.bf16.mxu0 %v12736_v56  ;;  %7306 = vmatprep.mubr.bf16.mxu1 %v12736_v56  ;;  %v11578_v18 = vcombine.high %v874_v13, %v910_v14  ;;  %v11577_v24 = vcombine.low %v874_v13, %v910_v14  ;;  %v299_v13 = vld [vmem:[#allocation6 + $0x260] sm:$0xff] }
  0xb6   : > { %v335_v14 = vld [vmem:[#allocation6 + $0x380] sm:$0xff] }
  0xb7   : > { %7234 = vmatpush1.bf16.msra.mxu0 %v10999_v21  ;;  %7277 = vmatpush1.bf16.msra.mxu1 %v11001_v22  ;;  %v946_v21 = vld [vmem:[#allocation6 + $0x1698] sm:$0xff] }
  0xb8   : > { %7235 = vmatprep.subr.bf16.mxu0 %v11072_v23  ;;  %7278 = vmatprep.subr.bf16.mxu1 %v11074_v27  ;;  %v982_v22 = vld [vmem:[#allocation6 + $0x17b8] sm:$0xff]  ;;  %v11575_v23 = vcombine.low %v873_v11, %v909_v12  ;;  %v1017_v27 = vld [vmem:[#allocation6 + $0x18d0] sm:$0xff]  ;;  %v10932_v11 = vcombine.high %v227_v4, %v263_v5 }
  0xb9   : > { %v11650_v26 = vcombine.high %v946_v21, %v982_v22  ;;  %v11649_v32 = vcombine.low %v946_v21, %v982_v22  ;;  %v371_v21 = vld [vmem:[#allocation6 + $0x4a0] sm:$0xff] }
  0xba   : > { %v407_v22 = vld [vmem:[#allocation6 + $0x5c0] sm:$0xff] }
  0xbb   : > { %7236 = vmatpush1.bf16.msra.mxu0 %v11071_v29  ;;  %7279 = vmatpush1.bf16.msra.mxu1 %v11073_v30  ;;  %v1018_v29 = vld [vmem:[#allocation6 + $0x18d8] sm:$0xff] }
  0xbc   : > { %7237 = vmatprep.subr.bf16.mxu0 %v11144_v31  ;;  %7280 = vmatprep.subr.bf16.mxu1 %v11146_v33  ;;  %v1054_v30 = vld [vmem:[#allocation6 + $0x19f8] sm:$0xff]  ;;  %v11647_v31 = vcombine.low %v945_v19, %v981_v20  ;;  %v11720_v33 = vcombine.high %v1017_v27, %v1053_v28  ;;  %v11004_v19 = vcombine.high %v299_v13, %v335_v14 }
  0xbd   : > { %v11722_v34 = vcombine.high %v1018_v29, %v1054_v30 }
  0xbf   : > { %7238 = vmatpush1.bf16.msra.mxu0 %v11143_v37  ;;  %7281 = vmatpush1.bf16.msra.mxu1 %v11145_v38  ;;  %v1090_v37 = vld [vmem:[#allocation6 + $0x1b18] sm:$0xff] }
  0xc0   : > { %7239 = vmatprep.subr.bf16.mxu0 %v11216_v39  ;;  %7282 = vmatprep.subr.bf16.mxu1 %v11218_v40  ;;  %v1126_v38 = vld [vmem:[#allocation6 + $0x1c38] sm:$0xff]  ;;  %v11719_v39 = vcombine.low %v1017_v27, %v1053_v28  ;;  %v11721_v40 = vcombine.low %v1018_v29, %v1054_v30  ;;  %v11076_v27 = vcombine.high %v371_v21, %v407_v22  ;;  %v443_v29 = vld [vmem:[#allocation6 + $0x6e0] sm:$0xff] }
  0xc1   : > { %v11794_v42 = vcombine.high %v1090_v37, %v1126_v38  ;;  %v479_v30 = vld [vmem:[#allocation6 + $0x800] sm:$0xff] }
  0xc3   : > { %7240 = vmatpush1.bf16.msra.mxu0 %v11215_v45  ;;  %7283 = vmatpush1.bf16.msra.mxu1 %v11217_v46  ;;  %v1162_v45 = vld [vmem:[#allocation6 + $0x1d58] sm:$0xff] }
  0xc4   : > { %7241 = vmatprep.subr.bf16.mxu0 %v11288_v47  ;;  %7284 = vmatprep.subr.bf16.mxu1 %v11290_v48  ;;  %v1198_v46 = vld [vmem:[#allocation6 + $0x1e78] sm:$0xff]  ;;  %v11791_v47 = vcombine.low %v1089_v35, %v1125_v36  ;;  %v11793_v48 = vcombine.low %v1090_v37, %v1126_v38  ;;  %v11148_v35 = vcombine.high %v443_v29, %v479_v30  ;;  %v515_v37 = vld [vmem:[#allocation6 + $0x920] sm:$0xff] }
  0xc5   : > { %v11866_v50 = vcombine.high %v1162_v45, %v1198_v46  ;;  %v551_v38 = vld [vmem:[#allocation6 + $0xa40] sm:$0xff] }
  0xc7   : > { %7242 = vmatpush1.bf16.msra.mxu0 %v11287_v53  ;;  %7285 = vmatpush1.bf16.msra.mxu1 %v11289_v54  ;;  %v1234_v53 = vld [vmem:[#allocation6 + $0x1f98] sm:$0xff] }
  0xc8   : > { %7243 = vmatprep.subr.bf16.mxu0 %v11360_v55  ;;  %7286 = vmatprep.subr.bf16.mxu1 %v11362_v57  ;;  %v1270_v54 = vld [vmem:[#allocation6 + $0x20b8] sm:$0xff]  ;;  %v11863_v55 = vcombine.low %v1161_v43, %v1197_v44  ;;  %v11865_v57 = vcombine.low %v1162_v45, %v1198_v46  ;;  %v11220_v43 = vcombine.high %v515_v37, %v551_v38  ;;  %v587_v44 = vld [vmem:[#allocation6 + $0xb60] sm:$0xff]  ;;  %v588_v46 = vld [vmem:[#allocation6 + $0xb68] sm:$0xff] }
  0xc9   : > { %v11938_v59 = vcombine.high %v1234_v53, %v1270_v54  ;;  %v623_v45 = vld [vmem:[#allocation6 + $0xc80] sm:$0xff] }
  0xcb   : > { %7244 = vmatpush1.bf16.msra.mxu0 %v11359_v62  ;;  %7287 = vmatpush1.bf16.msra.mxu1 %v11361_v63  ;;  %v1306_v62 = vld [vmem:[#allocation6 + $0x21d8] sm:$0xff] }
  0xcc   : > { %7245 = vmatprep.subr.bf16.mxu0 %v11432_v0  ;;  %7288 = vmatprep.subr.bf16.mxu1 %v11434_v1  ;;  %v1342_v63 = vld [vmem:[#allocation6 + $0x22f8] sm:$0xff]  ;;  %v11935_v0 = vcombine.low %v1233_v51, %v1269_v52  ;;  %v11937_v1 = vcombine.low %v1234_v53, %v1270_v54  ;;  %v659_v52 = vld [vmem:[#allocation6 + $0xda0] sm:$0xff]  ;;  %v660_v54 = vld [vmem:[#allocation6 + $0xda8] sm:$0xff] }
  0xcd   : > { %v12010_v3 = vcombine.high %v1306_v62, %v1342_v63  ;;  %v695_v53 = vld [vmem:[#allocation6 + $0xec0] sm:$0xff] }
  0xcf   : > { %7246 = vmatpush1.bf16.msra.mxu0 %v11431_v6  ;;  %7289 = vmatpush1.bf16.msra.mxu1 %v11433_v7  ;;  %v228_v6 = vld [vmem:[#allocation6 + $0x28] sm:$0xff] }
  0xd0   : > { %7247 = vmatprep.subr.bf16.mxu0 %v11504_v8  ;;  %7290 = vmatprep.subr.bf16.mxu1 %v11506_v9  ;;  %v264_v7 = vld [vmem:[#allocation6 + $0x148] sm:$0xff]  ;;  %v12007_v8 = vcombine.low %v1305_v60, %v1341_v61  ;;  %v12009_v9 = vcombine.low %v1306_v62, %v1342_v63  ;;  %v731_v61 = vld [vmem:[#allocation6 + $0xfe0] sm:$0xff] }
  0xd1   : > { %v10934_v12 = vcombine.high %v228_v6, %v264_v7  ;;  %v767_v62 = vld [vmem:[#allocation6 + $0x1100] sm:$0xff]  ;;  %v732_v63 = vld [vmem:[#allocation6 + $0xfe8] sm:$0xff] }
  0xd3   : > { %7248 = vmatpush1.bf16.msra.mxu0 %v11503_v15  ;;  %7291 = vmatpush1.bf16.msra.mxu1 %v11505_v16  ;;  %v300_v15 = vld [vmem:[#allocation6 + $0x268] sm:$0xff] }
  0xd4   : > { %7249 = vmatprep.subr.bf16.mxu0 %v11576_v17  ;;  %7292 = vmatprep.subr.bf16.mxu1 %v11578_v18  ;;  %v336_v16 = vld [vmem:[#allocation6 + $0x388] sm:$0xff]  ;;  %v10931_v17 = vcombine.low %v227_v4, %v263_v5  ;;  %v10933_v18 = vcombine.low %v228_v6, %v264_v7  ;;  %v803_v5 = vld [vmem:[#allocation6 + $0x1220] sm:$0xff] }
  0xd5   : > { %v11006_v20 = vcombine.high %v300_v15, %v336_v16  ;;  %v839_v6 = vld [vmem:[#allocation6 + $0x1340] sm:$0xff]  ;;  %v804_v7 = vld [vmem:[#allocation6 + $0x1228] sm:$0xff] }
  0xd7   : > { %7250 = vmatpush1.bf16.msra.mxu0 %v11575_v23  ;;  %7293 = vmatpush1.bf16.msra.mxu1 %v11577_v24  ;;  %v372_v23 = vld [vmem:[#allocation6 + $0x4a8] sm:$0xff] }
  0xd8   : > { %7251 = vmatprep.subr.bf16.mxu0 %v11648_v25  ;;  %7294 = vmatprep.subr.bf16.mxu1 %v11650_v26  ;;  %v408_v24 = vld [vmem:[#allocation6 + $0x5c8] sm:$0xff]  ;;  %v11003_v25 = vcombine.low %v299_v13, %v335_v14  ;;  %v11005_v26 = vcombine.low %v300_v15, %v336_v16  ;;  %v875_v14 = vld [vmem:[#allocation6 + $0x1460] sm:$0xff] }
  0xd9   : > { %v11078_v28 = vcombine.high %v372_v23, %v408_v24  ;;  %v911_v15 = vld [vmem:[#allocation6 + $0x1580] sm:$0xff]  ;;  %v876_v16 = vld [vmem:[#allocation6 + $0x1468] sm:$0xff] }
  0xdb   : > { %7252 = vmatpush1.bf16.msra.mxu0 %v11647_v31  ;;  %7295 = vmatpush1.bf16.msra.mxu1 %v11649_v32  ;;  %v444_v31 = vld [vmem:[#allocation6 + $0x6e8] sm:$0xff] }
  0xdc   : > { %7253 = vmatprep.subr.bf16.mxu0 %v11720_v33  ;;  %7296 = vmatprep.subr.bf16.mxu1 %v11722_v34  ;;  %v480_v32 = vld [vmem:[#allocation6 + $0x808] sm:$0xff]  ;;  %v11075_v33 = vcombine.low %v371_v21, %v407_v22  ;;  %v11077_v34 = vcombine.low %v372_v23, %v408_v24  ;;  %v947_v22 = vld [vmem:[#allocation6 + $0x16a0] sm:$0xff] }
  0xdd   : > { %v11150_v36 = vcombine.high %v444_v31, %v480_v32  ;;  %v983_v23 = vld [vmem:[#allocation6 + $0x17c0] sm:$0xff]  ;;  %v948_v24 = vld [vmem:[#allocation6 + $0x16a8] sm:$0xff] }
  0xdf   : > { %7254 = vmatpush1.bf16.msra.mxu0 %v11719_v39  ;;  %7297 = vmatpush1.bf16.msra.mxu1 %v11721_v40  ;;  %v516_v39 = vld [vmem:[#allocation6 + $0x928] sm:$0xff] }
  0xe0   : > { %7255 = vmatprep.subr.bf16.mxu0 %v11792_v41  ;;  %7298 = vmatprep.subr.bf16.mxu1 %v11794_v42  ;;  %v552_v40 = vld [vmem:[#allocation6 + $0xa48] sm:$0xff]  ;;  %v11147_v41 = vcombine.low %v443_v29, %v479_v30  ;;  %v11149_v42 = vcombine.low %v444_v31, %v480_v32  ;;  %v1019_v30 = vld [vmem:[#allocation6 + $0x18e0] sm:$0xff] }
  0xe1   : > { %v1055_v31 = vld [vmem:[#allocation6 + $0x1a00] sm:$0xff]  ;;  %v1020_v32 = vld [vmem:[#allocation6 + $0x18e8] sm:$0xff] }
  0xe3   : > { %7256 = vmatpush1.bf16.msra.mxu0 %v11791_v47  ;;  %7299 = vmatpush1.bf16.msra.mxu1 %v11793_v48  ;;  %v624_v47 = vld [vmem:[#allocation6 + $0xc88] sm:$0xff]  ;;  %v11219_v48 = vcombine.low %v515_v37, %v551_v38  ;;  %v1091_v38 = vld [vmem:[#allocation6 + $0x1b20] sm:$0xff] }
  0xe4   : > { %7257 = vmatprep.subr.bf16.mxu0 %v11864_v49  ;;  %7300 = vmatprep.subr.bf16.mxu1 %v11866_v50  ;;  %v11221_v49 = vcombine.low %v516_v39, %v552_v40  ;;  %v11292_v50 = vcombine.high %v587_v44, %v623_v45  ;;  %v11294_v51 = vcombine.high %v588_v46, %v624_v47 }
  0xe7   : > { %7258 = vmatpush1.bf16.msra.mxu0 %v11863_v55  ;;  %7301 = vmatpush1.bf16.msra.mxu1 %v11865_v57  ;;  %v696_v55 = vld [vmem:[#allocation6 + $0xec8] sm:$0xff]  ;;  %v11291_v57 = vcombine.low %v587_v44, %v623_v45  ;;  %v1163_v45 = vld [vmem:[#allocation6 + $0x1d60] sm:$0xff] }
  0xe8   : > { %7259 = vmatprep.subr.bf16.mxu0 %v11936_v58  ;;  %7302 = vmatprep.subr.bf16.mxu1 %v11938_v59  ;;  %v11293_v58 = vcombine.low %v588_v46, %v624_v47  ;;  %v11364_v59 = vcombine.high %v659_v52, %v695_v53  ;;  %v11366_v60 = vcombine.high %v660_v54, %v696_v55  ;;  %v1199_v46 = vld [vmem:[#allocation6 + $0x1e80] sm:$0xff]  ;;  %v1164_v47 = vld [vmem:[#allocation6 + $0x1d68] sm:$0xff] }
  0xeb   : > { %7260 = vmatpush1.bf16.msra.mxu0 %v11935_v0  ;;  %7303 = vmatpush1.bf16.msra.mxu1 %v11937_v1  ;;  %v768_v0 = vld [vmem:[#allocation6 + $0x1108] sm:$0xff]  ;;  %v11363_v1 = vcombine.low %v659_v52, %v695_v53  ;;  %v1235_v53 = vld [vmem:[#allocation6 + $0x1fa0] sm:$0xff] }
  0xec   : > { %7261 = vmatprep.subr.bf16.mxu0 %v12008_v2  ;;  %7304 = vmatprep.subr.bf16.mxu1 %v12010_v3  ;;  %v11365_v2 = vcombine.low %v660_v54, %v696_v55  ;;  %v11436_v3 = vcombine.high %v731_v61, %v767_v62  ;;  %v11438_v4 = vcombine.high %v732_v63, %v768_v0  ;;  %v1271_v54 = vld [vmem:[#allocation6 + $0x20c0] sm:$0xff]  ;;  %v1236_v55 = vld [vmem:[#allocation6 + $0x1fa8] sm:$0xff] }
  0xef   : > { %7262 = vmatpush1.bf16.msra.mxu0 %v12007_v8  ;;  %7305 = vmatpush1.bf16.msra.mxu1 %v12009_v9  ;;  %v840_v8 = vld [vmem:[#allocation6 + $0x1348] sm:$0xff]  ;;  %v11435_v9 = vcombine.low %v731_v61, %v767_v62  ;;  %v1307_v62 = vld [vmem:[#allocation6 + $0x21e0] sm:$0xff] }
  0xf0   : > { %7317 = vmatprep.subr.bf16.mxu0 %v10932_v11  ;;  %7360 = vmatprep.subr.bf16.mxu1 %v10934_v12  ;;  %v11437_v11 = vcombine.low %v732_v63, %v768_v0  ;;  %v11508_v12 = vcombine.high %v803_v5, %v839_v6  ;;  %v11510_v13 = vcombine.high %v804_v7, %v840_v8  ;;  %v1343_v63 = vld [vmem:[#allocation6 + $0x2300] sm:$0xff]  ;;  %v1308_v0 = vld [vmem:[#allocation6 + $0x21e8] sm:$0xff] }
  0xf2   : > { %7264 = vmatmul.mubr.bf16.vlgmr.msra.gmra.mrb[4].mxu0 %v12741_v10  ;;  %7307 = vmatmul.mubr.bf16.vlgmr.msra.gmra.mrb[4].mxu1 %v12741_v10 }
  0xf3   : > { %7318 = vmatpush1.bf16.msra.mxu0 %v10931_v17  ;;  %7361 = vmatpush1.bf16.msra.mxu1 %v10933_v18  ;;  %v912_v17 = vld [vmem:[#allocation6 + $0x1588] sm:$0xff]  ;;  %v11507_v18 = vcombine.low %v803_v5, %v839_v6  ;;  %v229_v6 = vld [vmem:[#allocation6 + $0x30] sm:$0xff] }
  0xf4   : > { %7319 = vmatprep.subr.bf16.mxu0 %v11004_v19  ;;  %7362 = vmatprep.subr.bf16.mxu1 %v11006_v20  ;;  %v11509_v19 = vcombine.low %v804_v7, %v840_v8  ;;  %v11580_v20 = vcombine.high %v875_v14, %v911_v15  ;;  %v11582_v21 = vcombine.high %v876_v16, %v912_v17  ;;  %v265_v7 = vld [vmem:[#allocation6 + $0x150] sm:$0xff]  ;;  %v230_v8 = vld [vmem:[#allocation6 + $0x38] sm:$0xff] }
  0xf5   : > { %7349 = vmatprep.mubr.bf16.mxu0 %v12736_v56  ;;  %7392 = vmatprep.mubr.bf16.mxu1 %v12736_v56  ;;  %v11222_v56 = vcombine.high %v516_v39, %v552_v40  ;;  %v1127_v39 = vld [vmem:[#allocation6 + $0x1c40] sm:$0xff]  ;;  %v1092_v40 = vld [vmem:[#allocation6 + $0x1b28] sm:$0xff] }
  0xf7   : > { %7320 = vmatpush1.bf16.msra.mxu0 %v11003_v25  ;;  %7363 = vmatpush1.bf16.msra.mxu1 %v11005_v26  ;;  %v984_v25 = vld [vmem:[#allocation6 + $0x17c8] sm:$0xff]  ;;  %v11579_v26 = vcombine.low %v875_v14, %v911_v15  ;;  %v301_v15 = vld [vmem:[#allocation6 + $0x270] sm:$0xff] }
  0xf8   : > { %7321 = vmatprep.subr.bf16.mxu0 %v11076_v27  ;;  %7364 = vmatprep.subr.bf16.mxu1 %v11078_v28  ;;  %v11581_v27 = vcombine.low %v876_v16, %v912_v17  ;;  %v11652_v28 = vcombine.high %v947_v22, %v983_v23  ;;  %v11654_v29 = vcombine.high %v948_v24, %v984_v25  ;;  %v337_v16 = vld [vmem:[#allocation6 + $0x390] sm:$0xff]  ;;  %v302_v17 = vld [vmem:[#allocation6 + $0x278] sm:$0xff] }
  0xfb   : > { %7322 = vmatpush1.bf16.msra.mxu0 %v11075_v33  ;;  %7365 = vmatpush1.bf16.msra.mxu1 %v11077_v34  ;;  %v1056_v33 = vld [vmem:[#allocation6 + $0x1a08] sm:$0xff]  ;;  %v11651_v34 = vcombine.low %v947_v22, %v983_v23  ;;  %v373_v23 = vld [vmem:[#allocation6 + $0x4b0] sm:$0xff] }
  0xfc   : > { %7323 = vmatprep.subr.bf16.mxu0 %v11148_v35  ;;  %7366 = vmatprep.subr.bf16.mxu1 %v11150_v36  ;;  %v11653_v35 = vcombine.low %v948_v24, %v984_v25  ;;  %v11724_v36 = vcombine.high %v1019_v30, %v1055_v31  ;;  %v11726_v37 = vcombine.high %v1020_v32, %v1056_v33  ;;  %v409_v24 = vld [vmem:[#allocation6 + $0x5d0] sm:$0xff]  ;;  %v374_v25 = vld [vmem:[#allocation6 + $0x4b8] sm:$0xff] }
  0xff   : > { %7324 = vmatpush1.bf16.msra.mxu0 %v11147_v41  ;;  %7367 = vmatpush1.bf16.msra.mxu1 %v11149_v42  ;;  %v1128_v41 = vld [vmem:[#allocation6 + $0x1c48] sm:$0xff]  ;;  %v11723_v42 = vcombine.low %v1019_v30, %v1055_v31  ;;  %v445_v31 = vld [vmem:[#allocation6 + $0x6f0] sm:$0xff] }
 0x100   : > { %7325 = vmatprep.subr.bf16.mxu0 %v11220_v43  ;;  %7368 = vmatprep.subr.bf16.mxu1 %v11222_v56  ;;  %v11725_v43 = vcombine.low %v1020_v32, %v1056_v33  ;;  %v11796_v56 = vcombine.high %v1091_v38, %v1127_v39  ;;  %v11798_v44 = vcombine.high %v1092_v40, %v1128_v41  ;;  %v481_v32 = vld [vmem:[#allocation6 + $0x810] sm:$0xff] }
 0x101   : > { %v12754_v33 = vld [vmem:[%s12725_s5 + $0x4] ss:$8 sps:$4 sm:$0xff]  }
 0x103   : > { %7326 = vmatpush1.bf16.msra.mxu0 %v11219_v48  ;;  %7369 = vmatpush1.bf16.msra.mxu1 %v11221_v49  ;;  %v1200_v48 = vld [vmem:[#allocation6 + $0x1e88] sm:$0xff]  ;;  %v11795_v49 = vcombine.low %v1091_v38, %v1127_v39  ;;  %v517_v39 = vld [vmem:[#allocation6 + $0x930] sm:$0xff] }
 0x104   : > { %7327 = vmatprep.subr.bf16.mxu0 %v11292_v50  ;;  %7370 = vmatprep.subr.bf16.mxu1 %v11294_v51  ;;  %v11797_v50 = vcombine.low %v1092_v40, %v1128_v41  ;;  %v11868_v51 = vcombine.high %v1163_v45, %v1199_v46  ;;  %v11870_v52 = vcombine.high %v1164_v47, %v1200_v48  ;;  %v553_v40 = vld [vmem:[#allocation6 + $0xa50] sm:$0xff]  ;;  %v518_v41 = vld [vmem:[#allocation6 + $0x938] sm:$0xff] }
 0x107   : > { %7328 = vmatpush1.bf16.msra.mxu0 %v11291_v57  ;;  %7371 = vmatpush1.bf16.msra.mxu1 %v11293_v58  ;;  %v1272_v57 = vld [vmem:[#allocation6 + $0x20c8] sm:$0xff]  ;;  %v11867_v58 = vcombine.low %v1163_v45, %v1199_v46  ;;  %v589_v46 = vld [vmem:[#allocation6 + $0xb70] sm:$0xff] }
 0x108   : > { %7329 = vmatprep.subr.bf16.mxu0 %v11364_v59  ;;  %7372 = vmatprep.subr.bf16.mxu1 %v11366_v60  ;;  %v11869_v59 = vcombine.low %v1164_v47, %v1200_v48  ;;  %v11940_v60 = vcombine.high %v1235_v53, %v1271_v54  ;;  %v11942_v61 = vcombine.high %v1236_v55, %v1272_v57  ;;  %v625_v47 = vld [vmem:[#allocation6 + $0xc90] sm:$0xff]  ;;  %v590_v48 = vld [vmem:[#allocation6 + $0xb78] sm:$0xff] }
 0x10b   : > { %7330 = vmatpush1.bf16.msra.mxu0 %v11363_v1  ;;  %7373 = vmatpush1.bf16.msra.mxu1 %v11365_v2  ;;  %v1344_v1 = vld [vmem:[#allocation6 + $0x2308] sm:$0xff]  ;;  %v11939_v2 = vcombine.low %v1235_v53, %v1271_v54  ;;  %v661_v54 = vld [vmem:[#allocation6 + $0xdb0] sm:$0xff] }
 0x10c   : > { %7331 = vmatprep.subr.bf16.mxu0 %v11436_v3  ;;  %7374 = vmatprep.subr.bf16.mxu1 %v11438_v4  ;;  %v11941_v3 = vcombine.low %v1236_v55, %v1272_v57  ;;  %v12012_v4 = vcombine.high %v1307_v62, %v1343_v63  ;;  %v12014_v5 = vcombine.high %v1308_v0, %v1344_v1  ;;  %v697_v55 = vld [vmem:[#allocation6 + $0xed0] sm:$0xff]  ;;  %v662_v57 = vld [vmem:[#allocation6 + $0xdb8] sm:$0xff] }
 0x10f   : > { %7332 = vmatpush1.bf16.msra.mxu0 %v11435_v9  ;;  %7375 = vmatpush1.bf16.msra.mxu1 %v11437_v11  ;;  %v266_v9 = vld [vmem:[#allocation6 + $0x158] sm:$0xff]  ;;  %v12011_v11 = vcombine.low %v1307_v62, %v1343_v63  ;;  %v733_v63 = vld [vmem:[#allocation6 + $0xff0] sm:$0xff] }
 0x110   : > { %7333 = vmatprep.subr.bf16.mxu0 %v11508_v12  ;;  %7376 = vmatprep.subr.bf16.mxu1 %v11510_v13  ;;  %v12013_v12 = vcombine.low %v1308_v0, %v1344_v1  ;;  %v10936_v13 = vcombine.high %v229_v6, %v265_v7  ;;  %v10938_v14 = vcombine.high %v230_v8, %v266_v9  ;;  %v769_v0 = vld [vmem:[#allocation6 + $0x1110] sm:$0xff]  ;;  %v734_v1 = vld [vmem:[#allocation6 + $0xff8] sm:$0xff] }
 0x113   : > { %7334 = vmatpush1.bf16.msra.mxu0 %v11507_v18  ;;  %7377 = vmatpush1.bf16.msra.mxu1 %v11509_v19  ;;  %v338_v18 = vld [vmem:[#allocation6 + $0x398] sm:$0xff]  ;;  %v10935_v19 = vcombine.low %v229_v6, %v265_v7  ;;  %v805_v7 = vld [vmem:[#allocation6 + $0x1230] sm:$0xff] }
 0x114   : > { %7335 = vmatprep.subr.bf16.mxu0 %v11580_v20  ;;  %7378 = vmatprep.subr.bf16.mxu1 %v11582_v21  ;;  %v10937_v20 = vcombine.low %v230_v8, %v266_v9  ;;  %v11008_v21 = vcombine.high %v301_v15, %v337_v16  ;;  %v11010_v22 = vcombine.high %v302_v17, %v338_v18  ;;  %v841_v8 = vld [vmem:[#allocation6 + $0x1350] sm:$0xff]  ;;  %v806_v9 = vld [vmem:[#allocation6 + $0x1238] sm:$0xff] }
 0x117   : > { %7336 = vmatpush1.bf16.msra.mxu0 %v11579_v26  ;;  %7379 = vmatpush1.bf16.msra.mxu1 %v11581_v27  ;;  %v410_v26 = vld [vmem:[#allocation6 + $0x5d8] sm:$0xff]  ;;  %v11007_v27 = vcombine.low %v301_v15, %v337_v16  ;;  %v877_v16 = vld [vmem:[#allocation6 + $0x1470] sm:$0xff] }
 0x118   : > { %7337 = vmatprep.subr.bf16.mxu0 %v11652_v28  ;;  %7380 = vmatprep.subr.bf16.mxu1 %v11654_v29  ;;  %v11009_v28 = vcombine.low %v302_v17, %v338_v18  ;;  %v11080_v29 = vcombine.high %v373_v23, %v409_v24  ;;  %v11082_v30 = vcombine.high %v374_v25, %v410_v26  ;;  %v913_v17 = vld [vmem:[#allocation6 + $0x1590] sm:$0xff]  ;;  %v878_v18 = vld [vmem:[#allocation6 + $0x1478] sm:$0xff] }
 0x11b   : > { %7338 = vmatpush1.bf16.msra.mxu0 %v11651_v34  ;;  %7381 = vmatpush1.bf16.msra.mxu1 %v11653_v35  ;;  %v446_v34 = vld [vmem:[#allocation6 + $0x6f8] sm:$0xff] }
 0x11c   : > { %7339 = vmatprep.subr.bf16.mxu0 %v11724_v36  ;;  %7382 = vmatprep.subr.bf16.mxu1 %v11726_v37  ;;  %v482_v35 = vld [vmem:[#allocation6 + $0x818] sm:$0xff]  ;;  %v11081_v36 = vcombine.low %v374_v25, %v410_v26  ;;  %v11152_v37 = vcombine.high %v445_v31, %v481_v32  ;;  %v985_v25 = vld [vmem:[#allocation6 + $0x17d0] sm:$0xff] }
 0x11d   : > { %v11154_v38 = vcombine.high %v446_v34, %v482_v35  ;;  %v950_v26 = vld [vmem:[#allocation6 + $0x16b8] sm:$0xff] }
 0x11f   : > { %7340 = vmatpush1.bf16.msra.mxu0 %v11723_v42  ;;  %7383 = vmatpush1.bf16.msra.mxu1 %v11725_v43  ;;  %v554_v42 = vld [vmem:[#allocation6 + $0xa58] sm:$0xff]  ;;  %v11151_v43 = vcombine.low %v445_v31, %v481_v32  ;;  %v1021_v32 = vld [vmem:[#allocation6 + $0x18f0] sm:$0xff] }
 0x120   : > { %7341 = vmatprep.subr.bf16.mxu0 %v11796_v56  ;;  %7384 = vmatprep.subr.bf16.mxu1 %v11798_v44  ;;  %v11153_v56 = vcombine.low %v446_v34, %v482_v35  ;;  %v11224_v44 = vcombine.high %v517_v39, %v553_v40  ;;  %v11226_v45 = vcombine.high %v518_v41, %v554_v42  ;;  %v1057_v34 = vld [vmem:[#allocation6 + $0x1a10] sm:$0xff]  ;;  %v1022_v35 = vld [vmem:[#allocation6 + $0x18f8] sm:$0xff] }
 0x123   : > { %7342 = vmatpush1.bf16.msra.mxu0 %v11795_v49  ;;  %7385 = vmatpush1.bf16.msra.mxu1 %v11797_v50  ;;  %v626_v49 = vld [vmem:[#allocation6 + $0xc98] sm:$0xff]  ;;  %v11223_v50 = vcombine.low %v517_v39, %v553_v40  ;;  %v1093_v40 = vld [vmem:[#allocation6 + $0x1b30] sm:$0xff] }
 0x124   : > { %7343 = vmatprep.subr.bf16.mxu0 %v11868_v51  ;;  %7386 = vmatprep.subr.bf16.mxu1 %v11870_v52  ;;  %v11225_v51 = vcombine.low %v518_v41, %v554_v42  ;;  %v11296_v52 = vcombine.high %v589_v46, %v625_v47  ;;  %v11298_v53 = vcombine.high %v590_v48, %v626_v49  ;;  %v1129_v41 = vld [vmem:[#allocation6 + $0x1c50] sm:$0xff]  ;;  %v1094_v42 = vld [vmem:[#allocation6 + $0x1b38] sm:$0xff] }
 0x127   : > { %7344 = vmatpush1.bf16.msra.mxu0 %v11867_v58  ;;  %7387 = vmatpush1.bf16.msra.mxu1 %v11869_v59  ;;  %v698_v58 = vld [vmem:[#allocation6 + $0xed8] sm:$0xff]  ;;  %v11295_v59 = vcombine.low %v589_v46, %v625_v47  ;;  %v1165_v47 = vld [vmem:[#allocation6 + $0x1d70] sm:$0xff] }
 0x128   : > { %7345 = vmatprep.subr.bf16.mxu0 %v11940_v60  ;;  %7388 = vmatprep.subr.bf16.mxu1 %v11942_v61  ;;  %v11297_v60 = vcombine.low %v590_v48, %v626_v49  ;;  %v11368_v61 = vcombine.high %v661_v54, %v697_v55  ;;  %v11370_v62 = vcombine.high %v662_v57, %v698_v58  ;;  %v1201_v48 = vld [vmem:[#allocation6 + $0x1e90] sm:$0xff]  ;;  %v1166_v49 = vld [vmem:[#allocation6 + $0x1d78] sm:$0xff] }
 0x12b   : > { %7346 = vmatpush1.bf16.msra.mxu0 %v11939_v2  ;;  %7389 = vmatpush1.bf16.msra.mxu1 %v11941_v3  ;;  %v770_v2 = vld [vmem:[#allocation6 + $0x1118] sm:$0xff]  ;;  %v11367_v3 = vcombine.low %v661_v54, %v697_v55  ;;  %v1237_v55 = vld [vmem:[#allocation6 + $0x1fb0] sm:$0xff] }
 0x12c   : > { %7347 = vmatprep.subr.bf16.mxu0 %v12012_v4  ;;  %7390 = vmatprep.subr.bf16.mxu1 %v12014_v5  ;;  %v11369_v4 = vcombine.low %v662_v57, %v698_v58  ;;  %v11440_v5 = vcombine.high %v733_v63, %v769_v0  ;;  %v11442_v6 = vcombine.high %v734_v1, %v770_v2  ;;  %v1273_v57 = vld [vmem:[#allocation6 + $0x20d0] sm:$0xff]  ;;  %v1238_v58 = vld [vmem:[#allocation6 + $0x1fb8] sm:$0xff] }
 0x12f   : > { %7348 = vmatpush1.bf16.msra.mxu0 %v12011_v11  ;;  %7391 = vmatpush1.bf16.msra.mxu1 %v12013_v12  ;;  %v842_v11 = vld [vmem:[#allocation6 + $0x1358] sm:$0xff]  ;;  %v11439_v12 = vcombine.low %v733_v63, %v769_v0  ;;  %v1309_v0 = vld [vmem:[#allocation6 + $0x21f0] sm:$0xff] }
 0x130   : > { %7403 = vmatprep.subr.bf16.mxu0 %v10936_v13  ;;  %7446 = vmatprep.subr.bf16.mxu1 %v10938_v14  ;;  %v11441_v13 = vcombine.low %v734_v1, %v770_v2  ;;  %v11512_v14 = vcombine.high %v805_v7, %v841_v8  ;;  %v11514_v15 = vcombine.high %v806_v9, %v842_v11  ;;  %v1345_v1 = vld [vmem:[#allocation6 + $0x2310] sm:$0xff]  ;;  %v1310_v2 = vld [vmem:[#allocation6 + $0x21f8] sm:$0xff] }
 0x132   : > { %7350 = vmatmul.mubr.bf16.vlgmr.msra.gmra.mrb[8].mxu0 %v12741_v10  ;;  %7393 = vmatmul.mubr.bf16.vlgmr.msra.gmra.mrb[8].mxu1 %v12741_v10  ;;  %v11079_v10 = vcombine.low %v373_v23, %v409_v24  ;;  %v949_v24 = vld [vmem:[#allocation6 + $0x16b0] sm:$0xff] }
 0x133   : > { %7404 = vmatpush1.bf16.msra.mxu0 %v10935_v19  ;;  %7447 = vmatpush1.bf16.msra.mxu1 %v10937_v20  ;;  %v914_v19 = vld [vmem:[#allocation6 + $0x1598] sm:$0xff]  ;;  %v11511_v20 = vcombine.low %v805_v7, %v841_v8  ;;  %v231_v8 = vld [vmem:[#allocation6 + $0x40] sm:$0xff] }
 0x134   : > { %7405 = vmatprep.subr.bf16.mxu0 %v11008_v21  ;;  %7448 = vmatprep.subr.bf16.mxu1 %v11010_v22  ;;  %v11513_v21 = vcombine.low %v806_v9, %v842_v11  ;;  %v11584_v22 = vcombine.high %v877_v16, %v913_v17  ;;  %v11586_v23 = vcombine.high %v878_v18, %v914_v19  ;;  %v267_v9 = vld [vmem:[#allocation6 + $0x160] sm:$0xff]  ;;  %v232_v11 = vld [vmem:[#allocation6 + $0x48] sm:$0xff] }
 0x135   : > { %7435 = vmatprep.mubr.bf16.mxu0 %v12754_v33  ;;  %7478 = vmatprep.mubr.bf16.mxu1 %v12754_v33 }
 0x137   : > { %7406 = vmatpush1.bf16.msra.mxu0 %v11007_v27  ;;  %7449 = vmatpush1.bf16.msra.mxu1 %v11009_v28  ;;  %v986_v27 = vld [vmem:[#allocation6 + $0x17d8] sm:$0xff]  ;;  %v11583_v28 = vcombine.low %v877_v16, %v913_v17  ;;  %v303_v17 = vld [vmem:[#allocation6 + $0x280] sm:$0xff] }
 0x138   : > { %7407 = vmatprep.subr.bf16.mxu0 %v11080_v29  ;;  %7450 = vmatprep.subr.bf16.mxu1 %v11082_v30  ;;  %v11585_v29 = vcombine.low %v878_v18, %v914_v19  ;;  %v11656_v30 = vcombine.high %v949_v24, %v985_v25  ;;  %v11658_v31 = vcombine.high %v950_v26, %v986_v27  ;;  %v339_v18 = vld [vmem:[#allocation6 + $0x3a0] sm:$0xff]  ;;  %v304_v19 = vld [vmem:[#allocation6 + $0x288] sm:$0xff] }
 0x13b   : > { %7408 = vmatpush1.bf16.msra.mxu0 %v11079_v10  ;;  %7451 = vmatpush1.bf16.msra.mxu1 %v11081_v36  ;;  %v1058_v10 = vld [vmem:[#allocation6 + $0x1a18] sm:$0xff]  ;;  %v11655_v36 = vcombine.low %v949_v24, %v985_v25  ;;  %v375_v25 = vld [vmem:[#allocation6 + $0x4c0] sm:$0xff] }
 0x13c   : > { %7409 = vmatprep.subr.bf16.mxu0 %v11152_v37  ;;  %7452 = vmatprep.subr.bf16.mxu1 %v11154_v38  ;;  %v11657_v37 = vcombine.low %v950_v26, %v986_v27  ;;  %v11728_v38 = vcombine.high %v1021_v32, %v1057_v34  ;;  %v11730_v39 = vcombine.high %v1022_v35, %v1058_v10  ;;  %v411_v26 = vld [vmem:[#allocation6 + $0x5e0] sm:$0xff] }
 0x13d   : > { %v12759_v27 = vld [vmem:[%s12725_s5] ss:$8 sps:$4 sm:$0xff]  }
 0x13f   : > { %7410 = vmatpush1.bf16.msra.mxu0 %v11151_v43  ;;  %7453 = vmatpush1.bf16.msra.mxu1 %v11153_v56  ;;  %v1130_v43 = vld [vmem:[#allocation6 + $0x1c58] sm:$0xff]  ;;  %v11727_v56 = vcombine.low %v1021_v32, %v1057_v34  ;;  %v11084_v32 = vcombine.high %v375_v25, %v411_v26 }
 0x140   : > { %7411 = vmatprep.subr.bf16.mxu0 %v11224_v44  ;;  %7454 = vmatprep.subr.bf16.mxu1 %v11226_v45  ;;  %v11729_v44 = vcombine.low %v1022_v35, %v1058_v10  ;;  %v11800_v45 = vcombine.high %v1093_v40, %v1129_v41  ;;  %v11802_v46 = vcombine.high %v1094_v42, %v1130_v43  ;;  %v447_v35 = vld [vmem:[#allocation6 + $0x700] sm:$0xff] }
 0x141   : > { %v483_v10 = vld [vmem:[#allocation6 + $0x820] sm:$0xff] }
 0x143   : > { %7412 = vmatpush1.bf16.msra.mxu0 %v11223_v50  ;;  %7455 = vmatpush1.bf16.msra.mxu1 %v11225_v51  ;;  %v1202_v50 = vld [vmem:[#allocation6 + $0x1e98] sm:$0xff]  ;;  %v11799_v51 = vcombine.low %v1093_v40, %v1129_v41  ;;  %v11156_v40 = vcombine.high %v447_v35, %v483_v10 }
 0x144   : > { %7413 = vmatprep.subr.bf16.mxu0 %v11296_v52  ;;  %7456 = vmatprep.subr.bf16.mxu1 %v11298_v53  ;;  %v11801_v52 = vcombine.low %v1094_v42, %v1130_v43  ;;  %v11872_v53 = vcombine.high %v1165_v47, %v1201_v48  ;;  %v11874_v54 = vcombine.high %v1166_v49, %v1202_v50  ;;  %v519_v42 = vld [vmem:[#allocation6 + $0x940] sm:$0xff] }
 0x145   : > { %v555_v43 = vld [vmem:[#allocation6 + $0xa60] sm:$0xff] }
 0x147   : > { %7414 = vmatpush1.bf16.msra.mxu0 %v11295_v59  ;;  %7457 = vmatpush1.bf16.msra.mxu1 %v11297_v60  ;;  %v1274_v59 = vld [vmem:[#allocation6 + $0x20d8] sm:$0xff]  ;;  %v11871_v60 = vcombine.low %v1165_v47, %v1201_v48  ;;  %v11228_v47 = vcombine.high %v519_v42, %v555_v43 }
 0x148   : > { %7415 = vmatprep.subr.bf16.mxu0 %v11368_v61  ;;  %7458 = vmatprep.subr.bf16.mxu1 %v11370_v62  ;;  %v11873_v61 = vcombine.low %v1166_v49, %v1202_v50  ;;  %v11944_v62 = vcombine.high %v1237_v55, %v1273_v57  ;;  %v11946_v63 = vcombine.high %v1238_v58, %v1274_v59  ;;  %v591_v49 = vld [vmem:[#allocation6 + $0xb80] sm:$0xff] }
 0x149   : > { %v627_v50 = vld [vmem:[#allocation6 + $0xca0] sm:$0xff] }
 0x14b   : > { %7416 = vmatpush1.bf16.msra.mxu0 %v11367_v3  ;;  %7459 = vmatpush1.bf16.msra.mxu1 %v11369_v4  ;;  %v1346_v3 = vld [vmem:[#allocation6 + $0x2318] sm:$0xff]  ;;  %v11943_v4 = vcombine.low %v1237_v55, %v1273_v57  ;;  %v11300_v55 = vcombine.high %v591_v49, %v627_v50 }
 0x14c   : > { %7417 = vmatprep.subr.bf16.mxu0 %v11440_v5  ;;  %7460 = vmatprep.subr.bf16.mxu1 %v11442_v6  ;;  %v11945_v5 = vcombine.low %v1238_v58, %v1274_v59  ;;  %v12016_v6 = vcombine.high %v1309_v0, %v1345_v1  ;;  %v12018_v7 = vcombine.high %v1310_v2, %v1346_v3  ;;  %v663_v58 = vld [vmem:[#allocation6 + $0xdc0] sm:$0xff] }
 0x14d   : > { %v699_v59 = vld [vmem:[#allocation6 + $0xee0] sm:$0xff] }
 0x14f   : > { %7418 = vmatpush1.bf16.msra.mxu0 %v11439_v12  ;;  %7461 = vmatpush1.bf16.msra.mxu1 %v11441_v13  ;;  %v268_v12 = vld [vmem:[#allocation6 + $0x168] sm:$0xff]  ;;  %v12015_v13 = vcombine.low %v1309_v0, %v1345_v1  ;;  %v11372_v0 = vcombine.high %v663_v58, %v699_v59 }
 0x150   : > { %7419 = vmatprep.subr.bf16.mxu0 %v11512_v14  ;;  %7462 = vmatprep.subr.bf16.mxu1 %v11514_v15  ;;  %v12017_v14 = vcombine.low %v1310_v2, %v1346_v3  ;;  %v10940_v15 = vcombine.high %v231_v8, %v267_v9  ;;  %v10942_v16 = vcombine.high %v232_v11, %v268_v12  ;;  %v735_v3 = vld [vmem:[#allocation6 + $0x1000] sm:$0xff] }
 0x153   : > { %7420 = vmatpush1.bf16.msra.mxu0 %v11511_v20  ;;  %7463 = vmatpush1.bf16.msra.mxu1 %v11513_v21  ;;  %v340_v20 = vld [vmem:[#allocation6 + $0x3a8] sm:$0xff]  ;;  %v10939_v21 = vcombine.low %v231_v8, %v267_v9 }
 0x154   : > { %7421 = vmatprep.subr.bf16.mxu0 %v11584_v22  ;;  %7464 = vmatprep.subr.bf16.mxu1 %v11586_v23  ;;  %v10941_v22 = vcombine.low %v232_v11, %v268_v12  ;;  %v11012_v23 = vcombine.high %v303_v17, %v339_v18  ;;  %v11014_v24 = vcombine.high %v304_v19, %v340_v20  ;;  %v772_v8 = vld [vmem:[#allocation6 + $0x1128] sm:$0xff] }
 0x155   : > { %v11371_v12 = vcombine.low %v663_v58, %v699_v59  ;;  %v1096_v58 = vld [vmem:[#allocation6 + $0x1b48] sm:$0xff] }
 0x156   : > { %v1132_v59 = vld [vmem:[#allocation6 + $0x1c68] sm:$0xff] }
 0x157   : > { %7422 = vmatpush1.bf16.msra.mxu0 %v11583_v28  ;;  %7465 = vmatpush1.bf16.msra.mxu1 %v11585_v29  ;;  %v376_v28 = vld [vmem:[#allocation6 + $0x4c8] sm:$0xff] }
 0x158   : > { %7423 = vmatprep.subr.bf16.mxu0 %v11656_v30  ;;  %7466 = vmatprep.subr.bf16.mxu1 %v11658_v31  ;;  %v412_v29 = vld [vmem:[#allocation6 + $0x5e8] sm:$0xff]  ;;  %v11011_v30 = vcombine.low %v303_v17, %v339_v18  ;;  %v11013_v31 = vcombine.low %v304_v19, %v340_v20  ;;  %v921_v19 = vld [vmem:[#allocation6 + $0x15d0] sm:$0xff] }
 0x159   : > { %v11086_v34 = vcombine.high %v376_v28, %v412_v29 }
 0x15b   : > { %7424 = vmatpush1.bf16.msra.mxu0 %v11655_v36  ;;  %7467 = vmatpush1.bf16.msra.mxu1 %v11657_v37  ;;  %v448_v36 = vld [vmem:[#allocation6 + $0x708] sm:$0xff] }
 0x15c   : > { %7425 = vmatprep.subr.bf16.mxu0 %v11728_v38  ;;  %7468 = vmatprep.subr.bf16.mxu1 %v11730_v39  ;;  %v484_v37 = vld [vmem:[#allocation6 + $0x828] sm:$0xff]  ;;  %v11083_v38 = vcombine.low %v375_v25, %v411_v26  ;;  %v11085_v39 = vcombine.low %v376_v28, %v412_v29 }
 0x15d   : > { %v11158_v41 = vcombine.high %v448_v36, %v484_v37  ;;  %v808_v25 = vld [vmem:[#allocation6 + $0x1248] sm:$0xff] }
 0x15e   : > { %v844_v26 = vld [vmem:[#allocation6 + $0x1368] sm:$0xff] }
 0x15f   : > { %7426 = vmatpush1.bf16.msra.mxu0 %v11727_v56  ;;  %7469 = vmatpush1.bf16.msra.mxu1 %v11729_v44  ;;  %v520_v56 = vld [vmem:[#allocation6 + $0x948] sm:$0xff] }
 0x160   : > { %7427 = vmatprep.subr.bf16.mxu0 %v11800_v45  ;;  %7470 = vmatprep.subr.bf16.mxu1 %v11802_v46  ;;  %v556_v44 = vld [vmem:[#allocation6 + $0xa68] sm:$0xff]  ;;  %v11155_v45 = vcombine.low %v447_v35, %v483_v10  ;;  %v11157_v46 = vcombine.low %v448_v36, %v484_v37  ;;  %v11517_v37 = vcombine.low %v808_v25, %v844_v26 }
 0x161   : > { %v11230_v48 = vcombine.high %v520_v56, %v556_v44  ;;  %v880_v35 = vld [vmem:[#allocation6 + $0x1488] sm:$0xff] }
 0x162   : > { %v916_v10 = vld [vmem:[#allocation6 + $0x15a8] sm:$0xff] }
 0x163   : > { %7428 = vmatpush1.bf16.msra.mxu0 %v11799_v51  ;;  %7471 = vmatpush1.bf16.msra.mxu1 %v11801_v52  ;;  %v592_v51 = vld [vmem:[#allocation6 + $0xb88] sm:$0xff] }
 0x164   : > { %7429 = vmatprep.subr.bf16.mxu0 %v11872_v53  ;;  %7472 = vmatprep.subr.bf16.mxu1 %v11874_v54  ;;  %v628_v52 = vld [vmem:[#allocation6 + $0xca8] sm:$0xff]  ;;  %v11227_v53 = vcombine.low %v519_v42, %v555_v43  ;;  %v11229_v54 = vcombine.low %v520_v56, %v556_v44  ;;  %v11589_v44 = vcombine.low %v880_v35, %v916_v10 }
 0x165   : > { %v11302_v57 = vcombine.high %v592_v51, %v628_v52  ;;  %v952_v42 = vld [vmem:[#allocation6 + $0x16c8] sm:$0xff] }
 0x166   : > { %v988_v43 = vld [vmem:[#allocation6 + $0x17e8] sm:$0xff] }
 0x167   : > { %7430 = vmatpush1.bf16.msra.mxu0 %v11871_v60  ;;  %7473 = vmatpush1.bf16.msra.mxu1 %v11873_v61  ;;  %v664_v60 = vld [vmem:[#allocation6 + $0xdc8] sm:$0xff] }
 0x168   : > { %7431 = vmatprep.subr.bf16.mxu0 %v11944_v62  ;;  %7474 = vmatprep.subr.bf16.mxu1 %v11946_v63  ;;  %v700_v61 = vld [vmem:[#allocation6 + $0xee8] sm:$0xff]  ;;  %v11299_v62 = vcombine.low %v591_v49, %v627_v50  ;;  %v11301_v63 = vcombine.low %v592_v51, %v628_v52  ;;  %v11661_v52 = vcombine.low %v952_v42, %v988_v43 }
 0x169   : > { %v11374_v2 = vcombine.high %v664_v60, %v700_v61  ;;  %v1024_v49 = vld [vmem:[#allocation6 + $0x1908] sm:$0xff] }
 0x16a   : > { %v1060_v50 = vld [vmem:[#allocation6 + $0x1a28] sm:$0xff] }
 0x16b   : > { %7432 = vmatpush1.bf16.msra.mxu0 %v11943_v4  ;;  %7475 = vmatpush1.bf16.msra.mxu1 %v11945_v5  ;;  %v771_v4 = vld [vmem:[#allocation6 + $0x1120] sm:$0xff] }
 0x16c   : > { %7433 = vmatprep.subr.bf16.mxu0 %v12016_v6  ;;  %7476 = vmatprep.subr.bf16.mxu1 %v12018_v7  ;;  %v736_v7 = vld [vmem:[#allocation6 + $0x1008] sm:$0xff]  ;;  %v11444_v17 = vcombine.high %v735_v3, %v771_v4  ;;  %v11443_v28 = vcombine.low %v735_v3, %v771_v4 }
 0x16d   : > { %v11445_v29 = vcombine.low %v736_v7, %v772_v8  ;;  %v1168_v3 = vld [vmem:[#allocation6 + $0x1d88] sm:$0xff] }
 0x16e   : > { %v1204_v4 = vld [vmem:[#allocation6 + $0x1ea8] sm:$0xff] }
 0x16f   : > { %7434 = vmatpush1.bf16.msra.mxu0 %v12015_v13  ;;  %7477 = vmatpush1.bf16.msra.mxu1 %v12017_v14  ;;  %v886_v13 = vld [vmem:[#allocation6 + $0x14b8] sm:$0xff] }
 0x170   : > { %7489 = vmatprep.subr.bf16.mxu0 %v10940_v15  ;;  %7532 = vmatprep.subr.bf16.mxu1 %v10942_v16  ;;  %v11373_v16 = vcombine.low %v664_v60, %v700_v61  ;;  %v11733_v61 = vcombine.low %v1024_v49, %v1060_v50 }
 0x172   : > { %7436 = vmatmul.mubr.bf16.vlgmr.msra.gmra.mrb[12].mxu0 %v12759_v27  ;;  %7479 = vmatmul.mubr.bf16.vlgmr.msra.gmra.mrb[12].mxu1 %v12759_v27 }
 0x173   : > { %7490 = vmatpush1.bf16.msra.mxu0 %v10939_v21  ;;  %7533 = vmatpush1.bf16.msra.mxu1 %v10941_v22  ;;  %v11446_v21 = vcombine.high %v736_v7, %v772_v8  ;;  %v807_v22 = vld [vmem:[#allocation6 + $0x1240] sm:$0xff]  ;;  %v11805_v8 = vcombine.low %v1096_v58, %v1132_v59 }
 0x174   : > { %7491 = vmatprep.subr.bf16.mxu0 %v11012_v23  ;;  %7534 = vmatprep.subr.bf16.mxu1 %v11014_v24  ;;  %v843_v23 = vld [vmem:[#allocation6 + $0x1360] sm:$0xff] }
 0x175   : > { %7521 = vmatprep.mubr.bf16.mxu0 %v12754_v33  ;;  %7564 = vmatprep.mubr.bf16.mxu1 %v12754_v33  ;;  %v11515_v36 = vcombine.low %v807_v22, %v843_v23 }
 0x177   : > { %7492 = vmatpush1.bf16.msra.mxu0 %v11011_v30  ;;  %7535 = vmatpush1.bf16.msra.mxu1 %v11013_v31  ;;  %v11516_v30 = vcombine.high %v807_v22, %v843_v23  ;;  %v11518_v31 = vcombine.high %v808_v25, %v844_v26  ;;  %v1240_v22 = vld [vmem:[#allocation6 + $0x1fc8] sm:$0xff]  ;;  %v11877_v26 = vcombine.low %v1168_v3, %v1204_v4 }
 0x178   : > { %7493 = vmatprep.subr.bf16.mxu0 %v11084_v32  ;;  %7536 = vmatprep.subr.bf16.mxu1 %v11086_v34  ;;  %v879_v32 = vld [vmem:[#allocation6 + $0x1480] sm:$0xff]  ;;  %v1276_v23 = vld [vmem:[#allocation6 + $0x20e8] sm:$0xff] }
 0x179   : > { %v915_v34 = vld [vmem:[#allocation6 + $0x15a0] sm:$0xff] }
 0x17a   : > { %v11587_v56 = vcombine.low %v879_v32, %v915_v34 }
 0x17b   : > { %7494 = vmatpush1.bf16.msra.mxu0 %v11083_v38  ;;  %7537 = vmatpush1.bf16.msra.mxu1 %v11085_v39  ;;  %v11588_v38 = vcombine.high %v879_v32, %v915_v34  ;;  %v11590_v39 = vcombine.high %v880_v35, %v916_v10  ;;  %v1312_v32 = vld [vmem:[#allocation6 + $0x2208] sm:$0xff]  ;;  %v11949_v10 = vcombine.low %v1240_v22, %v1276_v23 }
 0x17c   : > { %7495 = vmatprep.subr.bf16.mxu0 %v11156_v40  ;;  %7538 = vmatprep.subr.bf16.mxu1 %v11158_v41  ;;  %v951_v40 = vld [vmem:[#allocation6 + $0x16c0] sm:$0xff]  ;;  %v1348_v34 = vld [vmem:[#allocation6 + $0x2328] sm:$0xff] }
 0x17d   : > { %v987_v41 = vld [vmem:[#allocation6 + $0x17e0] sm:$0xff] }
 0x17e   : > { %v11659_v51 = vcombine.low %v951_v40, %v987_v41 }
 0x17f   : > { %7496 = vmatpush1.bf16.msra.mxu0 %v11155_v45  ;;  %7539 = vmatpush1.bf16.msra.mxu1 %v11157_v46  ;;  %v11660_v45 = vcombine.high %v951_v40, %v987_v41  ;;  %v11662_v46 = vcombine.high %v952_v42, %v988_v43  ;;  %v234_v40 = vld [vmem:[#allocation6 + $0x58] sm:$0xff]  ;;  %v12021_v43 = vcombine.low %v1312_v32, %v1348_v34 }
 0x180   : > { %7497 = vmatprep.subr.bf16.mxu0 %v11228_v47  ;;  %7540 = vmatprep.subr.bf16.mxu1 %v11230_v48  ;;  %v1023_v47 = vld [vmem:[#allocation6 + $0x1900] sm:$0xff]  ;;  %v270_v41 = vld [vmem:[#allocation6 + $0x178] sm:$0xff] }
 0x181   : > { %v1059_v48 = vld [vmem:[#allocation6 + $0x1a20] sm:$0xff] }
 0x182   : > { %v11731_v60 = vcombine.low %v1023_v47, %v1059_v48 }
 0x183   : > { %7498 = vmatpush1.bf16.msra.mxu0 %v11227_v53  ;;  %7541 = vmatpush1.bf16.msra.mxu1 %v11229_v54  ;;  %v11732_v53 = vcombine.high %v1023_v47, %v1059_v48  ;;  %v11734_v54 = vcombine.high %v1024_v49, %v1060_v50  ;;  %v306_v47 = vld [vmem:[#allocation6 + $0x298] sm:$0xff]  ;;  %v10945_v50 = vcombine.low %v234_v40, %v270_v41 }
 0x184   : > { %7499 = vmatprep.subr.bf16.mxu0 %v11300_v55  ;;  %7542 = vmatprep.subr.bf16.mxu1 %v11302_v57  ;;  %v1095_v55 = vld [vmem:[#allocation6 + $0x1b40] sm:$0xff]  ;;  %v342_v48 = vld [vmem:[#allocation6 + $0x3b8] sm:$0xff] }
 0x185   : > { %v12765_v1 = vpop.f32.mrb[0].mxu0  ;;  %v12769_v6 = vpop.f32.mrb[0].mxu1  ;;  %v1131_v57 = vld [vmem:[#allocation6 + $0x1c60] sm:$0xff] }
 0x186   : > { %v12767_v5 = vpop.f32.mrb[1].mxu0  ;;  %v12773_v11 = vpop.f32.mrb[1].mxu1  ;;  %v11803_v7 = vcombine.low %v1095_v55, %v1131_v57 }
 0x187   : > { %v12771_v9 = vpop.f32.mrb[2].mxu0  ;;  %7500 = vmatpush1.bf16.msra.mxu0 %v11299_v62  ;;  %7543 = vmatpush1.bf16.msra.mxu1 %v11301_v63  ;;  %v12779_v15 = vpop.f32.mrb[2].mxu1  ;;  %v11804_v62 = vcombine.high %v1095_v55, %v1131_v57  ;;  %v11806_v63 = vcombine.high %v1096_v58, %v1132_v59  ;;  %v378_v55 = vld [vmem:[#allocation6 + $0x4d8] sm:$0xff]  ;;  %v11017_v59 = vcombine.low %v306_v47, %v342_v48 }
 0x188   : > { %v12777_v14 = vpop.f32.mrb[3].mxu0  ;;  %7501 = vmatprep.subr.bf16.mxu0 %v11372_v0  ;;  %v12785_v20 = vpop.f32.mrb[3].mxu1  ;;  %7544 = vmatprep.subr.bf16.mxu1 %v11374_v2  ;;  %v1167_v0 = vld [vmem:[#allocation6 + $0x1d80] sm:$0xff]  ;;  %v414_v57 = vld [vmem:[#allocation6 + $0x5f8] sm:$0xff] }
 0x189   : > { %v1203_v2 = vld [vmem:[#allocation6 + $0x1ea0] sm:$0xff] }
 0x18a   : > { %v11875_v25 = vcombine.low %v1167_v0, %v1203_v2 }
 0x18b   : > { %7502 = vmatpush1.bf16.msra.mxu0 %v11371_v12  ;;  %7545 = vmatpush1.bf16.msra.mxu1 %v11373_v16  ;;  %v11876_v12 = vcombine.high %v1167_v0, %v1203_v2  ;;  %v11878_v16 = vcombine.high %v1168_v3, %v1204_v4  ;;  %v450_v0 = vld [vmem:[#allocation6 + $0x718] sm:$0xff]  ;;  %v11089_v4 = vcombine.low %v378_v55, %v414_v57 }
 0x18c   : > { %7503 = vmatprep.subr.bf16.mxu0 %v11444_v17  ;;  %7546 = vmatprep.subr.bf16.mxu1 %v11446_v21  ;;  %v1239_v17 = vld [vmem:[#allocation6 + $0x1fc0] sm:$0xff]  ;;  %v486_v2 = vld [vmem:[#allocation6 + $0x838] sm:$0xff] }
 0x18d   : > { %v1275_v21 = vld [vmem:[#allocation6 + $0x20e0] sm:$0xff] }
 0x18e   : > { %v11947_v35 = vcombine.low %v1239_v17, %v1275_v21 }
 0x18f   : > { %7504 = vmatpush1.bf16.msra.mxu0 %v11443_v28  ;;  %7547 = vmatpush1.bf16.msra.mxu1 %v11445_v29  ;;  %v11948_v28 = vcombine.high %v1239_v17, %v1275_v21  ;;  %v11950_v29 = vcombine.high %v1240_v22, %v1276_v23  ;;  %v522_v17 = vld [vmem:[#allocation6 + $0x958] sm:$0xff]  ;;  %v11161_v23 = vcombine.low %v450_v0, %v486_v2 }
 0x190   : > { %7505 = vmatprep.subr.bf16.mxu0 %v11516_v30  ;;  %7548 = vmatprep.subr.bf16.mxu1 %v11518_v31  ;;  %v1311_v30 = vld [vmem:[#allocation6 + $0x2200] sm:$0xff]  ;;  %v558_v21 = vld [vmem:[#allocation6 + $0xa78] sm:$0xff] }
 0x191   : > { %v1347_v31 = vld [vmem:[#allocation6 + $0x2320] sm:$0xff] }
 0x192   : > { %v12019_v42 = vcombine.low %v1311_v30, %v1347_v31 }
 0x193   : > { %7506 = vmatpush1.bf16.msra.mxu0 %v11515_v36  ;;  %7549 = vmatpush1.bf16.msra.mxu1 %v11517_v37  ;;  %v12020_v36 = vcombine.high %v1311_v30, %v1347_v31  ;;  %v12022_v37 = vcombine.high %v1312_v32, %v1348_v34  ;;  %v630_v30 = vld [vmem:[#allocation6 + $0xcb8] sm:$0xff]  ;;  %v11233_v32 = vcombine.low %v522_v17, %v558_v21 }
 0x194   : > { %7507 = vmatprep.subr.bf16.mxu0 %v11588_v38  ;;  %7550 = vmatprep.subr.bf16.mxu1 %v11590_v39  ;;  %v233_v38 = vld [vmem:[#allocation6 + $0x50] sm:$0xff] }
 0x195   : > { %v269_v39 = vld [vmem:[#allocation6 + $0x170] sm:$0xff] }
 0x196   : > { %v10943_v49 = vcombine.low %v233_v38, %v269_v39 }
 0x197   : > { %7508 = vmatpush1.bf16.msra.mxu0 %v11587_v56  ;;  %7551 = vmatpush1.bf16.msra.mxu1 %v11589_v44  ;;  %v10944_v56 = vcombine.high %v233_v38, %v269_v39  ;;  %v10946_v44 = vcombine.high %v234_v40, %v270_v41  ;;  %v702_v38 = vld [vmem:[#allocation6 + $0xef8] sm:$0xff] }
 0x198   : > { %7509 = vmatprep.subr.bf16.mxu0 %v11660_v45  ;;  %7552 = vmatprep.subr.bf16.mxu1 %v11662_v46  ;;  %v305_v45 = vld [vmem:[#allocation6 + $0x290] sm:$0xff] }
 0x199   : > { %v341_v46 = vld [vmem:[#allocation6 + $0x3b0] sm:$0xff] }
 0x19a   : > { %v11015_v58 = vcombine.low %v305_v45, %v341_v46 }
 0x19b   : > { %7510 = vmatpush1.bf16.msra.mxu0 %v11659_v51  ;;  %7553 = vmatpush1.bf16.msra.mxu1 %v11661_v52  ;;  %v11016_v51 = vcombine.high %v305_v45, %v341_v46  ;;  %v11018_v52 = vcombine.high %v306_v47, %v342_v48  ;;  %v738_v47 = vld [vmem:[#allocation6 + $0x1018] sm:$0xff] }
 0x19c   : > { %7511 = vmatprep.subr.bf16.mxu0 %v11732_v53  ;;  %7554 = vmatprep.subr.bf16.mxu1 %v11734_v54  ;;  %v377_v53 = vld [vmem:[#allocation6 + $0x4d0] sm:$0xff]  ;;  %v774_v48 = vld [vmem:[#allocation6 + $0x1138] sm:$0xff] }
 0x19d   : > { %v413_v54 = vld [vmem:[#allocation6 + $0x5f0] sm:$0xff] }
 0x19e   : > { %v11087_v3 = vcombine.low %v377_v53, %v413_v54 }
 0x19f   : > { %7512 = vmatpush1.bf16.msra.mxu0 %v11731_v60  ;;  %7555 = vmatpush1.bf16.msra.mxu1 %v11733_v61  ;;  %v11088_v60 = vcombine.high %v377_v53, %v413_v54  ;;  %v11090_v61 = vcombine.high %v378_v55, %v414_v57 }
 0x1a0   : > { %7513 = vmatprep.subr.bf16.mxu0 %v11804_v62  ;;  %7556 = vmatprep.subr.bf16.mxu1 %v11806_v63  ;;  %v449_v62 = vld [vmem:[#allocation6 + $0x710] sm:$0xff] }
 0x1a1   : > { %v485_v63 = vld [vmem:[#allocation6 + $0x830] sm:$0xff] }
 0x1a2   : > { %v11159_v22 = vcombine.low %v449_v62, %v485_v63 }
 0x1a3   : > { %7514 = vmatpush1.bf16.msra.mxu0 %v11803_v7  ;;  %7557 = vmatpush1.bf16.msra.mxu1 %v11805_v8  ;;  %v11160_v7 = vcombine.high %v449_v62, %v485_v63  ;;  %v11162_v8 = vcombine.high %v450_v0, %v486_v2  ;;  %v809_v62 = vld [vmem:[#allocation6 + $0x1250] sm:$0xff]  ;;  %v810_v2 = vld [vmem:[#allocation6 + $0x1258] sm:$0xff] }
 0x1a4   : > { %7515 = vmatprep.subr.bf16.mxu0 %v11876_v12  ;;  %7558 = vmatprep.subr.bf16.mxu1 %v11878_v16  ;;  %v521_v12 = vld [vmem:[#allocation6 + $0x950] sm:$0xff] }
 0x1a5   : > { %v557_v16 = vld [vmem:[#allocation6 + $0xa70] sm:$0xff] }
 0x1a6   : > { %v11231_v31 = vcombine.low %v521_v12, %v557_v16  ;;  %v845_v63 = vld [vmem:[#allocation6 + $0x1370] sm:$0xff] }
 0x1a7   : > { %7516 = vmatpush1.bf16.msra.mxu0 %v11875_v25  ;;  %7559 = vmatpush1.bf16.msra.mxu1 %v11877_v26  ;;  %v11232_v25 = vcombine.high %v521_v12, %v557_v16  ;;  %v593_v26 = vld [vmem:[#allocation6 + $0xb90] sm:$0xff] }
 0x1a8   : > { %7517 = vmatprep.subr.bf16.mxu0 %v11948_v28  ;;  %7560 = vmatprep.subr.bf16.mxu1 %v11950_v29  ;;  %v629_v28 = vld [vmem:[#allocation6 + $0xcb0] sm:$0xff]  ;;  %v594_v29 = vld [vmem:[#allocation6 + $0xb98] sm:$0xff] }
 0x1a9   : > { %v11304_v34 = vcombine.high %v593_v26, %v629_v28  ;;  %v11303_v39 = vcombine.low %v593_v26, %v629_v28  ;;  %v11305_v40 = vcombine.low %v594_v29, %v630_v30  ;;  %v881_v16 = vld [vmem:[#allocation6 + $0x1490] sm:$0xff] }
 0x1aa   : > { %v953_v28 = vld [vmem:[#allocation6 + $0x16d0] sm:$0xff] }
 0x1ab   : > { %7518 = vmatpush1.bf16.msra.mxu0 %v11947_v35  ;;  %7561 = vmatpush1.bf16.msra.mxu1 %v11949_v10  ;;  %v11306_v35 = vcombine.high %v594_v29, %v630_v30  ;;  %v665_v10 = vld [vmem:[#allocation6 + $0xdd0] sm:$0xff]  ;;  %v954_v30 = vld [vmem:[#allocation6 + $0x16d8] sm:$0xff] }
 0x1ac   : > { %7519 = vmatprep.subr.bf16.mxu0 %v12020_v36  ;;  %7562 = vmatprep.subr.bf16.mxu1 %v12022_v37  ;;  %v701_v36 = vld [vmem:[#allocation6 + $0xef0] sm:$0xff]  ;;  %v666_v37 = vld [vmem:[#allocation6 + $0xdd8] sm:$0xff] }
 0x1ad   : > { %v11376_v41 = vcombine.high %v665_v10, %v701_v36  ;;  %v11377_v55 = vcombine.low %v666_v37, %v702_v38  ;;  %v989_v29 = vld [vmem:[#allocation6 + $0x17f0] sm:$0xff] }
 0x1af   : > { %7520 = vmatpush1.bf16.msra.mxu0 %v12019_v42  ;;  %7563 = vmatpush1.bf16.msra.mxu1 %v12021_v43  ;;  %v11378_v43 = vcombine.high %v666_v37, %v702_v38  ;;  %v1061_v37 = vld [vmem:[#allocation6 + $0x1a30] sm:$0xff]  ;;  %v1026_v38 = vld [vmem:[#allocation6 + $0x1918] sm:$0xff] }
 0x1b0   : > { %7575 = vmatprep.subr.bf16.mxu0 %v10944_v56  ;;  %7618 = vmatprep.subr.bf16.mxu1 %v10946_v44  ;;  %v737_v56 = vld [vmem:[#allocation6 + $0x1010] sm:$0xff] }
 0x1b1   : > { %v773_v44 = vld [vmem:[#allocation6 + $0x1130] sm:$0xff] }
 0x1b2   : > { %7522 = vmatmul.mubr.bf16.vlgmr.msra.gmra.mrb[16].mxu0 %v12759_v27  ;;  %7565 = vmatmul.mubr.bf16.vlgmr.msra.gmra.mrb[16].mxu1 %v12759_v27  ;;  %v11448_v57 = vcombine.high %v737_v56, %v773_v44 }
 0x1b3   : > { %7576 = vmatpush1.bf16.msra.mxu0 %v10943_v49  ;;  %7619 = vmatpush1.bf16.msra.mxu1 %v10945_v50 }
 0x1b4   : > { %7577 = vmatprep.subr.bf16.mxu0 %v11016_v51  ;;  %7620 = vmatprep.subr.bf16.mxu1 %v11018_v52  ;;  %v11375_v51 = vcombine.low %v665_v10, %v701_v36  ;;  %v1025_v36 = vld [vmem:[#allocation6 + $0x1910] sm:$0xff]  ;;  %v850_v52 = vld [vmem:[#allocation6 + $0x1398] sm:$0xff] }
 0x1b5   : > { %7607 = vmatprep.mubr.bf16.mxu0 %v12754_v33  ;;  %7650 = vmatprep.mubr.bf16.mxu1 %v12754_v33  ;;  %v11234_v33 = vcombine.high %v522_v17, %v558_v21  ;;  %v917_v17 = vld [vmem:[#allocation6 + $0x15b0] sm:$0xff]  ;;  %v882_v21 = vld [vmem:[#allocation6 + $0x1498] sm:$0xff] }
 0x1b7   : > { %7578 = vmatpush1.bf16.msra.mxu0 %v11015_v58  ;;  %7621 = vmatpush1.bf16.msra.mxu1 %v11017_v59  ;;  %v814_v59 = vld [vmem:[#allocation6 + $0x1278] sm:$0xff]  ;;  %v885_v58 = vld [vmem:[#allocation6 + $0x14b0] sm:$0xff] }
 0x1b8   : > { %7579 = vmatprep.subr.bf16.mxu0 %v11088_v60  ;;  %7622 = vmatprep.subr.bf16.mxu1 %v11090_v61  ;;  %v11450_v61 = vcombine.high %v738_v47, %v774_v48  ;;  %v11530_v0 = vcombine.high %v814_v59, %v850_v52  ;;  %v11529_v18 = vcombine.low %v814_v59, %v850_v52 }
 0x1bb   : > { %7580 = vmatpush1.bf16.msra.mxu0 %v11087_v3  ;;  %7623 = vmatpush1.bf16.msra.mxu1 %v11089_v4  ;;  %v846_v3 = vld [vmem:[#allocation6 + $0x1378] sm:$0xff]  ;;  %v11447_v4 = vcombine.low %v737_v56, %v773_v44  ;;  %v1097_v44 = vld [vmem:[#allocation6 + $0x1b50] sm:$0xff] }
 0x1bc   : > { %7581 = vmatprep.subr.bf16.mxu0 %v11160_v7  ;;  %7624 = vmatprep.subr.bf16.mxu1 %v11162_v8  ;;  %v11449_v7 = vcombine.low %v738_v47, %v774_v48  ;;  %v11520_v8 = vcombine.high %v809_v62, %v845_v63  ;;  %v11522_v12 = vcombine.high %v810_v2, %v846_v3  ;;  %v1133_v47 = vld [vmem:[#allocation6 + $0x1c70] sm:$0xff]  ;;  %v1098_v48 = vld [vmem:[#allocation6 + $0x1b58] sm:$0xff] }
 0x1bf   : > { %7582 = vmatpush1.bf16.msra.mxu0 %v11159_v22  ;;  %7625 = vmatpush1.bf16.msra.mxu1 %v11161_v23  ;;  %v918_v22 = vld [vmem:[#allocation6 + $0x15b8] sm:$0xff]  ;;  %v11519_v23 = vcombine.low %v809_v62, %v845_v63  ;;  %v1169_v63 = vld [vmem:[#allocation6 + $0x1d90] sm:$0xff] }
 0x1c0   : > { %7583 = vmatprep.subr.bf16.mxu0 %v11232_v25  ;;  %7626 = vmatprep.subr.bf16.mxu1 %v11234_v33  ;;  %v11521_v25 = vcombine.low %v810_v2, %v846_v3  ;;  %v11592_v33 = vcombine.high %v881_v16, %v917_v17  ;;  %v11594_v26 = vcombine.high %v882_v21, %v918_v22  ;;  %v1205_v2 = vld [vmem:[#allocation6 + $0x1eb0] sm:$0xff]  ;;  %v1170_v3 = vld [vmem:[#allocation6 + $0x1d98] sm:$0xff] }
 0x1c3   : > { %7584 = vmatpush1.bf16.msra.mxu0 %v11231_v31  ;;  %7627 = vmatpush1.bf16.msra.mxu1 %v11233_v32  ;;  %v990_v31 = vld [vmem:[#allocation6 + $0x17f8] sm:$0xff]  ;;  %v11591_v32 = vcombine.low %v881_v16, %v917_v17  ;;  %v1241_v17 = vld [vmem:[#allocation6 + $0x1fd0] sm:$0xff] }
 0x1c4   : > { %7585 = vmatprep.subr.bf16.mxu0 %v11304_v34  ;;  %7628 = vmatprep.subr.bf16.mxu1 %v11306_v35  ;;  %v11593_v34 = vcombine.low %v882_v21, %v918_v22  ;;  %v11664_v35 = vcombine.high %v953_v28, %v989_v29  ;;  %v11666_v10 = vcombine.high %v954_v30, %v990_v31  ;;  %v1277_v21 = vld [vmem:[#allocation6 + $0x20f0] sm:$0xff]  ;;  %v1242_v22 = vld [vmem:[#allocation6 + $0x1fd8] sm:$0xff] }
 0x1c5   : > { %v12793_v42 = vpop.f32.mrb[4].mxu0  ;;  %v12797_v46 = vpop.f32.mrb[4].mxu1 }
 0x1c6   : > { %v12795_v45 = vpop.f32.mrb[5].mxu0  ;;  %v12801_v50 = vpop.f32.mrb[5].mxu1 }
 0x1c7   : > { %v12799_v49 = vpop.f32.mrb[6].mxu0  ;;  %7586 = vmatpush1.bf16.msra.mxu0 %v11303_v39  ;;  %7629 = vmatpush1.bf16.msra.mxu1 %v11305_v40  ;;  %v12807_v54 = vpop.f32.mrb[6].mxu1  ;;  %v1062_v39 = vld [vmem:[#allocation6 + $0x1a38] sm:$0xff]  ;;  %v11663_v40 = vcombine.low %v953_v28, %v989_v29  ;;  %v1313_v29 = vld [vmem:[#allocation6 + $0x2210] sm:$0xff] }
 0x1c8   : > { %v12805_v53 = vpop.f32.mrb[7].mxu0  ;;  %7587 = vmatprep.subr.bf16.mxu0 %v11376_v41  ;;  %v12813_v60 = vpop.f32.mrb[7].mxu1  ;;  %7630 = vmatprep.subr.bf16.mxu1 %v11378_v43  ;;  %v11665_v41 = vcombine.low %v954_v30, %v990_v31  ;;  %v11736_v43 = vcombine.high %v1025_v36, %v1061_v37  ;;  %v11738_v56 = vcombine.high %v1026_v38, %v1062_v39  ;;  %v1349_v30 = vld [vmem:[#allocation6 + $0x2330] sm:$0xff]  ;;  %v1314_v31 = vld [vmem:[#allocation6 + $0x2218] sm:$0xff] }
 0x1cb   : > { %7588 = vmatpush1.bf16.msra.mxu0 %v11375_v51  ;;  %7631 = vmatpush1.bf16.msra.mxu1 %v11377_v55  ;;  %v1134_v51 = vld [vmem:[#allocation6 + $0x1c78] sm:$0xff]  ;;  %v11735_v55 = vcombine.low %v1025_v36, %v1061_v37  ;;  %v235_v37 = vld [vmem:[#allocation6 + $0x60] sm:$0xff] }
 0x1cc   : > { %7589 = vmatprep.subr.bf16.mxu0 %v11448_v57  ;;  %7632 = vmatprep.subr.bf16.mxu1 %v11450_v61  ;;  %v11737_v57 = vcombine.low %v1026_v38, %v1062_v39  ;;  %v11808_v61 = vcombine.high %v1097_v44, %v1133_v47  ;;  %v11810_v62 = vcombine.high %v1098_v48, %v1134_v51  ;;  %v271_v38 = vld [vmem:[#allocation6 + $0x180] sm:$0xff]  ;;  %v236_v39 = vld [vmem:[#allocation6 + $0x68] sm:$0xff] }
 0x1cf   : > { %7590 = vmatpush1.bf16.msra.mxu0 %v11447_v4  ;;  %7633 = vmatpush1.bf16.msra.mxu1 %v11449_v7  ;;  %v1206_v4 = vld [vmem:[#allocation6 + $0x1eb8] sm:$0xff]  ;;  %v11807_v7 = vcombine.low %v1097_v44, %v1133_v47  ;;  %v307_v47 = vld [vmem:[#allocation6 + $0x2a0] sm:$0xff] }
 0x1d0   : > { %7591 = vmatprep.subr.bf16.mxu0 %v11520_v8  ;;  %7634 = vmatprep.subr.bf16.mxu1 %v11522_v12  ;;  %v11809_v8 = vcombine.low %v1098_v48, %v1134_v51  ;;  %v11880_v12 = vcombine.high %v1169_v63, %v1205_v2  ;;  %v11882_v16 = vcombine.high %v1170_v3, %v1206_v4  ;;  %v343_v48 = vld [vmem:[#allocation6 + $0x3c0] sm:$0xff]  ;;  %v308_v51 = vld [vmem:[#allocation6 + $0x2a8] sm:$0xff] }
 0x1d3   : > { %7592 = vmatpush1.bf16.msra.mxu0 %v11519_v23  ;;  %7635 = vmatpush1.bf16.msra.mxu1 %v11521_v25  ;;  %v1278_v23 = vld [vmem:[#allocation6 + $0x20f8] sm:$0xff]  ;;  %v11879_v25 = vcombine.low %v1169_v63, %v1205_v2  ;;  %v379_v2 = vld [vmem:[#allocation6 + $0x4e0] sm:$0xff] }
 0x1d4   : > { %7593 = vmatprep.subr.bf16.mxu0 %v11592_v33  ;;  %7636 = vmatprep.subr.bf16.mxu1 %v11594_v26  ;;  %v11881_v33 = vcombine.low %v1170_v3, %v1206_v4  ;;  %v11952_v26 = vcombine.high %v1241_v17, %v1277_v21  ;;  %v11954_v28 = vcombine.high %v1242_v22, %v1278_v23  ;;  %v415_v3 = vld [vmem:[#allocation6 + $0x600] sm:$0xff]  ;;  %v380_v4 = vld [vmem:[#allocation6 + $0x4e8] sm:$0xff] }
 0x1d7   : > { %7594 = vmatpush1.bf16.msra.mxu0 %v11591_v32  ;;  %7637 = vmatpush1.bf16.msra.mxu1 %v11593_v34  ;;  %v1350_v32 = vld [vmem:[#allocation6 + $0x2338] sm:$0xff]  ;;  %v11951_v34 = vcombine.low %v1241_v17, %v1277_v21  ;;  %v451_v21 = vld [vmem:[#allocation6 + $0x720] sm:$0xff] }
 0x1d8   : > { %7595 = vmatprep.subr.bf16.mxu0 %v11664_v35  ;;  %7638 = vmatprep.subr.bf16.mxu1 %v11666_v10  ;;  %v11953_v35 = vcombine.low %v1242_v22, %v1278_v23  ;;  %v12024_v10 = vcombine.high %v1313_v29, %v1349_v30  ;;  %v12026_v36 = vcombine.high %v1314_v31, %v1350_v32  ;;  %v487_v22 = vld [vmem:[#allocation6 + $0x840] sm:$0xff] }
 0x1d9   : > { %v12820_v23 = vld [vmem:[%s12725_s5 + $0x4] ss:$8 sps:$4 sm:$0xff]  }
 0x1db   : > { %7596 = vmatpush1.bf16.msra.mxu0 %v11663_v40  ;;  %7639 = vmatpush1.bf16.msra.mxu1 %v11665_v41  ;;  %v272_v40 = vld [vmem:[#allocation6 + $0x188] sm:$0xff]  ;;  %v12023_v41 = vcombine.low %v1313_v29, %v1349_v30  ;;  %v523_v30 = vld [vmem:[#allocation6 + $0x960] sm:$0xff] }
 0x1dc   : > { %7597 = vmatprep.subr.bf16.mxu0 %v11736_v43  ;;  %7640 = vmatprep.subr.bf16.mxu1 %v11738_v56  ;;  %v12025_v43 = vcombine.low %v1314_v31, %v1350_v32  ;;  %v10948_v56 = vcombine.high %v235_v37, %v271_v38  ;;  %v10950_v44 = vcombine.high %v236_v39, %v272_v40  ;;  %v559_v31 = vld [vmem:[#allocation6 + $0xa80] sm:$0xff]  ;;  %v524_v32 = vld [vmem:[#allocation6 + $0x968] sm:$0xff] }
 0x1df   : > { %7598 = vmatpush1.bf16.msra.mxu0 %v11735_v55  ;;  %7641 = vmatpush1.bf16.msra.mxu1 %v11737_v57  ;;  %v344_v55 = vld [vmem:[#allocation6 + $0x3c8] sm:$0xff]  ;;  %v10947_v57 = vcombine.low %v235_v37, %v271_v38  ;;  %v595_v38 = vld [vmem:[#allocation6 + $0xba0] sm:$0xff] }
 0x1e0   : > { %7599 = vmatprep.subr.bf16.mxu0 %v11808_v61  ;;  %7642 = vmatprep.subr.bf16.mxu1 %v11810_v62  ;;  %v10949_v61 = vcombine.low %v236_v39, %v272_v40  ;;  %v11020_v62 = vcombine.high %v307_v47, %v343_v48  ;;  %v11022_v63 = vcombine.high %v308_v51, %v344_v55  ;;  %v631_v39 = vld [vmem:[#allocation6 + $0xcc0] sm:$0xff]  ;;  %v596_v40 = vld [vmem:[#allocation6 + $0xba8] sm:$0xff] }
 0x1e3   : > { %7600 = vmatpush1.bf16.msra.mxu0 %v11807_v7  ;;  %7643 = vmatpush1.bf16.msra.mxu1 %v11809_v8  ;;  %v416_v7 = vld [vmem:[#allocation6 + $0x608] sm:$0xff]  ;;  %v11019_v8 = vcombine.low %v307_v47, %v343_v48  ;;  %v667_v48 = vld [vmem:[#allocation6 + $0xde0] sm:$0xff] }
 0x1e4   : > { %7601 = vmatprep.subr.bf16.mxu0 %v11880_v12  ;;  %7644 = vmatprep.subr.bf16.mxu1 %v11882_v16  ;;  %v11021_v12 = vcombine.low %v308_v51, %v344_v55  ;;  %v11092_v16 = vcombine.high %v379_v2, %v415_v3  ;;  %v11094_v17 = vcombine.high %v380_v4, %v416_v7  ;;  %v703_v51 = vld [vmem:[#allocation6 + $0xf00] sm:$0xff]  ;;  %v668_v55 = vld [vmem:[#allocation6 + $0xde8] sm:$0xff] }
 0x1e7   : > { %7602 = vmatpush1.bf16.msra.mxu0 %v11879_v25  ;;  %7645 = vmatpush1.bf16.msra.mxu1 %v11881_v33  ;;  %v452_v25 = vld [vmem:[#allocation6 + $0x728] sm:$0xff] }
 0x1e8   : > { %7603 = vmatprep.subr.bf16.mxu0 %v11952_v26  ;;  %7646 = vmatprep.subr.bf16.mxu1 %v11954_v28  ;;  %v488_v33 = vld [vmem:[#allocation6 + $0x848] sm:$0xff]  ;;  %v11093_v26 = vcombine.low %v380_v4, %v416_v7  ;;  %v11164_v28 = vcombine.high %v451_v21, %v487_v22  ;;  %v739_v4 = vld [vmem:[#allocation6 + $0x1020] sm:$0xff] }
 0x1e9   : > { %v11166_v29 = vcombine.high %v452_v25, %v488_v33  ;;  %v775_v7 = vld [vmem:[#allocation6 + $0x1140] sm:$0xff] }
 0x1eb   : > { %7604 = vmatpush1.bf16.msra.mxu0 %v11951_v34  ;;  %7647 = vmatpush1.bf16.msra.mxu1 %v11953_v35  ;;  %v560_v34 = vld [vmem:[#allocation6 + $0xa88] sm:$0xff]  ;;  %v11163_v35 = vcombine.low %v451_v21, %v487_v22 }
 0x1ec   : > { %7605 = vmatprep.subr.bf16.mxu0 %v12024_v10  ;;  %7648 = vmatprep.subr.bf16.mxu1 %v12026_v36  ;;  %v11165_v10 = vcombine.low %v452_v25, %v488_v33  ;;  %v11236_v36 = vcombine.high %v523_v30, %v559_v31  ;;  %v11238_v37 = vcombine.high %v524_v32, %v560_v34  ;;  %v888_v33 = vld [vmem:[#allocation6 + $0x14c8] sm:$0xff] }
 0x1ed   : > { %v11379_v25 = vcombine.low %v667_v48, %v703_v51 }
 0x1ef   : > { %7606 = vmatpush1.bf16.msra.mxu0 %v12023_v41  ;;  %7649 = vmatpush1.bf16.msra.mxu1 %v12025_v43  ;;  %v632_v41 = vld [vmem:[#allocation6 + $0xcc8] sm:$0xff]  ;;  %v11235_v43 = vcombine.low %v523_v30, %v559_v31  ;;  %v923_v31 = vld [vmem:[#allocation6 + $0x15e0] sm:$0xff] }
 0x1f0   : > { %7661 = vmatprep.subr.bf16.mxu0 %v10948_v56  ;;  %7704 = vmatprep.subr.bf16.mxu1 %v10950_v44  ;;  %v11237_v56 = vcombine.low %v524_v32, %v560_v34  ;;  %v11308_v44 = vcombine.high %v595_v38, %v631_v39  ;;  %v11310_v47 = vcombine.high %v596_v40, %v632_v41 }
 0x1f2   : > { %7608 = vmatmul.mubr.bf16.vlgmr.msra.gmra.mrb[20].mxu0 %v12759_v27  ;;  %7651 = vmatmul.mubr.bf16.vlgmr.msra.gmra.mrb[20].mxu1 %v12759_v27  ;;  %v11091_v27 = vcombine.low %v379_v2, %v415_v3 }
 0x1f3   : > { %7662 = vmatpush1.bf16.msra.mxu0 %v10947_v57  ;;  %7705 = vmatpush1.bf16.msra.mxu1 %v10949_v61  ;;  %v704_v57 = vld [vmem:[#allocation6 + $0xf08] sm:$0xff]  ;;  %v11307_v61 = vcombine.low %v595_v38, %v631_v39  ;;  %v11451_v39 = vcombine.low %v739_v4, %v775_v7 }
 0x1f4   : > { %7663 = vmatprep.subr.bf16.mxu0 %v11020_v62  ;;  %7706 = vmatprep.subr.bf16.mxu1 %v11022_v63  ;;  %v11309_v62 = vcombine.low %v596_v40, %v632_v41  ;;  %v11380_v63 = vcombine.high %v667_v48, %v703_v51  ;;  %v11382_v3 = vcombine.high %v668_v55, %v704_v57  ;;  %v848_v38 = vld [vmem:[#allocation6 + $0x1388] sm:$0xff] }
 0x1f5   : > { %7693 = vmatprep.mubr.bf16.mxu0 %v12820_v23  ;;  %7736 = vmatprep.mubr.bf16.mxu1 %v12820_v23  ;;  %v920_v48 = vld [vmem:[#allocation6 + $0x15c8] sm:$0xff] }
 0x1f7   : > { %7664 = vmatpush1.bf16.msra.mxu0 %v11019_v8  ;;  %7707 = vmatpush1.bf16.msra.mxu1 %v11021_v12 }
 0x1f8   : > { %7665 = vmatprep.subr.bf16.mxu0 %v11092_v16  ;;  %7708 = vmatprep.subr.bf16.mxu1 %v11094_v17  ;;  %v740_v16 = vld [vmem:[#allocation6 + $0x1028] sm:$0xff] }
 0x1f9   : > { %v776_v17 = vld [vmem:[#allocation6 + $0x1148] sm:$0xff] }
 0x1fa   : > { %v11454_v34 = vcombine.high %v740_v16, %v776_v17  ;;  %v11453_v40 = vcombine.low %v740_v16, %v776_v17 }
 0x1fb   : > { %7666 = vmatpush1.bf16.msra.mxu0 %v11091_v27  ;;  %7709 = vmatpush1.bf16.msra.mxu1 %v11093_v26 }
 0x1fc   : > { %7667 = vmatprep.subr.bf16.mxu0 %v11164_v28  ;;  %7710 = vmatprep.subr.bf16.mxu1 %v11166_v29  ;;  %v11381_v28 = vcombine.low %v668_v55, %v704_v57  ;;  %v11452_v29 = vcombine.high %v739_v4, %v775_v7  ;;  %v992_v4 = vld [vmem:[#allocation6 + $0x1808] sm:$0xff] }
 0x1ff   : > { %7668 = vmatpush1.bf16.msra.mxu0 %v11163_v35  ;;  %7711 = vmatpush1.bf16.msra.mxu1 %v11165_v10  ;;  %v811_v35 = vld [vmem:[#allocation6 + $0x1260] sm:$0xff] }
 0x200   : > { %7669 = vmatprep.subr.bf16.mxu0 %v11236_v36  ;;  %7712 = vmatprep.subr.bf16.mxu1 %v11238_v37  ;;  %v847_v10 = vld [vmem:[#allocation6 + $0x1380] sm:$0xff]  ;;  %v812_v37 = vld [vmem:[#allocation6 + $0x1268] sm:$0xff] }
 0x201   : > { %v11524_v41 = vcombine.high %v811_v35, %v847_v10  ;;  %v11523_v51 = vcombine.low %v811_v35, %v847_v10  ;;  %v11525_v55 = vcombine.low %v812_v37, %v848_v38  ;;  %v1064_v35 = vld [vmem:[#allocation6 + $0x1a48] sm:$0xff] }
 0x203   : > { %7670 = vmatpush1.bf16.msra.mxu0 %v11235_v43  ;;  %7713 = vmatpush1.bf16.msra.mxu1 %v11237_v56  ;;  %v11526_v43 = vcombine.high %v812_v37, %v848_v38  ;;  %v883_v56 = vld [vmem:[#allocation6 + $0x14a0] sm:$0xff] }
 0x204   : > { %7671 = vmatprep.subr.bf16.mxu0 %v11308_v44  ;;  %7714 = vmatprep.subr.bf16.mxu1 %v11310_v47  ;;  %v919_v44 = vld [vmem:[#allocation6 + $0x15c0] sm:$0xff]  ;;  %v884_v47 = vld [vmem:[#allocation6 + $0x14a8] sm:$0xff] }
 0x205   : > { %v12824_v2 = vpop.f32.mrb[8].mxu0  ;;  %v12828_v12 = vpop.f32.mrb[8].mxu1  ;;  %v11596_v57 = vcombine.high %v883_v56, %v919_v44  ;;  %v11595_v7 = vcombine.low %v883_v56, %v919_v44  ;;  %v11597_v16 = vcombine.low %v884_v47, %v920_v48  ;;  %v1136_v56 = vld [vmem:[#allocation6 + $0x1c88] sm:$0xff] }
 0x206   : > { %v12826_v8 = vpop.f32.mrb[9].mxu0  ;;  %v12832_v22 = vpop.f32.mrb[9].mxu1 }
 0x207   : > { %v12830_v21 = vpop.f32.mrb[10].mxu0  ;;  %7672 = vmatpush1.bf16.msra.mxu0 %v11307_v61  ;;  %7715 = vmatpush1.bf16.msra.mxu1 %v11309_v62  ;;  %v12838_v26 = vpop.f32.mrb[10].mxu1  ;;  %v11598_v61 = vcombine.high %v884_v47, %v920_v48  ;;  %v955_v62 = vld [vmem:[#allocation6 + $0x16e0] sm:$0xff] }
 0x208   : > { %v12836_v27 = vpop.f32.mrb[11].mxu0  ;;  %7673 = vmatprep.subr.bf16.mxu0 %v11380_v63  ;;  %v12844_v32 = vpop.f32.mrb[11].mxu1  ;;  %7716 = vmatprep.subr.bf16.mxu1 %v11382_v3  ;;  %v991_v63 = vld [vmem:[#allocation6 + $0x1800] sm:$0xff]  ;;  %v956_v3 = vld [vmem:[#allocation6 + $0x16e8] sm:$0xff] }
 0x209   : > { %v11668_v17 = vcombine.high %v955_v62, %v991_v63  ;;  %v11667_v10 = vcombine.low %v955_v62, %v991_v63  ;;  %v11669_v37 = vcombine.low %v956_v3, %v992_v4  ;;  %v1208_v62 = vld [vmem:[#allocation6 + $0x1ec8] sm:$0xff] }
 0x20b   : > { %7674 = vmatpush1.bf16.msra.mxu0 %v11379_v25  ;;  %7717 = vmatpush1.bf16.msra.mxu1 %v11381_v28  ;;  %v11670_v25 = vcombine.high %v956_v3, %v992_v4  ;;  %v1027_v28 = vld [vmem:[#allocation6 + $0x1920] sm:$0xff] }
 0x20c   : > { %7675 = vmatprep.subr.bf16.mxu0 %v11452_v29  ;;  %7718 = vmatprep.subr.bf16.mxu1 %v11454_v34  ;;  %v1063_v29 = vld [vmem:[#allocation6 + $0x1a40] sm:$0xff]  ;;  %v1028_v34 = vld [vmem:[#allocation6 + $0x1928] sm:$0xff] }
 0x20d   : > { %v11740_v38 = vcombine.high %v1027_v28, %v1063_v29  ;;  %v11739_v44 = vcombine.low %v1027_v28, %v1063_v29  ;;  %v11741_v47 = vcombine.low %v1028_v34, %v1064_v35  ;;  %v1280_v28 = vld [vmem:[#allocation6 + $0x2108] sm:$0xff] }
 0x20f   : > { %7676 = vmatpush1.bf16.msra.mxu0 %v11451_v39  ;;  %7719 = vmatpush1.bf16.msra.mxu1 %v11453_v40  ;;  %v11742_v39 = vcombine.high %v1028_v34, %v1064_v35  ;;  %v1099_v40 = vld [vmem:[#allocation6 + $0x1b60] sm:$0xff] }
 0x210   : > { %7677 = vmatprep.subr.bf16.mxu0 %v11524_v41  ;;  %7720 = vmatprep.subr.bf16.mxu1 %v11526_v43  ;;  %v1135_v41 = vld [vmem:[#allocation6 + $0x1c80] sm:$0xff]  ;;  %v1100_v43 = vld [vmem:[#allocation6 + $0x1b68] sm:$0xff] }
 0x211   : > { %v11812_v48 = vcombine.high %v1099_v40, %v1135_v41  ;;  %v11811_v63 = vcombine.low %v1099_v40, %v1135_v41  ;;  %v11813_v3 = vcombine.low %v1100_v43, %v1136_v56  ;;  %v1352_v40 = vld [vmem:[#allocation6 + $0x2348] sm:$0xff] }
 0x213   : > { %7678 = vmatpush1.bf16.msra.mxu0 %v11523_v51  ;;  %7721 = vmatpush1.bf16.msra.mxu1 %v11525_v55  ;;  %v11814_v51 = vcombine.high %v1100_v43, %v1136_v56  ;;  %v1171_v55 = vld [vmem:[#allocation6 + $0x1da0] sm:$0xff] }
 0x214   : > { %7679 = vmatprep.subr.bf16.mxu0 %v11596_v57  ;;  %7722 = vmatprep.subr.bf16.mxu1 %v11598_v61  ;;  %v1207_v57 = vld [vmem:[#allocation6 + $0x1ec0] sm:$0xff]  ;;  %v1172_v61 = vld [vmem:[#allocation6 + $0x1da8] sm:$0xff] }
 0x215   : > { %v11884_v4 = vcombine.high %v1171_v55, %v1207_v57  ;;  %v11883_v29 = vcombine.low %v1171_v55, %v1207_v57  ;;  %v11885_v34 = vcombine.low %v1172_v61, %v1208_v62  ;;  %v274_v55 = vld [vmem:[#allocation6 + $0x198] sm:$0xff] }
 0x217   : > { %7680 = vmatpush1.bf16.msra.mxu0 %v11595_v7  ;;  %7723 = vmatpush1.bf16.msra.mxu1 %v11597_v16  ;;  %v11886_v7 = vcombine.high %v1172_v61, %v1208_v62  ;;  %v1243_v16 = vld [vmem:[#allocation6 + $0x1fe0] sm:$0xff] }
 0x218   : > { %7681 = vmatprep.subr.bf16.mxu0 %v11668_v17  ;;  %7724 = vmatprep.subr.bf16.mxu1 %v11670_v25  ;;  %v1279_v17 = vld [vmem:[#allocation6 + $0x2100] sm:$0xff]  ;;  %v1244_v25 = vld [vmem:[#allocation6 + $0x1fe8] sm:$0xff] }
 0x219   : > { %v11956_v35 = vcombine.high %v1243_v16, %v1279_v17  ;;  %v11955_v41 = vcombine.low %v1243_v16, %v1279_v17  ;;  %v11957_v43 = vcombine.low %v1244_v25, %v1280_v28  ;;  %v346_v16 = vld [vmem:[#allocation6 + $0x3d8] sm:$0xff] }
 0x21b   : > { %7682 = vmatpush1.bf16.msra.mxu0 %v11667_v10  ;;  %7725 = vmatpush1.bf16.msra.mxu1 %v11669_v37  ;;  %v11958_v10 = vcombine.high %v1244_v25, %v1280_v28  ;;  %v1315_v37 = vld [vmem:[#allocation6 + $0x2220] sm:$0xff] }
 0x21c   : > { %7683 = vmatprep.subr.bf16.mxu0 %v11740_v38  ;;  %7726 = vmatprep.subr.bf16.mxu1 %v11742_v39  ;;  %v1351_v38 = vld [vmem:[#allocation6 + $0x2340] sm:$0xff]  ;;  %v1316_v39 = vld [vmem:[#allocation6 + $0x2228] sm:$0xff] }
 0x21d   : > { %v12028_v56 = vcombine.high %v1315_v37, %v1351_v38  ;;  %v12027_v57 = vcombine.low %v1315_v37, %v1351_v38  ;;  %v12029_v61 = vcombine.low %v1316_v39, %v1352_v40  ;;  %v382_v37 = vld [vmem:[#allocation6 + $0x4f8] sm:$0xff] }
 0x21e   : > { %v418_v38 = vld [vmem:[#allocation6 + $0x618] sm:$0xff] }
 0x21f   : > { %7684 = vmatpush1.bf16.msra.mxu0 %v11739_v44  ;;  %7727 = vmatpush1.bf16.msra.mxu1 %v11741_v47  ;;  %v12030_v44 = vcombine.high %v1316_v39, %v1352_v40  ;;  %v237_v47 = vld [vmem:[#allocation6 + $0x70] sm:$0xff] }
 0x220   : > { %7685 = vmatprep.subr.bf16.mxu0 %v11812_v48  ;;  %7728 = vmatprep.subr.bf16.mxu1 %v11814_v51  ;;  %v273_v48 = vld [vmem:[#allocation6 + $0x190] sm:$0xff]  ;;  %v238_v51 = vld [vmem:[#allocation6 + $0x78] sm:$0xff] }
 0x221   : > { %v10952_v62 = vcombine.high %v237_v47, %v273_v48  ;;  %v10951_v17 = vcombine.low %v237_v47, %v273_v48  ;;  %v10953_v25 = vcombine.low %v238_v51, %v274_v55  ;;  %v454_v47 = vld [vmem:[#allocation6 + $0x738] sm:$0xff] }
 0x222   : > { %v490_v48 = vld [vmem:[#allocation6 + $0x858] sm:$0xff] }
 0x223   : > { %7686 = vmatpush1.bf16.msra.mxu0 %v11811_v63  ;;  %7729 = vmatpush1.bf16.msra.mxu1 %v11813_v3  ;;  %v10954_v63 = vcombine.high %v238_v51, %v274_v55  ;;  %v309_v3 = vld [vmem:[#allocation6 + $0x2b0] sm:$0xff]  ;;  %v11097_v55 = vcombine.low %v382_v37, %v418_v38 }
 0x224   : > { %7687 = vmatprep.subr.bf16.mxu0 %v11884_v4  ;;  %7730 = vmatprep.subr.bf16.mxu1 %v11886_v7  ;;  %v345_v4 = vld [vmem:[#allocation6 + $0x3d0] sm:$0xff]  ;;  %v310_v7 = vld [vmem:[#allocation6 + $0x2b8] sm:$0xff] }
 0x225   : > { %v11024_v28 = vcombine.high %v309_v3, %v345_v4  ;;  %v11023_v39 = vcombine.low %v309_v3, %v345_v4  ;;  %v11025_v40 = vcombine.low %v310_v7, %v346_v16  ;;  %v526_v3 = vld [vmem:[#allocation6 + $0x978] sm:$0xff] }
 0x226   : > { %v562_v4 = vld [vmem:[#allocation6 + $0xa98] sm:$0xff] }
 0x227   : > { %7688 = vmatpush1.bf16.msra.mxu0 %v11883_v29  ;;  %7731 = vmatpush1.bf16.msra.mxu1 %v11885_v34  ;;  %v11026_v29 = vcombine.high %v310_v7, %v346_v16  ;;  %v381_v34 = vld [vmem:[#allocation6 + $0x4f0] sm:$0xff]  ;;  %v11169_v16 = vcombine.low %v454_v47, %v490_v48 }
 0x228   : > { %7689 = vmatprep.subr.bf16.mxu0 %v11956_v35  ;;  %7732 = vmatprep.subr.bf16.mxu1 %v11958_v10  ;;  %v417_v35 = vld [vmem:[#allocation6 + $0x610] sm:$0xff] }
 0x229   : > { %v12849_v10 = vld [vmem:[%s12725_s5] ss:$8 sps:$4 sm:$0xff]   ;;  %v11095_v51 = vcombine.low %v381_v34, %v417_v35 }
 0x22b   : > { %7690 = vmatpush1.bf16.msra.mxu0 %v11955_v41  ;;  %7733 = vmatpush1.bf16.msra.mxu1 %v11957_v43  ;;  %v11096_v41 = vcombine.high %v381_v34, %v417_v35  ;;  %v11098_v43 = vcombine.high %v382_v37, %v418_v38  ;;  %v598_v34 = vld [vmem:[#allocation6 + $0xbb8] sm:$0xff]  ;;  %v11241_v38 = vcombine.low %v526_v3, %v562_v4 }
 0x22c   : > { %7691 = vmatprep.subr.bf16.mxu0 %v12028_v56  ;;  %7734 = vmatprep.subr.bf16.mxu1 %v12030_v44  ;;  %v453_v56 = vld [vmem:[#allocation6 + $0x730] sm:$0xff]  ;;  %v634_v35 = vld [vmem:[#allocation6 + $0xcd8] sm:$0xff] }
 0x22d   : > { %v489_v44 = vld [vmem:[#allocation6 + $0x850] sm:$0xff] }
 0x22e   : > { %v11167_v7 = vcombine.low %v453_v56, %v489_v44 }
 0x22f   : > { %7692 = vmatpush1.bf16.msra.mxu0 %v12027_v57  ;;  %7735 = vmatpush1.bf16.msra.mxu1 %v12029_v61  ;;  %v11168_v57 = vcombine.high %v453_v56, %v489_v44  ;;  %v11170_v61 = vcombine.high %v454_v47, %v490_v48  ;;  %v670_v56 = vld [vmem:[#allocation6 + $0xdf8] sm:$0xff]  ;;  %v11313_v48 = vcombine.low %v598_v34, %v634_v35 }
 0x230   : > { %7747 = vmatprep.subr.bf16.mxu0 %v10952_v62  ;;  %7790 = vmatprep.subr.bf16.mxu1 %v10954_v63  ;;  %v525_v62 = vld [vmem:[#allocation6 + $0x970] sm:$0xff]  ;;  %v706_v44 = vld [vmem:[#allocation6 + $0xf18] sm:$0xff] }
 0x231   : > { %v561_v63 = vld [vmem:[#allocation6 + $0xa90] sm:$0xff] }
 0x232   : > { %7694 = vmatmul.mubr.bf16.vlgmr.msra.gmra.mrb[24].mxu0 %v12849_v10  ;;  %7737 = vmatmul.mubr.bf16.vlgmr.msra.gmra.mrb[24].mxu1 %v12849_v10  ;;  %v11239_v37 = vcombine.low %v525_v62, %v561_v63 }
 0x233   : > { %7748 = vmatpush1.bf16.msra.mxu0 %v10951_v17  ;;  %7791 = vmatpush1.bf16.msra.mxu1 %v10953_v25  ;;  %v11240_v17 = vcombine.high %v525_v62, %v561_v63  ;;  %v11242_v25 = vcombine.high %v526_v3, %v562_v4  ;;  %v777_v62 = vld [vmem:[#allocation6 + $0x1150] sm:$0xff]  ;;  %v742_v4 = vld [vmem:[#allocation6 + $0x1038] sm:$0xff] }
 0x234   : > { %7749 = vmatprep.subr.bf16.mxu0 %v11024_v28  ;;  %7792 = vmatprep.subr.bf16.mxu1 %v11026_v29  ;;  %v597_v28 = vld [vmem:[#allocation6 + $0xbb0] sm:$0xff] }
 0x235   : > { %7779 = vmatprep.mubr.bf16.mxu0 %v12820_v23  ;;  %7822 = vmatprep.mubr.bf16.mxu1 %v12820_v23  ;;  %v633_v29 = vld [vmem:[#allocation6 + $0xcd0] sm:$0xff] }
 0x236   : > { %v11311_v47 = vcombine.low %v597_v28, %v633_v29 }
 0x237   : > { %7750 = vmatpush1.bf16.msra.mxu0 %v11023_v39  ;;  %7793 = vmatpush1.bf16.msra.mxu1 %v11025_v40  ;;  %v11312_v39 = vcombine.high %v597_v28, %v633_v29  ;;  %v11314_v40 = vcombine.high %v598_v34, %v634_v35  ;;  %v11385_v35 = vcombine.low %v670_v56, %v706_v44 }
 0x238   : > { %7751 = vmatprep.subr.bf16.mxu0 %v11096_v41  ;;  %7794 = vmatprep.subr.bf16.mxu1 %v11098_v43  ;;  %v669_v41 = vld [vmem:[#allocation6 + $0xdf0] sm:$0xff] }
 0x239   : > { %v705_v43 = vld [vmem:[#allocation6 + $0xf10] sm:$0xff] }
 0x23b   : > { %7752 = vmatpush1.bf16.msra.mxu0 %v11095_v51  ;;  %7795 = vmatpush1.bf16.msra.mxu1 %v11097_v55  ;;  %v11384_v51 = vcombine.high %v669_v41, %v705_v43 }
 0x23c   : > { %7753 = vmatprep.subr.bf16.mxu0 %v11168_v57  ;;  %7796 = vmatprep.subr.bf16.mxu1 %v11170_v61  ;;  %v11386_v57 = vcombine.high %v670_v56, %v706_v44  ;;  %v741_v61 = vld [vmem:[#allocation6 + $0x1030] sm:$0xff] }
 0x23d   : > { %v11455_v56 = vcombine.low %v741_v61, %v777_v62 }
 0x23f   : > { %7754 = vmatpush1.bf16.msra.mxu0 %v11167_v7  ;;  %7797 = vmatpush1.bf16.msra.mxu1 %v11169_v16  ;;  %v778_v7 = vld [vmem:[#allocation6 + $0x1158] sm:$0xff] }
 0x240   : > { %7755 = vmatprep.subr.bf16.mxu0 %v11240_v17  ;;  %7798 = vmatprep.subr.bf16.mxu1 %v11242_v25  ;;  %v11383_v25 = vcombine.low %v669_v41, %v705_v43  ;;  %v11458_v41 = vcombine.high %v742_v4, %v778_v7  ;;  %v813_v43 = vld [vmem:[#allocation6 + $0x1270] sm:$0xff]  ;;  %v11457_v44 = vcombine.low %v742_v4, %v778_v7 }
 0x241   : > { %v11599_v4 = vcombine.low %v885_v58, %v921_v19 }
 0x243   : > { %7756 = vmatpush1.bf16.msra.mxu0 %v11239_v37  ;;  %7799 = vmatpush1.bf16.msra.mxu1 %v11241_v38  ;;  %v11456_v37 = vcombine.high %v741_v61, %v777_v62  ;;  %v993_v61 = vld [vmem:[#allocation6 + $0x1810] sm:$0xff]  ;;  %v958_v62 = vld [vmem:[#allocation6 + $0x16f8] sm:$0xff]  ;;  %v852_v38 = vld [vmem:[#allocation6 + $0x13a8] sm:$0xff] }
 0x244   : > { %7757 = vmatprep.subr.bf16.mxu0 %v11312_v39  ;;  %7800 = vmatprep.subr.bf16.mxu1 %v11314_v40  ;;  %v11600_v39 = vcombine.high %v885_v58, %v921_v19  ;;  %v1137_v19 = vld [vmem:[#allocation6 + $0x1c90] sm:$0xff]  ;;  %v1138_v58 = vld [vmem:[#allocation6 + $0x1c98] sm:$0xff] }
 0x245   : > { %v12855_v55 = vpop.f32.mrb[12].mxu0  ;;  %v12859_v3 = vpop.f32.mrb[12].mxu1 }
 0x246   : > { %v12857_v63 = vpop.f32.mrb[13].mxu0  ;;  %v12863_v17 = vpop.f32.mrb[13].mxu1 }
 0x247   : > { %v12861_v16 = vpop.f32.mrb[14].mxu0  ;;  %7758 = vmatpush1.bf16.msra.mxu0 %v11311_v47  ;;  %7801 = vmatpush1.bf16.msra.mxu1 %v11313_v48  ;;  %v12869_v34 = vpop.f32.mrb[14].mxu1  ;;  %v849_v47 = vld [vmem:[#allocation6 + $0x1390] sm:$0xff]  ;;  %v816_v48 = vld [vmem:[#allocation6 + $0x1288] sm:$0xff] }
 0x248   : > { %v12867_v29 = vpop.f32.mrb[15].mxu0  ;;  %7759 = vmatprep.subr.bf16.mxu0 %v11384_v51  ;;  %v12875_v40 = vpop.f32.mrb[15].mxu1  ;;  %7802 = vmatprep.subr.bf16.mxu1 %v11386_v57  ;;  %v11528_v51 = vcombine.high %v813_v43, %v849_v47  ;;  %v922_v57 = vld [vmem:[#allocation6 + $0x15d8] sm:$0xff]  ;;  %v11527_v24 = vcombine.low %v813_v43, %v849_v47  ;;  %v1065_v43 = vld [vmem:[#allocation6 + $0x1a50] sm:$0xff]  ;;  %v11533_v30 = vcombine.low %v816_v48, %v852_v38 }
 0x249   : > { %v11602_v28 = vcombine.high %v886_v13, %v922_v57  ;;  %v11601_v7 = vcombine.low %v886_v13, %v922_v57  ;;  %v1030_v47 = vld [vmem:[#allocation6 + $0x1938] sm:$0xff] }
 0x24b   : > { %7760 = vmatpush1.bf16.msra.mxu0 %v11383_v25  ;;  %7803 = vmatpush1.bf16.msra.mxu1 %v11385_v35  ;;  %v957_v25 = vld [vmem:[#allocation6 + $0x16f0] sm:$0xff]  ;;  %v994_v35 = vld [vmem:[#allocation6 + $0x1818] sm:$0xff] }
 0x24c   : > { %7761 = vmatprep.subr.bf16.mxu0 %v11456_v37  ;;  %7804 = vmatprep.subr.bf16.mxu1 %v11458_v41  ;;  %v11672_v37 = vcombine.high %v957_v25, %v993_v61  ;;  %v11674_v41 = vcombine.high %v958_v62, %v994_v35  ;;  %v11671_v52 = vcombine.low %v957_v25, %v993_v61  ;;  %v1209_v25 = vld [vmem:[#allocation6 + $0x1ed0] sm:$0xff]  ;;  %v1174_v61 = vld [vmem:[#allocation6 + $0x1db8] sm:$0xff] }
 0x24d   : > { %v11673_v59 = vcombine.low %v958_v62, %v994_v35 }
 0x24f   : > { %7762 = vmatpush1.bf16.msra.mxu0 %v11455_v56  ;;  %7805 = vmatpush1.bf16.msra.mxu1 %v11457_v44  ;;  %v1029_v56 = vld [vmem:[#allocation6 + $0x1930] sm:$0xff]  ;;  %v1066_v44 = vld [vmem:[#allocation6 + $0x1a58] sm:$0xff] }
 0x250   : > { %7763 = vmatprep.subr.bf16.mxu0 %v11528_v51  ;;  %7806 = vmatprep.subr.bf16.mxu1 %v11530_v0  ;;  %v11744_v0 = vcombine.high %v1029_v56, %v1065_v43  ;;  %v11746_v51 = vcombine.high %v1030_v47, %v1066_v44  ;;  %v11743_v13 = vcombine.low %v1029_v56, %v1065_v43  ;;  %v1281_v56 = vld [vmem:[#allocation6 + $0x2110] sm:$0xff]  ;;  %v1246_v43 = vld [vmem:[#allocation6 + $0x1ff8] sm:$0xff] }
 0x253   : > { %7764 = vmatpush1.bf16.msra.mxu0 %v11527_v24  ;;  %7807 = vmatpush1.bf16.msra.mxu1 %v11529_v18  ;;  %v1101_v24 = vld [vmem:[#allocation6 + $0x1b70] sm:$0xff]  ;;  %v1102_v18 = vld [vmem:[#allocation6 + $0x1b78] sm:$0xff] }
 0x254   : > { %7765 = vmatprep.subr.bf16.mxu0 %v11600_v39  ;;  %7808 = vmatprep.subr.bf16.mxu1 %v11602_v28  ;;  %v11745_v28 = vcombine.low %v1030_v47, %v1066_v44  ;;  %v11816_v39 = vcombine.high %v1101_v24, %v1137_v19  ;;  %v11818_v57 = vcombine.high %v1102_v18, %v1138_v58 }
 0x255   : > { %v11815_v62 = vcombine.low %v1101_v24, %v1137_v19  ;;  %v11817_v35 = vcombine.low %v1102_v18, %v1138_v58  ;;  %v1353_v24 = vld [vmem:[#allocation6 + $0x2350] sm:$0xff]  ;;  %v1318_v19 = vld [vmem:[#allocation6 + $0x2238] sm:$0xff] }
 0x257   : > { %7766 = vmatpush1.bf16.msra.mxu0 %v11599_v4  ;;  %7809 = vmatpush1.bf16.msra.mxu1 %v11601_v7  ;;  %v1173_v4 = vld [vmem:[#allocation6 + $0x1db0] sm:$0xff]  ;;  %v1210_v7 = vld [vmem:[#allocation6 + $0x1ed8] sm:$0xff] }
 0x258   : > { %7767 = vmatprep.subr.bf16.mxu0 %v11672_v37  ;;  %7810 = vmatprep.subr.bf16.mxu1 %v11674_v41  ;;  %v11888_v37 = vcombine.high %v1173_v4, %v1209_v25  ;;  %v11890_v41 = vcombine.high %v1174_v61, %v1210_v7  ;;  %v11887_v47 = vcombine.low %v1173_v4, %v1209_v25  ;;  %v275_v4 = vld [vmem:[#allocation6 + $0x1a0] sm:$0xff]  ;;  %v240_v25 = vld [vmem:[#allocation6 + $0x88] sm:$0xff] }
 0x259   : > { %v11889_v44 = vcombine.low %v1174_v61, %v1210_v7 }
 0x25b   : > { %7768 = vmatpush1.bf16.msra.mxu0 %v11671_v52  ;;  %7811 = vmatpush1.bf16.msra.mxu1 %v11673_v59  ;;  %v1245_v52 = vld [vmem:[#allocation6 + $0x1ff0] sm:$0xff]  ;;  %v1282_v59 = vld [vmem:[#allocation6 + $0x2118] sm:$0xff] }
 0x25c   : > { %7769 = vmatprep.subr.bf16.mxu0 %v11744_v0  ;;  %7812 = vmatprep.subr.bf16.mxu1 %v11746_v51  ;;  %v11960_v0 = vcombine.high %v1245_v52, %v1281_v56  ;;  %v11962_v51 = vcombine.high %v1246_v43, %v1282_v59  ;;  %v11959_v18 = vcombine.low %v1245_v52, %v1281_v56  ;;  %v347_v52 = vld [vmem:[#allocation6 + $0x3e0] sm:$0xff]  ;;  %v312_v56 = vld [vmem:[#allocation6 + $0x2c8] sm:$0xff] }
 0x25d   : > { %v11961_v58 = vcombine.low %v1246_v43, %v1282_v59 }
 0x25f   : > { %7770 = vmatpush1.bf16.msra.mxu0 %v11743_v13  ;;  %7813 = vmatpush1.bf16.msra.mxu1 %v11745_v28  ;;  %v1317_v13 = vld [vmem:[#allocation6 + $0x2230] sm:$0xff]  ;;  %v1354_v28 = vld [vmem:[#allocation6 + $0x2358] sm:$0xff] }
 0x260   : > { %7771 = vmatprep.subr.bf16.mxu0 %v11816_v39  ;;  %7814 = vmatprep.subr.bf16.mxu1 %v11818_v57  ;;  %v12032_v39 = vcombine.high %v1317_v13, %v1353_v24  ;;  %v12034_v57 = vcombine.high %v1318_v19, %v1354_v28  ;;  %v12031_v61 = vcombine.low %v1317_v13, %v1353_v24  ;;  %v419_v13 = vld [vmem:[#allocation6 + $0x620] sm:$0xff]  ;;  %v384_v24 = vld [vmem:[#allocation6 + $0x508] sm:$0xff] }
 0x261   : > { %v12033_v7 = vcombine.low %v1318_v19, %v1354_v28  ;;  %v420_v19 = vld [vmem:[#allocation6 + $0x628] sm:$0xff] }
 0x263   : > { %7772 = vmatpush1.bf16.msra.mxu0 %v11815_v62  ;;  %7815 = vmatpush1.bf16.msra.mxu1 %v11817_v35  ;;  %v239_v62 = vld [vmem:[#allocation6 + $0x80] sm:$0xff]  ;;  %v276_v35 = vld [vmem:[#allocation6 + $0x1a8] sm:$0xff] }
 0x264   : > { %7773 = vmatprep.subr.bf16.mxu0 %v11888_v37  ;;  %7816 = vmatprep.subr.bf16.mxu1 %v11890_v41  ;;  %v10956_v37 = vcombine.high %v239_v62, %v275_v4  ;;  %v10958_v41 = vcombine.high %v240_v25, %v276_v35  ;;  %v10955_v43 = vcombine.low %v239_v62, %v275_v4  ;;  %v455_v62 = vld [vmem:[#allocation6 + $0x740] sm:$0xff] }
 0x265   : > { %v10957_v59 = vcombine.low %v240_v25, %v276_v35  ;;  %v491_v4 = vld [vmem:[#allocation6 + $0x860] sm:$0xff]  ;;  %v456_v25 = vld [vmem:[#allocation6 + $0x748] sm:$0xff] }
 0x266   : > { %v492_v35 = vld [vmem:[#allocation6 + $0x868] sm:$0xff] }
 0x267   : > { %7774 = vmatpush1.bf16.msra.mxu0 %v11887_v47  ;;  %7817 = vmatpush1.bf16.msra.mxu1 %v11889_v44  ;;  %v311_v47 = vld [vmem:[#allocation6 + $0x2c0] sm:$0xff]  ;;  %v348_v44 = vld [vmem:[#allocation6 + $0x3e8] sm:$0xff] }
 0x268   : > { %7775 = vmatprep.subr.bf16.mxu0 %v11960_v0  ;;  %7818 = vmatprep.subr.bf16.mxu1 %v11962_v51  ;;  %v11028_v0 = vcombine.high %v311_v47, %v347_v52  ;;  %v11030_v51 = vcombine.high %v312_v56, %v348_v44  ;;  %v11027_v28 = vcombine.low %v311_v47, %v347_v52  ;;  %v527_v47 = vld [vmem:[#allocation6 + $0x980] sm:$0xff] }
 0x269   : > { %v563_v52 = vld [vmem:[#allocation6 + $0xaa0] sm:$0xff] }
 0x26b   : > { %7776 = vmatpush1.bf16.msra.mxu0 %v11959_v18  ;;  %7819 = vmatpush1.bf16.msra.mxu1 %v11961_v58  ;;  %v383_v18 = vld [vmem:[#allocation6 + $0x500] sm:$0xff]  ;;  %v11029_v58 = vcombine.low %v312_v56, %v348_v44  ;;  %v528_v56 = vld [vmem:[#allocation6 + $0x988] sm:$0xff] }
 0x26c   : > { %7777 = vmatprep.subr.bf16.mxu0 %v12032_v39  ;;  %7820 = vmatprep.subr.bf16.mxu1 %v12034_v57  ;;  %v11100_v39 = vcombine.high %v383_v18, %v419_v13  ;;  %v11102_v57 = vcombine.high %v384_v24, %v420_v19  ;;  %v564_v44 = vld [vmem:[#allocation6 + $0xaa8] sm:$0xff] }
 0x26f   : > { %7778 = vmatpush1.bf16.msra.mxu0 %v12031_v61  ;;  %7821 = vmatpush1.bf16.msra.mxu1 %v12033_v7  ;;  %v11099_v61 = vcombine.low %v383_v18, %v419_v13  ;;  %v11101_v7 = vcombine.low %v384_v24, %v420_v19  ;;  %v635_v18 = vld [vmem:[#allocation6 + $0xce0] sm:$0xff]  ;;  %v600_v13 = vld [vmem:[#allocation6 + $0xbc8] sm:$0xff]  ;;  %v11243_v24 = vcombine.low %v527_v47, %v563_v52 }
 0x270   : > { %7833 = vmatprep.subr.bf16.mxu0 %v10956_v37  ;;  %7876 = vmatprep.subr.bf16.mxu1 %v10958_v41  ;;  %v11172_v37 = vcombine.high %v455_v62, %v491_v4  ;;  %v11174_v41 = vcombine.high %v456_v25, %v492_v35  ;;  %v11245_v19 = vcombine.low %v528_v56, %v564_v44 }
 0x272   : > { %7780 = vmatmul.mubr.bf16.vlgmr.msra.gmra.mrb[28].mxu0 %v12849_v10  ;;  %7823 = vmatmul.mubr.bf16.vlgmr.msra.gmra.mrb[28].mxu1 %v12849_v10 }
 0x273   : > { %7834 = vmatpush1.bf16.msra.mxu0 %v10955_v43  ;;  %7877 = vmatpush1.bf16.msra.mxu1 %v10957_v59  ;;  %v11171_v43 = vcombine.low %v455_v62, %v491_v4  ;;  %v11173_v59 = vcombine.low %v456_v25, %v492_v35  ;;  %v707_v62 = vld [vmem:[#allocation6 + $0xf20] sm:$0xff]  ;;  %v672_v4 = vld [vmem:[#allocation6 + $0xe08] sm:$0xff] }
 0x274   : > { %7835 = vmatprep.subr.bf16.mxu0 %v11028_v0  ;;  %7878 = vmatprep.subr.bf16.mxu1 %v11030_v51  ;;  %v11244_v0 = vcombine.high %v527_v47, %v563_v52  ;;  %v599_v51 = vld [vmem:[#allocation6 + $0xbc0] sm:$0xff] }
 0x275   : > { %7865 = vmatprep.mubr.bf16.mxu0 %v12820_v23  ;;  %7908 = vmatprep.mubr.bf16.mxu1 %v12820_v23  ;;  %v11246_v23 = vcombine.high %v528_v56, %v564_v44  ;;  %v11315_v25 = vcombine.low %v599_v51, %v635_v18  ;;  %v743_v47 = vld [vmem:[#allocation6 + $0x1040] sm:$0xff] }
 0x276   : > { %v779_v52 = vld [vmem:[#allocation6 + $0x1160] sm:$0xff] }
 0x277   : > { %7836 = vmatpush1.bf16.msra.mxu0 %v11027_v28  ;;  %7879 = vmatpush1.bf16.msra.mxu1 %v11029_v58  ;;  %v636_v28 = vld [vmem:[#allocation6 + $0xce8] sm:$0xff]  ;;  %v11316_v58 = vcombine.high %v599_v51, %v635_v18  ;;  %v851_v18 = vld [vmem:[#allocation6 + $0x13a0] sm:$0xff] }
 0x278   : > { %7837 = vmatprep.subr.bf16.mxu0 %v11100_v39  ;;  %7880 = vmatprep.subr.bf16.mxu1 %v11102_v57  ;;  %v11318_v39 = vcombine.high %v600_v13, %v636_v28  ;;  %v671_v57 = vld [vmem:[#allocation6 + $0xe00] sm:$0xff]  ;;  %v11317_v35 = vcombine.low %v600_v13, %v636_v28 }
 0x279   : > { %v11387_v51 = vcombine.low %v671_v57, %v707_v62 }
 0x27b   : > { %7838 = vmatpush1.bf16.msra.mxu0 %v11099_v61  ;;  %7881 = vmatpush1.bf16.msra.mxu1 %v11101_v7  ;;  %v708_v61 = vld [vmem:[#allocation6 + $0xf28] sm:$0xff]  ;;  %v11388_v7 = vcombine.high %v671_v57, %v707_v62  ;;  %v815_v62 = vld [vmem:[#allocation6 + $0x1280] sm:$0xff] }
 0x27c   : > { %7839 = vmatprep.subr.bf16.mxu0 %v11172_v37  ;;  %7882 = vmatprep.subr.bf16.mxu1 %v11174_v41  ;;  %v11390_v41 = vcombine.high %v672_v4, %v708_v61  ;;  %v11531_v36 = vcombine.low %v815_v62, %v851_v18 }
 0x27f   : > { %7840 = vmatpush1.bf16.msra.mxu0 %v11171_v43  ;;  %7883 = vmatpush1.bf16.msra.mxu1 %v11173_v59  ;;  %v744_v43 = vld [vmem:[#allocation6 + $0x1048] sm:$0xff] }
 0x280   : > { %7841 = vmatprep.subr.bf16.mxu0 %v11244_v0  ;;  %7884 = vmatprep.subr.bf16.mxu1 %v11246_v23  ;;  %v780_v59 = vld [vmem:[#allocation6 + $0x1168] sm:$0xff] }
 0x281   : > { %v11462_v57 = vcombine.high %v744_v43, %v780_v59 }
 0x283   : > { %7842 = vmatpush1.bf16.msra.mxu0 %v11243_v24  ;;  %7885 = vmatpush1.bf16.msra.mxu1 %v11245_v19  ;;  %v11389_v24 = vcombine.low %v672_v4, %v708_v61  ;;  %v11460_v19 = vcombine.high %v743_v47, %v779_v52  ;;  %v11459_v4 = vcombine.low %v743_v47, %v779_v52  ;;  %v995_v47 = vld [vmem:[#allocation6 + $0x1820] sm:$0xff]  ;;  %v960_v52 = vld [vmem:[#allocation6 + $0x1708] sm:$0xff] }
 0x284   : > { %7843 = vmatprep.subr.bf16.mxu0 %v11316_v58  ;;  %7886 = vmatprep.subr.bf16.mxu1 %v11318_v39  ;;  %v11461_v61 = vcombine.low %v744_v43, %v780_v59  ;;  %v11534_v58 = vcombine.high %v816_v48, %v852_v38  ;;  %v887_v39 = vld [vmem:[#allocation6 + $0x14c0] sm:$0xff] }
 0x285   : > { %v12883_v37 = vpop.f32.mrb[16].mxu0  ;;  %v12887_v44 = vpop.f32.mrb[16].mxu1  ;;  %v11603_v43 = vcombine.low %v887_v39, %v923_v31 }
 0x286   : > { %13711 = vst [vmem:[#allocation13_spill] sm:$0xff] %v12883_v37  ;;  %v12885_v56 = vpop.f32.mrb[17].mxu0  ;;  %13712 = vst [vmem:[#allocation14_spill] sm:$0xff] %v12887_v44  ;;  %v12891_v23 = vpop.f32.mrb[17].mxu1 }
 0x287   : > { %v12889_v0 = vpop.f32.mrb[18].mxu0  ;;  %7844 = vmatpush1.bf16.msra.mxu0 %v11315_v25  ;;  %7887 = vmatpush1.bf16.msra.mxu1 %v11317_v35  ;;  %v12897_v28 = vpop.f32.mrb[18].mxu1  ;;  %v11604_v35 = vcombine.high %v887_v39, %v923_v31  ;;  %v1139_v31 = vld [vmem:[#allocation6 + $0x1ca0] sm:$0xff]  ;;  %v1140_v39 = vld [vmem:[#allocation6 + $0x1ca8] sm:$0xff] }
 0x288   : > { %v12895_v13 = vpop.f32.mrb[19].mxu0  ;;  %13713 = vst [vmem:[#allocation15_spill] sm:$0xff] %v12897_v28  ;;  %7845 = vmatprep.subr.bf16.mxu0 %v11388_v7  ;;  %v12903_v25 = vpop.f32.mrb[19].mxu1  ;;  %7888 = vmatprep.subr.bf16.mxu1 %v11390_v41  ;;  %v11532_v7 = vcombine.high %v815_v62, %v851_v18  ;;  %v924_v41 = vld [vmem:[#allocation6 + $0x15e8] sm:$0xff]  ;;  %v1067_v18 = vld [vmem:[#allocation6 + $0x1a60] sm:$0xff] }
 0x289   : > { %v11606_v44 = vcombine.high %v888_v33, %v924_v41  ;;  %v11605_v59 = vcombine.low %v888_v33, %v924_v41  ;;  %v1032_v62 = vld [vmem:[#allocation6 + $0x1948] sm:$0xff] }
 0x28b   : > { %7846 = vmatpush1.bf16.msra.mxu0 %v11387_v51  ;;  %7889 = vmatpush1.bf16.msra.mxu1 %v11389_v24  ;;  %v959_v51 = vld [vmem:[#allocation6 + $0x1700] sm:$0xff]  ;;  %v996_v24 = vld [vmem:[#allocation6 + $0x1828] sm:$0xff] }
 0x28c   : > { %7847 = vmatprep.subr.bf16.mxu0 %v11460_v19  ;;  %7890 = vmatprep.subr.bf16.mxu1 %v11462_v57  ;;  %v11676_v19 = vcombine.high %v959_v51, %v995_v47  ;;  %v11678_v57 = vcombine.high %v960_v52, %v996_v24  ;;  %v11675_v38 = vcombine.low %v959_v51, %v995_v47  ;;  %v1211_v51 = vld [vmem:[#allocation6 + $0x1ee0] sm:$0xff]  ;;  %v1176_v47 = vld [vmem:[#allocation6 + $0x1dc8] sm:$0xff] }
 0x28d   : > { %v11677_v48 = vcombine.low %v960_v52, %v996_v24 }
 0x28f   : > { %7848 = vmatpush1.bf16.msra.mxu0 %v11459_v4  ;;  %7891 = vmatpush1.bf16.msra.mxu1 %v11461_v61  ;;  %v1031_v4 = vld [vmem:[#allocation6 + $0x1940] sm:$0xff]  ;;  %v1068_v61 = vld [vmem:[#allocation6 + $0x1a68] sm:$0xff] }
 0x290   : > { %7849 = vmatprep.subr.bf16.mxu0 %v11532_v7  ;;  %7892 = vmatprep.subr.bf16.mxu1 %v11534_v58  ;;  %v11748_v58 = vcombine.high %v1031_v4, %v1067_v18  ;;  %v11750_v7 = vcombine.high %v1032_v62, %v1068_v61  ;;  %v11747_v33 = vcombine.low %v1031_v4, %v1067_v18  ;;  %v1283_v4 = vld [vmem:[#allocation6 + $0x2120] sm:$0xff]  ;;  %v1248_v18 = vld [vmem:[#allocation6 + $0x2008] sm:$0xff] }
 0x293   : > { %7850 = vmatpush1.bf16.msra.mxu0 %v11531_v36  ;;  %7893 = vmatpush1.bf16.msra.mxu1 %v11533_v30  ;;  %v1103_v36 = vld [vmem:[#allocation6 + $0x1b80] sm:$0xff]  ;;  %v1104_v30 = vld [vmem:[#allocation6 + $0x1b88] sm:$0xff] }
 0x294   : > { %7851 = vmatprep.subr.bf16.mxu0 %v11604_v35  ;;  %7894 = vmatprep.subr.bf16.mxu1 %v11606_v44  ;;  %v11749_v44 = vcombine.low %v1032_v62, %v1068_v61  ;;  %v11820_v35 = vcombine.high %v1103_v36, %v1139_v31  ;;  %v11822_v41 = vcombine.high %v1104_v30, %v1140_v39 }
 0x295   : > { %v11819_v52 = vcombine.low %v1103_v36, %v1139_v31  ;;  %v11821_v24 = vcombine.low %v1104_v30, %v1140_v39  ;;  %v1355_v36 = vld [vmem:[#allocation6 + $0x2360] sm:$0xff]  ;;  %v1320_v31 = vld [vmem:[#allocation6 + $0x2248] sm:$0xff] }
 0x297   : > { %7852 = vmatpush1.bf16.msra.mxu0 %v11603_v43  ;;  %7895 = vmatpush1.bf16.msra.mxu1 %v11605_v59  ;;  %v1175_v43 = vld [vmem:[#allocation6 + $0x1dc0] sm:$0xff]  ;;  %v1212_v59 = vld [vmem:[#allocation6 + $0x1ee8] sm:$0xff] }
 0x298   : > { %7853 = vmatprep.subr.bf16.mxu0 %v11676_v19  ;;  %7896 = vmatprep.subr.bf16.mxu1 %v11678_v57  ;;  %v11892_v19 = vcombine.high %v1175_v43, %v1211_v51  ;;  %v11894_v57 = vcombine.high %v1176_v47, %v1212_v59  ;;  %v11891_v62 = vcombine.low %v1175_v43, %v1211_v51  ;;  %v277_v43 = vld [vmem:[#allocation6 + $0x1b0] sm:$0xff]  ;;  %v242_v51 = vld [vmem:[#allocation6 + $0x98] sm:$0xff] }
 0x299   : > { %v11893_v61 = vcombine.low %v1176_v47, %v1212_v59 }
 0x29b   : > { %7854 = vmatpush1.bf16.msra.mxu0 %v11675_v38  ;;  %7897 = vmatpush1.bf16.msra.mxu1 %v11677_v48  ;;  %v1247_v38 = vld [vmem:[#allocation6 + $0x2000] sm:$0xff]  ;;  %v1284_v48 = vld [vmem:[#allocation6 + $0x2128] sm:$0xff] }
 0x29c   : > { %7855 = vmatprep.subr.bf16.mxu0 %v11748_v58  ;;  %7898 = vmatprep.subr.bf16.mxu1 %v11750_v7  ;;  %v11964_v58 = vcombine.high %v1247_v38, %v1283_v4  ;;  %v11966_v7 = vcombine.high %v1248_v18, %v1284_v48  ;;  %v11963_v30 = vcombine.low %v1247_v38, %v1283_v4  ;;  %v349_v38 = vld [vmem:[#allocation6 + $0x3f0] sm:$0xff]  ;;  %v314_v4 = vld [vmem:[#allocation6 + $0x2d8] sm:$0xff] }
 0x29d   : > { %v11965_v39 = vcombine.low %v1248_v18, %v1284_v48 }
 0x29f   : > { %7856 = vmatpush1.bf16.msra.mxu0 %v11747_v33  ;;  %7899 = vmatpush1.bf16.msra.mxu1 %v11749_v44  ;;  %v1319_v33 = vld [vmem:[#allocation6 + $0x2240] sm:$0xff]  ;;  %v1356_v44 = vld [vmem:[#allocation6 + $0x2368] sm:$0xff] }
 0x2a0   : > { %7857 = vmatprep.subr.bf16.mxu0 %v11820_v35  ;;  %7900 = vmatprep.subr.bf16.mxu1 %v11822_v41  ;;  %v12036_v35 = vcombine.high %v1319_v33, %v1355_v36  ;;  %v12038_v41 = vcombine.high %v1320_v31, %v1356_v44  ;;  %v12035_v47 = vcombine.low %v1319_v33, %v1355_v36  ;;  %v421_v33 = vld [vmem:[#allocation6 + $0x630] sm:$0xff]  ;;  %v386_v36 = vld [vmem:[#allocation6 + $0x518] sm:$0xff] }
 0x2a1   : > { %v12037_v59 = vcombine.low %v1320_v31, %v1356_v44  ;;  %v422_v31 = vld [vmem:[#allocation6 + $0x638] sm:$0xff] }
 0x2a3   : > { %7858 = vmatpush1.bf16.msra.mxu0 %v11819_v52  ;;  %7901 = vmatpush1.bf16.msra.mxu1 %v11821_v24  ;;  %v241_v52 = vld [vmem:[#allocation6 + $0x90] sm:$0xff]  ;;  %v278_v24 = vld [vmem:[#allocation6 + $0x1b8] sm:$0xff] }
 0x2a4   : > { %7859 = vmatprep.subr.bf16.mxu0 %v11892_v19  ;;  %7902 = vmatprep.subr.bf16.mxu1 %v11894_v57  ;;  %v10960_v19 = vcombine.high %v241_v52, %v277_v43  ;;  %v10962_v57 = vcombine.high %v242_v51, %v278_v24  ;;  %v10959_v18 = vcombine.low %v241_v52, %v277_v43  ;;  %v457_v52 = vld [vmem:[#allocation6 + $0x750] sm:$0xff] }
 0x2a5   : > { %v10961_v48 = vcombine.low %v242_v51, %v278_v24  ;;  %v493_v43 = vld [vmem:[#allocation6 + $0x870] sm:$0xff]  ;;  %v458_v24 = vld [vmem:[#allocation6 + $0x758] sm:$0xff] }
 0x2a6   : > { %v12910_v51 = vld [vmem:[%s12725_s5 + $0x4] ss:$8 sps:$4 sm:$0xff]  }
 0x2a7   : > { %7860 = vmatpush1.bf16.msra.mxu0 %v11891_v62  ;;  %7903 = vmatpush1.bf16.msra.mxu1 %v11893_v61  ;;  %v313_v62 = vld [vmem:[#allocation6 + $0x2d0] sm:$0xff]  ;;  %v350_v61 = vld [vmem:[#allocation6 + $0x3f8] sm:$0xff] }
 0x2a8   : > { %7861 = vmatprep.subr.bf16.mxu0 %v11964_v58  ;;  %7904 = vmatprep.subr.bf16.mxu1 %v11966_v7  ;;  %v11032_v58 = vcombine.high %v313_v62, %v349_v38  ;;  %v11034_v7 = vcombine.high %v314_v4, %v350_v61  ;;  %v11031_v44 = vcombine.low %v313_v62, %v349_v38  ;;  %v529_v62 = vld [vmem:[#allocation6 + $0x990] sm:$0xff] }
 0x2a9   : > { %v565_v38 = vld [vmem:[#allocation6 + $0xab0] sm:$0xff] }
 0x2ab   : > { %7862 = vmatpush1.bf16.msra.mxu0 %v11963_v30  ;;  %7905 = vmatpush1.bf16.msra.mxu1 %v11965_v39  ;;  %v385_v30 = vld [vmem:[#allocation6 + $0x510] sm:$0xff]  ;;  %v11033_v39 = vcombine.low %v314_v4, %v350_v61  ;;  %v530_v4 = vld [vmem:[#allocation6 + $0x998] sm:$0xff] }
 0x2ac   : > { %7863 = vmatprep.subr.bf16.mxu0 %v12036_v35  ;;  %7906 = vmatprep.subr.bf16.mxu1 %v12038_v41  ;;  %v11104_v35 = vcombine.high %v385_v30, %v421_v33  ;;  %v11106_v41 = vcombine.high %v386_v36, %v422_v31  ;;  %v566_v61 = vld [vmem:[#allocation6 + $0xab8] sm:$0xff] }
 0x2af   : > { %7864 = vmatpush1.bf16.msra.mxu0 %v12035_v47  ;;  %7907 = vmatpush1.bf16.msra.mxu1 %v12037_v59  ;;  %v494_v47 = vld [vmem:[#allocation6 + $0x878] sm:$0xff]  ;;  %v11105_v59 = vcombine.low %v386_v36, %v422_v31  ;;  %v11247_v36 = vcombine.low %v529_v62, %v565_v38  ;;  %v11249_v31 = vcombine.low %v530_v4, %v566_v61 }
 0x2b0   : > { %7919 = vmatprep.subr.bf16.mxu0 %v10960_v19  ;;  %7962 = vmatprep.subr.bf16.mxu1 %v10962_v57  ;;  %v11176_v19 = vcombine.high %v457_v52, %v493_v43  ;;  %v11178_v57 = vcombine.high %v458_v24, %v494_v47 }
 0x2b2   : > { %7866 = vmatmul.mubr.bf16.vlgmr.msra.gmra.mrb[32].mxu0 %v12849_v10  ;;  %7909 = vmatmul.mubr.bf16.vlgmr.msra.gmra.mrb[32].mxu1 %v12849_v10  ;;  %v11103_v10 = vcombine.low %v385_v30, %v421_v33  ;;  %v637_v30 = vld [vmem:[#allocation6 + $0xcf0] sm:$0xff]  ;;  %v602_v33 = vld [vmem:[#allocation6 + $0xbd8] sm:$0xff] }
 0x2b3   : > { %7920 = vmatpush1.bf16.msra.mxu0 %v10959_v18  ;;  %7963 = vmatpush1.bf16.msra.mxu1 %v10961_v48  ;;  %v11175_v18 = vcombine.low %v457_v52, %v493_v43  ;;  %v11177_v48 = vcombine.low %v458_v24, %v494_v47  ;;  %v709_v52 = vld [vmem:[#allocation6 + $0xf30] sm:$0xff]  ;;  %v674_v43 = vld [vmem:[#allocation6 + $0xe18] sm:$0xff] }
 0x2b4   : > { %7921 = vmatprep.subr.bf16.mxu0 %v11032_v58  ;;  %7964 = vmatprep.subr.bf16.mxu1 %v11034_v7  ;;  %v11248_v58 = vcombine.high %v529_v62, %v565_v38  ;;  %v11250_v7 = vcombine.high %v530_v4, %v566_v61  ;;  %v745_v38 = vld [vmem:[#allocation6 + $0x1050] sm:$0xff] }
 0x2b5   : > { %7951 = vmatprep.mubr.bf16.mxu0 %v12910_v51  ;;  %7994 = vmatprep.mubr.bf16.mxu1 %v12910_v51 }
 0x2b7   : > { %7922 = vmatpush1.bf16.msra.mxu0 %v11031_v44  ;;  %7965 = vmatpush1.bf16.msra.mxu1 %v11033_v39  ;;  %v601_v44 = vld [vmem:[#allocation6 + $0xbd0] sm:$0xff]  ;;  %v638_v39 = vld [vmem:[#allocation6 + $0xcf8] sm:$0xff] }
 0x2b8   : > { %7923 = vmatprep.subr.bf16.mxu0 %v11104_v35  ;;  %7966 = vmatprep.subr.bf16.mxu1 %v11106_v41  ;;  %v11320_v35 = vcombine.high %v601_v44, %v637_v30  ;;  %v11322_v41 = vcombine.high %v602_v33, %v638_v39  ;;  %v11319_v24 = vcombine.low %v601_v44, %v637_v30 }
 0x2b9   : > { %v11321_v47 = vcombine.low %v602_v33, %v638_v39  ;;  %v853_v33 = vld [vmem:[#allocation6 + $0x13b0] sm:$0xff] }
 0x2bb   : > { %7924 = vmatpush1.bf16.msra.mxu0 %v11103_v10  ;;  %7967 = vmatpush1.bf16.msra.mxu1 %v11105_v59  ;;  %v673_v10 = vld [vmem:[#allocation6 + $0xe10] sm:$0xff]  ;;  %v710_v59 = vld [vmem:[#allocation6 + $0xf38] sm:$0xff] }
 0x2bc   : > { %7925 = vmatprep.subr.bf16.mxu0 %v11176_v19  ;;  %7968 = vmatprep.subr.bf16.mxu1 %v11178_v57  ;;  %v11392_v19 = vcombine.high %v673_v10, %v709_v52  ;;  %v11394_v62 = vcombine.high %v674_v43, %v710_v59  ;;  %v11391_v30 = vcombine.low %v673_v10, %v709_v52  ;;  %v817_v52 = vld [vmem:[#allocation6 + $0x1290] sm:$0xff] }
 0x2bf   : > { %7926 = vmatpush1.bf16.msra.mxu0 %v11175_v18  ;;  %7969 = vmatpush1.bf16.msra.mxu1 %v11177_v48  ;;  %v781_v18 = vld [vmem:[#allocation6 + $0x1170] sm:$0xff]  ;;  %v746_v48 = vld [vmem:[#allocation6 + $0x1058] sm:$0xff] }
 0x2c0   : > { %7927 = vmatprep.subr.bf16.mxu0 %v11248_v58  ;;  %7970 = vmatprep.subr.bf16.mxu1 %v11250_v7  ;;  %v782_v58 = vld [vmem:[#allocation6 + $0x1178] sm:$0xff] }
 0x2c1   : > { %v11466_v10 = vcombine.high %v746_v48, %v782_v58 }
 0x2c3   : > { %7928 = vmatpush1.bf16.msra.mxu0 %v11247_v36  ;;  %7971 = vmatpush1.bf16.msra.mxu1 %v11249_v31  ;;  %v11393_v31 = vcombine.low %v674_v43, %v710_v59  ;;  %v11463_v43 = vcombine.low %v745_v38, %v781_v18  ;;  %v11465_v59 = vcombine.low %v746_v48, %v782_v58 }
 0x2c4   : > { %7929 = vmatprep.subr.bf16.mxu0 %v11320_v35  ;;  %7972 = vmatprep.subr.bf16.mxu1 %v11322_v41  ;;  %v11464_v35 = vcombine.high %v745_v38, %v781_v18  ;;  %v997_v38 = vld [vmem:[#allocation6 + $0x1830] sm:$0xff]  ;;  %v962_v18 = vld [vmem:[#allocation6 + $0x1718] sm:$0xff] }
 0x2c5   : > { %v12914_v57 = vpop.f32.mrb[20].mxu0  ;;  %v12918_v61 = vpop.f32.mrb[20].mxu1 }
 0x2c6   : > { %13714 = vst [vmem:[#allocation16_spill] sm:$0xff] %v12914_v57  ;;  %v12916_v4 = vpop.f32.mrb[21].mxu0  ;;  %13716 = vst [vmem:[#allocation18_spill] sm:$0xff] %v12918_v61  ;;  %v12922_v44 = vpop.f32.mrb[21].mxu1  ;;  %v818_v57 = vld [vmem:[#allocation6 + $0x1298] sm:$0xff]  ;;  %v925_v61 = vld [vmem:[#allocation6 + $0x15f0] sm:$0xff] }
 0x2c7   : > { %13715 = vst [vmem:[#allocation17_spill] sm:$0xff] %v12916_v4  ;;  %v12920_v7 = vpop.f32.mrb[22].mxu0  ;;  %7930 = vmatpush1.bf16.msra.mxu0 %v11319_v24  ;;  %13718 = vst [vmem:[#allocation20_spill] sm:$0xff] %v12922_v44  ;;  %7973 = vmatpush1.bf16.msra.mxu1 %v11321_v47  ;;  %v12928_v36 = vpop.f32.mrb[22].mxu1  ;;  %v889_v24 = vld [vmem:[#allocation6 + $0x14d0] sm:$0xff]  ;;  %v11535_v4 = vcombine.low %v817_v52, %v853_v33 }
 0x2c8   : > { %13717 = vst [vmem:[#allocation19_spill] sm:$0xff] %v12920_v7  ;;  %v12926_v39 = vpop.f32.mrb[23].mxu0  ;;  %13720 = vst [vmem:[#allocation22_spill] sm:$0xff] %v12928_v36  ;;  %7931 = vmatprep.subr.bf16.mxu0 %v11392_v19  ;;  %v12934_v28 = vpop.f32.mrb[23].mxu1  ;;  %7974 = vmatprep.subr.bf16.mxu1 %v11394_v62  ;;  %v854_v7 = vld [vmem:[#allocation6 + $0x13b8] sm:$0xff]  ;;  %v11536_v19 = vcombine.high %v817_v52, %v853_v33  ;;  %v11608_v47 = vcombine.high %v889_v24, %v925_v61  ;;  %v1069_v33 = vld [vmem:[#allocation6 + $0x1a70] sm:$0xff] }
 0x2c9   : > { %13719 = vst [vmem:[#allocation21_spill] sm:$0xff] %v12926_v39  ;;  %13721 = vst [vmem:[#allocation23_spill] sm:$0xff] %v12934_v28  ;;  %v11538_v41 = vcombine.high %v818_v57, %v854_v7  ;;  %v890_v36 = vld [vmem:[#allocation6 + $0x14d8] sm:$0xff]  ;;  %v11537_v39 = vcombine.low %v818_v57, %v854_v7  ;;  %v11607_v48 = vcombine.low %v889_v24, %v925_v61  ;;  %v1141_v61 = vld [vmem:[#allocation6 + $0x1cb0] sm:$0xff] }
 0x2ca   : > { %v926_v62 = vld [vmem:[#allocation6 + $0x15f8] sm:$0xff] }
 0x2cb   : > { %7932 = vmatpush1.bf16.msra.mxu0 %v11391_v30  ;;  %7975 = vmatpush1.bf16.msra.mxu1 %v11393_v31  ;;  %v11610_v44 = vcombine.high %v890_v36, %v926_v62  ;;  %v961_v30 = vld [vmem:[#allocation6 + $0x1710] sm:$0xff]  ;;  %v998_v31 = vld [vmem:[#allocation6 + $0x1838] sm:$0xff]  ;;  %v11609_v58 = vcombine.low %v890_v36, %v926_v62 }
 0x2cc   : > { %7933 = vmatprep.subr.bf16.mxu0 %v11464_v35  ;;  %7976 = vmatprep.subr.bf16.mxu1 %v11466_v10  ;;  %v11680_v35 = vcombine.high %v961_v30, %v997_v38  ;;  %v11682_v10 = vcombine.high %v962_v18, %v998_v31  ;;  %v1034_v52 = vld [vmem:[#allocation6 + $0x1958] sm:$0xff]  ;;  %v11679_v57 = vcombine.low %v961_v30, %v997_v38  ;;  %v1213_v30 = vld [vmem:[#allocation6 + $0x1ef0] sm:$0xff] }
 0x2cd   : > { %v11681_v7 = vcombine.low %v962_v18, %v998_v31  ;;  %v1142_v24 = vld [vmem:[#allocation6 + $0x1cb8] sm:$0xff] }
 0x2ce   : > { %v1178_v38 = vld [vmem:[#allocation6 + $0x1dd8] sm:$0xff] }
 0x2cf   : > { %7934 = vmatpush1.bf16.msra.mxu0 %v11463_v43  ;;  %7977 = vmatpush1.bf16.msra.mxu1 %v11465_v59  ;;  %v1033_v43 = vld [vmem:[#allocation6 + $0x1950] sm:$0xff]  ;;  %v1070_v59 = vld [vmem:[#allocation6 + $0x1a78] sm:$0xff] }
 0x2d0   : > { %7935 = vmatprep.subr.bf16.mxu0 %v11536_v19  ;;  %7978 = vmatprep.subr.bf16.mxu1 %v11538_v41  ;;  %v11752_v41 = vcombine.high %v1033_v43, %v1069_v33  ;;  %v11754_v19 = vcombine.high %v1034_v52, %v1070_v59  ;;  %v11751_v36 = vcombine.low %v1033_v43, %v1069_v33  ;;  %v1285_v43 = vld [vmem:[#allocation6 + $0x2130] sm:$0xff]  ;;  %v1250_v33 = vld [vmem:[#allocation6 + $0x2018] sm:$0xff] }
 0x2d3   : > { %7936 = vmatpush1.bf16.msra.mxu0 %v11535_v4  ;;  %7979 = vmatpush1.bf16.msra.mxu1 %v11537_v39  ;;  %v1105_v4 = vld [vmem:[#allocation6 + $0x1b90] sm:$0xff]  ;;  %v1106_v39 = vld [vmem:[#allocation6 + $0x1b98] sm:$0xff] }
 0x2d4   : > { %7937 = vmatprep.subr.bf16.mxu0 %v11608_v47  ;;  %7980 = vmatprep.subr.bf16.mxu1 %v11610_v44  ;;  %v11753_v44 = vcombine.low %v1034_v52, %v1070_v59  ;;  %v11824_v47 = vcombine.high %v1105_v4, %v1141_v61  ;;  %v11826_v62 = vcombine.high %v1106_v39, %v1142_v24 }
 0x2d5   : > { %v11823_v18 = vcombine.low %v1105_v4, %v1141_v61  ;;  %v11825_v31 = vcombine.low %v1106_v39, %v1142_v24  ;;  %v1357_v4 = vld [vmem:[#allocation6 + $0x2370] sm:$0xff]  ;;  %v1322_v61 = vld [vmem:[#allocation6 + $0x2258] sm:$0xff] }
 0x2d7   : > { %7938 = vmatpush1.bf16.msra.mxu0 %v11607_v48  ;;  %7981 = vmatpush1.bf16.msra.mxu1 %v11609_v58  ;;  %v1177_v48 = vld [vmem:[#allocation6 + $0x1dd0] sm:$0xff]  ;;  %v1214_v58 = vld [vmem:[#allocation6 + $0x1ef8] sm:$0xff] }
 0x2d8   : > { %7939 = vmatprep.subr.bf16.mxu0 %v11680_v35  ;;  %7982 = vmatprep.subr.bf16.mxu1 %v11682_v10  ;;  %v11896_v35 = vcombine.high %v1177_v48, %v1213_v30  ;;  %v11898_v10 = vcombine.high %v1178_v38, %v1214_v58  ;;  %v11895_v52 = vcombine.low %v1177_v48, %v1213_v30  ;;  %v279_v48 = vld [vmem:[#allocation6 + $0x1c0] sm:$0xff]  ;;  %v244_v30 = vld [vmem:[#allocation6 + $0xa8] sm:$0xff] }
 0x2d9   : > { %v11897_v59 = vcombine.low %v1178_v38, %v1214_v58 }
 0x2db   : > { %7940 = vmatpush1.bf16.msra.mxu0 %v11679_v57  ;;  %7983 = vmatpush1.bf16.msra.mxu1 %v11681_v7  ;;  %v1249_v57 = vld [vmem:[#allocation6 + $0x2010] sm:$0xff]  ;;  %v1286_v7 = vld [vmem:[#allocation6 + $0x2138] sm:$0xff] }
 0x2dc   : > { %7941 = vmatprep.subr.bf16.mxu0 %v11752_v41  ;;  %7984 = vmatprep.subr.bf16.mxu1 %v11754_v19  ;;  %v11968_v41 = vcombine.high %v1249_v57, %v1285_v43  ;;  %v11970_v19 = vcombine.high %v1250_v33, %v1286_v7  ;;  %v11967_v39 = vcombine.low %v1249_v57, %v1285_v43  ;;  %v315_v57 = vld [vmem:[#allocation6 + $0x2e0] sm:$0xff] }
 0x2dd   : > { %v11969_v24 = vcombine.low %v1250_v33, %v1286_v7  ;;  %v351_v43 = vld [vmem:[#allocation6 + $0x400] sm:$0xff]  ;;  %v352_v33 = vld [vmem:[#allocation6 + $0x408] sm:$0xff] }
 0x2df   : > { %7942 = vmatpush1.bf16.msra.mxu0 %v11751_v36  ;;  %7985 = vmatpush1.bf16.msra.mxu1 %v11753_v44  ;;  %v1321_v36 = vld [vmem:[#allocation6 + $0x2250] sm:$0xff]  ;;  %v1358_v44 = vld [vmem:[#allocation6 + $0x2378] sm:$0xff] }
 0x2e0   : > { %7943 = vmatprep.subr.bf16.mxu0 %v11824_v47  ;;  %7986 = vmatprep.subr.bf16.mxu1 %v11826_v62  ;;  %v12040_v47 = vcombine.high %v1321_v36, %v1357_v4  ;;  %v12042_v62 = vcombine.high %v1322_v61, %v1358_v44  ;;  %v12039_v38 = vcombine.low %v1321_v36, %v1357_v4  ;;  %v387_v36 = vld [vmem:[#allocation6 + $0x520] sm:$0xff] }
 0x2e1   : > { %v12041_v58 = vcombine.low %v1322_v61, %v1358_v44  ;;  %v423_v4 = vld [vmem:[#allocation6 + $0x640] sm:$0xff]  ;;  %v388_v61 = vld [vmem:[#allocation6 + $0x528] sm:$0xff] }
 0x2e2   : > { %v424_v44 = vld [vmem:[#allocation6 + $0x648] sm:$0xff] }
 0x2e3   : > { %7944 = vmatpush1.bf16.msra.mxu0 %v11823_v18  ;;  %7987 = vmatpush1.bf16.msra.mxu1 %v11825_v31  ;;  %v243_v18 = vld [vmem:[#allocation6 + $0xa0] sm:$0xff]  ;;  %v280_v31 = vld [vmem:[#allocation6 + $0x1c8] sm:$0xff] }
 0x2e4   : > { %7945 = vmatprep.subr.bf16.mxu0 %v11896_v35  ;;  %7988 = vmatprep.subr.bf16.mxu1 %v11898_v10  ;;  %v10964_v35 = vcombine.high %v243_v18, %v279_v48  ;;  %v10966_v10 = vcombine.high %v244_v30, %v280_v31  ;;  %v10963_v7 = vcombine.low %v243_v18, %v279_v48  ;;  %v459_v48 = vld [vmem:[#allocation6 + $0x760] sm:$0xff] }
 0x2e5   : > { %v11110_v18 = vcombine.high %v388_v61, %v424_v44 }
 0x2e7   : > { %7946 = vmatpush1.bf16.msra.mxu0 %v11895_v52  ;;  %7989 = vmatpush1.bf16.msra.mxu1 %v11897_v59  ;;  %v316_v52 = vld [vmem:[#allocation6 + $0x2e8] sm:$0xff]  ;;  %v10965_v59 = vcombine.low %v244_v30, %v280_v31  ;;  %v495_v30 = vld [vmem:[#allocation6 + $0x880] sm:$0xff] }
 0x2e8   : > { %7947 = vmatprep.subr.bf16.mxu0 %v11968_v41  ;;  %7990 = vmatprep.subr.bf16.mxu1 %v11970_v19  ;;  %v11036_v41 = vcombine.high %v315_v57, %v351_v43  ;;  %v11038_v19 = vcombine.high %v316_v52, %v352_v33  ;;  %v460_v31 = vld [vmem:[#allocation6 + $0x768] sm:$0xff] }
 0x2eb   : > { %7948 = vmatpush1.bf16.msra.mxu0 %v11967_v39  ;;  %7991 = vmatpush1.bf16.msra.mxu1 %v11969_v24  ;;  %v12939_v39 = vld [vmem:[%s12725_s5] ss:$8 sps:$4 sm:$0xff]   ;;  %v11035_v24 = vcombine.low %v315_v57, %v351_v43 }
 0x2ec   : > { %7949 = vmatprep.subr.bf16.mxu0 %v12040_v47  ;;  %7992 = vmatprep.subr.bf16.mxu1 %v12042_v62  ;;  %v11037_v47 = vcombine.low %v316_v52, %v352_v33  ;;  %v11108_v62 = vcombine.high %v387_v36, %v423_v4  ;;  %v531_v43 = vld [vmem:[#allocation6 + $0x9a0] sm:$0xff]  ;;  %v532_v33 = vld [vmem:[#allocation6 + $0x9a8] sm:$0xff] }
 0x2ed   : > { %v567_v52 = vld [vmem:[#allocation6 + $0xac0] sm:$0xff] }
 0x2ef   : > { %7950 = vmatpush1.bf16.msra.mxu0 %v12039_v38  ;;  %7993 = vmatpush1.bf16.msra.mxu1 %v12041_v58  ;;  %v496_v38 = vld [vmem:[#allocation6 + $0x888] sm:$0xff]  ;;  %v11107_v58 = vcombine.low %v387_v36, %v423_v4  ;;  %v639_v36 = vld [vmem:[#allocation6 + $0xd00] sm:$0xff] }
 0x2f0   : > { %8005 = vmatprep.subr.bf16.mxu0 %v10964_v35  ;;  %8048 = vmatprep.subr.bf16.mxu1 %v10966_v10  ;;  %v11109_v35 = vcombine.low %v388_v61, %v424_v44  ;;  %v11180_v10 = vcombine.high %v459_v48, %v495_v30  ;;  %v11182_v57 = vcombine.high %v460_v31, %v496_v38  ;;  %v604_v4 = vld [vmem:[#allocation6 + $0xbe8] sm:$0xff] }
 0x2f1   : > { %v11251_v61 = vcombine.low %v531_v43, %v567_v52 }
 0x2f2   : > { %7952 = vmatmul.mubr.bf16.vlgmr.msra.gmra.mrb[36].mxu0 %v12939_v39  ;;  %7995 = vmatmul.mubr.bf16.vlgmr.msra.gmra.mrb[36].mxu1 %v12939_v39 }
 0x2f3   : > { %8006 = vmatpush1.bf16.msra.mxu0 %v10963_v7  ;;  %8049 = vmatpush1.bf16.msra.mxu1 %v10965_v59  ;;  %v568_v7 = vld [vmem:[#allocation6 + $0xac8] sm:$0xff]  ;;  %v11179_v59 = vcombine.low %v459_v48, %v495_v30  ;;  %v711_v48 = vld [vmem:[#allocation6 + $0xf40] sm:$0xff] }
 0x2f4   : > { %8007 = vmatprep.subr.bf16.mxu0 %v11036_v41  ;;  %8050 = vmatprep.subr.bf16.mxu1 %v11038_v19  ;;  %v11181_v41 = vcombine.low %v460_v31, %v496_v38  ;;  %v11252_v19 = vcombine.high %v531_v43, %v567_v52  ;;  %v11254_v28 = vcombine.high %v532_v33, %v568_v7  ;;  %v676_v30 = vld [vmem:[#allocation6 + $0xe28] sm:$0xff]  ;;  %v747_v52 = vld [vmem:[#allocation6 + $0x1060] sm:$0xff] }
 0x2f5   : > { %8037 = vmatprep.mubr.bf16.mxu0 %v12910_v51  ;;  %8080 = vmatprep.mubr.bf16.mxu1 %v12910_v51  ;;  %v11253_v44 = vcombine.low %v532_v33, %v568_v7  ;;  %v748_v7 = vld [vmem:[#allocation6 + $0x1068] sm:$0xff] }
 0x2f7   : > { %8008 = vmatpush1.bf16.msra.mxu0 %v11035_v24  ;;  %8051 = vmatpush1.bf16.msra.mxu1 %v11037_v47  ;;  %v603_v24 = vld [vmem:[#allocation6 + $0xbe0] sm:$0xff]  ;;  %v640_v47 = vld [vmem:[#allocation6 + $0xd08] sm:$0xff] }
 0x2f8   : > { %8009 = vmatprep.subr.bf16.mxu0 %v11108_v62  ;;  %8052 = vmatprep.subr.bf16.mxu1 %v11110_v18  ;;  %v11324_v62 = vcombine.high %v603_v24, %v639_v36  ;;  %v11326_v18 = vcombine.high %v604_v4, %v640_v47  ;;  %v11323_v31 = vcombine.low %v603_v24, %v639_v36 }
 0x2f9   : > { %v11325_v38 = vcombine.low %v604_v4, %v640_v47  ;;  %v855_v4 = vld [vmem:[#allocation6 + $0x13c0] sm:$0xff] }
 0x2fb   : > { %8010 = vmatpush1.bf16.msra.mxu0 %v11107_v58  ;;  %8053 = vmatpush1.bf16.msra.mxu1 %v11109_v35  ;;  %v675_v58 = vld [vmem:[#allocation6 + $0xe20] sm:$0xff]  ;;  %v712_v35 = vld [vmem:[#allocation6 + $0xf48] sm:$0xff] }
 0x2fc   : > { %8011 = vmatprep.subr.bf16.mxu0 %v11180_v10  ;;  %8054 = vmatprep.subr.bf16.mxu1 %v11182_v57  ;;  %v11396_v10 = vcombine.high %v675_v58, %v711_v48  ;;  %v11398_v43 = vcombine.high %v676_v30, %v712_v35  ;;  %v11395_v36 = vcombine.low %v675_v58, %v711_v48  ;;  %v819_v48 = vld [vmem:[#allocation6 + $0x12a0] sm:$0xff] }
 0x2ff   : > { %8012 = vmatpush1.bf16.msra.mxu0 %v11179_v59  ;;  %8055 = vmatpush1.bf16.msra.mxu1 %v11181_v41  ;;  %v783_v59 = vld [vmem:[#allocation6 + $0x1180] sm:$0xff]  ;;  %v784_v41 = vld [vmem:[#allocation6 + $0x1188] sm:$0xff] }
 0x300   : > { %8013 = vmatprep.subr.bf16.mxu0 %v11252_v19  ;;  %8056 = vmatprep.subr.bf16.mxu1 %v11254_v28  ;;  %v11470_v58 = vcombine.high %v748_v7, %v784_v41 }
 0x303   : > { %8014 = vmatpush1.bf16.msra.mxu0 %v11251_v61  ;;  %8057 = vmatpush1.bf16.msra.mxu1 %v11253_v44  ;;  %v11397_v44 = vcombine.low %v676_v30, %v712_v35  ;;  %v11467_v30 = vcombine.low %v747_v52, %v783_v59  ;;  %v11469_v35 = vcombine.low %v748_v7, %v784_v41 }
 0x304   : > { %8015 = vmatprep.subr.bf16.mxu0 %v11324_v62  ;;  %8058 = vmatprep.subr.bf16.mxu1 %v11326_v18  ;;  %v11468_v62 = vcombine.high %v747_v52, %v783_v59  ;;  %v999_v52 = vld [vmem:[#allocation6 + $0x1840] sm:$0xff]  ;;  %v964_v59 = vld [vmem:[#allocation6 + $0x1728] sm:$0xff] }
 0x305   : > { %v12945_v57 = vpop.f32.mrb[24].mxu0  ;;  %v12949_v28 = vpop.f32.mrb[24].mxu1 }
 0x306   : > { %13722 = vst [vmem:[#allocation24_spill] sm:$0xff] %v12945_v57  ;;  %v12947_v33 = vpop.f32.mrb[25].mxu0  ;;  %13724 = vst [vmem:[#allocation26_spill] sm:$0xff] %v12949_v28  ;;  %v12953_v24 = vpop.f32.mrb[25].mxu1  ;;  %v820_v57 = vld [vmem:[#allocation6 + $0x12a8] sm:$0xff]  ;;  %v927_v28 = vld [vmem:[#allocation6 + $0x1600] sm:$0xff] }
 0x307   : > { %13723 = vst [vmem:[#allocation25_spill] sm:$0xff] %v12947_v33  ;;  %v12951_v19 = vpop.f32.mrb[26].mxu0  ;;  %8016 = vmatpush1.bf16.msra.mxu0 %v11323_v31  ;;  %13726 = vst [vmem:[#allocation28_spill] sm:$0xff] %v12953_v24  ;;  %8059 = vmatpush1.bf16.msra.mxu1 %v11325_v38  ;;  %v12959_v61 = vpop.f32.mrb[26].mxu1  ;;  %v891_v31 = vld [vmem:[#allocation6 + $0x14e0] sm:$0xff]  ;;  %v11539_v33 = vcombine.low %v819_v48, %v855_v4 }
 0x308   : > { %13725 = vst [vmem:[#allocation27_spill] sm:$0xff] %v12951_v19  ;;  %v12957_v47 = vpop.f32.mrb[27].mxu0  ;;  %13728 = vst [vmem:[#allocation30_spill] sm:$0xff] %v12959_v61  ;;  %8017 = vmatprep.subr.bf16.mxu0 %v11396_v10  ;;  %v12965_v37 = vpop.f32.mrb[27].mxu1  ;;  %8060 = vmatprep.subr.bf16.mxu1 %v11398_v43  ;;  %v856_v19 = vld [vmem:[#allocation6 + $0x13c8] sm:$0xff]  ;;  %v11540_v10 = vcombine.high %v819_v48, %v855_v4  ;;  %v11612_v38 = vcombine.high %v891_v31, %v927_v28  ;;  %v1071_v4 = vld [vmem:[#allocation6 + $0x1a80] sm:$0xff] }
 0x309   : > { %13727 = vst [vmem:[#allocation29_spill] sm:$0xff] %v12957_v47  ;;  %13729 = vst [vmem:[#allocation31_spill] sm:$0xff] %v12965_v37  ;;  %v11542_v18 = vcombine.high %v820_v57, %v856_v19  ;;  %v892_v61 = vld [vmem:[#allocation6 + $0x14e8] sm:$0xff]  ;;  %v11541_v47 = vcombine.low %v820_v57, %v856_v19  ;;  %v11611_v7 = vcombine.low %v891_v31, %v927_v28  ;;  %v1143_v28 = vld [vmem:[#allocation6 + $0x1cc0] sm:$0xff] }
 0x30a   : > { %v928_v43 = vld [vmem:[#allocation6 + $0x1608] sm:$0xff] }
 0x30b   : > { %8018 = vmatpush1.bf16.msra.mxu0 %v11395_v36  ;;  %8061 = vmatpush1.bf16.msra.mxu1 %v11397_v44  ;;  %v11614_v24 = vcombine.high %v892_v61, %v928_v43  ;;  %v963_v36 = vld [vmem:[#allocation6 + $0x1720] sm:$0xff]  ;;  %v1000_v44 = vld [vmem:[#allocation6 + $0x1848] sm:$0xff]  ;;  %v11613_v41 = vcombine.low %v892_v61, %v928_v43 }
 0x30c   : > { %8019 = vmatprep.subr.bf16.mxu0 %v11468_v62  ;;  %8062 = vmatprep.subr.bf16.mxu1 %v11470_v58  ;;  %v11684_v62 = vcombine.high %v963_v36, %v999_v52  ;;  %v11686_v58 = vcombine.high %v964_v59, %v1000_v44  ;;  %v1036_v48 = vld [vmem:[#allocation6 + $0x1968] sm:$0xff]  ;;  %v11683_v57 = vcombine.low %v963_v36, %v999_v52  ;;  %v1215_v36 = vld [vmem:[#allocation6 + $0x1f00] sm:$0xff] }
 0x30d   : > { %v11685_v19 = vcombine.low %v964_v59, %v1000_v44  ;;  %v1144_v31 = vld [vmem:[#allocation6 + $0x1cc8] sm:$0xff] }
 0x30e   : > { %v1180_v52 = vld [vmem:[#allocation6 + $0x1de8] sm:$0xff] }
 0x30f   : > { %8020 = vmatpush1.bf16.msra.mxu0 %v11467_v30  ;;  %8063 = vmatpush1.bf16.msra.mxu1 %v11469_v35  ;;  %v1035_v30 = vld [vmem:[#allocation6 + $0x1960] sm:$0xff]  ;;  %v1072_v35 = vld [vmem:[#allocation6 + $0x1a88] sm:$0xff] }
 0x310   : > { %8021 = vmatprep.subr.bf16.mxu0 %v11540_v10  ;;  %8064 = vmatprep.subr.bf16.mxu1 %v11542_v18  ;;  %v11756_v18 = vcombine.high %v1035_v30, %v1071_v4  ;;  %v11758_v10 = vcombine.high %v1036_v48, %v1072_v35  ;;  %v11755_v61 = vcombine.low %v1035_v30, %v1071_v4  ;;  %v1287_v30 = vld [vmem:[#allocation6 + $0x2140] sm:$0xff]  ;;  %v1252_v4 = vld [vmem:[#allocation6 + $0x2028] sm:$0xff] }
 0x313   : > { %8022 = vmatpush1.bf16.msra.mxu0 %v11539_v33  ;;  %8065 = vmatpush1.bf16.msra.mxu1 %v11541_v47  ;;  %v1107_v33 = vld [vmem:[#allocation6 + $0x1ba0] sm:$0xff]  ;;  %v1108_v47 = vld [vmem:[#allocation6 + $0x1ba8] sm:$0xff] }
 0x314   : > { %8023 = vmatprep.subr.bf16.mxu0 %v11612_v38  ;;  %8066 = vmatprep.subr.bf16.mxu1 %v11614_v24  ;;  %v11757_v24 = vcombine.low %v1036_v48, %v1072_v35  ;;  %v11828_v38 = vcombine.high %v1107_v33, %v1143_v28  ;;  %v11830_v43 = vcombine.high %v1108_v47, %v1144_v31 }
 0x315   : > { %v11827_v59 = vcombine.low %v1107_v33, %v1143_v28  ;;  %v11829_v44 = vcombine.low %v1108_v47, %v1144_v31  ;;  %v1359_v33 = vld [vmem:[#allocation6 + $0x2380] sm:$0xff]  ;;  %v1324_v28 = vld [vmem:[#allocation6 + $0x2268] sm:$0xff] }
 0x317   : > { %8024 = vmatpush1.bf16.msra.mxu0 %v11611_v7  ;;  %8067 = vmatpush1.bf16.msra.mxu1 %v11613_v41  ;;  %v1179_v7 = vld [vmem:[#allocation6 + $0x1de0] sm:$0xff]  ;;  %v1216_v41 = vld [vmem:[#allocation6 + $0x1f08] sm:$0xff] }
 0x318   : > { %8025 = vmatprep.subr.bf16.mxu0 %v11684_v62  ;;  %8068 = vmatprep.subr.bf16.mxu1 %v11686_v58  ;;  %v11900_v62 = vcombine.high %v1179_v7, %v1215_v36  ;;  %v11902_v58 = vcombine.high %v1180_v52, %v1216_v41  ;;  %v11899_v48 = vcombine.low %v1179_v7, %v1215_v36  ;;  %v281_v7 = vld [vmem:[#allocation6 + $0x1d0] sm:$0xff]  ;;  %v246_v36 = vld [vmem:[#allocation6 + $0xb8] sm:$0xff] }
 0x319   : > { %v11901_v35 = vcombine.low %v1180_v52, %v1216_v41 }
 0x31b   : > { %8026 = vmatpush1.bf16.msra.mxu0 %v11683_v57  ;;  %8069 = vmatpush1.bf16.msra.mxu1 %v11685_v19  ;;  %v1251_v57 = vld [vmem:[#allocation6 + $0x2020] sm:$0xff]  ;;  %v1288_v19 = vld [vmem:[#allocation6 + $0x2148] sm:$0xff] }
 0x31c   : > { %8027 = vmatprep.subr.bf16.mxu0 %v11756_v18  ;;  %8070 = vmatprep.subr.bf16.mxu1 %v11758_v10  ;;  %v11972_v18 = vcombine.high %v1251_v57, %v1287_v30  ;;  %v11974_v10 = vcombine.high %v1252_v4, %v1288_v19  ;;  %v11971_v47 = vcombine.low %v1251_v57, %v1287_v30  ;;  %v353_v57 = vld [vmem:[#allocation6 + $0x410] sm:$0xff]  ;;  %v318_v30 = vld [vmem:[#allocation6 + $0x2f8] sm:$0xff] }
 0x31d   : > { %v11973_v31 = vcombine.low %v1252_v4, %v1288_v19 }
 0x31f   : > { %8028 = vmatpush1.bf16.msra.mxu0 %v11755_v61  ;;  %8071 = vmatpush1.bf16.msra.mxu1 %v11757_v24  ;;  %v1323_v61 = vld [vmem:[#allocation6 + $0x2260] sm:$0xff]  ;;  %v1360_v24 = vld [vmem:[#allocation6 + $0x2388] sm:$0xff] }
 0x320   : > { %8029 = vmatprep.subr.bf16.mxu0 %v11828_v38  ;;  %8072 = vmatprep.subr.bf16.mxu1 %v11830_v43  ;;  %v12044_v38 = vcombine.high %v1323_v61, %v1359_v33  ;;  %v12046_v43 = vcombine.high %v1324_v28, %v1360_v24  ;;  %v12043_v52 = vcombine.low %v1323_v61, %v1359_v33  ;;  %v425_v61 = vld [vmem:[#allocation6 + $0x650] sm:$0xff]  ;;  %v390_v33 = vld [vmem:[#allocation6 + $0x538] sm:$0xff] }
 0x321   : > { %v12045_v41 = vcombine.low %v1324_v28, %v1360_v24  ;;  %v426_v28 = vld [vmem:[#allocation6 + $0x658] sm:$0xff] }
 0x323   : > { %8030 = vmatpush1.bf16.msra.mxu0 %v11827_v59  ;;  %8073 = vmatpush1.bf16.msra.mxu1 %v11829_v44  ;;  %v245_v59 = vld [vmem:[#allocation6 + $0xb0] sm:$0xff]  ;;  %v282_v44 = vld [vmem:[#allocation6 + $0x1d8] sm:$0xff] }
 0x324   : > { %8031 = vmatprep.subr.bf16.mxu0 %v11900_v62  ;;  %8074 = vmatprep.subr.bf16.mxu1 %v11902_v58  ;;  %v10968_v62 = vcombine.high %v245_v59, %v281_v7  ;;  %v10970_v58 = vcombine.high %v246_v36, %v282_v44  ;;  %v10967_v4 = vcombine.low %v245_v59, %v281_v7  ;;  %v461_v59 = vld [vmem:[#allocation6 + $0x770] sm:$0xff] }
 0x325   : > { %v10969_v19 = vcombine.low %v246_v36, %v282_v44  ;;  %v497_v7 = vld [vmem:[#allocation6 + $0x890] sm:$0xff]  ;;  %v462_v36 = vld [vmem:[#allocation6 + $0x778] sm:$0xff] }
 0x326   : > { %v498_v44 = vld [vmem:[#allocation6 + $0x898] sm:$0xff] }
 0x327   : > { %8032 = vmatpush1.bf16.msra.mxu0 %v11899_v48  ;;  %8075 = vmatpush1.bf16.msra.mxu1 %v11901_v35  ;;  %v317_v48 = vld [vmem:[#allocation6 + $0x2f0] sm:$0xff]  ;;  %v354_v35 = vld [vmem:[#allocation6 + $0x418] sm:$0xff] }
 0x328   : > { %8033 = vmatprep.subr.bf16.mxu0 %v11972_v18  ;;  %8076 = vmatprep.subr.bf16.mxu1 %v11974_v10  ;;  %v11040_v18 = vcombine.high %v317_v48, %v353_v57  ;;  %v11042_v10 = vcombine.high %v318_v30, %v354_v35  ;;  %v11039_v24 = vcombine.low %v317_v48, %v353_v57  ;;  %v533_v48 = vld [vmem:[#allocation6 + $0x9b0] sm:$0xff] }
 0x329   : > { %v569_v57 = vld [vmem:[#allocation6 + $0xad0] sm:$0xff] }
 0x32b   : > { %8034 = vmatpush1.bf16.msra.mxu0 %v11971_v47  ;;  %8077 = vmatpush1.bf16.msra.mxu1 %v11973_v31  ;;  %v389_v47 = vld [vmem:[#allocation6 + $0x530] sm:$0xff]  ;;  %v11041_v31 = vcombine.low %v318_v30, %v354_v35  ;;  %v534_v30 = vld [vmem:[#allocation6 + $0x9b8] sm:$0xff] }
 0x32c   : > { %8035 = vmatprep.subr.bf16.mxu0 %v12044_v38  ;;  %8078 = vmatprep.subr.bf16.mxu1 %v12046_v43  ;;  %v11112_v38 = vcombine.high %v389_v47, %v425_v61  ;;  %v11114_v43 = vcombine.high %v390_v33, %v426_v28  ;;  %v570_v35 = vld [vmem:[#allocation6 + $0xad8] sm:$0xff] }
 0x32f   : > { %8036 = vmatpush1.bf16.msra.mxu0 %v12043_v52  ;;  %8079 = vmatpush1.bf16.msra.mxu1 %v12045_v41  ;;  %v11111_v52 = vcombine.low %v389_v47, %v425_v61  ;;  %v11113_v41 = vcombine.low %v390_v33, %v426_v28  ;;  %v641_v47 = vld [vmem:[#allocation6 + $0xd10] sm:$0xff]  ;;  %v606_v61 = vld [vmem:[#allocation6 + $0xbf8] sm:$0xff]  ;;  %v11255_v33 = vcombine.low %v533_v48, %v569_v57 }
 0x330   : > { %8091 = vmatprep.subr.bf16.mxu0 %v10968_v62  ;;  %8134 = vmatprep.subr.bf16.mxu1 %v10970_v58  ;;  %v11184_v62 = vcombine.high %v461_v59, %v497_v7  ;;  %v11186_v58 = vcombine.high %v462_v36, %v498_v44  ;;  %v11257_v28 = vcombine.low %v534_v30, %v570_v35 }
 0x332   : > { %8038 = vmatmul.mubr.bf16.vlgmr.msra.gmra.mrb[40].mxu0 %v12939_v39  ;;  %8081 = vmatmul.mubr.bf16.vlgmr.msra.gmra.mrb[40].mxu1 %v12939_v39 }
 0x333   : > { %8092 = vmatpush1.bf16.msra.mxu0 %v10967_v4  ;;  %8135 = vmatpush1.bf16.msra.mxu1 %v10969_v19  ;;  %v11183_v4 = vcombine.low %v461_v59, %v497_v7  ;;  %v11185_v19 = vcombine.low %v462_v36, %v498_v44  ;;  %v713_v59 = vld [vmem:[#allocation6 + $0xf50] sm:$0xff]  ;;  %v678_v7 = vld [vmem:[#allocation6 + $0xe38] sm:$0xff] }
 0x334   : > { %8093 = vmatprep.subr.bf16.mxu0 %v11040_v18  ;;  %8136 = vmatprep.subr.bf16.mxu1 %v11042_v10  ;;  %v11256_v18 = vcombine.high %v533_v48, %v569_v57  ;;  %v605_v10 = vld [vmem:[#allocation6 + $0xbf0] sm:$0xff] }
 0x335   : > { %8123 = vmatprep.mubr.bf16.mxu0 %v12910_v51  ;;  %8166 = vmatprep.mubr.bf16.mxu1 %v12910_v51  ;;  %v11258_v51 = vcombine.high %v534_v30, %v570_v35  ;;  %v11327_v36 = vcombine.low %v605_v10, %v641_v47  ;;  %v749_v48 = vld [vmem:[#allocation6 + $0x1070] sm:$0xff] }
 0x336   : > { %v785_v57 = vld [vmem:[#allocation6 + $0x1190] sm:$0xff] }
 0x337   : > { %8094 = vmatpush1.bf16.msra.mxu0 %v11039_v24  ;;  %8137 = vmatpush1.bf16.msra.mxu1 %v11041_v31  ;;  %v642_v24 = vld [vmem:[#allocation6 + $0xd18] sm:$0xff]  ;;  %v11328_v31 = vcombine.high %v605_v10, %v641_v47  ;;  %v857_v47 = vld [vmem:[#allocation6 + $0x13d0] sm:$0xff] }
 0x338   : > { %8095 = vmatprep.subr.bf16.mxu0 %v11112_v38  ;;  %8138 = vmatprep.subr.bf16.mxu1 %v11114_v43  ;;  %v11330_v38 = vcombine.high %v606_v61, %v642_v24  ;;  %v677_v43 = vld [vmem:[#allocation6 + $0xe30] sm:$0xff]  ;;  %v11329_v44 = vcombine.low %v606_v61, %v642_v24 }
 0x339   : > { %v11399_v10 = vcombine.low %v677_v43, %v713_v59 }
 0x33b   : > { %8096 = vmatpush1.bf16.msra.mxu0 %v11111_v52  ;;  %8139 = vmatpush1.bf16.msra.mxu1 %v11113_v41  ;;  %v714_v52 = vld [vmem:[#allocation6 + $0xf58] sm:$0xff]  ;;  %v11400_v41 = vcombine.high %v677_v43, %v713_v59  ;;  %v821_v59 = vld [vmem:[#allocation6 + $0x12b0] sm:$0xff] }
 0x33c   : > { %8097 = vmatprep.subr.bf16.mxu0 %v11184_v62  ;;  %8140 = vmatprep.subr.bf16.mxu1 %v11186_v58  ;;  %v11402_v58 = vcombine.high %v678_v7, %v714_v52 }
 0x33f   : > { %8098 = vmatpush1.bf16.msra.mxu0 %v11183_v4  ;;  %8141 = vmatpush1.bf16.msra.mxu1 %v11185_v19  ;;  %v750_v4 = vld [vmem:[#allocation6 + $0x1078] sm:$0xff] }
 0x340   : > { %8099 = vmatprep.subr.bf16.mxu0 %v11256_v18  ;;  %8142 = vmatprep.subr.bf16.mxu1 %v11258_v51  ;;  %v786_v19 = vld [vmem:[#allocation6 + $0x1198] sm:$0xff] }
 0x341   : > { %v11474_v43 = vcombine.high %v750_v4, %v786_v19 }
 0x343   : > { %8100 = vmatpush1.bf16.msra.mxu0 %v11255_v33  ;;  %8143 = vmatpush1.bf16.msra.mxu1 %v11257_v28  ;;  %v11401_v33 = vcombine.low %v678_v7, %v714_v52  ;;  %v11472_v28 = vcombine.high %v749_v48, %v785_v57  ;;  %v11471_v7 = vcombine.low %v749_v48, %v785_v57  ;;  %v1001_v48 = vld [vmem:[#allocation6 + $0x1850] sm:$0xff]  ;;  %v966_v57 = vld [vmem:[#allocation6 + $0x1738] sm:$0xff] }
 0x344   : > { %8101 = vmatprep.subr.bf16.mxu0 %v11328_v31  ;;  %8144 = vmatprep.subr.bf16.mxu1 %v11330_v38  ;;  %v11473_v52 = vcombine.low %v750_v4, %v786_v19  ;;  %v893_v38 = vld [vmem:[#allocation6 + $0x14f0] sm:$0xff] }
 0x345   : > { %v12973_v62 = vpop.f32.mrb[28].mxu0  ;;  %v12977_v35 = vpop.f32.mrb[28].mxu1 }
 0x346   : > { %13730 = vst [vmem:[#allocation32_spill] sm:$0xff] %v12973_v62  ;;  %v12975_v30 = vpop.f32.mrb[29].mxu0  ;;  %13732 = vst [vmem:[#allocation34_spill] sm:$0xff] %v12977_v35  ;;  %v12981_v51 = vpop.f32.mrb[29].mxu1  ;;  %v822_v62 = vld [vmem:[#allocation6 + $0x12b8] sm:$0xff]  ;;  %v929_v35 = vld [vmem:[#allocation6 + $0x1610] sm:$0xff] }
 0x347   : > { %13731 = vst [vmem:[#allocation33_spill] sm:$0xff] %v12975_v30  ;;  %v12979_v18 = vpop.f32.mrb[30].mxu0  ;;  %8102 = vmatpush1.bf16.msra.mxu0 %v11327_v36  ;;  %13734 = vst [vmem:[#allocation36_spill] sm:$0xff] %v12981_v51  ;;  %8145 = vmatpush1.bf16.msra.mxu1 %v11329_v44  ;;  %v12987_v24 = vpop.f32.mrb[30].mxu1  ;;  %v11543_v30 = vcombine.low %v821_v59, %v857_v47  ;;  %v11616_v44 = vcombine.high %v893_v38, %v929_v35 }
 0x348   : > { %13733 = vst [vmem:[#allocation35_spill] sm:$0xff] %v12979_v18  ;;  %v12985_v61 = vpop.f32.mrb[31].mxu0  ;;  %13736 = vst [vmem:[#allocation38_spill] sm:$0xff] %v12987_v24  ;;  %8103 = vmatprep.subr.bf16.mxu0 %v11400_v41  ;;  %v12993_v36 = vpop.f32.mrb[31].mxu1  ;;  %8146 = vmatprep.subr.bf16.mxu1 %v11402_v58  ;;  %v858_v18 = vld [vmem:[#allocation6 + $0x13d8] sm:$0xff]  ;;  %v11544_v41 = vcombine.high %v821_v59, %v857_v47  ;;  %v11615_v4 = vcombine.low %v893_v38, %v929_v35  ;;  %v1073_v47 = vld [vmem:[#allocation6 + $0x1a90] sm:$0xff] }
 0x349   : > { %13735 = vst [vmem:[#allocation37_spill] sm:$0xff] %v12985_v61  ;;  %13737 = vst [vmem:[#allocation39_spill] sm:$0xff] %v12993_v36  ;;  %v11546_v31 = vcombine.high %v822_v62, %v858_v18  ;;  %v894_v24 = vld [vmem:[#allocation6 + $0x14f8] sm:$0xff]  ;;  %v11545_v61 = vcombine.low %v822_v62, %v858_v18  ;;  %v1145_v35 = vld [vmem:[#allocation6 + $0x1cd0] sm:$0xff] }
 0x34a   : > { %v930_v58 = vld [vmem:[#allocation6 + $0x1618] sm:$0xff] }
 0x34b   : > { %8104 = vmatpush1.bf16.msra.mxu0 %v11399_v10  ;;  %8147 = vmatpush1.bf16.msra.mxu1 %v11401_v33  ;;  %v11618_v51 = vcombine.high %v894_v24, %v930_v58  ;;  %v965_v10 = vld [vmem:[#allocation6 + $0x1730] sm:$0xff]  ;;  %v1002_v33 = vld [vmem:[#allocation6 + $0x1858] sm:$0xff]  ;;  %v11617_v19 = vcombine.low %v894_v24, %v930_v58 }
 0x34c   : > { %8105 = vmatprep.subr.bf16.mxu0 %v11472_v28  ;;  %8148 = vmatprep.subr.bf16.mxu1 %v11474_v43  ;;  %v11688_v28 = vcombine.high %v965_v10, %v1001_v48  ;;  %v11690_v43 = vcombine.high %v966_v57, %v1002_v33  ;;  %v1038_v59 = vld [vmem:[#allocation6 + $0x1978] sm:$0xff]  ;;  %v11687_v62 = vcombine.low %v965_v10, %v1001_v48  ;;  %v1217_v10 = vld [vmem:[#allocation6 + $0x1f10] sm:$0xff] }
 0x34d   : > { %v11689_v18 = vcombine.low %v966_v57, %v1002_v33  ;;  %v1146_v38 = vld [vmem:[#allocation6 + $0x1cd8] sm:$0xff] }
 0x34e   : > { %v1182_v48 = vld [vmem:[#allocation6 + $0x1df8] sm:$0xff] }
 0x34f   : > { %8106 = vmatpush1.bf16.msra.mxu0 %v11471_v7  ;;  %8149 = vmatpush1.bf16.msra.mxu1 %v11473_v52  ;;  %v1037_v7 = vld [vmem:[#allocation6 + $0x1970] sm:$0xff]  ;;  %v1074_v52 = vld [vmem:[#allocation6 + $0x1a98] sm:$0xff] }
 0x350   : > { %8107 = vmatprep.subr.bf16.mxu0 %v11544_v41  ;;  %8150 = vmatprep.subr.bf16.mxu1 %v11546_v31  ;;  %v11760_v31 = vcombine.high %v1037_v7, %v1073_v47  ;;  %v11762_v41 = vcombine.high %v1038_v59, %v1074_v52  ;;  %v11759_v24 = vcombine.low %v1037_v7, %v1073_v47  ;;  %v1289_v7 = vld [vmem:[#allocation6 + $0x2150] sm:$0xff]  ;;  %v1254_v47 = vld [vmem:[#allocation6 + $0x2038] sm:$0xff] }
 0x353   : > { %8108 = vmatpush1.bf16.msra.mxu0 %v11543_v30  ;;  %8151 = vmatpush1.bf16.msra.mxu1 %v11545_v61  ;;  %v1109_v30 = vld [vmem:[#allocation6 + $0x1bb0] sm:$0xff]  ;;  %v1110_v61 = vld [vmem:[#allocation6 + $0x1bb8] sm:$0xff] }
 0x354   : > { %8109 = vmatprep.subr.bf16.mxu0 %v11616_v44  ;;  %8152 = vmatprep.subr.bf16.mxu1 %v11618_v51  ;;  %v11761_v51 = vcombine.low %v1038_v59, %v1074_v52  ;;  %v11832_v44 = vcombine.high %v1109_v30, %v1145_v35  ;;  %v11834_v58 = vcombine.high %v1110_v61, %v1146_v38 }
 0x355   : > { %v11831_v57 = vcombine.low %v1109_v30, %v1145_v35  ;;  %v11833_v33 = vcombine.low %v1110_v61, %v1146_v38  ;;  %v1361_v30 = vld [vmem:[#allocation6 + $0x2390] sm:$0xff]  ;;  %v1326_v35 = vld [vmem:[#allocation6 + $0x2278] sm:$0xff] }
 0x357   : > { %8110 = vmatpush1.bf16.msra.mxu0 %v11615_v4  ;;  %8153 = vmatpush1.bf16.msra.mxu1 %v11617_v19  ;;  %v1181_v4 = vld [vmem:[#allocation6 + $0x1df0] sm:$0xff]  ;;  %v1218_v19 = vld [vmem:[#allocation6 + $0x1f18] sm:$0xff] }
 0x358   : > { %8111 = vmatprep.subr.bf16.mxu0 %v11688_v28  ;;  %8154 = vmatprep.subr.bf16.mxu1 %v11690_v43  ;;  %v11904_v28 = vcombine.high %v1181_v4, %v1217_v10  ;;  %v11906_v43 = vcombine.high %v1182_v48, %v1218_v19  ;;  %v11903_v59 = vcombine.low %v1181_v4, %v1217_v10  ;;  %v283_v4 = vld [vmem:[#allocation6 + $0x1e0] sm:$0xff]  ;;  %v248_v10 = vld [vmem:[#allocation6 + $0xc8] sm:$0xff] }
 0x359   : > { %v11905_v52 = vcombine.low %v1182_v48, %v1218_v19 }
 0x35b   : > { %8112 = vmatpush1.bf16.msra.mxu0 %v11687_v62  ;;  %8155 = vmatpush1.bf16.msra.mxu1 %v11689_v18  ;;  %v1253_v62 = vld [vmem:[#allocation6 + $0x2030] sm:$0xff]  ;;  %v1290_v18 = vld [vmem:[#allocation6 + $0x2158] sm:$0xff] }
 0x35c   : > { %8113 = vmatprep.subr.bf16.mxu0 %v11760_v31  ;;  %8156 = vmatprep.subr.bf16.mxu1 %v11762_v41  ;;  %v11976_v31 = vcombine.high %v1253_v62, %v1289_v7  ;;  %v11978_v41 = vcombine.high %v1254_v47, %v1290_v18  ;;  %v11975_v61 = vcombine.low %v1253_v62, %v1289_v7  ;;  %v355_v62 = vld [vmem:[#allocation6 + $0x420] sm:$0xff]  ;;  %v320_v7 = vld [vmem:[#allocation6 + $0x308] sm:$0xff] }
 0x35d   : > { %v11977_v38 = vcombine.low %v1254_v47, %v1290_v18 }
 0x35f   : > { %8114 = vmatpush1.bf16.msra.mxu0 %v11759_v24  ;;  %8157 = vmatpush1.bf16.msra.mxu1 %v11761_v51  ;;  %v1325_v24 = vld [vmem:[#allocation6 + $0x2270] sm:$0xff]  ;;  %v1362_v51 = vld [vmem:[#allocation6 + $0x2398] sm:$0xff] }
 0x360   : > { %8115 = vmatprep.subr.bf16.mxu0 %v11832_v44  ;;  %8158 = vmatprep.subr.bf16.mxu1 %v11834_v58  ;;  %v12048_v44 = vcombine.high %v1325_v24, %v1361_v30  ;;  %v12050_v58 = vcombine.high %v1326_v35, %v1362_v51  ;;  %v12047_v48 = vcombine.low %v1325_v24, %v1361_v30  ;;  %v427_v24 = vld [vmem:[#allocation6 + $0x660] sm:$0xff]  ;;  %v392_v30 = vld [vmem:[#allocation6 + $0x548] sm:$0xff] }
 0x361   : > { %v12049_v19 = vcombine.low %v1326_v35, %v1362_v51  ;;  %v428_v35 = vld [vmem:[#allocation6 + $0x668] sm:$0xff] }
 0x363   : > { %8116 = vmatpush1.bf16.msra.mxu0 %v11831_v57  ;;  %8159 = vmatpush1.bf16.msra.mxu1 %v11833_v33  ;;  %v247_v57 = vld [vmem:[#allocation6 + $0xc0] sm:$0xff]  ;;  %v284_v33 = vld [vmem:[#allocation6 + $0x1e8] sm:$0xff] }
 0x364   : > { %8117 = vmatprep.subr.bf16.mxu0 %v11904_v28  ;;  %8160 = vmatprep.subr.bf16.mxu1 %v11906_v43  ;;  %v10972_v28 = vcombine.high %v247_v57, %v283_v4  ;;  %v10974_v43 = vcombine.high %v248_v10, %v284_v33  ;;  %v10971_v47 = vcombine.low %v247_v57, %v283_v4  ;;  %v463_v57 = vld [vmem:[#allocation6 + $0x780] sm:$0xff] }
 0x365   : > { %v10973_v18 = vcombine.low %v248_v10, %v284_v33  ;;  %v499_v4 = vld [vmem:[#allocation6 + $0x8a0] sm:$0xff]  ;;  %v464_v33 = vld [vmem:[#allocation6 + $0x788] sm:$0xff] }
 0x366   : > { %v13000_v10 = vld [vmem:[%s12725_s5 + $0x4] ss:$8 sps:$4 sm:$0xff]  }
 0x367   : > { %8118 = vmatpush1.bf16.msra.mxu0 %v11903_v59  ;;  %8161 = vmatpush1.bf16.msra.mxu1 %v11905_v52  ;;  %v319_v59 = vld [vmem:[#allocation6 + $0x300] sm:$0xff]  ;;  %v356_v52 = vld [vmem:[#allocation6 + $0x428] sm:$0xff] }
 0x368   : > { %8119 = vmatprep.subr.bf16.mxu0 %v11976_v31  ;;  %8162 = vmatprep.subr.bf16.mxu1 %v11978_v41  ;;  %v11044_v31 = vcombine.high %v319_v59, %v355_v62  ;;  %v11046_v41 = vcombine.high %v320_v7, %v356_v52  ;;  %v11043_v51 = vcombine.low %v319_v59, %v355_v62  ;;  %v535_v59 = vld [vmem:[#allocation6 + $0x9c0] sm:$0xff] }
 0x369   : > { %v571_v62 = vld [vmem:[#allocation6 + $0xae0] sm:$0xff] }
 0x36b   : > { %8120 = vmatpush1.bf16.msra.mxu0 %v11975_v61  ;;  %8163 = vmatpush1.bf16.msra.mxu1 %v11977_v38  ;;  %v391_v61 = vld [vmem:[#allocation6 + $0x540] sm:$0xff]  ;;  %v11045_v38 = vcombine.low %v320_v7, %v356_v52  ;;  %v536_v7 = vld [vmem:[#allocation6 + $0x9c8] sm:$0xff] }
 0x36c   : > { %8121 = vmatprep.subr.bf16.mxu0 %v12048_v44  ;;  %8164 = vmatprep.subr.bf16.mxu1 %v12050_v58  ;;  %v11116_v44 = vcombine.high %v391_v61, %v427_v24  ;;  %v11118_v58 = vcombine.high %v392_v30, %v428_v35  ;;  %v572_v52 = vld [vmem:[#allocation6 + $0xae8] sm:$0xff] }
 0x36f   : > { %8122 = vmatpush1.bf16.msra.mxu0 %v12047_v48  ;;  %8165 = vmatpush1.bf16.msra.mxu1 %v12049_v19  ;;  %v500_v48 = vld [vmem:[#allocation6 + $0x8a8] sm:$0xff]  ;;  %v11117_v19 = vcombine.low %v392_v30, %v428_v35  ;;  %v11259_v30 = vcombine.low %v535_v59, %v571_v62  ;;  %v11261_v35 = vcombine.low %v536_v7, %v572_v52 }
 0x370   : > { %8177 = vmatprep.subr.bf16.mxu0 %v10972_v28  ;;  %8220 = vmatprep.subr.bf16.mxu1 %v10974_v43  ;;  %v11188_v28 = vcombine.high %v463_v57, %v499_v4  ;;  %v11190_v43 = vcombine.high %v464_v33, %v500_v48 }
 0x372   : > { %8124 = vmatmul.mubr.bf16.vlgmr.msra.gmra.mrb[44].mxu0 %v12939_v39  ;;  %8167 = vmatmul.mubr.bf16.vlgmr.msra.gmra.mrb[44].mxu1 %v12939_v39  ;;  %v11115_v39 = vcombine.low %v391_v61, %v427_v24  ;;  %v643_v61 = vld [vmem:[#allocation6 + $0xd20] sm:$0xff]  ;;  %v608_v24 = vld [vmem:[#allocation6 + $0xc08] sm:$0xff] }
 0x373   : > { %8178 = vmatpush1.bf16.msra.mxu0 %v10971_v47  ;;  %8221 = vmatpush1.bf16.msra.mxu1 %v10973_v18  ;;  %v11187_v47 = vcombine.low %v463_v57, %v499_v4  ;;  %v11189_v18 = vcombine.low %v464_v33, %v500_v48  ;;  %v715_v57 = vld [vmem:[#allocation6 + $0xf60] sm:$0xff]  ;;  %v680_v4 = vld [vmem:[#allocation6 + $0xe48] sm:$0xff] }
 0x374   : > { %8179 = vmatprep.subr.bf16.mxu0 %v11044_v31  ;;  %8222 = vmatprep.subr.bf16.mxu1 %v11046_v41  ;;  %v11260_v31 = vcombine.high %v535_v59, %v571_v62  ;;  %v11262_v41 = vcombine.high %v536_v7, %v572_v52  ;;  %v751_v62 = vld [vmem:[#allocation6 + $0x1080] sm:$0xff] }
 0x375   : > { %8209 = vmatprep.mubr.bf16.mxu0 %v13000_v10  ;;  %8252 = vmatprep.mubr.bf16.mxu1 %v13000_v10 }
 0x377   : > { %8180 = vmatpush1.bf16.msra.mxu0 %v11043_v51  ;;  %8223 = vmatpush1.bf16.msra.mxu1 %v11045_v38  ;;  %v607_v51 = vld [vmem:[#allocation6 + $0xc00] sm:$0xff]  ;;  %v644_v38 = vld [vmem:[#allocation6 + $0xd28] sm:$0xff] }
 0x378   : > { %8181 = vmatprep.subr.bf16.mxu0 %v11116_v44  ;;  %8224 = vmatprep.subr.bf16.mxu1 %v11118_v58  ;;  %v11332_v44 = vcombine.high %v607_v51, %v643_v61  ;;  %v11334_v58 = vcombine.high %v608_v24, %v644_v38  ;;  %v11331_v33 = vcombine.low %v607_v51, %v643_v61 }
 0x379   : > { %v11333_v48 = vcombine.low %v608_v24, %v644_v38  ;;  %v859_v24 = vld [vmem:[#allocation6 + $0x13e0] sm:$0xff] }
 0x37b   : > { %8182 = vmatpush1.bf16.msra.mxu0 %v11115_v39  ;;  %8225 = vmatpush1.bf16.msra.mxu1 %v11117_v19  ;;  %v679_v39 = vld [vmem:[#allocation6 + $0xe40] sm:$0xff]  ;;  %v716_v19 = vld [vmem:[#allocation6 + $0xf68] sm:$0xff] }
 0x37c   : > { %8183 = vmatprep.subr.bf16.mxu0 %v11188_v28  ;;  %8226 = vmatprep.subr.bf16.mxu1 %v11190_v43  ;;  %v11404_v28 = vcombine.high %v679_v39, %v715_v57  ;;  %v11406_v59 = vcombine.high %v680_v4, %v716_v19  ;;  %v11403_v61 = vcombine.low %v679_v39, %v715_v57  ;;  %v823_v57 = vld [vmem:[#allocation6 + $0x12c0] sm:$0xff] }
 0x37f   : > { %8184 = vmatpush1.bf16.msra.mxu0 %v11187_v47  ;;  %8227 = vmatpush1.bf16.msra.mxu1 %v11189_v18  ;;  %v787_v47 = vld [vmem:[#allocation6 + $0x11a0] sm:$0xff]  ;;  %v752_v18 = vld [vmem:[#allocation6 + $0x1088] sm:$0xff] }
 0x380   : > { %8185 = vmatprep.subr.bf16.mxu0 %v11260_v31  ;;  %8228 = vmatprep.subr.bf16.mxu1 %v11262_v41  ;;  %v788_v31 = vld [vmem:[#allocation6 + $0x11a8] sm:$0xff] }
 0x381   : > { %v11478_v39 = vcombine.high %v752_v18, %v788_v31 }
 0x383   : > { %8186 = vmatpush1.bf16.msra.mxu0 %v11259_v30  ;;  %8229 = vmatpush1.bf16.msra.mxu1 %v11261_v35  ;;  %v11405_v35 = vcombine.low %v680_v4, %v716_v19  ;;  %v11475_v4 = vcombine.low %v751_v62, %v787_v47  ;;  %v11477_v19 = vcombine.low %v752_v18, %v788_v31 }
 0x384   : > { %8187 = vmatprep.subr.bf16.mxu0 %v11332_v44  ;;  %8230 = vmatprep.subr.bf16.mxu1 %v11334_v58  ;;  %v11476_v44 = vcombine.high %v751_v62, %v787_v47  ;;  %v1003_v62 = vld [vmem:[#allocation6 + $0x1860] sm:$0xff]  ;;  %v968_v47 = vld [vmem:[#allocation6 + $0x1748] sm:$0xff] }
 0x385   : > { %v13004_v43 = vpop.f32.mrb[32].mxu0  ;;  %v13008_v52 = vpop.f32.mrb[32].mxu1 }
 0x386   : > { %13738 = vst [vmem:[#allocation40_spill] sm:$0xff] %v13004_v43  ;;  %v13006_v7 = vpop.f32.mrb[33].mxu0  ;;  %13740 = vst [vmem:[#allocation42_spill] sm:$0xff] %v13008_v52  ;;  %v13012_v51 = vpop.f32.mrb[33].mxu1  ;;  %v824_v43 = vld [vmem:[#allocation6 + $0x12c8] sm:$0xff]  ;;  %v931_v52 = vld [vmem:[#allocation6 + $0x1620] sm:$0xff] }
 0x387   : > { %13739 = vst [vmem:[#allocation41_spill] sm:$0xff] %v13006_v7  ;;  %v13010_v41 = vpop.f32.mrb[34].mxu0  ;;  %8188 = vmatpush1.bf16.msra.mxu0 %v11331_v33  ;;  %13742 = vst [vmem:[#allocation44_spill] sm:$0xff] %v13012_v51  ;;  %8231 = vmatpush1.bf16.msra.mxu1 %v11333_v48  ;;  %v13018_v30 = vpop.f32.mrb[34].mxu1  ;;  %v895_v33 = vld [vmem:[#allocation6 + $0x1500] sm:$0xff]  ;;  %v11547_v7 = vcombine.low %v823_v57, %v859_v24 }
 0x388   : > { %13741 = vst [vmem:[#allocation43_spill] sm:$0xff] %v13010_v41  ;;  %v13016_v38 = vpop.f32.mrb[35].mxu0  ;;  %13744 = vst [vmem:[#allocation46_spill] sm:$0xff] %v13018_v30  ;;  %8189 = vmatprep.subr.bf16.mxu0 %v11404_v28  ;;  %v13024_v36 = vpop.f32.mrb[35].mxu1  ;;  %8232 = vmatprep.subr.bf16.mxu1 %v11406_v59  ;;  %v860_v41 = vld [vmem:[#allocation6 + $0x13e8] sm:$0xff]  ;;  %v11548_v28 = vcombine.high %v823_v57, %v859_v24  ;;  %v11620_v48 = vcombine.high %v895_v33, %v931_v52  ;;  %v1075_v24 = vld [vmem:[#allocation6 + $0x1aa0] sm:$0xff] }
 0x389   : > { %13743 = vst [vmem:[#allocation45_spill] sm:$0xff] %v13016_v38  ;;  %13745 = vst [vmem:[#allocation47_spill] sm:$0xff] %v13024_v36  ;;  %v11550_v58 = vcombine.high %v824_v43, %v860_v41  ;;  %v896_v30 = vld [vmem:[#allocation6 + $0x1508] sm:$0xff]  ;;  %v11549_v38 = vcombine.low %v824_v43, %v860_v41  ;;  %v11619_v18 = vcombine.low %v895_v33, %v931_v52  ;;  %v1147_v52 = vld [vmem:[#allocation6 + $0x1ce0] sm:$0xff] }
 0x38a   : > { %v932_v59 = vld [vmem:[#allocation6 + $0x1628] sm:$0xff] }
 0x38b   : > { %8190 = vmatpush1.bf16.msra.mxu0 %v11403_v61  ;;  %8233 = vmatpush1.bf16.msra.mxu1 %v11405_v35  ;;  %v11622_v51 = vcombine.high %v896_v30, %v932_v59  ;;  %v967_v61 = vld [vmem:[#allocation6 + $0x1740] sm:$0xff]  ;;  %v1004_v35 = vld [vmem:[#allocation6 + $0x1868] sm:$0xff]  ;;  %v11621_v31 = vcombine.low %v896_v30, %v932_v59 }
 0x38c   : > { %8191 = vmatprep.subr.bf16.mxu0 %v11476_v44  ;;  %8234 = vmatprep.subr.bf16.mxu1 %v11478_v39  ;;  %v11692_v44 = vcombine.high %v967_v61, %v1003_v62  ;;  %v11694_v39 = vcombine.high %v968_v47, %v1004_v35  ;;  %v1040_v57 = vld [vmem:[#allocation6 + $0x1988] sm:$0xff]  ;;  %v11691_v43 = vcombine.low %v967_v61, %v1003_v62  ;;  %v1219_v61 = vld [vmem:[#allocation6 + $0x1f20] sm:$0xff] }
 0x38d   : > { %v11693_v41 = vcombine.low %v968_v47, %v1004_v35  ;;  %v1148_v33 = vld [vmem:[#allocation6 + $0x1ce8] sm:$0xff] }
 0x38e   : > { %v1184_v62 = vld [vmem:[#allocation6 + $0x1e08] sm:$0xff] }
 0x38f   : > { %8192 = vmatpush1.bf16.msra.mxu0 %v11475_v4  ;;  %8235 = vmatpush1.bf16.msra.mxu1 %v11477_v19  ;;  %v1039_v4 = vld [vmem:[#allocation6 + $0x1980] sm:$0xff]  ;;  %v1076_v19 = vld [vmem:[#allocation6 + $0x1aa8] sm:$0xff] }
 0x390   : > { %8193 = vmatprep.subr.bf16.mxu0 %v11548_v28  ;;  %8236 = vmatprep.subr.bf16.mxu1 %v11550_v58  ;;  %v11764_v58 = vcombine.high %v1039_v4, %v1075_v24  ;;  %v11766_v28 = vcombine.high %v1040_v57, %v1076_v19  ;;  %v11763_v30 = vcombine.low %v1039_v4, %v1075_v24  ;;  %v1291_v4 = vld [vmem:[#allocation6 + $0x2160] sm:$0xff]  ;;  %v1256_v24 = vld [vmem:[#allocation6 + $0x2048] sm:$0xff] }
 0x393   : > { %8194 = vmatpush1.bf16.msra.mxu0 %v11547_v7  ;;  %8237 = vmatpush1.bf16.msra.mxu1 %v11549_v38  ;;  %v1111_v7 = vld [vmem:[#allocation6 + $0x1bc0] sm:$0xff]  ;;  %v1112_v38 = vld [vmem:[#allocation6 + $0x1bc8] sm:$0xff] }
 0x394   : > { %8195 = vmatprep.subr.bf16.mxu0 %v11620_v48  ;;  %8238 = vmatprep.subr.bf16.mxu1 %v11622_v51  ;;  %v11765_v51 = vcombine.low %v1040_v57, %v1076_v19  ;;  %v11836_v48 = vcombine.high %v1111_v7, %v1147_v52  ;;  %v11838_v59 = vcombine.high %v1112_v38, %v1148_v33 }
 0x395   : > { %v11835_v47 = vcombine.low %v1111_v7, %v1147_v52  ;;  %v11837_v35 = vcombine.low %v1112_v38, %v1148_v33  ;;  %v1363_v7 = vld [vmem:[#allocation6 + $0x23a0] sm:$0xff]  ;;  %v1328_v52 = vld [vmem:[#allocation6 + $0x2288] sm:$0xff] }
 0x397   : > { %8196 = vmatpush1.bf16.msra.mxu0 %v11619_v18  ;;  %8239 = vmatpush1.bf16.msra.mxu1 %v11621_v31  ;;  %v1183_v18 = vld [vmem:[#allocation6 + $0x1e00] sm:$0xff]  ;;  %v1220_v31 = vld [vmem:[#allocation6 + $0x1f28] sm:$0xff] }
 0x398   : > { %8197 = vmatprep.subr.bf16.mxu0 %v11692_v44  ;;  %8240 = vmatprep.subr.bf16.mxu1 %v11694_v39  ;;  %v11908_v44 = vcombine.high %v1183_v18, %v1219_v61  ;;  %v11910_v39 = vcombine.high %v1184_v62, %v1220_v31  ;;  %v11907_v57 = vcombine.low %v1183_v18, %v1219_v61  ;;  %v285_v18 = vld [vmem:[#allocation6 + $0x1f0] sm:$0xff]  ;;  %v250_v61 = vld [vmem:[#allocation6 + $0xd8] sm:$0xff] }
 0x399   : > { %v11909_v19 = vcombine.low %v1184_v62, %v1220_v31 }
 0x39b   : > { %8198 = vmatpush1.bf16.msra.mxu0 %v11691_v43  ;;  %8241 = vmatpush1.bf16.msra.mxu1 %v11693_v41  ;;  %v1255_v43 = vld [vmem:[#allocation6 + $0x2040] sm:$0xff]  ;;  %v1292_v41 = vld [vmem:[#allocation6 + $0x2168] sm:$0xff] }
 0x39c   : > { %8199 = vmatprep.subr.bf16.mxu0 %v11764_v58  ;;  %8242 = vmatprep.subr.bf16.mxu1 %v11766_v28  ;;  %v11980_v58 = vcombine.high %v1255_v43, %v1291_v4  ;;  %v11982_v28 = vcombine.high %v1256_v24, %v1292_v41  ;;  %v11979_v38 = vcombine.low %v1255_v43, %v1291_v4  ;;  %v321_v43 = vld [vmem:[#allocation6 + $0x310] sm:$0xff] }
 0x39d   : > { %v11981_v33 = vcombine.low %v1256_v24, %v1292_v41  ;;  %v357_v4 = vld [vmem:[#allocation6 + $0x430] sm:$0xff]  ;;  %v358_v24 = vld [vmem:[#allocation6 + $0x438] sm:$0xff] }
 0x39f   : > { %8200 = vmatpush1.bf16.msra.mxu0 %v11763_v30  ;;  %8243 = vmatpush1.bf16.msra.mxu1 %v11765_v51  ;;  %v1327_v30 = vld [vmem:[#allocation6 + $0x2280] sm:$0xff]  ;;  %v1364_v51 = vld [vmem:[#allocation6 + $0x23a8] sm:$0xff] }
 0x3a0   : > { %8201 = vmatprep.subr.bf16.mxu0 %v11836_v48  ;;  %8244 = vmatprep.subr.bf16.mxu1 %v11838_v59  ;;  %v12052_v48 = vcombine.high %v1327_v30, %v1363_v7  ;;  %v12054_v59 = vcombine.high %v1328_v52, %v1364_v51  ;;  %v12051_v62 = vcombine.low %v1327_v30, %v1363_v7  ;;  %v393_v30 = vld [vmem:[#allocation6 + $0x550] sm:$0xff] }
 0x3a1   : > { %v12053_v31 = vcombine.low %v1328_v52, %v1364_v51  ;;  %v429_v7 = vld [vmem:[#allocation6 + $0x670] sm:$0xff]  ;;  %v394_v52 = vld [vmem:[#allocation6 + $0x558] sm:$0xff] }
 0x3a2   : > { %v430_v51 = vld [vmem:[#allocation6 + $0x678] sm:$0xff] }
 0x3a3   : > { %8202 = vmatpush1.bf16.msra.mxu0 %v11835_v47  ;;  %8245 = vmatpush1.bf16.msra.mxu1 %v11837_v35  ;;  %v249_v47 = vld [vmem:[#allocation6 + $0xd0] sm:$0xff]  ;;  %v286_v35 = vld [vmem:[#allocation6 + $0x1f8] sm:$0xff] }
 0x3a4   : > { %8203 = vmatprep.subr.bf16.mxu0 %v11908_v44  ;;  %8246 = vmatprep.subr.bf16.mxu1 %v11910_v39  ;;  %v10976_v44 = vcombine.high %v249_v47, %v285_v18  ;;  %v10978_v39 = vcombine.high %v250_v61, %v286_v35  ;;  %v10975_v41 = vcombine.low %v249_v47, %v285_v18  ;;  %v465_v18 = vld [vmem:[#allocation6 + $0x790] sm:$0xff] }
 0x3a5   : > { %v11122_v47 = vcombine.high %v394_v52, %v430_v51 }
 0x3a7   : > { %8204 = vmatpush1.bf16.msra.mxu0 %v11907_v57  ;;  %8247 = vmatpush1.bf16.msra.mxu1 %v11909_v19  ;;  %v322_v57 = vld [vmem:[#allocation6 + $0x318] sm:$0xff]  ;;  %v10977_v19 = vcombine.low %v250_v61, %v286_v35  ;;  %v501_v61 = vld [vmem:[#allocation6 + $0x8b0] sm:$0xff] }
 0x3a8   : > { %8205 = vmatprep.subr.bf16.mxu0 %v11980_v58  ;;  %8248 = vmatprep.subr.bf16.mxu1 %v11982_v28  ;;  %v11048_v58 = vcombine.high %v321_v43, %v357_v4  ;;  %v11050_v28 = vcombine.high %v322_v57, %v358_v24  ;;  %v466_v35 = vld [vmem:[#allocation6 + $0x798] sm:$0xff] }
 0x3ab   : > { %8206 = vmatpush1.bf16.msra.mxu0 %v11979_v38  ;;  %8249 = vmatpush1.bf16.msra.mxu1 %v11981_v33  ;;  %v13029_v38 = vld [vmem:[%s12725_s5] ss:$8 sps:$4 sm:$0xff]   ;;  %v11047_v33 = vcombine.low %v321_v43, %v357_v4 }
 0x3ac   : > { %8207 = vmatprep.subr.bf16.mxu0 %v12052_v48  ;;  %8250 = vmatprep.subr.bf16.mxu1 %v12054_v59  ;;  %v11049_v48 = vcombine.low %v322_v57, %v358_v24  ;;  %v11120_v59 = vcombine.high %v393_v30, %v429_v7  ;;  %v537_v4 = vld [vmem:[#allocation6 + $0x9d0] sm:$0xff]  ;;  %v538_v24 = vld [vmem:[#allocation6 + $0x9d8] sm:$0xff] }
 0x3ad   : > { %v573_v57 = vld [vmem:[#allocation6 + $0xaf0] sm:$0xff] }
 0x3af   : > { %8208 = vmatpush1.bf16.msra.mxu0 %v12051_v62  ;;  %8251 = vmatpush1.bf16.msra.mxu1 %v12053_v31  ;;  %v502_v62 = vld [vmem:[#allocation6 + $0x8b8] sm:$0xff]  ;;  %v11119_v31 = vcombine.low %v393_v30, %v429_v7  ;;  %v645_v30 = vld [vmem:[#allocation6 + $0xd30] sm:$0xff] }
 0x3b0   : > { %8263 = vmatprep.subr.bf16.mxu0 %v10976_v44  ;;  %8306 = vmatprep.subr.bf16.mxu1 %v10978_v39  ;;  %v11121_v44 = vcombine.low %v394_v52, %v430_v51  ;;  %v11192_v39 = vcombine.high %v465_v18, %v501_v61  ;;  %v11194_v43 = vcombine.high %v466_v35, %v502_v62  ;;  %v610_v7 = vld [vmem:[#allocation6 + $0xc18] sm:$0xff] }
 0x3b1   : > { %v11263_v52 = vcombine.low %v537_v4, %v573_v57 }
 0x3b2   : > { %8210 = vmatmul.mubr.bf16.vlgmr.msra.gmra.mrb[48].mxu0 %v13029_v38  ;;  %8253 = vmatmul.mubr.bf16.vlgmr.msra.gmra.mrb[48].mxu1 %v13029_v38 }
 0x3b3   : > { %8264 = vmatpush1.bf16.msra.mxu0 %v10975_v41  ;;  %8307 = vmatpush1.bf16.msra.mxu1 %v10977_v19  ;;  %v574_v41 = vld [vmem:[#allocation6 + $0xaf8] sm:$0xff]  ;;  %v11191_v19 = vcombine.low %v465_v18, %v501_v61  ;;  %v717_v18 = vld [vmem:[#allocation6 + $0xf70] sm:$0xff] }
 0x3b4   : > { %8265 = vmatprep.subr.bf16.mxu0 %v11048_v58  ;;  %8308 = vmatprep.subr.bf16.mxu1 %v11050_v28  ;;  %v11193_v58 = vcombine.low %v466_v35, %v502_v62  ;;  %v11264_v28 = vcombine.high %v537_v4, %v573_v57  ;;  %v11266_v36 = vcombine.high %v538_v24, %v574_v41  ;;  %v682_v61 = vld [vmem:[#allocation6 + $0xe58] sm:$0xff]  ;;  %v753_v57 = vld [vmem:[#allocation6 + $0x1090] sm:$0xff] }
 0x3b5   : > { %8295 = vmatprep.mubr.bf16.mxu0 %v13000_v10  ;;  %8338 = vmatprep.mubr.bf16.mxu1 %v13000_v10  ;;  %v11265_v51 = vcombine.low %v538_v24, %v574_v41  ;;  %v754_v41 = vld [vmem:[#allocation6 + $0x1098] sm:$0xff] }
 0x3b7   : > { %8266 = vmatpush1.bf16.msra.mxu0 %v11047_v33  ;;  %8309 = vmatpush1.bf16.msra.mxu1 %v11049_v48  ;;  %v609_v33 = vld [vmem:[#allocation6 + $0xc10] sm:$0xff]  ;;  %v646_v48 = vld [vmem:[#allocation6 + $0xd38] sm:$0xff] }
 0x3b8   : > { %8267 = vmatprep.subr.bf16.mxu0 %v11120_v59  ;;  %8310 = vmatprep.subr.bf16.mxu1 %v11122_v47  ;;  %v11336_v59 = vcombine.high %v609_v33, %v645_v30  ;;  %v11338_v47 = vcombine.high %v610_v7, %v646_v48  ;;  %v11335_v35 = vcombine.low %v609_v33, %v645_v30 }
 0x3b9   : > { %v11337_v62 = vcombine.low %v610_v7, %v646_v48  ;;  %v861_v7 = vld [vmem:[#allocation6 + $0x13f0] sm:$0xff] }
 0x3bb   : > { %8268 = vmatpush1.bf16.msra.mxu0 %v11119_v31  ;;  %8311 = vmatpush1.bf16.msra.mxu1 %v11121_v44  ;;  %v681_v31 = vld [vmem:[#allocation6 + $0xe50] sm:$0xff]  ;;  %v718_v44 = vld [vmem:[#allocation6 + $0xf78] sm:$0xff] }
 0x3bc   : > { %8269 = vmatprep.subr.bf16.mxu0 %v11192_v39  ;;  %8312 = vmatprep.subr.bf16.mxu1 %v11194_v43  ;;  %v11408_v39 = vcombine.high %v681_v31, %v717_v18  ;;  %v11410_v4 = vcombine.high %v682_v61, %v718_v44  ;;  %v11407_v30 = vcombine.low %v681_v31, %v717_v18  ;;  %v825_v18 = vld [vmem:[#allocation6 + $0x12d0] sm:$0xff] }
 0x3bf   : > { %8270 = vmatpush1.bf16.msra.mxu0 %v11191_v19  ;;  %8313 = vmatpush1.bf16.msra.mxu1 %v11193_v58  ;;  %v789_v19 = vld [vmem:[#allocation6 + $0x11b0] sm:$0xff]  ;;  %v790_v58 = vld [vmem:[#allocation6 + $0x11b8] sm:$0xff] }
 0x3c0   : > { %8271 = vmatprep.subr.bf16.mxu0 %v11264_v28  ;;  %8314 = vmatprep.subr.bf16.mxu1 %v11266_v36  ;;  %v11482_v31 = vcombine.high %v754_v41, %v790_v58 }
 0x3c3   : > { %8272 = vmatpush1.bf16.msra.mxu0 %v11263_v52  ;;  %8315 = vmatpush1.bf16.msra.mxu1 %v11265_v51  ;;  %v11409_v51 = vcombine.low %v682_v61, %v718_v44  ;;  %v11479_v61 = vcombine.low %v753_v57, %v789_v19  ;;  %v11481_v44 = vcombine.low %v754_v41, %v790_v58 }
 0x3c4   : > { %8273 = vmatprep.subr.bf16.mxu0 %v11336_v59  ;;  %8316 = vmatprep.subr.bf16.mxu1 %v11338_v47  ;;  %v11480_v59 = vcombine.high %v753_v57, %v789_v19  ;;  %v1005_v57 = vld [vmem:[#allocation6 + $0x1870] sm:$0xff]  ;;  %v970_v19 = vld [vmem:[#allocation6 + $0x1758] sm:$0xff] }
 0x3c5   : > { %v13035_v43 = vpop.f32.mrb[36].mxu0  ;;  %v13039_v36 = vpop.f32.mrb[36].mxu1 }
 0x3c6   : > { %13746 = vst [vmem:[#allocation48_spill] sm:$0xff] %v13035_v43  ;;  %v13037_v24 = vpop.f32.mrb[37].mxu0  ;;  %13748 = vst [vmem:[#allocation50_spill] sm:$0xff] %v13039_v36  ;;  %v13043_v33 = vpop.f32.mrb[37].mxu1  ;;  %v826_v43 = vld [vmem:[#allocation6 + $0x12d8] sm:$0xff]  ;;  %v933_v36 = vld [vmem:[#allocation6 + $0x1630] sm:$0xff] }
 0x3c7   : > { %13747 = vst [vmem:[#allocation49_spill] sm:$0xff] %v13037_v24  ;;  %v13041_v28 = vpop.f32.mrb[38].mxu0  ;;  %8274 = vmatpush1.bf16.msra.mxu0 %v11335_v35  ;;  %13750 = vst [vmem:[#allocation52_spill] sm:$0xff] %v13043_v33  ;;  %8317 = vmatpush1.bf16.msra.mxu1 %v11337_v62  ;;  %v13049_v52 = vpop.f32.mrb[38].mxu1  ;;  %v897_v35 = vld [vmem:[#allocation6 + $0x1510] sm:$0xff]  ;;  %v11551_v24 = vcombine.low %v825_v18, %v861_v7 }
 0x3c8   : > { %13749 = vst [vmem:[#allocation51_spill] sm:$0xff] %v13041_v28  ;;  %v13047_v48 = vpop.f32.mrb[39].mxu0  ;;  %13752 = vst [vmem:[#allocation54_spill] sm:$0xff] %v13049_v52  ;;  %8275 = vmatprep.subr.bf16.mxu0 %v11408_v39  ;;  %v13055_v37 = vpop.f32.mrb[39].mxu1  ;;  %8318 = vmatprep.subr.bf16.mxu1 %v11410_v4  ;;  %v862_v28 = vld [vmem:[#allocation6 + $0x13f8] sm:$0xff]  ;;  %v11552_v39 = vcombine.high %v825_v18, %v861_v7  ;;  %v11624_v62 = vcombine.high %v897_v35, %v933_v36  ;;  %v1077_v7 = vld [vmem:[#allocation6 + $0x1ab0] sm:$0xff] }
 0x3c9   : > { %13751 = vst [vmem:[#allocation53_spill] sm:$0xff] %v13047_v48  ;;  %13753 = vst [vmem:[#allocation55_spill] sm:$0xff] %v13055_v37  ;;  %v11554_v47 = vcombine.high %v826_v43, %v862_v28  ;;  %v898_v52 = vld [vmem:[#allocation6 + $0x1518] sm:$0xff]  ;;  %v11553_v48 = vcombine.low %v826_v43, %v862_v28  ;;  %v11623_v41 = vcombine.low %v897_v35, %v933_v36  ;;  %v1149_v36 = vld [vmem:[#allocation6 + $0x1cf0] sm:$0xff] }
 0x3ca   : > { %v934_v4 = vld [vmem:[#allocation6 + $0x1638] sm:$0xff] }
 0x3cb   : > { %8276 = vmatpush1.bf16.msra.mxu0 %v11407_v30  ;;  %8319 = vmatpush1.bf16.msra.mxu1 %v11409_v51  ;;  %v11626_v33 = vcombine.high %v898_v52, %v934_v4  ;;  %v969_v30 = vld [vmem:[#allocation6 + $0x1750] sm:$0xff]  ;;  %v1006_v51 = vld [vmem:[#allocation6 + $0x1878] sm:$0xff]  ;;  %v11625_v58 = vcombine.low %v898_v52, %v934_v4 }
 0x3cc   : > { %8277 = vmatprep.subr.bf16.mxu0 %v11480_v59  ;;  %8320 = vmatprep.subr.bf16.mxu1 %v11482_v31  ;;  %v11696_v59 = vcombine.high %v969_v30, %v1005_v57  ;;  %v11698_v31 = vcombine.high %v970_v19, %v1006_v51  ;;  %v1042_v18 = vld [vmem:[#allocation6 + $0x1998] sm:$0xff]  ;;  %v11695_v43 = vcombine.low %v969_v30, %v1005_v57  ;;  %v1221_v30 = vld [vmem:[#allocation6 + $0x1f30] sm:$0xff] }
 0x3cd   : > { %v11697_v28 = vcombine.low %v970_v19, %v1006_v51  ;;  %v1150_v35 = vld [vmem:[#allocation6 + $0x1cf8] sm:$0xff] }
 0x3ce   : > { %v1186_v57 = vld [vmem:[#allocation6 + $0x1e18] sm:$0xff] }
 0x3cf   : > { %8278 = vmatpush1.bf16.msra.mxu0 %v11479_v61  ;;  %8321 = vmatpush1.bf16.msra.mxu1 %v11481_v44  ;;  %v1041_v61 = vld [vmem:[#allocation6 + $0x1990] sm:$0xff]  ;;  %v1078_v44 = vld [vmem:[#allocation6 + $0x1ab8] sm:$0xff] }
 0x3d0   : > { %8279 = vmatprep.subr.bf16.mxu0 %v11552_v39  ;;  %8322 = vmatprep.subr.bf16.mxu1 %v11554_v47  ;;  %v11768_v47 = vcombine.high %v1041_v61, %v1077_v7  ;;  %v11770_v39 = vcombine.high %v1042_v18, %v1078_v44  ;;  %v11767_v52 = vcombine.low %v1041_v61, %v1077_v7  ;;  %v1293_v61 = vld [vmem:[#allocation6 + $0x2170] sm:$0xff]  ;;  %v1258_v7 = vld [vmem:[#allocation6 + $0x2058] sm:$0xff] }
 0x3d3   : > { %8280 = vmatpush1.bf16.msra.mxu0 %v11551_v24  ;;  %8323 = vmatpush1.bf16.msra.mxu1 %v11553_v48  ;;  %v1113_v24 = vld [vmem:[#allocation6 + $0x1bd0] sm:$0xff]  ;;  %v1114_v48 = vld [vmem:[#allocation6 + $0x1bd8] sm:$0xff] }
 0x3d4   : > { %8281 = vmatprep.subr.bf16.mxu0 %v11624_v62  ;;  %8324 = vmatprep.subr.bf16.mxu1 %v11626_v33  ;;  %v11769_v33 = vcombine.low %v1042_v18, %v1078_v44  ;;  %v11840_v62 = vcombine.high %v1113_v24, %v1149_v36  ;;  %v11842_v4 = vcombine.high %v1114_v48, %v1150_v35 }
 0x3d5   : > { %v11839_v19 = vcombine.low %v1113_v24, %v1149_v36  ;;  %v11841_v51 = vcombine.low %v1114_v48, %v1150_v35  ;;  %v1365_v24 = vld [vmem:[#allocation6 + $0x23b0] sm:$0xff]  ;;  %v1330_v36 = vld [vmem:[#allocation6 + $0x2298] sm:$0xff] }
 0x3d7   : > { %8282 = vmatpush1.bf16.msra.mxu0 %v11623_v41  ;;  %8325 = vmatpush1.bf16.msra.mxu1 %v11625_v58  ;;  %v1185_v41 = vld [vmem:[#allocation6 + $0x1e10] sm:$0xff]  ;;  %v1222_v58 = vld [vmem:[#allocation6 + $0x1f38] sm:$0xff] }
 0x3d8   : > { %8283 = vmatprep.subr.bf16.mxu0 %v11696_v59  ;;  %8326 = vmatprep.subr.bf16.mxu1 %v11698_v31  ;;  %v11912_v59 = vcombine.high %v1185_v41, %v1221_v30  ;;  %v11914_v31 = vcombine.high %v1186_v57, %v1222_v58  ;;  %v11911_v18 = vcombine.low %v1185_v41, %v1221_v30  ;;  %v287_v41 = vld [vmem:[#allocation6 + $0x200] sm:$0xff]  ;;  %v252_v30 = vld [vmem:[#allocation6 + $0xe8] sm:$0xff] }
 0x3d9   : > { %v11913_v44 = vcombine.low %v1186_v57, %v1222_v58 }
 0x3db   : > { %8284 = vmatpush1.bf16.msra.mxu0 %v11695_v43  ;;  %8327 = vmatpush1.bf16.msra.mxu1 %v11697_v28  ;;  %v1257_v43 = vld [vmem:[#allocation6 + $0x2050] sm:$0xff]  ;;  %v1294_v28 = vld [vmem:[#allocation6 + $0x2178] sm:$0xff] }
 0x3dc   : > { %8285 = vmatprep.subr.bf16.mxu0 %v11768_v47  ;;  %8328 = vmatprep.subr.bf16.mxu1 %v11770_v39  ;;  %v11984_v47 = vcombine.high %v1257_v43, %v1293_v61  ;;  %v11986_v39 = vcombine.high %v1258_v7, %v1294_v28  ;;  %v11983_v48 = vcombine.low %v1257_v43, %v1293_v61  ;;  %v359_v43 = vld [vmem:[#allocation6 + $0x440] sm:$0xff]  ;;  %v324_v61 = vld [vmem:[#allocation6 + $0x328] sm:$0xff] }
 0x3dd   : > { %v11985_v35 = vcombine.low %v1258_v7, %v1294_v28 }
 0x3df   : > { %8286 = vmatpush1.bf16.msra.mxu0 %v11767_v52  ;;  %8329 = vmatpush1.bf16.msra.mxu1 %v11769_v33  ;;  %v1329_v52 = vld [vmem:[#allocation6 + $0x2290] sm:$0xff]  ;;  %v1366_v33 = vld [vmem:[#allocation6 + $0x23b8] sm:$0xff] }
 0x3e0   : > { %8287 = vmatprep.subr.bf16.mxu0 %v11840_v62  ;;  %8330 = vmatprep.subr.bf16.mxu1 %v11842_v4  ;;  %v12056_v62 = vcombine.high %v1329_v52, %v1365_v24  ;;  %v12058_v4 = vcombine.high %v1330_v36, %v1366_v33  ;;  %v12055_v57 = vcombine.low %v1329_v52, %v1365_v24  ;;  %v431_v52 = vld [vmem:[#allocation6 + $0x680] sm:$0xff]  ;;  %v396_v24 = vld [vmem:[#allocation6 + $0x568] sm:$0xff] }
 0x3e1   : > { %v12057_v58 = vcombine.low %v1330_v36, %v1366_v33  ;;  %v432_v36 = vld [vmem:[#allocation6 + $0x688] sm:$0xff] }
 0x3e3   : > { %8288 = vmatpush1.bf16.msra.mxu0 %v11839_v19  ;;  %8331 = vmatpush1.bf16.msra.mxu1 %v11841_v51  ;;  %v251_v19 = vld [vmem:[#allocation6 + $0xe0] sm:$0xff]  ;;  %v288_v51 = vld [vmem:[#allocation6 + $0x208] sm:$0xff] }
 0x3e4   : > { %8289 = vmatprep.subr.bf16.mxu0 %v11912_v59  ;;  %8332 = vmatprep.subr.bf16.mxu1 %v11914_v31  ;;  %v10980_v59 = vcombine.high %v251_v19, %v287_v41  ;;  %v10982_v31 = vcombine.high %v252_v30, %v288_v51  ;;  %v10979_v7 = vcombine.low %v251_v19, %v287_v41  ;;  %v467_v19 = vld [vmem:[#allocation6 + $0x7a0] sm:$0xff] }
 0x3e5   : > { %v10981_v28 = vcombine.low %v252_v30, %v288_v51  ;;  %v503_v41 = vld [vmem:[#allocation6 + $0x8c0] sm:$0xff]  ;;  %v468_v30 = vld [vmem:[#allocation6 + $0x7a8] sm:$0xff] }
 0x3e6   : > { %v504_v51 = vld [vmem:[#allocation6 + $0x8c8] sm:$0xff] }
 0x3e7   : > { %8290 = vmatpush1.bf16.msra.mxu0 %v11911_v18  ;;  %8333 = vmatpush1.bf16.msra.mxu1 %v11913_v44  ;;  %v323_v18 = vld [vmem:[#allocation6 + $0x320] sm:$0xff]  ;;  %v360_v44 = vld [vmem:[#allocation6 + $0x448] sm:$0xff] }
 0x3e8   : > { %8291 = vmatprep.subr.bf16.mxu0 %v11984_v47  ;;  %8334 = vmatprep.subr.bf16.mxu1 %v11986_v39  ;;  %v11052_v47 = vcombine.high %v323_v18, %v359_v43  ;;  %v11054_v39 = vcombine.high %v324_v61, %v360_v44  ;;  %v11051_v33 = vcombine.low %v323_v18, %v359_v43  ;;  %v539_v18 = vld [vmem:[#allocation6 + $0x9e0] sm:$0xff] }
 0x3e9   : > { %v575_v43 = vld [vmem:[#allocation6 + $0xb00] sm:$0xff] }
 0x3eb   : > { %8292 = vmatpush1.bf16.msra.mxu0 %v11983_v48  ;;  %8335 = vmatpush1.bf16.msra.mxu1 %v11985_v35  ;;  %v395_v48 = vld [vmem:[#allocation6 + $0x560] sm:$0xff]  ;;  %v11053_v35 = vcombine.low %v324_v61, %v360_v44  ;;  %v540_v61 = vld [vmem:[#allocation6 + $0x9e8] sm:$0xff] }
 0x3ec   : > { %8293 = vmatprep.subr.bf16.mxu0 %v12056_v62  ;;  %8336 = vmatprep.subr.bf16.mxu1 %v12058_v4  ;;  %v11124_v62 = vcombine.high %v395_v48, %v431_v52  ;;  %v11126_v4 = vcombine.high %v396_v24, %v432_v36  ;;  %v576_v44 = vld [vmem:[#allocation6 + $0xb08] sm:$0xff] }
 0x3ef   : > { %8294 = vmatpush1.bf16.msra.mxu0 %v12055_v57  ;;  %8337 = vmatpush1.bf16.msra.mxu1 %v12057_v58  ;;  %v11123_v57 = vcombine.low %v395_v48, %v431_v52  ;;  %v11125_v58 = vcombine.low %v396_v24, %v432_v36  ;;  %v647_v48 = vld [vmem:[#allocation6 + $0xd40] sm:$0xff]  ;;  %v612_v52 = vld [vmem:[#allocation6 + $0xc28] sm:$0xff]  ;;  %v11267_v24 = vcombine.low %v539_v18, %v575_v43 }
 0x3f0   : > { %8349 = vmatprep.subr.bf16.mxu0 %v10980_v59  ;;  %8392 = vmatprep.subr.bf16.mxu1 %v10982_v31  ;;  %v11196_v59 = vcombine.high %v467_v19, %v503_v41  ;;  %v11198_v31 = vcombine.high %v468_v30, %v504_v51  ;;  %v11269_v36 = vcombine.low %v540_v61, %v576_v44 }
 0x3f2   : > { %8296 = vmatmul.mubr.bf16.vlgmr.msra.gmra.mrb[52].mxu0 %v13029_v38  ;;  %8339 = vmatmul.mubr.bf16.vlgmr.msra.gmra.mrb[52].mxu1 %v13029_v38 }
 0x3f3   : > { %8350 = vmatpush1.bf16.msra.mxu0 %v10979_v7  ;;  %8393 = vmatpush1.bf16.msra.mxu1 %v10981_v28  ;;  %v11195_v7 = vcombine.low %v467_v19, %v503_v41  ;;  %v11197_v28 = vcombine.low %v468_v30, %v504_v51  ;;  %v719_v19 = vld [vmem:[#allocation6 + $0xf80] sm:$0xff]  ;;  %v684_v41 = vld [vmem:[#allocation6 + $0xe68] sm:$0xff] }
 0x3f4   : > { %8351 = vmatprep.subr.bf16.mxu0 %v11052_v47  ;;  %8394 = vmatprep.subr.bf16.mxu1 %v11054_v39  ;;  %v11268_v47 = vcombine.high %v539_v18, %v575_v43  ;;  %v611_v39 = vld [vmem:[#allocation6 + $0xc20] sm:$0xff] }
 0x3f5   : > { %8381 = vmatprep.mubr.bf16.mxu0 %v13000_v10  ;;  %8424 = vmatprep.mubr.bf16.mxu1 %v13000_v10  ;;  %v11270_v10 = vcombine.high %v540_v61, %v576_v44  ;;  %v11339_v30 = vcombine.low %v611_v39, %v647_v48  ;;  %v755_v18 = vld [vmem:[#allocation6 + $0x10a0] sm:$0xff] }
 0x3f6   : > { %v791_v43 = vld [vmem:[#allocation6 + $0x11c0] sm:$0xff] }
 0x3f7   : > { %8352 = vmatpush1.bf16.msra.mxu0 %v11051_v33  ;;  %8395 = vmatpush1.bf16.msra.mxu1 %v11053_v35  ;;  %v648_v33 = vld [vmem:[#allocation6 + $0xd48] sm:$0xff]  ;;  %v11340_v35 = vcombine.high %v611_v39, %v647_v48  ;;  %v863_v48 = vld [vmem:[#allocation6 + $0x1400] sm:$0xff] }
 0x3f8   : > { %8353 = vmatprep.subr.bf16.mxu0 %v11124_v62  ;;  %8396 = vmatprep.subr.bf16.mxu1 %v11126_v4  ;;  %v11342_v62 = vcombine.high %v612_v52, %v648_v33  ;;  %v683_v4 = vld [vmem:[#allocation6 + $0xe60] sm:$0xff]  ;;  %v11341_v51 = vcombine.low %v612_v52, %v648_v33 }
 0x3f9   : > { %v11411_v39 = vcombine.low %v683_v4, %v719_v19 }
 0x3fb   : > { %8354 = vmatpush1.bf16.msra.mxu0 %v11123_v57  ;;  %8397 = vmatpush1.bf16.msra.mxu1 %v11125_v58  ;;  %v720_v57 = vld [vmem:[#allocation6 + $0xf88] sm:$0xff]  ;;  %v11412_v58 = vcombine.high %v683_v4, %v719_v19  ;;  %v827_v19 = vld [vmem:[#allocation6 + $0x12e0] sm:$0xff] }
 0x3fc   : > { %8355 = vmatprep.subr.bf16.mxu0 %v11196_v59  ;;  %8398 = vmatprep.subr.bf16.mxu1 %v11198_v31  ;;  %v11414_v31 = vcombine.high %v684_v41, %v720_v57 }
 0x3ff   : > { %8356 = vmatpush1.bf16.msra.mxu0 %v11195_v7  ;;  %8399 = vmatpush1.bf16.msra.mxu1 %v11197_v28  ;;  %v756_v7 = vld [vmem:[#allocation6 + $0x10a8] sm:$0xff] }
 0x400   : > { %8357 = vmatprep.subr.bf16.mxu0 %v11268_v47  ;;  %8400 = vmatprep.subr.bf16.mxu1 %v11270_v10  ;;  %v792_v28 = vld [vmem:[#allocation6 + $0x11c8] sm:$0xff] }
 0x401   : > { %v11486_v4 = vcombine.high %v756_v7, %v792_v28 }
 0x403   : > { %8358 = vmatpush1.bf16.msra.mxu0 %v11267_v24  ;;  %8401 = vmatpush1.bf16.msra.mxu1 %v11269_v36  ;;  %v11413_v24 = vcombine.low %v684_v41, %v720_v57  ;;  %v11484_v36 = vcombine.high %v755_v18, %v791_v43  ;;  %v11483_v41 = vcombine.low %v755_v18, %v791_v43  ;;  %v1007_v18 = vld [vmem:[#allocation6 + $0x1880] sm:$0xff]  ;;  %v972_v43 = vld [vmem:[#allocation6 + $0x1768] sm:$0xff] }
 0x404   : > { %8359 = vmatprep.subr.bf16.mxu0 %v11340_v35  ;;  %8402 = vmatprep.subr.bf16.mxu1 %v11342_v62  ;;  %v11485_v57 = vcombine.low %v756_v7, %v792_v28  ;;  %v899_v62 = vld [vmem:[#allocation6 + $0x1520] sm:$0xff] }
 0x405   : > { %v13063_v59 = vpop.f32.mrb[40].mxu0  ;;  %v13067_v44 = vpop.f32.mrb[40].mxu1 }
 0x406   : > { %13754 = vst [vmem:[#allocation56_spill] sm:$0xff] %v13063_v59  ;;  %v13065_v61 = vpop.f32.mrb[41].mxu0  ;;  %13756 = vst [vmem:[#allocation58_spill] sm:$0xff] %v13067_v44  ;;  %v13071_v10 = vpop.f32.mrb[41].mxu1  ;;  %v828_v59 = vld [vmem:[#allocation6 + $0x12e8] sm:$0xff]  ;;  %v935_v44 = vld [vmem:[#allocation6 + $0x1640] sm:$0xff] }
 0x407   : > { %13755 = vst [vmem:[#allocation57_spill] sm:$0xff] %v13065_v61  ;;  %v13069_v47 = vpop.f32.mrb[42].mxu0  ;;  %8360 = vmatpush1.bf16.msra.mxu0 %v11339_v30  ;;  %13758 = vst [vmem:[#allocation60_spill] sm:$0xff] %v13071_v10  ;;  %8403 = vmatpush1.bf16.msra.mxu1 %v11341_v51  ;;  %v13077_v33 = vpop.f32.mrb[42].mxu1  ;;  %v11555_v61 = vcombine.low %v827_v19, %v863_v48  ;;  %v11628_v51 = vcombine.high %v899_v62, %v935_v44 }
 0x408   : > { %13757 = vst [vmem:[#allocation59_spill] sm:$0xff] %v13069_v47  ;;  %v13075_v52 = vpop.f32.mrb[43].mxu0  ;;  %13760 = vst [vmem:[#allocation62_spill] sm:$0xff] %v13077_v33  ;;  %8361 = vmatprep.subr.bf16.mxu0 %v11412_v58  ;;  %v13083_v30 = vpop.f32.mrb[43].mxu1  ;;  %8404 = vmatprep.subr.bf16.mxu1 %v11414_v31  ;;  %v864_v47 = vld [vmem:[#allocation6 + $0x1408] sm:$0xff]  ;;  %v11556_v58 = vcombine.high %v827_v19, %v863_v48  ;;  %v11627_v7 = vcombine.low %v899_v62, %v935_v44  ;;  %v1079_v48 = vld [vmem:[#allocation6 + $0x1ac0] sm:$0xff] }
 0x409   : > { %13759 = vst [vmem:[#allocation61_spill] sm:$0xff] %v13075_v52  ;;  %13761 = vst [vmem:[#allocation63_spill] sm:$0xff] %v13083_v30  ;;  %v11558_v35 = vcombine.high %v828_v59, %v864_v47  ;;  %v900_v33 = vld [vmem:[#allocation6 + $0x1528] sm:$0xff]  ;;  %v11557_v52 = vcombine.low %v828_v59, %v864_v47  ;;  %v1151_v44 = vld [vmem:[#allocation6 + $0x1d00] sm:$0xff] }
 0x40a   : > { %v936_v31 = vld [vmem:[#allocation6 + $0x1648] sm:$0xff] }
 0x40b   : > { %8362 = vmatpush1.bf16.msra.mxu0 %v11411_v39  ;;  %8405 = vmatpush1.bf16.msra.mxu1 %v11413_v24  ;;  %v11630_v10 = vcombine.high %v900_v33, %v936_v31  ;;  %v971_v39 = vld [vmem:[#allocation6 + $0x1760] sm:$0xff]  ;;  %v1008_v24 = vld [vmem:[#allocation6 + $0x1888] sm:$0xff]  ;;  %v11629_v28 = vcombine.low %v900_v33, %v936_v31 }
 0x40c   : > { %8363 = vmatprep.subr.bf16.mxu0 %v11484_v36  ;;  %8406 = vmatprep.subr.bf16.mxu1 %v11486_v4  ;;  %v11700_v36 = vcombine.high %v971_v39, %v1007_v18  ;;  %v11702_v4 = vcombine.high %v972_v43, %v1008_v24  ;;  %v1044_v19 = vld [vmem:[#allocation6 + $0x19a8] sm:$0xff]  ;;  %v11699_v59 = vcombine.low %v971_v39, %v1007_v18  ;;  %v1223_v39 = vld [vmem:[#allocation6 + $0x1f40] sm:$0xff] }
 0x40d   : > { %v11701_v47 = vcombine.low %v972_v43, %v1008_v24  ;;  %v1152_v62 = vld [vmem:[#allocation6 + $0x1d08] sm:$0xff] }
 0x40e   : > { %v1188_v18 = vld [vmem:[#allocation6 + $0x1e28] sm:$0xff] }
 0x40f   : > { %8364 = vmatpush1.bf16.msra.mxu0 %v11483_v41  ;;  %8407 = vmatpush1.bf16.msra.mxu1 %v11485_v57  ;;  %v1043_v41 = vld [vmem:[#allocation6 + $0x19a0] sm:$0xff]  ;;  %v1080_v57 = vld [vmem:[#allocation6 + $0x1ac8] sm:$0xff] }
 0x410   : > { %8365 = vmatprep.subr.bf16.mxu0 %v11556_v58  ;;  %8408 = vmatprep.subr.bf16.mxu1 %v11558_v35  ;;  %v11772_v35 = vcombine.high %v1043_v41, %v1079_v48  ;;  %v11774_v58 = vcombine.high %v1044_v19, %v1080_v57  ;;  %v11771_v33 = vcombine.low %v1043_v41, %v1079_v48  ;;  %v1295_v41 = vld [vmem:[#allocation6 + $0x2180] sm:$0xff]  ;;  %v1260_v48 = vld [vmem:[#allocation6 + $0x2068] sm:$0xff] }
 0x413   : > { %8366 = vmatpush1.bf16.msra.mxu0 %v11555_v61  ;;  %8409 = vmatpush1.bf16.msra.mxu1 %v11557_v52  ;;  %v1115_v61 = vld [vmem:[#allocation6 + $0x1be0] sm:$0xff]  ;;  %v1116_v52 = vld [vmem:[#allocation6 + $0x1be8] sm:$0xff] }
 0x414   : > { %8367 = vmatprep.subr.bf16.mxu0 %v11628_v51  ;;  %8410 = vmatprep.subr.bf16.mxu1 %v11630_v10  ;;  %v11773_v10 = vcombine.low %v1044_v19, %v1080_v57  ;;  %v11844_v51 = vcombine.high %v1115_v61, %v1151_v44  ;;  %v11846_v31 = vcombine.high %v1116_v52, %v1152_v62 }
 0x415   : > { %v11843_v43 = vcombine.low %v1115_v61, %v1151_v44  ;;  %v11845_v24 = vcombine.low %v1116_v52, %v1152_v62  ;;  %v1367_v61 = vld [vmem:[#allocation6 + $0x23c0] sm:$0xff]  ;;  %v1332_v44 = vld [vmem:[#allocation6 + $0x22a8] sm:$0xff] }
 0x417   : > { %8368 = vmatpush1.bf16.msra.mxu0 %v11627_v7  ;;  %8411 = vmatpush1.bf16.msra.mxu1 %v11629_v28  ;;  %v1187_v7 = vld [vmem:[#allocation6 + $0x1e20] sm:$0xff]  ;;  %v1224_v28 = vld [vmem:[#allocation6 + $0x1f48] sm:$0xff] }
 0x418   : > { %8369 = vmatprep.subr.bf16.mxu0 %v11700_v36  ;;  %8412 = vmatprep.subr.bf16.mxu1 %v11702_v4  ;;  %v11916_v36 = vcombine.high %v1187_v7, %v1223_v39  ;;  %v11918_v4 = vcombine.high %v1188_v18, %v1224_v28  ;;  %v11915_v19 = vcombine.low %v1187_v7, %v1223_v39  ;;  %v289_v7 = vld [vmem:[#allocation6 + $0x210] sm:$0xff]  ;;  %v254_v39 = vld [vmem:[#allocation6 + $0xf8] sm:$0xff] }
 0x419   : > { %v11917_v57 = vcombine.low %v1188_v18, %v1224_v28 }
 0x41b   : > { %8370 = vmatpush1.bf16.msra.mxu0 %v11699_v59  ;;  %8413 = vmatpush1.bf16.msra.mxu1 %v11701_v47  ;;  %v1259_v59 = vld [vmem:[#allocation6 + $0x2060] sm:$0xff]  ;;  %v1296_v47 = vld [vmem:[#allocation6 + $0x2188] sm:$0xff] }
 0x41c   : > { %8371 = vmatprep.subr.bf16.mxu0 %v11772_v35  ;;  %8414 = vmatprep.subr.bf16.mxu1 %v11774_v58  ;;  %v11988_v35 = vcombine.high %v1259_v59, %v1295_v41  ;;  %v11990_v58 = vcombine.high %v1260_v48, %v1296_v47  ;;  %v11987_v52 = vcombine.low %v1259_v59, %v1295_v41  ;;  %v361_v59 = vld [vmem:[#allocation6 + $0x450] sm:$0xff]  ;;  %v326_v41 = vld [vmem:[#allocation6 + $0x338] sm:$0xff] }
 0x41d   : > { %v11989_v62 = vcombine.low %v1260_v48, %v1296_v47 }
 0x41f   : > { %8372 = vmatpush1.bf16.msra.mxu0 %v11771_v33  ;;  %8415 = vmatpush1.bf16.msra.mxu1 %v11773_v10  ;;  %v1331_v33 = vld [vmem:[#allocation6 + $0x22a0] sm:$0xff]  ;;  %v1368_v10 = vld [vmem:[#allocation6 + $0x23c8] sm:$0xff] }
 0x420   : > { %8373 = vmatprep.subr.bf16.mxu0 %v11844_v51  ;;  %8416 = vmatprep.subr.bf16.mxu1 %v11846_v31  ;;  %v12060_v51 = vcombine.high %v1331_v33, %v1367_v61  ;;  %v12062_v31 = vcombine.high %v1332_v44, %v1368_v10  ;;  %v12059_v18 = vcombine.low %v1331_v33, %v1367_v61  ;;  %v433_v33 = vld [vmem:[#allocation6 + $0x690] sm:$0xff]  ;;  %v398_v61 = vld [vmem:[#allocation6 + $0x578] sm:$0xff] }
 0x421   : > { %v12061_v28 = vcombine.low %v1332_v44, %v1368_v10  ;;  %v434_v44 = vld [vmem:[#allocation6 + $0x698] sm:$0xff] }
 0x423   : > { %8374 = vmatpush1.bf16.msra.mxu0 %v11843_v43  ;;  %8417 = vmatpush1.bf16.msra.mxu1 %v11845_v24  ;;  %v253_v43 = vld [vmem:[#allocation6 + $0xf0] sm:$0xff]  ;;  %v290_v24 = vld [vmem:[#allocation6 + $0x218] sm:$0xff] }
 0x424   : > { %8375 = vmatprep.subr.bf16.mxu0 %v11916_v36  ;;  %8418 = vmatprep.subr.bf16.mxu1 %v11918_v4  ;;  %v10984_v36 = vcombine.high %v253_v43, %v289_v7  ;;  %v10986_v4 = vcombine.high %v254_v39, %v290_v24  ;;  %v10983_v48 = vcombine.low %v253_v43, %v289_v7  ;;  %v469_v43 = vld [vmem:[#allocation6 + $0x7b0] sm:$0xff] }
 0x425   : > { %v10985_v47 = vcombine.low %v254_v39, %v290_v24  ;;  %v505_v7 = vld [vmem:[#allocation6 + $0x8d0] sm:$0xff]  ;;  %v470_v24 = vld [vmem:[#allocation6 + $0x7b8] sm:$0xff] }
 0x426   : > { %v13090_v39 = vld [vmem:[%s12725_s5 + $0x4] ss:$8 sps:$4 sm:$0xff]  }
 0x427   : > { %8376 = vmatpush1.bf16.msra.mxu0 %v11915_v19  ;;  %8419 = vmatpush1.bf16.msra.mxu1 %v11917_v57  ;;  %v325_v19 = vld [vmem:[#allocation6 + $0x330] sm:$0xff]  ;;  %v362_v57 = vld [vmem:[#allocation6 + $0x458] sm:$0xff] }
 0x428   : > { %8377 = vmatprep.subr.bf16.mxu0 %v11988_v35  ;;  %8420 = vmatprep.subr.bf16.mxu1 %v11990_v58  ;;  %v11056_v35 = vcombine.high %v325_v19, %v361_v59  ;;  %v11058_v58 = vcombine.high %v326_v41, %v362_v57  ;;  %v11055_v10 = vcombine.low %v325_v19, %v361_v59  ;;  %v541_v19 = vld [vmem:[#allocation6 + $0x9f0] sm:$0xff] }
 0x429   : > { %v577_v59 = vld [vmem:[#allocation6 + $0xb10] sm:$0xff] }
 0x42b   : > { %8378 = vmatpush1.bf16.msra.mxu0 %v11987_v52  ;;  %8421 = vmatpush1.bf16.msra.mxu1 %v11989_v62  ;;  %v397_v52 = vld [vmem:[#allocation6 + $0x570] sm:$0xff]  ;;  %v11057_v62 = vcombine.low %v326_v41, %v362_v57  ;;  %v542_v41 = vld [vmem:[#allocation6 + $0x9f8] sm:$0xff] }
 0x42c   : > { %8379 = vmatprep.subr.bf16.mxu0 %v12060_v51  ;;  %8422 = vmatprep.subr.bf16.mxu1 %v12062_v31  ;;  %v11128_v51 = vcombine.high %v397_v52, %v433_v33  ;;  %v11130_v31 = vcombine.high %v398_v61, %v434_v44  ;;  %v578_v57 = vld [vmem:[#allocation6 + $0xb18] sm:$0xff] }
 0x42f   : > { %8380 = vmatpush1.bf16.msra.mxu0 %v12059_v18  ;;  %8423 = vmatpush1.bf16.msra.mxu1 %v12061_v28  ;;  %v506_v18 = vld [vmem:[#allocation6 + $0x8d8] sm:$0xff]  ;;  %v11129_v28 = vcombine.low %v398_v61, %v434_v44  ;;  %v11271_v61 = vcombine.low %v541_v19, %v577_v59  ;;  %v11273_v44 = vcombine.low %v542_v41, %v578_v57 }
 0x430   : > { %8435 = vmatprep.subr.bf16.mxu0 %v10984_v36  ;;  %8478 = vmatprep.subr.bf16.mxu1 %v10986_v4  ;;  %v11200_v36 = vcombine.high %v469_v43, %v505_v7  ;;  %v11202_v4 = vcombine.high %v470_v24, %v506_v18 }
 0x432   : > { %8382 = vmatmul.mubr.bf16.vlgmr.msra.gmra.mrb[56].mxu0 %v13029_v38  ;;  %8425 = vmatmul.mubr.bf16.vlgmr.msra.gmra.mrb[56].mxu1 %v13029_v38  ;;  %v11127_v38 = vcombine.low %v397_v52, %v433_v33  ;;  %v649_v52 = vld [vmem:[#allocation6 + $0xd50] sm:$0xff]  ;;  %v614_v33 = vld [vmem:[#allocation6 + $0xc38] sm:$0xff] }
 0x433   : > { %8436 = vmatpush1.bf16.msra.mxu0 %v10983_v48  ;;  %8479 = vmatpush1.bf16.msra.mxu1 %v10985_v47  ;;  %v11199_v48 = vcombine.low %v469_v43, %v505_v7  ;;  %v11201_v47 = vcombine.low %v470_v24, %v506_v18  ;;  %v721_v43 = vld [vmem:[#allocation6 + $0xf90] sm:$0xff]  ;;  %v686_v7 = vld [vmem:[#allocation6 + $0xe78] sm:$0xff] }
 0x434   : > { %8437 = vmatprep.subr.bf16.mxu0 %v11056_v35  ;;  %8480 = vmatprep.subr.bf16.mxu1 %v11058_v58  ;;  %v11272_v35 = vcombine.high %v541_v19, %v577_v59  ;;  %v11274_v58 = vcombine.high %v542_v41, %v578_v57  ;;  %v757_v59 = vld [vmem:[#allocation6 + $0x10b0] sm:$0xff] }
 0x435   : > { %8467 = vmatprep.mubr.bf16.mxu0 %v13090_v39  ;;  %8510 = vmatprep.mubr.bf16.mxu1 %v13090_v39 }
 0x437   : > { %8438 = vmatpush1.bf16.msra.mxu0 %v11055_v10  ;;  %8481 = vmatpush1.bf16.msra.mxu1 %v11057_v62  ;;  %v613_v10 = vld [vmem:[#allocation6 + $0xc30] sm:$0xff]  ;;  %v650_v62 = vld [vmem:[#allocation6 + $0xd58] sm:$0xff] }
 0x438   : > { %8439 = vmatprep.subr.bf16.mxu0 %v11128_v51  ;;  %8482 = vmatprep.subr.bf16.mxu1 %v11130_v31  ;;  %v11344_v51 = vcombine.high %v613_v10, %v649_v52  ;;  %v11346_v31 = vcombine.high %v614_v33, %v650_v62  ;;  %v11343_v24 = vcombine.low %v613_v10, %v649_v52 }
 0x439   : > { %v11345_v18 = vcombine.low %v614_v33, %v650_v62  ;;  %v865_v33 = vld [vmem:[#allocation6 + $0x1410] sm:$0xff] }
 0x43b   : > { %8440 = vmatpush1.bf16.msra.mxu0 %v11127_v38  ;;  %8483 = vmatpush1.bf16.msra.mxu1 %v11129_v28  ;;  %v685_v38 = vld [vmem:[#allocation6 + $0xe70] sm:$0xff]  ;;  %v722_v28 = vld [vmem:[#allocation6 + $0xf98] sm:$0xff] }
 0x43c   : > { %8441 = vmatprep.subr.bf16.mxu0 %v11200_v36  ;;  %8484 = vmatprep.subr.bf16.mxu1 %v11202_v4  ;;  %v11416_v36 = vcombine.high %v685_v38, %v721_v43  ;;  %v11418_v19 = vcombine.high %v686_v7, %v722_v28  ;;  %v11415_v52 = vcombine.low %v685_v38, %v721_v43  ;;  %v829_v43 = vld [vmem:[#allocation6 + $0x12f0] sm:$0xff] }
 0x43f   : > { %8442 = vmatpush1.bf16.msra.mxu0 %v11199_v48  ;;  %8485 = vmatpush1.bf16.msra.mxu1 %v11201_v47  ;;  %v793_v48 = vld [vmem:[#allocation6 + $0x11d0] sm:$0xff]  ;;  %v758_v47 = vld [vmem:[#allocation6 + $0x10b8] sm:$0xff] }
 0x440   : > { %8443 = vmatprep.subr.bf16.mxu0 %v11272_v35  ;;  %8486 = vmatprep.subr.bf16.mxu1 %v11274_v58  ;;  %v794_v35 = vld [vmem:[#allocation6 + $0x11d8] sm:$0xff] }
 0x441   : > { %v11490_v38 = vcombine.high %v758_v47, %v794_v35 }
 0x443   : > { %8444 = vmatpush1.bf16.msra.mxu0 %v11271_v61  ;;  %8487 = vmatpush1.bf16.msra.mxu1 %v11273_v44  ;;  %v11417_v44 = vcombine.low %v686_v7, %v722_v28  ;;  %v11487_v7 = vcombine.low %v757_v59, %v793_v48  ;;  %v11489_v28 = vcombine.low %v758_v47, %v794_v35 }
 0x444   : > { %8445 = vmatprep.subr.bf16.mxu0 %v11344_v51  ;;  %8488 = vmatprep.subr.bf16.mxu1 %v11346_v31  ;;  %v11488_v51 = vcombine.high %v757_v59, %v793_v48  ;;  %v1009_v59 = vld [vmem:[#allocation6 + $0x1890] sm:$0xff]  ;;  %v974_v48 = vld [vmem:[#allocation6 + $0x1778] sm:$0xff] }
 0x445   : > { %v13094_v4 = vpop.f32.mrb[44].mxu0  ;;  %v13098_v57 = vpop.f32.mrb[44].mxu1 }
 0x446   : > { %13762 = vst [vmem:[#allocation64_spill] sm:$0xff] %v13094_v4  ;;  %v13096_v41 = vpop.f32.mrb[45].mxu0  ;;  %13764 = vst [vmem:[#allocation66_spill] sm:$0xff] %v13098_v57  ;;  %v13102_v10 = vpop.f32.mrb[45].mxu1  ;;  %v830_v4 = vld [vmem:[#allocation6 + $0x12f8] sm:$0xff]  ;;  %v937_v57 = vld [vmem:[#allocation6 + $0x1650] sm:$0xff] }
 0x447   : > { %13763 = vst [vmem:[#allocation65_spill] sm:$0xff] %v13096_v41  ;;  %v13100_v58 = vpop.f32.mrb[46].mxu0  ;;  %8446 = vmatpush1.bf16.msra.mxu0 %v11343_v24  ;;  %13766 = vst [vmem:[#allocation68_spill] sm:$0xff] %v13102_v10  ;;  %8489 = vmatpush1.bf16.msra.mxu1 %v11345_v18  ;;  %v13108_v61 = vpop.f32.mrb[46].mxu1  ;;  %v901_v24 = vld [vmem:[#allocation6 + $0x1530] sm:$0xff]  ;;  %v11559_v41 = vcombine.low %v829_v43, %v865_v33 }
 0x448   : > { %13765 = vst [vmem:[#allocation67_spill] sm:$0xff] %v13100_v58  ;;  %v13106_v62 = vpop.f32.mrb[47].mxu0  ;;  %13768 = vst [vmem:[#allocation70_spill] sm:$0xff] %v13108_v61  ;;  %8447 = vmatprep.subr.bf16.mxu0 %v11416_v36  ;;  %v13114_v30 = vpop.f32.mrb[47].mxu1  ;;  %8490 = vmatprep.subr.bf16.mxu1 %v11418_v19  ;;  %v866_v58 = vld [vmem:[#allocation6 + $0x1418] sm:$0xff]  ;;  %v11560_v36 = vcombine.high %v829_v43, %v865_v33  ;;  %v11632_v18 = vcombine.high %v901_v24, %v937_v57  ;;  %v1081_v33 = vld [vmem:[#allocation6 + $0x1ad0] sm:$0xff] }
 0x449   : > { %13767 = vst [vmem:[#allocation69_spill] sm:$0xff] %v13106_v62  ;;  %13769 = vst [vmem:[#allocation71_spill] sm:$0xff] %v13114_v30  ;;  %v11562_v31 = vcombine.high %v830_v4, %v866_v58  ;;  %v902_v61 = vld [vmem:[#allocation6 + $0x1538] sm:$0xff]  ;;  %v11561_v62 = vcombine.low %v830_v4, %v866_v58  ;;  %v11631_v47 = vcombine.low %v901_v24, %v937_v57  ;;  %v1153_v57 = vld [vmem:[#allocation6 + $0x1d10] sm:$0xff] }
 0x44a   : > { %v938_v19 = vld [vmem:[#allocation6 + $0x1658] sm:$0xff] }
 0x44b   : > { %8448 = vmatpush1.bf16.msra.mxu0 %v11415_v52  ;;  %8491 = vmatpush1.bf16.msra.mxu1 %v11417_v44  ;;  %v11634_v10 = vcombine.high %v902_v61, %v938_v19  ;;  %v973_v52 = vld [vmem:[#allocation6 + $0x1770] sm:$0xff]  ;;  %v1010_v44 = vld [vmem:[#allocation6 + $0x1898] sm:$0xff]  ;;  %v11633_v35 = vcombine.low %v902_v61, %v938_v19 }
 0x44c   : > { %8449 = vmatprep.subr.bf16.mxu0 %v11488_v51  ;;  %8492 = vmatprep.subr.bf16.mxu1 %v11490_v38  ;;  %v11704_v51 = vcombine.high %v973_v52, %v1009_v59  ;;  %v11706_v38 = vcombine.high %v974_v48, %v1010_v44  ;;  %v1046_v43 = vld [vmem:[#allocation6 + $0x19b8] sm:$0xff]  ;;  %v11703_v4 = vcombine.low %v973_v52, %v1009_v59  ;;  %v1225_v52 = vld [vmem:[#allocation6 + $0x1f50] sm:$0xff] }
 0x44d   : > { %v11705_v58 = vcombine.low %v974_v48, %v1010_v44  ;;  %v1154_v24 = vld [vmem:[#allocation6 + $0x1d18] sm:$0xff] }
 0x44e   : > { %v1190_v59 = vld [vmem:[#allocation6 + $0x1e38] sm:$0xff] }
 0x44f   : > { %8450 = vmatpush1.bf16.msra.mxu0 %v11487_v7  ;;  %8493 = vmatpush1.bf16.msra.mxu1 %v11489_v28  ;;  %v1045_v7 = vld [vmem:[#allocation6 + $0x19b0] sm:$0xff]  ;;  %v1082_v28 = vld [vmem:[#allocation6 + $0x1ad8] sm:$0xff] }
 0x450   : > { %8451 = vmatprep.subr.bf16.mxu0 %v11560_v36  ;;  %8494 = vmatprep.subr.bf16.mxu1 %v11562_v31  ;;  %v11776_v31 = vcombine.high %v1045_v7, %v1081_v33  ;;  %v11778_v36 = vcombine.high %v1046_v43, %v1082_v28  ;;  %v11775_v61 = vcombine.low %v1045_v7, %v1081_v33  ;;  %v1297_v7 = vld [vmem:[#allocation6 + $0x2190] sm:$0xff]  ;;  %v1262_v33 = vld [vmem:[#allocation6 + $0x2078] sm:$0xff] }
 0x453   : > { %8452 = vmatpush1.bf16.msra.mxu0 %v11559_v41  ;;  %8495 = vmatpush1.bf16.msra.mxu1 %v11561_v62  ;;  %v1117_v41 = vld [vmem:[#allocation6 + $0x1bf0] sm:$0xff]  ;;  %v1118_v62 = vld [vmem:[#allocation6 + $0x1bf8] sm:$0xff] }
 0x454   : > { %8453 = vmatprep.subr.bf16.mxu0 %v11632_v18  ;;  %8496 = vmatprep.subr.bf16.mxu1 %v11634_v10  ;;  %v11777_v10 = vcombine.low %v1046_v43, %v1082_v28  ;;  %v11848_v18 = vcombine.high %v1117_v41, %v1153_v57  ;;  %v11850_v19 = vcombine.high %v1118_v62, %v1154_v24 }
 0x455   : > { %v11847_v48 = vcombine.low %v1117_v41, %v1153_v57  ;;  %v11849_v44 = vcombine.low %v1118_v62, %v1154_v24  ;;  %v1369_v41 = vld [vmem:[#allocation6 + $0x23d0] sm:$0xff]  ;;  %v1334_v57 = vld [vmem:[#allocation6 + $0x22b8] sm:$0xff] }
 0x457   : > { %8454 = vmatpush1.bf16.msra.mxu0 %v11631_v47  ;;  %8497 = vmatpush1.bf16.msra.mxu1 %v11633_v35  ;;  %v1189_v47 = vld [vmem:[#allocation6 + $0x1e30] sm:$0xff]  ;;  %v1226_v35 = vld [vmem:[#allocation6 + $0x1f58] sm:$0xff] }
 0x458   : > { %8455 = vmatprep.subr.bf16.mxu0 %v11704_v51  ;;  %8498 = vmatprep.subr.bf16.mxu1 %v11706_v38  ;;  %v11920_v51 = vcombine.high %v1189_v47, %v1225_v52  ;;  %v11922_v38 = vcombine.high %v1190_v59, %v1226_v35  ;;  %v11919_v43 = vcombine.low %v1189_v47, %v1225_v52  ;;  %v291_v47 = vld [vmem:[#allocation6 + $0x220] sm:$0xff]  ;;  %v256_v52 = vld [vmem:[#allocation6 + $0x108] sm:$0xff] }
 0x459   : > { %v11921_v28 = vcombine.low %v1190_v59, %v1226_v35 }
 0x45b   : > { %8456 = vmatpush1.bf16.msra.mxu0 %v11703_v4  ;;  %8499 = vmatpush1.bf16.msra.mxu1 %v11705_v58  ;;  %v1261_v4 = vld [vmem:[#allocation6 + $0x2070] sm:$0xff]  ;;  %v1298_v58 = vld [vmem:[#allocation6 + $0x2198] sm:$0xff] }
 0x45c   : > { %8457 = vmatprep.subr.bf16.mxu0 %v11776_v31  ;;  %8500 = vmatprep.subr.bf16.mxu1 %v11778_v36  ;;  %v11992_v31 = vcombine.high %v1261_v4, %v1297_v7  ;;  %v11994_v36 = vcombine.high %v1262_v33, %v1298_v58  ;;  %v11991_v62 = vcombine.low %v1261_v4, %v1297_v7  ;;  %v327_v4 = vld [vmem:[#allocation6 + $0x340] sm:$0xff] }
 0x45d   : > { %v11993_v24 = vcombine.low %v1262_v33, %v1298_v58  ;;  %v363_v7 = vld [vmem:[#allocation6 + $0x460] sm:$0xff]  ;;  %v364_v33 = vld [vmem:[#allocation6 + $0x468] sm:$0xff] }
 0x45f   : > { %8458 = vmatpush1.bf16.msra.mxu0 %v11775_v61  ;;  %8501 = vmatpush1.bf16.msra.mxu1 %v11777_v10  ;;  %v1333_v61 = vld [vmem:[#allocation6 + $0x22b0] sm:$0xff]  ;;  %v1370_v10 = vld [vmem:[#allocation6 + $0x23d8] sm:$0xff] }
 0x460   : > { %8459 = vmatprep.subr.bf16.mxu0 %v11848_v18  ;;  %8502 = vmatprep.subr.bf16.mxu1 %v11850_v19  ;;  %v12064_v18 = vcombine.high %v1333_v61, %v1369_v41  ;;  %v12066_v19 = vcombine.high %v1334_v57, %v1370_v10  ;;  %v12063_v59 = vcombine.low %v1333_v61, %v1369_v41  ;;  %v399_v61 = vld [vmem:[#allocation6 + $0x580] sm:$0xff] }
 0x461   : > { %v12065_v35 = vcombine.low %v1334_v57, %v1370_v10  ;;  %v435_v41 = vld [vmem:[#allocation6 + $0x6a0] sm:$0xff]  ;;  %v400_v57 = vld [vmem:[#allocation6 + $0x588] sm:$0xff] }
 0x462   : > { %v436_v10 = vld [vmem:[#allocation6 + $0x6a8] sm:$0xff] }
 0x463   : > { %8460 = vmatpush1.bf16.msra.mxu0 %v11847_v48  ;;  %8503 = vmatpush1.bf16.msra.mxu1 %v11849_v44  ;;  %v255_v48 = vld [vmem:[#allocation6 + $0x100] sm:$0xff]  ;;  %v292_v44 = vld [vmem:[#allocation6 + $0x228] sm:$0xff] }
 0x464   : > { %8461 = vmatprep.subr.bf16.mxu0 %v11920_v51  ;;  %8504 = vmatprep.subr.bf16.mxu1 %v11922_v38  ;;  %v10988_v51 = vcombine.high %v255_v48, %v291_v47  ;;  %v10990_v38 = vcombine.high %v256_v52, %v292_v44  ;;  %v10987_v58 = vcombine.low %v255_v48, %v291_v47  ;;  %v471_v47 = vld [vmem:[#allocation6 + $0x7c0] sm:$0xff] }
 0x465   : > { %v11134_v48 = vcombine.high %v400_v57, %v436_v10 }
 0x467   : > { %8462 = vmatpush1.bf16.msra.mxu0 %v11919_v43  ;;  %8505 = vmatpush1.bf16.msra.mxu1 %v11921_v28  ;;  %v328_v43 = vld [vmem:[#allocation6 + $0x348] sm:$0xff]  ;;  %v10989_v28 = vcombine.low %v256_v52, %v292_v44  ;;  %v507_v52 = vld [vmem:[#allocation6 + $0x8e0] sm:$0xff] }
 0x468   : > { %8463 = vmatprep.subr.bf16.mxu0 %v11992_v31  ;;  %8506 = vmatprep.subr.bf16.mxu1 %v11994_v36  ;;  %v11060_v31 = vcombine.high %v327_v4, %v363_v7  ;;  %v11062_v36 = vcombine.high %v328_v43, %v364_v33  ;;  %v472_v44 = vld [vmem:[#allocation6 + $0x7c8] sm:$0xff] }
 0x46b   : > { %8464 = vmatpush1.bf16.msra.mxu0 %v11991_v62  ;;  %8507 = vmatpush1.bf16.msra.mxu1 %v11993_v24  ;;  %v13119_v62 = vld [vmem:[%s12725_s5] ss:$8 sps:$4 sm:$0xff]   ;;  %v11059_v24 = vcombine.low %v327_v4, %v363_v7 }
 0x46c   : > { %8465 = vmatprep.subr.bf16.mxu0 %v12064_v18  ;;  %8508 = vmatprep.subr.bf16.mxu1 %v12066_v19  ;;  %v11061_v18 = vcombine.low %v328_v43, %v364_v33  ;;  %v11132_v19 = vcombine.high %v399_v61, %v435_v41  ;;  %v543_v7 = vld [vmem:[#allocation6 + $0xa00] sm:$0xff]  ;;  %v544_v33 = vld [vmem:[#allocation6 + $0xa08] sm:$0xff] }
 0x46d   : > { %v579_v43 = vld [vmem:[#allocation6 + $0xb20] sm:$0xff] }
 0x46f   : > { %8466 = vmatpush1.bf16.msra.mxu0 %v12063_v59  ;;  %8509 = vmatpush1.bf16.msra.mxu1 %v12065_v35  ;;  %v508_v59 = vld [vmem:[#allocation6 + $0x8e8] sm:$0xff]  ;;  %v11131_v35 = vcombine.low %v399_v61, %v435_v41  ;;  %v651_v61 = vld [vmem:[#allocation6 + $0xd60] sm:$0xff] }
 0x470   : > { %8521 = vmatprep.subr.bf16.mxu0 %v10988_v51  ;;  %8564 = vmatprep.subr.bf16.mxu1 %v10990_v38  ;;  %v11133_v51 = vcombine.low %v400_v57, %v436_v10  ;;  %v11204_v38 = vcombine.high %v471_v47, %v507_v52  ;;  %v11206_v4 = vcombine.high %v472_v44, %v508_v59  ;;  %v616_v41 = vld [vmem:[#allocation6 + $0xc48] sm:$0xff] }
 0x471   : > { %v11275_v57 = vcombine.low %v543_v7, %v579_v43 }
 0x472   : > { %8468 = vmatmul.mubr.bf16.vlgmr.msra.gmra.mrb[60].mxu0 %v13119_v62  ;;  %8511 = vmatmul.mubr.bf16.vlgmr.msra.gmra.mrb[60].mxu1 %v13119_v62 }
 0x473   : > { %8522 = vmatpush1.bf16.msra.mxu0 %v10987_v58  ;;  %8565 = vmatpush1.bf16.msra.mxu1 %v10989_v28  ;;  %v580_v58 = vld [vmem:[#allocation6 + $0xb28] sm:$0xff]  ;;  %v11203_v28 = vcombine.low %v471_v47, %v507_v52  ;;  %v723_v47 = vld [vmem:[#allocation6 + $0xfa0] sm:$0xff] }
 0x474   : > { %8523 = vmatprep.subr.bf16.mxu0 %v11060_v31  ;;  %8566 = vmatprep.subr.bf16.mxu1 %v11062_v36  ;;  %v11205_v31 = vcombine.low %v472_v44, %v508_v59  ;;  %v11276_v36 = vcombine.high %v543_v7, %v579_v43  ;;  %v11278_v30 = vcombine.high %v544_v33, %v580_v58  ;;  %v688_v52 = vld [vmem:[#allocation6 + $0xe88] sm:$0xff]  ;;  %v759_v43 = vld [vmem:[#allocation6 + $0x10c0] sm:$0xff] }
 0x475   : > { %8553 = vmatprep.mubr.bf16.mxu0 %v13090_v39  ;;  %8596 = vmatprep.mubr.bf16.mxu1 %v13090_v39  ;;  %v11277_v10 = vcombine.low %v544_v33, %v580_v58  ;;  %v760_v58 = vld [vmem:[#allocation6 + $0x10c8] sm:$0xff] }
 0x477   : > { %8524 = vmatpush1.bf16.msra.mxu0 %v11059_v24  ;;  %8567 = vmatpush1.bf16.msra.mxu1 %v11061_v18  ;;  %v615_v24 = vld [vmem:[#allocation6 + $0xc40] sm:$0xff]  ;;  %v652_v18 = vld [vmem:[#allocation6 + $0xd68] sm:$0xff] }
 0x478   : > { %8525 = vmatprep.subr.bf16.mxu0 %v11132_v19  ;;  %8568 = vmatprep.subr.bf16.mxu1 %v11134_v48  ;;  %v11348_v19 = vcombine.high %v615_v24, %v651_v61  ;;  %v11350_v48 = vcombine.high %v616_v41, %v652_v18  ;;  %v11347_v44 = vcombine.low %v615_v24, %v651_v61 }
 0x479   : > { %v11349_v59 = vcombine.low %v616_v41, %v652_v18  ;;  %v867_v41 = vld [vmem:[#allocation6 + $0x1420] sm:$0xff] }
 0x47b   : > { %8526 = vmatpush1.bf16.msra.mxu0 %v11131_v35  ;;  %8569 = vmatpush1.bf16.msra.mxu1 %v11133_v51  ;;  %v687_v35 = vld [vmem:[#allocation6 + $0xe80] sm:$0xff]  ;;  %v724_v51 = vld [vmem:[#allocation6 + $0xfa8] sm:$0xff] }
 0x47c   : > { %8527 = vmatprep.subr.bf16.mxu0 %v11204_v38  ;;  %8570 = vmatprep.subr.bf16.mxu1 %v11206_v4  ;;  %v11420_v38 = vcombine.high %v687_v35, %v723_v47  ;;  %v11422_v7 = vcombine.high %v688_v52, %v724_v51  ;;  %v11419_v61 = vcombine.low %v687_v35, %v723_v47  ;;  %v831_v47 = vld [vmem:[#allocation6 + $0x1300] sm:$0xff] }
 0x47f   : > { %8528 = vmatpush1.bf16.msra.mxu0 %v11203_v28  ;;  %8571 = vmatpush1.bf16.msra.mxu1 %v11205_v31  ;;  %v795_v28 = vld [vmem:[#allocation6 + $0x11e0] sm:$0xff]  ;;  %v796_v31 = vld [vmem:[#allocation6 + $0x11e8] sm:$0xff] }
 0x480   : > { %8529 = vmatprep.subr.bf16.mxu0 %v11276_v36  ;;  %8572 = vmatprep.subr.bf16.mxu1 %v11278_v30  ;;  %v11494_v35 = vcombine.high %v760_v58, %v796_v31 }
 0x483   : > { %8530 = vmatpush1.bf16.msra.mxu0 %v11275_v57  ;;  %8573 = vmatpush1.bf16.msra.mxu1 %v11277_v10  ;;  %v11421_v10 = vcombine.low %v688_v52, %v724_v51  ;;  %v11491_v52 = vcombine.low %v759_v43, %v795_v28  ;;  %v11493_v51 = vcombine.low %v760_v58, %v796_v31 }
 0x484   : > { %8531 = vmatprep.subr.bf16.mxu0 %v11348_v19  ;;  %8574 = vmatprep.subr.bf16.mxu1 %v11350_v48  ;;  %v11492_v19 = vcombine.high %v759_v43, %v795_v28  ;;  %v1011_v43 = vld [vmem:[#allocation6 + $0x18a0] sm:$0xff]  ;;  %v976_v28 = vld [vmem:[#allocation6 + $0x1788] sm:$0xff] }
 0x485   : > { %v13125_v4 = vpop.f32.mrb[48].mxu0  ;;  %v13129_v30 = vpop.f32.mrb[48].mxu1 }
 0x486   : > { %13770 = vst [vmem:[#allocation72_spill] sm:$0xff] %v13125_v4  ;;  %v13127_v33 = vpop.f32.mrb[49].mxu0  ;;  %13772 = vst [vmem:[#allocation74_spill] sm:$0xff] %v13129_v30  ;;  %v13133_v24 = vpop.f32.mrb[49].mxu1  ;;  %v832_v4 = vld [vmem:[#allocation6 + $0x1308] sm:$0xff]  ;;  %v939_v30 = vld [vmem:[#allocation6 + $0x1660] sm:$0xff] }
 0x487   : > { %13771 = vst [vmem:[#allocation73_spill] sm:$0xff] %v13127_v33  ;;  %v13131_v36 = vpop.f32.mrb[50].mxu0  ;;  %8532 = vmatpush1.bf16.msra.mxu0 %v11347_v44  ;;  %13774 = vst [vmem:[#allocation76_spill] sm:$0xff] %v13133_v24  ;;  %8575 = vmatpush1.bf16.msra.mxu1 %v11349_v59  ;;  %v13139_v57 = vpop.f32.mrb[50].mxu1  ;;  %v903_v44 = vld [vmem:[#allocation6 + $0x1540] sm:$0xff]  ;;  %v11563_v33 = vcombine.low %v831_v47, %v867_v41 }
 0x488   : > { %13773 = vst [vmem:[#allocation75_spill] sm:$0xff] %v13131_v36  ;;  %v13137_v18 = vpop.f32.mrb[51].mxu0  ;;  %13776 = vst [vmem:[#allocation78_spill] sm:$0xff] %v13139_v57  ;;  %8533 = vmatprep.subr.bf16.mxu0 %v11420_v38  ;;  %v13145_v37 = vpop.f32.mrb[51].mxu1  ;;  %8576 = vmatprep.subr.bf16.mxu1 %v11422_v7  ;;  %v868_v36 = vld [vmem:[#allocation6 + $0x1428] sm:$0xff]  ;;  %v11564_v38 = vcombine.high %v831_v47, %v867_v41  ;;  %v11636_v59 = vcombine.high %v903_v44, %v939_v30  ;;  %v1083_v41 = vld [vmem:[#allocation6 + $0x1ae0] sm:$0xff] }
 0x489   : > { %13775 = vst [vmem:[#allocation77_spill] sm:$0xff] %v13137_v18  ;;  %v11566_v48 = vcombine.high %v832_v4, %v868_v36  ;;  %v904_v57 = vld [vmem:[#allocation6 + $0x1548] sm:$0xff]  ;;  %v11565_v18 = vcombine.low %v832_v4, %v868_v36  ;;  %v11635_v58 = vcombine.low %v903_v44, %v939_v30  ;;  %v1155_v30 = vld [vmem:[#allocation6 + $0x1d20] sm:$0xff] }
 0x48a   : > { %v940_v7 = vld [vmem:[#allocation6 + $0x1668] sm:$0xff] }
 0x48b   : > { %8534 = vmatpush1.bf16.msra.mxu0 %v11419_v61  ;;  %8577 = vmatpush1.bf16.msra.mxu1 %v11421_v10  ;;  %v11638_v24 = vcombine.high %v904_v57, %v940_v7  ;;  %v975_v61 = vld [vmem:[#allocation6 + $0x1780] sm:$0xff]  ;;  %v1012_v10 = vld [vmem:[#allocation6 + $0x18a8] sm:$0xff]  ;;  %v11637_v31 = vcombine.low %v904_v57, %v940_v7 }
 0x48c   : > { %8535 = vmatprep.subr.bf16.mxu0 %v11492_v19  ;;  %8578 = vmatprep.subr.bf16.mxu1 %v11494_v35  ;;  %v11708_v19 = vcombine.high %v975_v61, %v1011_v43  ;;  %v11710_v35 = vcombine.high %v976_v28, %v1012_v10  ;;  %v1048_v47 = vld [vmem:[#allocation6 + $0x19c8] sm:$0xff]  ;;  %v11707_v4 = vcombine.low %v975_v61, %v1011_v43  ;;  %v1227_v61 = vld [vmem:[#allocation6 + $0x1f60] sm:$0xff] }
 0x48d   : > { %v11709_v36 = vcombine.low %v976_v28, %v1012_v10  ;;  %v1156_v44 = vld [vmem:[#allocation6 + $0x1d28] sm:$0xff] }
 0x48e   : > { %v1192_v43 = vld [vmem:[#allocation6 + $0x1e48] sm:$0xff] }
 0x48f   : > { %8536 = vmatpush1.bf16.msra.mxu0 %v11491_v52  ;;  %8579 = vmatpush1.bf16.msra.mxu1 %v11493_v51  ;;  %v1047_v52 = vld [vmem:[#allocation6 + $0x19c0] sm:$0xff]  ;;  %v1084_v51 = vld [vmem:[#allocation6 + $0x1ae8] sm:$0xff] }
 0x490   : > { %8537 = vmatprep.subr.bf16.mxu0 %v11564_v38  ;;  %8580 = vmatprep.subr.bf16.mxu1 %v11566_v48  ;;  %v11780_v48 = vcombine.high %v1047_v52, %v1083_v41  ;;  %v11782_v38 = vcombine.high %v1048_v47, %v1084_v51  ;;  %v11779_v57 = vcombine.low %v1047_v52, %v1083_v41  ;;  %v1299_v52 = vld [vmem:[#allocation6 + $0x21a0] sm:$0xff]  ;;  %v1264_v41 = vld [vmem:[#allocation6 + $0x2088] sm:$0xff] }
 0x493   : > { %8538 = vmatpush1.bf16.msra.mxu0 %v11563_v33  ;;  %8581 = vmatpush1.bf16.msra.mxu1 %v11565_v18  ;;  %v1119_v33 = vld [vmem:[#allocation6 + $0x1c00] sm:$0xff]  ;;  %v1120_v18 = vld [vmem:[#allocation6 + $0x1c08] sm:$0xff] }
 0x494   : > { %8539 = vmatprep.subr.bf16.mxu0 %v11636_v59  ;;  %8582 = vmatprep.subr.bf16.mxu1 %v11638_v24  ;;  %v11781_v24 = vcombine.low %v1048_v47, %v1084_v51  ;;  %v11852_v59 = vcombine.high %v1119_v33, %v1155_v30  ;;  %v11854_v7 = vcombine.high %v1120_v18, %v1156_v44 }
 0x495   : > { %v11851_v28 = vcombine.low %v1119_v33, %v1155_v30  ;;  %v11853_v10 = vcombine.low %v1120_v18, %v1156_v44  ;;  %v1371_v33 = vld [vmem:[#allocation6 + $0x23e0] sm:$0xff]  ;;  %v1336_v30 = vld [vmem:[#allocation6 + $0x22c8] sm:$0xff] }
 0x497   : > { %8540 = vmatpush1.bf16.msra.mxu0 %v11635_v58  ;;  %8583 = vmatpush1.bf16.msra.mxu1 %v11637_v31  ;;  %v1191_v58 = vld [vmem:[#allocation6 + $0x1e40] sm:$0xff]  ;;  %v1228_v31 = vld [vmem:[#allocation6 + $0x1f68] sm:$0xff] }
 0x498   : > { %8541 = vmatprep.subr.bf16.mxu0 %v11708_v19  ;;  %8584 = vmatprep.subr.bf16.mxu1 %v11710_v35  ;;  %v11924_v19 = vcombine.high %v1191_v58, %v1227_v61  ;;  %v11926_v35 = vcombine.high %v1192_v43, %v1228_v31  ;;  %v11923_v47 = vcombine.low %v1191_v58, %v1227_v61  ;;  %v293_v58 = vld [vmem:[#allocation6 + $0x230] sm:$0xff]  ;;  %v258_v61 = vld [vmem:[#allocation6 + $0x118] sm:$0xff] }
 0x499   : > { %v11925_v51 = vcombine.low %v1192_v43, %v1228_v31 }
 0x49b   : > { %8542 = vmatpush1.bf16.msra.mxu0 %v11707_v4  ;;  %8585 = vmatpush1.bf16.msra.mxu1 %v11709_v36  ;;  %v1263_v4 = vld [vmem:[#allocation6 + $0x2080] sm:$0xff]  ;;  %v1300_v36 = vld [vmem:[#allocation6 + $0x21a8] sm:$0xff] }
 0x49c   : > { %8543 = vmatprep.subr.bf16.mxu0 %v11780_v48  ;;  %8586 = vmatprep.subr.bf16.mxu1 %v11782_v38  ;;  %v11996_v48 = vcombine.high %v1263_v4, %v1299_v52  ;;  %v11998_v38 = vcombine.high %v1264_v41, %v1300_v36  ;;  %v11995_v18 = vcombine.low %v1263_v4, %v1299_v52  ;;  %v365_v4 = vld [vmem:[#allocation6 + $0x470] sm:$0xff]  ;;  %v330_v52 = vld [vmem:[#allocation6 + $0x358] sm:$0xff] }
 0x49d   : > { %v11997_v44 = vcombine.low %v1264_v41, %v1300_v36 }
 0x49f   : > { %8544 = vmatpush1.bf16.msra.mxu0 %v11779_v57  ;;  %8587 = vmatpush1.bf16.msra.mxu1 %v11781_v24  ;;  %v1335_v57 = vld [vmem:[#allocation6 + $0x22c0] sm:$0xff]  ;;  %v1372_v24 = vld [vmem:[#allocation6 + $0x23e8] sm:$0xff] }
 0x4a0   : > { %8545 = vmatprep.subr.bf16.mxu0 %v11852_v59  ;;  %8588 = vmatprep.subr.bf16.mxu1 %v11854_v7  ;;  %v12068_v59 = vcombine.high %v1335_v57, %v1371_v33  ;;  %v12070_v7 = vcombine.high %v1336_v30, %v1372_v24  ;;  %v12067_v43 = vcombine.low %v1335_v57, %v1371_v33  ;;  %v437_v57 = vld [vmem:[#allocation6 + $0x6b0] sm:$0xff]  ;;  %v402_v33 = vld [vmem:[#allocation6 + $0x598] sm:$0xff] }
 0x4a1   : > { %v12069_v31 = vcombine.low %v1336_v30, %v1372_v24  ;;  %v438_v30 = vld [vmem:[#allocation6 + $0x6b8] sm:$0xff] }
 0x4a3   : > { %8546 = vmatpush1.bf16.msra.mxu0 %v11851_v28  ;;  %8589 = vmatpush1.bf16.msra.mxu1 %v11853_v10  ;;  %v257_v28 = vld [vmem:[#allocation6 + $0x110] sm:$0xff]  ;;  %v294_v10 = vld [vmem:[#allocation6 + $0x238] sm:$0xff] }
 0x4a4   : > { %8547 = vmatprep.subr.bf16.mxu0 %v11924_v19  ;;  %8590 = vmatprep.subr.bf16.mxu1 %v11926_v35  ;;  %v10992_v19 = vcombine.high %v257_v28, %v293_v58  ;;  %v10994_v35 = vcombine.high %v258_v61, %v294_v10  ;;  %v10991_v41 = vcombine.low %v257_v28, %v293_v58  ;;  %v473_v28 = vld [vmem:[#allocation6 + $0x7d0] sm:$0xff] }
 0x4a5   : > { %v10993_v36 = vcombine.low %v258_v61, %v294_v10  ;;  %v509_v58 = vld [vmem:[#allocation6 + $0x8f0] sm:$0xff]  ;;  %v474_v61 = vld [vmem:[#allocation6 + $0x7d8] sm:$0xff] }
 0x4a6   : > { %v510_v10 = vld [vmem:[#allocation6 + $0x8f8] sm:$0xff] }
 0x4a7   : > { %8548 = vmatpush1.bf16.msra.mxu0 %v11923_v47  ;;  %8591 = vmatpush1.bf16.msra.mxu1 %v11925_v51  ;;  %v329_v47 = vld [vmem:[#allocation6 + $0x350] sm:$0xff]  ;;  %v366_v51 = vld [vmem:[#allocation6 + $0x478] sm:$0xff] }
 0x4a8   : > { %8549 = vmatprep.subr.bf16.mxu0 %v11996_v48  ;;  %8592 = vmatprep.subr.bf16.mxu1 %v11998_v38  ;;  %v11064_v48 = vcombine.high %v329_v47, %v365_v4  ;;  %v11066_v38 = vcombine.high %v330_v52, %v366_v51  ;;  %v11063_v24 = vcombine.low %v329_v47, %v365_v4  ;;  %v545_v47 = vld [vmem:[#allocation6 + $0xa10] sm:$0xff] }
 0x4a9   : > { %v581_v4 = vld [vmem:[#allocation6 + $0xb30] sm:$0xff] }
 0x4ab   : > { %8550 = vmatpush1.bf16.msra.mxu0 %v11995_v18  ;;  %8593 = vmatpush1.bf16.msra.mxu1 %v11997_v44  ;;  %v401_v18 = vld [vmem:[#allocation6 + $0x590] sm:$0xff]  ;;  %v11065_v44 = vcombine.low %v330_v52, %v366_v51  ;;  %v546_v52 = vld [vmem:[#allocation6 + $0xa18] sm:$0xff] }
 0x4ac   : > { %8551 = vmatprep.subr.bf16.mxu0 %v12068_v59  ;;  %8594 = vmatprep.subr.bf16.mxu1 %v12070_v7  ;;  %v11136_v59 = vcombine.high %v401_v18, %v437_v57  ;;  %v11138_v7 = vcombine.high %v402_v33, %v438_v30  ;;  %v582_v51 = vld [vmem:[#allocation6 + $0xb38] sm:$0xff] }
 0x4af   : > { %8552 = vmatpush1.bf16.msra.mxu0 %v12067_v43  ;;  %8595 = vmatpush1.bf16.msra.mxu1 %v12069_v31  ;;  %v11135_v43 = vcombine.low %v401_v18, %v437_v57  ;;  %v11137_v31 = vcombine.low %v402_v33, %v438_v30  ;;  %v653_v18 = vld [vmem:[#allocation6 + $0xd70] sm:$0xff]  ;;  %v618_v57 = vld [vmem:[#allocation6 + $0xc58] sm:$0xff]  ;;  %v11279_v33 = vcombine.low %v545_v47, %v581_v4 }
 0x4b0   : > { %8607 = vmatprep.subr.bf16.mxu0 %v10992_v19  ;;  %8650 = vmatprep.subr.bf16.mxu1 %v10994_v35  ;;  %v11208_v19 = vcombine.high %v473_v28, %v509_v58  ;;  %v11210_v35 = vcombine.high %v474_v61, %v510_v10  ;;  %v11281_v30 = vcombine.low %v546_v52, %v582_v51 }
 0x4b2   : > { %8554 = vmatmul.mubr.bf16.vlgmr.msra.gmra.mrb[64].mxu0 %v13119_v62  ;;  %8597 = vmatmul.mubr.bf16.vlgmr.msra.gmra.mrb[64].mxu1 %v13119_v62 }
 0x4b3   : > { %8608 = vmatpush1.bf16.msra.mxu0 %v10991_v41  ;;  %8651 = vmatpush1.bf16.msra.mxu1 %v10993_v36  ;;  %v11207_v41 = vcombine.low %v473_v28, %v509_v58  ;;  %v11209_v36 = vcombine.low %v474_v61, %v510_v10  ;;  %v725_v28 = vld [vmem:[#allocation6 + $0xfb0] sm:$0xff]  ;;  %v690_v58 = vld [vmem:[#allocation6 + $0xe98] sm:$0xff] }
 0x4b4   : > { %8609 = vmatprep.subr.bf16.mxu0 %v11064_v48  ;;  %8652 = vmatprep.subr.bf16.mxu1 %v11066_v38  ;;  %v11280_v48 = vcombine.high %v545_v47, %v581_v4  ;;  %v617_v38 = vld [vmem:[#allocation6 + $0xc50] sm:$0xff] }
 0x4b5   : > { %8639 = vmatprep.mubr.bf16.mxu0 %v13090_v39  ;;  %8682 = vmatprep.mubr.bf16.mxu1 %v13090_v39  ;;  %v11282_v39 = vcombine.high %v546_v52, %v582_v51  ;;  %v11351_v61 = vcombine.low %v617_v38, %v653_v18  ;;  %v761_v47 = vld [vmem:[#allocation6 + $0x10d0] sm:$0xff] }
 0x4b6   : > { %v797_v4 = vld [vmem:[#allocation6 + $0x11f0] sm:$0xff] }
 0x4b7   : > { %8610 = vmatpush1.bf16.msra.mxu0 %v11063_v24  ;;  %8653 = vmatpush1.bf16.msra.mxu1 %v11065_v44  ;;  %v654_v24 = vld [vmem:[#allocation6 + $0xd78] sm:$0xff]  ;;  %v11352_v44 = vcombine.high %v617_v38, %v653_v18  ;;  %v869_v18 = vld [vmem:[#allocation6 + $0x1430] sm:$0xff] }
 0x4b8   : > { %8611 = vmatprep.subr.bf16.mxu0 %v11136_v59  ;;  %8654 = vmatprep.subr.bf16.mxu1 %v11138_v7  ;;  %v11354_v59 = vcombine.high %v618_v57, %v654_v24  ;;  %v689_v7 = vld [vmem:[#allocation6 + $0xe90] sm:$0xff]  ;;  %v11353_v10 = vcombine.low %v618_v57, %v654_v24 }
 0x4b9   : > { %v11423_v38 = vcombine.low %v689_v7, %v725_v28 }
 0x4bb   : > { %8612 = vmatpush1.bf16.msra.mxu0 %v11135_v43  ;;  %8655 = vmatpush1.bf16.msra.mxu1 %v11137_v31  ;;  %v726_v43 = vld [vmem:[#allocation6 + $0xfb8] sm:$0xff]  ;;  %v11424_v31 = vcombine.high %v689_v7, %v725_v28  ;;  %v833_v28 = vld [vmem:[#allocation6 + $0x1310] sm:$0xff] }
 0x4bc   : > { %8613 = vmatprep.subr.bf16.mxu0 %v11208_v19  ;;  %8656 = vmatprep.subr.bf16.mxu1 %v11210_v35  ;;  %v11426_v35 = vcombine.high %v690_v58, %v726_v43 }
 0x4bf   : > { %8614 = vmatpush1.bf16.msra.mxu0 %v11207_v41  ;;  %8657 = vmatpush1.bf16.msra.mxu1 %v11209_v36  ;;  %v762_v41 = vld [vmem:[#allocation6 + $0x10d8] sm:$0xff] }
 0x4c0   : > { %8615 = vmatprep.subr.bf16.mxu0 %v11280_v48  ;;  %8658 = vmatprep.subr.bf16.mxu1 %v11282_v39  ;;  %v798_v36 = vld [vmem:[#allocation6 + $0x11f8] sm:$0xff] }
 0x4c1   : > { %v11498_v7 = vcombine.high %v762_v41, %v798_v36 }
 0x4c3   : > { %8616 = vmatpush1.bf16.msra.mxu0 %v11279_v33  ;;  %8659 = vmatpush1.bf16.msra.mxu1 %v11281_v30  ;;  %v11425_v33 = vcombine.low %v690_v58, %v726_v43  ;;  %v11496_v30 = vcombine.high %v761_v47, %v797_v4  ;;  %v11495_v58 = vcombine.low %v761_v47, %v797_v4  ;;  %v1013_v47 = vld [vmem:[#allocation6 + $0x18b0] sm:$0xff]  ;;  %v978_v4 = vld [vmem:[#allocation6 + $0x1798] sm:$0xff] }
 0x4c4   : > { %8617 = vmatprep.subr.bf16.mxu0 %v11352_v44  ;;  %8660 = vmatprep.subr.bf16.mxu1 %v11354_v59  ;;  %v11497_v43 = vcombine.low %v762_v41, %v798_v36  ;;  %v905_v59 = vld [vmem:[#allocation6 + $0x1550] sm:$0xff] }
 0x4c5   : > { %v13153_v19 = vpop.f32.mrb[52].mxu0  ;;  %v13157_v51 = vpop.f32.mrb[52].mxu1 }
 0x4c6   : > { %13777 = vst [vmem:[#allocation79_spill] sm:$0xff] %v13153_v19  ;;  %v13155_v52 = vpop.f32.mrb[53].mxu0  ;;  %13779 = vst [vmem:[#allocation81_spill] sm:$0xff] %v13157_v51  ;;  %v13161_v39 = vpop.f32.mrb[53].mxu1  ;;  %v834_v19 = vld [vmem:[#allocation6 + $0x1318] sm:$0xff]  ;;  %v941_v51 = vld [vmem:[#allocation6 + $0x1670] sm:$0xff] }
 0x4c7   : > { %13778 = vst [vmem:[#allocation80_spill] sm:$0xff] %v13155_v52  ;;  %v13159_v48 = vpop.f32.mrb[54].mxu0  ;;  %8618 = vmatpush1.bf16.msra.mxu0 %v11351_v61  ;;  %13781 = vst [vmem:[#allocation83_spill] sm:$0xff] %v13161_v39  ;;  %8661 = vmatpush1.bf16.msra.mxu1 %v11353_v10  ;;  %v13167_v24 = vpop.f32.mrb[54].mxu1  ;;  %v11567_v52 = vcombine.low %v833_v28, %v869_v18  ;;  %v11640_v10 = vcombine.high %v905_v59, %v941_v51 }
 0x4c8   : > { %13780 = vst [vmem:[#allocation82_spill] sm:$0xff] %v13159_v48  ;;  %v13165_v57 = vpop.f32.mrb[55].mxu0  ;;  %13783 = vst [vmem:[#allocation85_spill] sm:$0xff] %v13167_v24  ;;  %8619 = vmatprep.subr.bf16.mxu0 %v11424_v31  ;;  %v13173_v61 = vpop.f32.mrb[55].mxu1  ;;  %8662 = vmatprep.subr.bf16.mxu1 %v11426_v35  ;;  %v870_v48 = vld [vmem:[#allocation6 + $0x1438] sm:$0xff]  ;;  %v11568_v31 = vcombine.high %v833_v28, %v869_v18  ;;  %v11639_v41 = vcombine.low %v905_v59, %v941_v51  ;;  %v1085_v18 = vld [vmem:[#allocation6 + $0x1af0] sm:$0xff] }
 0x4c9   : > { %13782 = vst [vmem:[#allocation84_spill] sm:$0xff] %v13165_v57  ;;  %v11570_v44 = vcombine.high %v834_v19, %v870_v48  ;;  %v906_v24 = vld [vmem:[#allocation6 + $0x1558] sm:$0xff]  ;;  %v11569_v57 = vcombine.low %v834_v19, %v870_v48  ;;  %v1157_v51 = vld [vmem:[#allocation6 + $0x1d30] sm:$0xff] }
 0x4ca   : > { %v942_v35 = vld [vmem:[#allocation6 + $0x1678] sm:$0xff] }
 0x4cb   : > { %8620 = vmatpush1.bf16.msra.mxu0 %v11423_v38  ;;  %8663 = vmatpush1.bf16.msra.mxu1 %v11425_v33  ;;  %v11642_v39 = vcombine.high %v906_v24, %v942_v35  ;;  %v977_v38 = vld [vmem:[#allocation6 + $0x1790] sm:$0xff]  ;;  %v1014_v33 = vld [vmem:[#allocation6 + $0x18b8] sm:$0xff]  ;;  %v11641_v36 = vcombine.low %v906_v24, %v942_v35 }
 0x4cc   : > { %8621 = vmatprep.subr.bf16.mxu0 %v11496_v30  ;;  %8664 = vmatprep.subr.bf16.mxu1 %v11498_v7  ;;  %v11712_v30 = vcombine.high %v977_v38, %v1013_v47  ;;  %v11714_v7 = vcombine.high %v978_v4, %v1014_v33  ;;  %v1050_v28 = vld [vmem:[#allocation6 + $0x19d8] sm:$0xff]  ;;  %v11711_v19 = vcombine.low %v977_v38, %v1013_v47  ;;  %v1229_v38 = vld [vmem:[#allocation6 + $0x1f70] sm:$0xff] }
 0x4cd   : > { %v11713_v48 = vcombine.low %v978_v4, %v1014_v33  ;;  %v1158_v59 = vld [vmem:[#allocation6 + $0x1d38] sm:$0xff] }
 0x4ce   : > { %v1194_v47 = vld [vmem:[#allocation6 + $0x1e58] sm:$0xff] }
 0x4cf   : > { %8622 = vmatpush1.bf16.msra.mxu0 %v11495_v58  ;;  %8665 = vmatpush1.bf16.msra.mxu1 %v11497_v43  ;;  %v1049_v58 = vld [vmem:[#allocation6 + $0x19d0] sm:$0xff]  ;;  %v1086_v43 = vld [vmem:[#allocation6 + $0x1af8] sm:$0xff] }
 0x4d0   : > { %8623 = vmatprep.subr.bf16.mxu0 %v11568_v31  ;;  %8666 = vmatprep.subr.bf16.mxu1 %v11570_v44  ;;  %v11784_v44 = vcombine.high %v1049_v58, %v1085_v18  ;;  %v11786_v31 = vcombine.high %v1050_v28, %v1086_v43  ;;  %v11783_v24 = vcombine.low %v1049_v58, %v1085_v18  ;;  %v1301_v58 = vld [vmem:[#allocation6 + $0x21b0] sm:$0xff]  ;;  %v1266_v18 = vld [vmem:[#allocation6 + $0x2098] sm:$0xff] }
 0x4d3   : > { %8624 = vmatpush1.bf16.msra.mxu0 %v11567_v52  ;;  %8667 = vmatpush1.bf16.msra.mxu1 %v11569_v57  ;;  %v1121_v52 = vld [vmem:[#allocation6 + $0x1c10] sm:$0xff]  ;;  %v1122_v57 = vld [vmem:[#allocation6 + $0x1c18] sm:$0xff] }
 0x4d4   : > { %8625 = vmatprep.subr.bf16.mxu0 %v11640_v10  ;;  %8668 = vmatprep.subr.bf16.mxu1 %v11642_v39  ;;  %v11785_v39 = vcombine.low %v1050_v28, %v1086_v43  ;;  %v11856_v10 = vcombine.high %v1121_v52, %v1157_v51  ;;  %v11858_v35 = vcombine.high %v1122_v57, %v1158_v59 }
 0x4d5   : > { %v11855_v4 = vcombine.low %v1121_v52, %v1157_v51  ;;  %v11857_v33 = vcombine.low %v1122_v57, %v1158_v59  ;;  %v1373_v52 = vld [vmem:[#allocation6 + $0x23f0] sm:$0xff]  ;;  %v1338_v51 = vld [vmem:[#allocation6 + $0x22d8] sm:$0xff] }
 0x4d7   : > { %8626 = vmatpush1.bf16.msra.mxu0 %v11639_v41  ;;  %8669 = vmatpush1.bf16.msra.mxu1 %v11641_v36  ;;  %v1193_v41 = vld [vmem:[#allocation6 + $0x1e50] sm:$0xff]  ;;  %v1230_v36 = vld [vmem:[#allocation6 + $0x1f78] sm:$0xff] }
 0x4d8   : > { %8627 = vmatprep.subr.bf16.mxu0 %v11712_v30  ;;  %8670 = vmatprep.subr.bf16.mxu1 %v11714_v7  ;;  %v11928_v30 = vcombine.high %v1193_v41, %v1229_v38  ;;  %v11930_v7 = vcombine.high %v1194_v47, %v1230_v36  ;;  %v11927_v28 = vcombine.low %v1193_v41, %v1229_v38 }
 0x4d9   : > { %v11929_v43 = vcombine.low %v1194_v47, %v1230_v36  ;;  %v13784_v47 = vpack.c.bf16 %v12836_v27, %v12826_v8  ;;  %v13785_v36 = vpack.c.bf16 %v12844_v32, %v12832_v22  ;;  %v13788_v8 = vpack.c.bf16 %v12867_v29, %v12857_v63  ;;  %v12335_v32 = vld [vmem:[#allocation8 + $0x8] sm:$0xff]  }
 0x4da   : > { %v13789_v22 = vpack.c.bf16 %v12875_v40, %v12863_v17  ;;  %v12525_v27 = vmov 0   ;;  %v13798_v29 = vpack.c.bf16 %v12799_v49, %v12793_v42  ;;  %v13800_v40 = vpack.c.bf16 %v12895_v13, %v12885_v56  ;;  %v13802_v42 = vld [vmem:[#allocation13_spill] sm:$0xff]  ;;  %v13804_v49 = vld [vmem:[#allocation15_spill] sm:$0xff] }
 0x4db   : > { %8628 = vmatpush1.bf16.msra.mxu0 %v11711_v19  ;;  %8671 = vmatpush1.bf16.msra.mxu1 %v11713_v48  ;;  %v1265_v19 = vld [vmem:[#allocation6 + $0x2090] sm:$0xff]  ;;  %v1302_v48 = vld [vmem:[#allocation6 + $0x21b8] sm:$0xff]  ;;  %v13807_v13 = vld [vmem:[#allocation21_spill] sm:$0xff] }
 0x4dc   : > { %8629 = vmatprep.subr.bf16.mxu0 %v11784_v44  ;;  %8672 = vmatprep.subr.bf16.mxu1 %v11786_v31  ;;  %v12000_v44 = vcombine.high %v1265_v19, %v1301_v58  ;;  %v12002_v31 = vcombine.high %v1266_v18, %v1302_v48  ;;  %v11999_v57 = vcombine.low %v1265_v19, %v1301_v58  ;;  %v12337_v58 = vld [vmem:[#allocation8 + $0x10] sm:$0xff]  }
 0x4dd   : > { %v12001_v59 = vcombine.low %v1266_v18, %v1302_v48  ;;  %v13814_v18 = vld [vmem:[#allocation16_spill] sm:$0xff] }
 0x4df   : > { %8630 = vmatpush1.bf16.msra.mxu0 %v11783_v24  ;;  %8673 = vmatpush1.bf16.msra.mxu1 %v11785_v39  ;;  %v1337_v24 = vld [vmem:[#allocation6 + $0x22d0] sm:$0xff]  ;;  %v1374_v39 = vld [vmem:[#allocation6 + $0x23f8] sm:$0xff] }
 0x4e0   : > { %8631 = vmatprep.subr.bf16.mxu0 %v11856_v10  ;;  %8674 = vmatprep.subr.bf16.mxu1 %v11858_v35  ;;  %v12072_v10 = vcombine.high %v1337_v24, %v1373_v52  ;;  %v12074_v35 = vcombine.high %v1338_v51, %v1374_v39  ;;  %v12071_v41 = vcombine.low %v1337_v24, %v1373_v52  ;;  %v13820_v24 = vld [vmem:[#allocation25_spill] sm:$0xff] }
 0x4e1   : > { %v12073_v38 = vcombine.low %v1338_v51, %v1374_v39  ;;  %v13822_v51 = vld [vmem:[#allocation31_spill] sm:$0xff]  ;;  %v13823_v39 = vld [vmem:[#allocation28_spill] sm:$0xff] }
 0x4e3   : > { %8632 = vmatpush1.bf16.msra.mxu0 %v11855_v4  ;;  %8675 = vmatpush1.bf16.msra.mxu1 %v11857_v33  ;;  %v13786_v4 = vpack.c.bf16 %v12830_v21, %v12824_v2  ;;  %v13787_v33 = vpack.c.bf16 %v12838_v26, %v12828_v12  ;;  %v13790_v2 = vpack.c.bf16 %v12861_v16, %v12855_v55 }
 0x4e4   : > { %8633 = vmatprep.subr.bf16.mxu0 %v11928_v30  ;;  %8676 = vmatprep.subr.bf16.mxu1 %v11930_v7  ;;  %v13791_v12 = vpack.c.bf16 %v12869_v34, %v12859_v3  ;;  %v13792_v21 = vpack.c.bf16 %v12777_v14, %v12767_v5  ;;  %v13793_v26 = vpack.c.bf16 %v12785_v20, %v12773_v11  ;;  %v13808_v30 = vld [vmem:[#allocation17_spill] sm:$0xff]  ;;  %v13811_v7 = vld [vmem:[#allocation20_spill] sm:$0xff] }
 0x4e5   : > { %v13794_v55 = vpack.c.bf16 %v12771_v9, %v12765_v1  ;;  %v13795_v5 = vpack.c.bf16 %v12779_v15, %v12769_v6  ;;  %v13796_v11 = vpack.c.bf16 %v12805_v53, %v12795_v45  ;;  %v13797_v14 = vpack.c.bf16 %v12813_v60, %v12801_v50  ;;  %v12336_v6 = vld [vmem:[#allocation8] sm:$0xff]  }
 0x4e6   : > { %v13799_v34 = vpack.c.bf16 %v12807_v54, %v12797_v46  ;;  %v13803_v46 = vpack.c.bf16 %v12889_v0, %v13802_v42  ;;  %v13805_v54 = vld [vmem:[#allocation14_spill] sm:$0xff]  ;;  %v13813_v0 = vld [vmem:[#allocation19_spill] sm:$0xff] }
 0x4e7   : > { %8634 = vmatpush1.bf16.msra.mxu0 %v11927_v28  ;;  %8677 = vmatpush1.bf16.msra.mxu1 %v11929_v43  ;;  %v13806_v56 = vpack.c.bf16 %v13804_v49, %v13805_v54  ;;  %v13815_v48 = vpack.c.bf16 %v13813_v0, %v13814_v18  ;;  %v13816_v28 = vld [vmem:[#allocation22_spill] sm:$0xff]  ;;  %v13849_v42 = vld [vmem:[#allocation43_spill] sm:$0xff]  ;;  %v12339_v0 = vld [vmem:[#allocation8 + $0x20] sm:$0xff]  }
 0x4e8   : > { %8635 = vmatprep.subr.bf16.mxu0 %v12000_v44  ;;  %8678 = vmatprep.subr.bf16.mxu1 %v12002_v31  ;;  %v13817_v43 = vld [vmem:[#allocation18_spill] sm:$0xff]  ;;  %v13819_v31 = vld [vmem:[#allocation29_spill] sm:$0xff]  ;;  %v13861_v18 = vld [vmem:[#allocation51_spill] sm:$0xff] }
 0x4e9   : > { %v13818_v44 = vpack.c.bf16 %v13816_v28, %v13817_v43  ;;  %v13821_v52 = vpack.c.bf16 %v13819_v31, %v13820_v24  ;;  %v13852_v54 = vld [vmem:[#allocation46_spill] sm:$0xff]  ;;  %v13867_v24 = vld [vmem:[#allocation61_spill] sm:$0xff] }
 0x4ea   : > { %v13864_v43 = vld [vmem:[#allocation54_spill] sm:$0xff] }
 0x4eb   : > { %8636 = vmatpush1.bf16.msra.mxu0 %v11999_v57  ;;  %8679 = vmatpush1.bf16.msra.mxu1 %v12001_v59  ;;  %v13824_v57 = vpack.c.bf16 %v13822_v51, %v13823_v39  ;;  %v13825_v59 = vld [vmem:[#allocation27_spill] sm:$0xff] }
 0x4ec   : > { %8637 = vmatprep.subr.bf16.mxu0 %v12072_v10  ;;  %8680 = vmatprep.subr.bf16.mxu1 %v12074_v35  ;;  %v13826_v10 = vld [vmem:[#allocation24_spill] sm:$0xff]  ;;  %v13870_v39 = vld [vmem:[#allocation63_spill] sm:$0xff] }
 0x4ed   : > { %v13827_v35 = vpack.c.bf16 %v13825_v59, %v13826_v10  ;;  %v13873_v10 = vld [vmem:[#allocation59_spill] sm:$0xff] }
 0x4ef   : > { %8638 = vmatpush1.bf16.msra.mxu0 %v12071_v41  ;;  %8681 = vmatpush1.bf16.msra.mxu1 %v12073_v38  ;;  %v13828_v41 = vld [vmem:[#allocation30_spill] sm:$0xff] }
 0x4f0   : > { %8870 = vmatprep.subr.bf16.mxu0 %v13784_v47  ;;  %8913 = vmatprep.subr.bf16.mxu1 %v13785_v36  ;;  %v13829_v38 = vld [vmem:[#allocation26_spill] sm:$0xff]  ;;  %v13831_v36 = vld [vmem:[#allocation37_spill] sm:$0xff] }
 0x4f1   : > { %v13830_v47 = vpack.c.bf16 %v13828_v41, %v13829_v38  ;;  %v13876_v38 = vld [vmem:[#allocation62_spill] sm:$0xff] }
 0x4f2   : > { %8640 = vmatmul.mubr.bf16.vlgmr.msra.gmra.mrb[68].mxu0 %v13119_v62  ;;  %8683 = vmatmul.mubr.bf16.vlgmr.msra.gmra.mrb[68].mxu1 %v13119_v62  ;;  %v13801_v62 = vpack.c.bf16 %v12903_v25, %v12891_v23  ;;  %v13809_v23 = vpack.c.bf16 %v13807_v13, %v13808_v30  ;;  %v13810_v25 = vld [vmem:[#allocation23_spill] sm:$0xff]  ;;  %v13855_v30 = vld [vmem:[#allocation53_spill] sm:$0xff] }
 0x4f3   : > { %8871 = vmatpush1.bf16.msra.mxu0 %v13786_v4  ;;  %8914 = vmatpush1.bf16.msra.mxu1 %v13787_v33  ;;  %v13812_v19 = vpack.c.bf16 %v13810_v25, %v13811_v7  ;;  %v13832_v4 = vld [vmem:[#allocation33_spill] sm:$0xff]  ;;  %v13858_v7 = vld [vmem:[#allocation55_spill] sm:$0xff] }
 0x4f4   : > { %8956 = vmatprep.subr.bf16.mxu0 %v13788_v8  ;;  %8999 = vmatprep.subr.bf16.mxu1 %v13789_v22  ;;  %v13833_v33 = vpack.c.bf16 %v13831_v36, %v13832_v4  ;;  %v13834_v8 = vld [vmem:[#allocation39_spill] sm:$0xff]  ;;  %v13835_v22 = vld [vmem:[#allocation36_spill] sm:$0xff]  ;;  %v13879_v4 = vld [vmem:[#allocation69_spill] sm:$0xff] }
 0x4f5   : > { %8902 = vmatprep.mubr.bf16.mxu0 %v12525_v27  ;;  %8945 = vmatprep.mubr.bf16.mxu1 %v12525_v27 }
 0x4fa   : > { %12076 = vmatmul.mubr.msk.bf16.vlgmr.msra.gmra.mrb[72].mxu0 %vm8866_vm0, %v12335_v32  ;;  %12077 = vmatmul.mubr.msk.bf16.vlgmr.msra.gmra.mrb[72].mxu1 %vm8866_vm0, %v12335_v32 }
 0x4fb   : > { %8957 = vmatpush1.bf16.msra.mxu0 %v13790_v2  ;;  %9000 = vmatpush1.bf16.msra.mxu1 %v13791_v12  ;;  %v12338_v2 = vld [vmem:[#allocation8 + $0x18] sm:$0xff]  }
 0x4fc   : > { %9050 = vmatprep.subr.bf16.mxu0 %v13792_v21  ;;  %9093 = vmatprep.subr.bf16.mxu1 %v13793_v26  ;;  %v13837_v12 = vld [vmem:[#allocation35_spill] sm:$0xff]  ;;  %v13838_v21 = vld [vmem:[#allocation32_spill] sm:$0xff] }
 0x4fd   : > { %8988 = vmatprep.mubr.bf16.mxu0 %v12525_v27  ;;  %9031 = vmatprep.mubr.bf16.mxu1 %v12525_v27  ;;  %v13839_v26 = vpack.c.bf16 %v13837_v12, %v13838_v21 }
 0x502   : > { %12078 = vmatmul.mubr.msk.bf16.vlgmr.msra.gmra.mrb[76].mxu0 %vm8866_vm0, %v12335_v32  ;;  %12079 = vmatmul.mubr.msk.bf16.vlgmr.msra.gmra.mrb[76].mxu1 %vm8866_vm0, %v12335_v32  ;;  %v13836_v32 = vpack.c.bf16 %v13834_v8, %v13835_v22  ;;  %v13882_v22 = vld [vmem:[#allocation71_spill] sm:$0xff] }
 0x503   : > { %9051 = vmatpush1.bf16.msra.mxu0 %v13794_v55  ;;  %9094 = vmatpush1.bf16.msra.mxu1 %v13795_v5  ;;  %v13840_v55 = vld [vmem:[#allocation38_spill] sm:$0xff] }
 0x504   : > { %9136 = vmatprep.subr.bf16.mxu0 %v13796_v11  ;;  %9179 = vmatprep.subr.bf16.mxu1 %v13797_v14  ;;  %v13841_v5 = vld [vmem:[#allocation34_spill] sm:$0xff]  ;;  %v13843_v14 = vld [vmem:[#allocation45_spill] sm:$0xff] }
 0x505   : > { %v13229_v20 = vpop.f32.mrb[56].mxu0  ;;  %9082 = vmatprep.mubr.bf16.mxu0 %v12525_v27  ;;  %v13234_v1 = vpop.f32.mrb[56].mxu1  ;;  %9125 = vmatprep.mubr.bf16.mxu1 %v12525_v27  ;;  %v13842_v11 = vpack.c.bf16 %v13840_v55, %v13841_v5  ;;  %v12340_v55 = vld [vmem:[#allocation8 + $0x28] sm:$0xff]  }
 0x506   : > { %v13232_v63 = vpop.f32.mrb[57].mxu0  ;;  %v13239_v15 = vpop.f32.mrb[57].mxu1 }
 0x507   : > { %v13237_v9 = vpop.f32.mrb[58].mxu0  ;;  %v13245_v53 = vpop.f32.mrb[58].mxu1 }
 0x508   : > { %v8749_v45 = vpack.c.bf16 %v13237_v9, %v13229_v20  ;;  %v13243_v50 = vpop.f32.mrb[59].mxu0  ;;  %v8751_v3 = vpack.c.bf16 %v13245_v53, %v13234_v1  ;;  %v13251_v16 = vpop.f32.mrb[59].mxu1 }
 0x509   : > { %v8750_v60 = vpack.c.bf16 %v13243_v50, %v13232_v63  ;;  %v8752_v17 = vpack.c.bf16 %v13251_v16, %v13239_v15 }
 0x50a   : > { %12081 = vmatmul.mubr.msk.bf16.vlgmr.msra.gmra.mrb[72].mxu0 %vm8866_vm0, %v12336_v6  ;;  %12082 = vmatmul.mubr.msk.bf16.vlgmr.msra.gmra.mrb[72].mxu1 %vm8866_vm0, %v12336_v6 }
 0x50b   : > { %9137 = vmatpush1.bf16.msra.mxu0 %v13798_v29  ;;  %9180 = vmatpush1.bf16.msra.mxu1 %v13799_v34  ;;  %v13846_v34 = vld [vmem:[#allocation47_spill] sm:$0xff] }
 0x50c   : > { %9241 = vmatprep.subr.bf16.mxu0 %v13800_v40  ;;  %9284 = vmatprep.subr.bf16.mxu1 %v13801_v62  ;;  %v13847_v40 = vld [vmem:[#allocation44_spill] sm:$0xff] }
 0x50d   : > { %9168 = vmatprep.mubr.bf16.mxu0 %v12525_v27  ;;  %9211 = vmatprep.mubr.bf16.mxu1 %v12525_v27  ;;  %v13848_v62 = vpack.c.bf16 %v13846_v34, %v13847_v40 }
 0x512   : > { %12083 = vmatmul.mubr.msk.bf16.vlgmr.msra.gmra.mrb[76].mxu0 %vm8866_vm0, %v12336_v6  ;;  %12084 = vmatmul.mubr.msk.bf16.vlgmr.msra.gmra.mrb[76].mxu1 %vm8866_vm0, %v12336_v6  ;;  %v13844_v6 = vld [vmem:[#allocation41_spill] sm:$0xff] }
 0x513   : > { %9242 = vmatpush1.bf16.msra.mxu0 %v13803_v46  ;;  %9285 = vmatpush1.bf16.msra.mxu1 %v13806_v56  ;;  %v13845_v29 = vpack.c.bf16 %v13843_v14, %v13844_v6  ;;  %v13850_v46 = vld [vmem:[#allocation40_spill] sm:$0xff]  ;;  %v13853_v56 = vld [vmem:[#allocation42_spill] sm:$0xff] }
 0x514   : > { %9327 = vmatprep.subr.bf16.mxu0 %v13809_v23  ;;  %9370 = vmatprep.subr.bf16.mxu1 %v13812_v19  ;;  %v13851_v49 = vpack.c.bf16 %v13849_v42, %v13850_v46  ;;  %v13854_v13 = vpack.c.bf16 %v13852_v54, %v13853_v56  ;;  %v13856_v23 = vld [vmem:[#allocation49_spill] sm:$0xff]  ;;  %v13859_v19 = vld [vmem:[#allocation52_spill] sm:$0xff]  ;;  %v13885_v46 = vld [vmem:[#allocation67_spill] sm:$0xff] }
 0x515   : > { %9273 = vmatprep.mubr.bf16.mxu0 %v12525_v27  ;;  %9316 = vmatprep.mubr.bf16.mxu1 %v12525_v27  ;;  %v13857_v25 = vpack.c.bf16 %v13855_v30, %v13856_v23  ;;  %v13888_v56 = vld [vmem:[#allocation70_spill] sm:$0xff]  ;;  %v13891_v23 = vld [vmem:[#allocation77_spill] sm:$0xff] }
 0x51a   : > { %12086 = vmatmul.mubr.msk.bf16.vlgmr.msra.gmra.mrb[72].mxu0 %vm8866_vm0, %v12337_v58  ;;  %12087 = vmatmul.mubr.msk.bf16.vlgmr.msra.gmra.mrb[72].mxu1 %vm8866_vm0, %v12337_v58 }
 0x51b   : > { %9328 = vmatpush1.bf16.msra.mxu0 %v13815_v48  ;;  %9371 = vmatpush1.bf16.msra.mxu1 %v13818_v44  ;;  %v13862_v48 = vld [vmem:[#allocation48_spill] sm:$0xff]  ;;  %v13865_v44 = vld [vmem:[#allocation50_spill] sm:$0xff] }
 0x51c   : > { %9448 = vmatprep.subr.bf16.mxu0 %v13821_v52  ;;  %9491 = vmatprep.subr.bf16.mxu1 %v13824_v57  ;;  %v13863_v28 = vpack.c.bf16 %v13861_v18, %v13862_v48  ;;  %v13866_v31 = vpack.c.bf16 %v13864_v43, %v13865_v44  ;;  %v13868_v52 = vld [vmem:[#allocation57_spill] sm:$0xff]  ;;  %v13871_v57 = vld [vmem:[#allocation60_spill] sm:$0xff]  ;;  %v13900_v43 = vld [vmem:[#allocation74_spill] sm:$0xff] }
 0x51d   : > { %9359 = vmatprep.mubr.bf16.mxu0 %v12525_v27  ;;  %9402 = vmatprep.mubr.bf16.mxu1 %v12525_v27  ;;  %v13869_v51 = vpack.c.bf16 %v13867_v24, %v13868_v52  ;;  %v13872_v59 = vpack.c.bf16 %v13870_v39, %v13871_v57  ;;  %v13897_v18 = vld [vmem:[#allocation72_spill] sm:$0xff]  ;;  %v13905_v52 = vld [vmem:[#allocation83_spill] sm:$0xff]  ;;  %v12341_v39 = vld [vmem:[#allocation8 + $0x30] sm:$0xff]  }
 0x51e   : > { %v13903_v24 = vld [vmem:[#allocation80_spill] sm:$0xff]  ;;  %v13907_v57 = vld [vmem:[#allocation82_spill] sm:$0xff] }
 0x522   : > { %12088 = vmatmul.mubr.msk.bf16.vlgmr.msra.gmra.mrb[76].mxu0 %vm8866_vm0, %v12337_v58  ;;  %12089 = vmatmul.mubr.msk.bf16.vlgmr.msra.gmra.mrb[76].mxu1 %vm8866_vm0, %v12337_v58  ;;  %v13860_v58 = vpack.c.bf16 %v13858_v7, %v13859_v19  ;;  %v13894_v19 = vld [vmem:[#allocation76_spill] sm:$0xff] }
 0x523   : > { %9449 = vmatpush1.bf16.msra.mxu0 %v13827_v35  ;;  %9492 = vmatpush1.bf16.msra.mxu1 %v13830_v47  ;;  %v13874_v35 = vld [vmem:[#allocation56_spill] sm:$0xff]  ;;  %v13877_v47 = vld [vmem:[#allocation58_spill] sm:$0xff] }
 0x524   : > { %9534 = vmatprep.subr.bf16.mxu0 %v13833_v33  ;;  %9577 = vmatprep.subr.bf16.mxu1 %v13836_v32  ;;  %v13875_v41 = vpack.c.bf16 %v13873_v10, %v13874_v35  ;;  %v13878_v36 = vpack.c.bf16 %v13876_v38, %v13877_v47  ;;  %v13880_v33 = vld [vmem:[#allocation65_spill] sm:$0xff]  ;;  %v13883_v32 = vld [vmem:[#allocation68_spill] sm:$0xff] }
 0x525   : > { %9480 = vmatprep.mubr.bf16.mxu0 %v12525_v27  ;;  %9523 = vmatprep.mubr.bf16.mxu1 %v12525_v27  ;;  %v13881_v8 = vpack.c.bf16 %v13879_v4, %v13880_v33  ;;  %v13910_v35 = vld [vmem:[#allocation85_spill] sm:$0xff]  ;;  %v12343_v47 = vld [vmem:[#allocation8 + $0x40] sm:$0xff]  }
 0x52a   : > { %12091 = vmatmul.mubr.msk.bf16.vlgmr.msra.gmra.mrb[72].mxu0 %vm8866_vm0, %v12338_v2  ;;  %12092 = vmatmul.mubr.msk.bf16.vlgmr.msra.gmra.mrb[72].mxu1 %vm8866_vm0, %v12338_v2 }
 0x52b   : > { %9535 = vmatpush1.bf16.msra.mxu0 %v13839_v26  ;;  %9578 = vmatpush1.bf16.msra.mxu1 %v13842_v11 }
 0x52c   : > { %9655 = vmatprep.subr.bf16.mxu0 %v13845_v29  ;;  %9698 = vmatprep.subr.bf16.mxu1 %v13848_v62 }
 0x52d   : > { %9566 = vmatprep.mubr.bf16.mxu0 %v12525_v27  ;;  %9609 = vmatprep.mubr.bf16.mxu1 %v12525_v27 }
 0x532   : > { %12093 = vmatmul.mubr.msk.bf16.vlgmr.msra.gmra.mrb[76].mxu0 %vm8866_vm0, %v12338_v2  ;;  %12094 = vmatmul.mubr.msk.bf16.vlgmr.msra.gmra.mrb[76].mxu1 %vm8866_vm0, %v12338_v2  ;;  %v13884_v2 = vpack.c.bf16 %v13882_v22, %v13883_v32 }
 0x533   : > { %9656 = vmatpush1.bf16.msra.mxu0 %v13851_v49  ;;  %9699 = vmatpush1.bf16.msra.mxu1 %v13854_v13  ;;  %v13886_v49 = vld [vmem:[#allocation64_spill] sm:$0xff]  ;;  %v13889_v13 = vld [vmem:[#allocation66_spill] sm:$0xff] }
 0x534   : > { %9741 = vmatprep.subr.bf16.mxu0 %v13857_v25  ;;  %9784 = vmatprep.subr.bf16.mxu1 %v13860_v58  ;;  %v13887_v54 = vpack.c.bf16 %v13885_v46, %v13886_v49  ;;  %v13890_v30 = vpack.c.bf16 %v13888_v56, %v13889_v13  ;;  %v13892_v25 = vld [vmem:[#allocation73_spill] sm:$0xff]  ;;  %v13895_v58 = vpack.c.bf16 %v13145_v37, %v13894_v19 }
 0x535   : > { %9687 = vmatprep.mubr.bf16.mxu0 %v12525_v27  ;;  %9730 = vmatprep.mubr.bf16.mxu1 %v12525_v27  ;;  %v13893_v7 = vpack.c.bf16 %v13891_v23, %v13892_v25 }
 0x53a   : > { %12096 = vmatmul.mubr.msk.bf16.vlgmr.msra.gmra.mrb[72].mxu0 %vm8866_vm0, %v12339_v0  ;;  %12097 = vmatmul.mubr.msk.bf16.vlgmr.msra.gmra.mrb[72].mxu1 %vm8866_vm0, %v12339_v0 }
 0x53b   : > { %9742 = vmatpush1.bf16.msra.mxu0 %v13863_v28  ;;  %9785 = vmatpush1.bf16.msra.mxu1 %v13866_v31  ;;  %v13899_v28 = vld [vmem:[#allocation78_spill] sm:$0xff]  ;;  %v13902_v31 = vld [vmem:[#allocation84_spill] sm:$0xff] }
 0x53c   : > { %9862 = vmatprep.subr.bf16.mxu0 %v13869_v51  ;;  %9905 = vmatprep.subr.bf16.mxu1 %v13872_v59  ;;  %v13901_v44 = vpack.c.bf16 %v13899_v28, %v13900_v43  ;;  %v13904_v37 = vpack.c.bf16 %v13902_v31, %v13903_v24  ;;  %v13906_v51 = vpack.c.bf16 %v13173_v61, %v13905_v52  ;;  %v13908_v59 = vld [vmem:[#allocation79_spill] sm:$0xff] }
 0x53d   : > { %9773 = vmatprep.mubr.bf16.mxu0 %v12525_v27  ;;  %9816 = vmatprep.mubr.bf16.mxu1 %v12525_v27  ;;  %v13909_v10 = vpack.c.bf16 %v13907_v57, %v13908_v59  ;;  %v12342_v61 = vld [vmem:[#allocation8 + $0x38] sm:$0xff]  }
 0x542   : > { %12098 = vmatmul.mubr.msk.bf16.vlgmr.msra.gmra.mrb[76].mxu0 %vm8866_vm0, %v12339_v0  ;;  %12099 = vmatmul.mubr.msk.bf16.vlgmr.msra.gmra.mrb[76].mxu1 %vm8866_vm0, %v12339_v0  ;;  %v13896_v0 = vld [vmem:[#allocation75_spill] sm:$0xff] }
 0x543   : > { %9863 = vmatpush1.bf16.msra.mxu0 %v13875_v41  ;;  %9906 = vmatpush1.bf16.msra.mxu1 %v13878_v36  ;;  %v13898_v48 = vpack.c.bf16 %v13896_v0, %v13897_v18  ;;  %v13911_v41 = vld [vmem:[#allocation81_spill] sm:$0xff] }
 0x544   : > { %9948 = vmatprep.subr.bf16.mxu0 %v13881_v8  ;;  %9991 = vmatprep.subr.bf16.mxu1 %v13884_v2  ;;  %v13912_v38 = vpack.c.bf16 %v13910_v35, %v13911_v41 }
 0x545   : > { %v8469_v12 = vpop.f32.mrb[60].mxu0  ;;  %9894 = vmatprep.mubr.bf16.mxu0 %v12525_v27  ;;  %v8512_v26 = vpop.f32.mrb[60].mxu1  ;;  %9937 = vmatprep.mubr.bf16.mxu1 %v12525_v27 }
 0x546   : > { %v8471_v21 = vpop.f32.mrb[61].mxu0  ;;  %v8514_v11 = vpop.f32.mrb[61].mxu1 }
 0x547   : > { %v8473_v5 = vpop.f32.mrb[62].mxu0  ;;  %v8516_v29 = vpop.f32.mrb[62].mxu1 }
 0x548   : > { %v8753_v14 = vpack.c.bf16 %v8473_v5, %v8469_v12  ;;  %v8475_v6 = vpop.f32.mrb[63].mxu0  ;;  %v8755_v40 = vpack.c.bf16 %v8516_v29, %v8512_v26  ;;  %v8518_v62 = vpop.f32.mrb[63].mxu1 }
 0x549   : > { %v8754_v34 = vpack.c.bf16 %v8475_v6, %v8471_v21  ;;  %v8756_v42 = vpack.c.bf16 %v8518_v62, %v8514_v11 }
 0x54a   : > { %12101 = vmatmul.mubr.msk.bf16.vlgmr.msra.gmra.mrb[72].mxu0 %vm8866_vm0, %v12340_v55  ;;  %12102 = vmatmul.mubr.msk.bf16.vlgmr.msra.gmra.mrb[72].mxu1 %vm8866_vm0, %v12340_v55 }
 0x54b   : > { %9949 = vmatpush1.bf16.msra.mxu0 %v13887_v54  ;;  %9992 = vmatpush1.bf16.msra.mxu1 %v13890_v30 }
 0x54c   : > { %10069 = vmatprep.subr.bf16.mxu0 %v13893_v7  ;;  %10112 = vmatprep.subr.bf16.mxu1 %v13895_v58 }
 0x54d   : > { %9980 = vmatprep.mubr.bf16.mxu0 %v12525_v27  ;;  %10023 = vmatprep.mubr.bf16.mxu1 %v12525_v27 }
 0x552   : > { %12103 = vmatmul.mubr.msk.bf16.vlgmr.msra.gmra.mrb[76].mxu0 %vm8866_vm0, %v12340_v55  ;;  %12104 = vmatmul.mubr.msk.bf16.vlgmr.msra.gmra.mrb[76].mxu1 %vm8866_vm0, %v12340_v55 }
 0x553   : > { %10070 = vmatpush1.bf16.msra.mxu0 %v13898_v48  ;;  %10113 = vmatpush1.bf16.msra.mxu1 %v13901_v44 }
 0x554   : > { %10155 = vmatprep.subr.bf16.mxu0 %v13904_v37  ;;  %10198 = vmatprep.subr.bf16.mxu1 %v13906_v51 }
 0x555   : > { %10101 = vmatprep.mubr.bf16.mxu0 %v12525_v27  ;;  %10144 = vmatprep.mubr.bf16.mxu1 %v12525_v27 }
 0x55a   : > { %12106 = vmatmul.mubr.msk.bf16.vlgmr.msra.gmra.mrb[72].mxu0 %vm8866_vm0, %v12341_v39  ;;  %12107 = vmatmul.mubr.msk.bf16.vlgmr.msra.gmra.mrb[72].mxu1 %vm8866_vm0, %v12341_v39 }
 0x55b   : > { %10156 = vmatpush1.bf16.msra.mxu0 %v13909_v10  ;;  %10199 = vmatpush1.bf16.msra.mxu1 %v13912_v38 }
 0x55c   : > { %10276 = vmatprep.subr.bf16.mxu0 %v8750_v60  ;;  %10319 = vmatprep.subr.bf16.mxu1 %v8752_v17 }
 0x55d   : > { %10187 = vmatprep.mubr.bf16.mxu0 %v12525_v27  ;;  %10230 = vmatprep.mubr.bf16.mxu1 %v12525_v27 }
 0x562   : > { %12108 = vmatmul.mubr.msk.bf16.vlgmr.msra.gmra.mrb[76].mxu0 %vm8866_vm0, %v12341_v39  ;;  %12109 = vmatmul.mubr.msk.bf16.vlgmr.msra.gmra.mrb[76].mxu1 %vm8866_vm0, %v12341_v39 }
 0x563   : > { %10277 = vmatpush1.bf16.msra.mxu0 %v8749_v45  ;;  %10320 = vmatpush1.bf16.msra.mxu1 %v8751_v3 }
 0x564   : > { %10362 = vmatprep.subr.bf16.mxu0 %v8754_v34  ;;  %10405 = vmatprep.subr.bf16.mxu1 %v8756_v42 }
 0x565   : > { %10308 = vmatprep.mubr.bf16.mxu0 %v12525_v27  ;;  %10351 = vmatprep.mubr.bf16.mxu1 %v12525_v27 }
 0x56a   : > { %12111 = vmatmul.mubr.msk.bf16.vlgmr.msra.gmra.mrb[72].mxu0 %vm8866_vm0, %v12342_v61  ;;  %12112 = vmatmul.mubr.msk.bf16.vlgmr.msra.gmra.mrb[72].mxu1 %vm8866_vm0, %v12342_v61 }
 0x56b   : > { %10363 = vmatpush1.bf16.msra.mxu0 %v8753_v14  ;;  %10406 = vmatpush1.bf16.msra.mxu1 %v8755_v40 }
 0x56c   : > { %10394 = vmatprep.mubr.bf16.mxu0 %v12525_v27  ;;  %10437 = vmatprep.mubr.bf16.mxu1 %v12525_v27 }
 0x572   : > { %12113 = vmatmul.mubr.msk.bf16.vlgmr.msra.gmra.mrb[76].mxu0 %vm8866_vm0, %v12342_v61  ;;  %12114 = vmatmul.mubr.msk.bf16.vlgmr.msra.gmra.mrb[76].mxu1 %vm8866_vm0, %v12342_v61 }
 0x573   : > { %10515 = vmatprep.mubr.bf16.mxu0 %v12525_v27  ;;  %10558 = vmatprep.mubr.bf16.mxu1 %v12525_v27 }
 0x585   : > { %v8555_v20 = vpop.f32.mrb[64].mxu0  ;;  %v8598_v63 = vpop.f32.mrb[64].mxu1 }
 0x586   : > { %v8557_v1 = vpop.f32.mrb[65].mxu0  ;;  %v8600_v9 = vpop.f32.mrb[65].mxu1 }
 0x587   : > { %v8559_v15 = vpop.f32.mrb[66].mxu0  ;;  %v8602_v50 = vpop.f32.mrb[66].mxu1 }
 0x588   : > { %v8757_v45 = vpack.c.bf16 %v8559_v15, %v8555_v20  ;;  %v8561_v53 = vpop.f32.mrb[67].mxu0  ;;  %v8759_v60 = vpack.c.bf16 %v8602_v50, %v8598_v63  ;;  %v8604_v16 = vpop.f32.mrb[67].mxu1 }
 0x589   : > { %v8758_v3 = vpack.c.bf16 %v8561_v53, %v8557_v1  ;;  %v8760_v17 = vpack.c.bf16 %v8604_v16, %v8600_v9 }
 0x58b   : > { %10483 = vmatprep.subr.bf16.mxu0 %v8758_v3  ;;  %10526 = vmatprep.subr.bf16.mxu1 %v8760_v17 }
 0x58c   : > { %10484 = vmatpush1.bf16.msra.mxu0 %v8757_v45  ;;  %10527 = vmatpush1.bf16.msra.mxu1 %v8759_v60 }
 0x58f   : > { %12116 = vmatmul.mubr.msk.bf16.vlgmr.msra.gmra.mrb[72].mxu0 %vm8866_vm0, %v12343_v47  ;;  %12117 = vmatmul.mubr.msk.bf16.vlgmr.msra.gmra.mrb[72].mxu1 %vm8866_vm0, %v12343_v47 }
 0x590   : > { %10601 = vmatprep.mubr.bf16.mxu0 %v12525_v27  ;;  %10644 = vmatprep.mubr.bf16.mxu1 %v12525_v27 }
 0x5c5   : > { %v8641_v36 = vpop.f32.mrb[68].mxu0  ;;  %v8684_v4 = vpop.f32.mrb[68].mxu1 }
 0x5c6   : > { %v8643_v33 = vpop.f32.mrb[69].mxu0  ;;  %v8686_v8 = vpop.f32.mrb[69].mxu1 }
 0x5c7   : > { %v8645_v22 = vpop.f32.mrb[70].mxu0  ;;  %v8688_v2 = vpop.f32.mrb[70].mxu1 }
 0x5c8   : > { %v8761_v32 = vpack.c.bf16 %v8645_v22, %v8641_v36  ;;  %v8647_v12 = vpop.f32.mrb[71].mxu0  ;;  %v8763_v21 = vpack.c.bf16 %v8688_v2, %v8684_v4  ;;  %v8690_v55 = vpop.f32.mrb[71].mxu1 }
 0x5c9   : > { %v8762_v26 = vpack.c.bf16 %v8647_v12, %v8643_v33  ;;  %v8764_v5 = vpack.c.bf16 %v8690_v55, %v8686_v8 }
 0x5cb   : > { %10569 = vmatprep.subr.bf16.mxu0 %v8762_v26  ;;  %10612 = vmatprep.subr.bf16.mxu1 %v8764_v5 }
 0x5cc   : > { %10570 = vmatpush1.bf16.msra.mxu0 %v8761_v32  ;;  %10613 = vmatpush1.bf16.msra.mxu1 %v8763_v21 }
 0x5cf   : > { %12118 = vmatmul.mubr.msk.bf16.vlgmr.msra.gmra.mrb[76].mxu0 %vm8866_vm0, %v12343_v47  ;;  %12119 = vmatmul.mubr.msk.bf16.vlgmr.msra.gmra.mrb[76].mxu1 %vm8866_vm0, %v12343_v47 }
 0x662   : > { %v13455_v27 = vpop.f32.mrb[72].mxu0  ;;  %v13459_v14 = vpop.f32.mrb[72].mxu1 }
 0x663   : > { %v10689_v11 = vmul.f32 %v13455_v27, %v13455_v27  ;;  %v13461_v6 = vpop.f32.mrb[73].mxu0  ;;  %v13467_v40 = vpop.f32.mrb[73].mxu1  ;;  %v10691_v54 = vmul.f32 %v13459_v14, %v13459_v14 }
 0x664   : > { %v10671_v29 = vadd.f32 %v13461_v6, %v13455_v27  ;;  %v10690_v34 = vmul.f32 %v13461_v6, %v13461_v6  ;;  %v13469_v62 = vpop.f32.mrb[74].mxu0  ;;  %v13473_v46 = vpop.f32.mrb[74].mxu1  ;;  %v10692_v19 = vmul.f32 %v13467_v40, %v13467_v40 }
 0x665   : > { %v10697_v42 = vmul.f32 %v13469_v62, %v13469_v62  ;;  %v13475_v49 = vpop.f32.mrb[75].mxu0  ;;  %v13482_v23 = vpop.f32.mrb[75].mxu1  ;;  %v10699_v18 = vmul.f32 %v13473_v46, %v13473_v46 }
 0x666   : > { %v10705_v56 = vadd.f32 %v10690_v34, %v10689_v11  ;;  %v10672_v13 = vadd.f32 %v10671_v29, %v13459_v14  ;;  %v10680_v30 = vadd.f32 %v13475_v49, %v13469_v62  ;;  %v10698_v25 = vmul.f32 %v13475_v49, %v13475_v49 }
 0x667   : > { %v10700_v44 = vmul.f32 %v13482_v23, %v13482_v23 }
 0x668   : > { %v10673_v7 = vadd.f32 %v10672_v13, %v13467_v40  ;;  %v10706_v58 = vadd.f32 %v10705_v56, %v10691_v54  ;;  %v10681_v0 = vadd.f32 %v10680_v30, %v13473_v46  ;;  %v10714_v48 = vadd.f32 %v10698_v25, %v10697_v42 }
 0x66a   : > { %v10707_v28 = vadd.f32 %v10706_v58, %v10692_v19  ;;  %v10682_v43 = vadd.f32 %v10681_v0, %v13482_v23  ;;  %v10715_v31 = vadd.f32 %v10714_v48, %v10699_v18 }
 0x66c   : > { %v10716_v24 = vadd.f32 %v10715_v31, %v10700_v44 }
 0x6a2   : > { %v13495_v37 = vpop.f32.mrb[76].mxu0  ;;  %v13500_v39 = vpop.f32.mrb[76].mxu1 }
 0x6a3   : > { %v10674_v52 = vadd.f32 %v10673_v7, %v13495_v37  ;;  %v10693_v51 = vmul.f32 %v13495_v37, %v13495_v37  ;;  %v13502_v57 = vpop.f32.mrb[77].mxu0  ;;  %v13506_v10 = vpop.f32.mrb[77].mxu1  ;;  %v10695_v60 = vmul.f32 %v13500_v39, %v13500_v39 }
 0x6a4   : > { %v10694_v59 = vmul.f32 %v13502_v57, %v13502_v57  ;;  %v13508_v35 = vpop.f32.mrb[78].mxu0  ;;  %v13514_v63 = vpop.f32.mrb[78].mxu1  ;;  %v10696_v4 = vmul.f32 %v13506_v10, %v13506_v10 }
 0x6a5   : > { %v10708_v41 = vadd.f32 %v10707_v28, %v10693_v51  ;;  %v10675_v38 = vadd.f32 %v10674_v52, %v13502_v57  ;;  %v10683_v61 = vadd.f32 %v10682_v43, %v13508_v35  ;;  %v10701_v20 = vmul.f32 %v13508_v35, %v13508_v35  ;;  %v13516_v1 = vpop.f32.mrb[79].mxu0  ;;  %v13520_v15 = vpop.f32.mrb[79].mxu1 }
 0x6a6   : > { %v10702_v9 = vmul.f32 %v13516_v1, %v13516_v1  ;;  %v10703_v16 = vmul.f32 %v13514_v63, %v13514_v63  ;;  %v10704_v8 = vmul.f32 %v13520_v15, %v13520_v15 }
 0x6a7   : > { %v10717_v45 = vadd.f32 %v10716_v24, %v10701_v20  ;;  %v10684_v50 = vadd.f32 %v10683_v61, %v13516_v1  ;;  %v10676_v53 = vadd.f32 %v10675_v38, %v13500_v39  ;;  %v10709_v3 = vadd.f32 %v10708_v41, %v10694_v59 }
 0x6a9   : > { %v10718_v17 = vadd.f32 %v10717_v45, %v10702_v9  ;;  %v10677_v47 = vadd.f32 %v10676_v53, %v13506_v10  ;;  %v10685_v36 = vadd.f32 %v10684_v50, %v13514_v63  ;;  %v10710_v33 = vadd.f32 %v10709_v3, %v10695_v60 }
 0x6ab   : > { %10678 = vadd.xlane.f32.xlu0 %v10677_v47  ;;  %v10686_v22 = vadd.f32 %v10685_v36, %v13520_v15  ;;  %v10719_v32 = vadd.f32 %v10718_v17, %v10703_v16  ;;  %v10711_v2 = vadd.f32 %v10710_v33, %v10696_v4 }
 0x6ad   : > { %v10720_v12 = vadd.f32 %v10719_v32, %v10704_v8  ;;  %10712 = vadd.xlane.f32.xlu1 %v10711_v2 }
 0x6af   : > { %10687 = vadd.xlane.f32.xlu0 %v10686_v22 }
 0x6b1   : > { %10721 = vadd.xlane.f32.xlu1 %v10720_v12 }
 0x738   : > { %v10679_v21 = vpop.xlane.xlu0 %10678 }
 0x739   : > { %v10723_v26 = vmul.f32 0.0009765625, %v10679_v21 }
 0x73a   : > { %v10713_v55 = vpop.xlane.xlu1 %10712 }
 0x73b   : > { %v10725_v11 = vmul.f32 0.0009765625, %v10713_v55  ;;  %v10727_v29 = vmul.f32 %v10723_v26, %v10723_v26  ;;  %v10733_v0 = vsub.f32 %v13455_v27, %v10723_v26  ;;  %v10734_v18 = vsub.f32 %v13461_v6, %v10723_v26 }
 0x73c   : > { %v10688_v5 = vpop.xlane.xlu0 %10687  ;;  %v10735_v48 = vsub.f32 %v13459_v14, %v10723_v26  ;;  %v10736_v28 = vsub.f32 %v13467_v40, %v10723_v26  ;;  %v10737_v43 = vsub.f32 %v13495_v37, %v10723_v26  ;;  %v10738_v44 = vsub.f32 %v13502_v57, %v10723_v26 }
 0x73d   : > { %v10724_v34 = vmul.f32 0.0009765625, %v10688_v5  ;;  %v10729_v42 = vsub.f32 %v10725_v11, %v10727_v29  ;;  %v10739_v31 = vsub.f32 %v13500_v39, %v10723_v26  ;;  %v10740_v24 = vsub.f32 %v13506_v10, %v10723_v26 }
 0x73e   : > { %v10722_v54 = vpop.xlane.xlu1 %10721 }
 0x73f   : > { %v10731_v56 = vmax.f32 %v10729_v42, 0.0  ;;  %v10726_v13 = vmul.f32 0.0009765625, %v10722_v54  ;;  %v10728_v30 = vmul.f32 %v10724_v34, %v10724_v34  ;;  %v10741_v52 = vsub.f32 %v13469_v62, %v10724_v34 }
 0x740   : > { %v10742_v51 = vsub.f32 %v13475_v49, %v10724_v34  ;;  %v10743_v27 = vsub.f32 %v13473_v46, %v10724_v34  ;;  %v10744_v6 = vsub.f32 %v13482_v23, %v10724_v34  ;;  %v10745_v40 = vsub.f32 %v13508_v35, %v10724_v34 }
 0x741   : > { %v10749_v25 = vadd.f32 1e-05, %v10731_v56  ;;  %v10730_v7 = vsub.f32 %v10726_v13, %v10728_v30  ;;  %v10746_v37 = vsub.f32 %v13516_v1, %v10724_v34  ;;  %v10747_v57 = vsub.f32 %v13514_v63, %v10724_v34 }
 0x742   : > { %v10748_v39 = vsub.f32 %v13520_v15, %v10724_v34 }
 0x743   : > { %12344 = vrsqrt.f32 %v10749_v25  ;;  %v10732_v19 = vmax.f32 %v10730_v7, 0.0 }
 0x745   : > { %v10750_v58 = vadd.f32 1e-05, %v10732_v19 }
 0x747   : > { %12346 = vrsqrt.f32 %v10750_v58 }
 0x74d   : > { %v12345_v14 = vpop.eup %12344 }
 0x74e   : > { %v10753_v59 = vmul.f32 %v12345_v14, %v10733_v0  ;;  %v10754_v10 = vmul.f32 %v12345_v14, %v10734_v18  ;;  %v10755_v62 = vmul.f32 %v12345_v14, %v10735_v48  ;;  %v10756_v41 = vmul.f32 %v12345_v14, %v10736_v28 }
 0x74f   : > { %v10757_v49 = vmul.f32 %v12345_v14, %v10737_v43  ;;  %v10758_v38 = vmul.f32 %v12345_v14, %v10738_v44  ;;  %v10759_v46 = vmul.f32 %v12345_v14, %v10739_v31  ;;  %v10760_v61 = vmul.f32 %v12345_v14, %v10740_v24 }
 0x750   : > { %v10769_v23 = vmax.f32 %v10753_v59, 0.0  ;;  %v10770_v20 = vmax.f32 %v10754_v10, 0.0  ;;  %v10771_v9 = vmax.f32 %v10755_v62, 0.0  ;;  %v10772_v45 = vmax.f32 %v10756_v41, 0.0 }
 0x751   : > { %v12347_v35 = vpop.eup %12346  ;;  %v10773_v50 = vmax.f32 %v10757_v49, 0.0  ;;  %v10774_v1 = vmax.f32 %v10758_v38, 0.0  ;;  %v10775_v53 = vmax.f32 %v10759_v46, 0.0  ;;  %v10776_v63 = vmax.f32 %v10760_v61, 0.0 }
 0x752   : > { %v10761_v15 = vmul.f32 %v12347_v35, %v10741_v52  ;;  %v10762_v60 = vmul.f32 %v12347_v35, %v10742_v51  ;;  %v10763_v3 = vmul.f32 %v12347_v35, %v10743_v27  ;;  %v10764_v16 = vmul.f32 %v12347_v35, %v10744_v6  ;;  %10785 = vst [vmem:[%s13553_s24] sm:$0xff] %v10769_v23 }
 0x753   : > { %10786 = vst [vmem:[%s13553_s24 + $0x8] sm:$0xff] %v10770_v20  ;;  %10787 = vst [vmem:[%s13553_s24 + $0x10] sm:$0xff] %v10771_v9  ;;  %v10765_v17 = vmul.f32 %v12347_v35, %v10745_v40  ;;  %v10766_v47 = vmul.f32 %v12347_v35, %v10746_v37  ;;  %v10767_v36 = vmul.f32 %v12347_v35, %v10747_v57 }
 0x754   : > { %10788 = vst [vmem:[%s13553_s24 + $0x18] sm:$0xff] %v10772_v45  ;;  %v10768_v4 = vmul.f32 %v12347_v35, %v10748_v39  ;;  %10789 = vst [vmem:[%s13553_s24 + $0x20] sm:$0xff] %v10773_v50  ;;  %v10777_v33 = vmax.f32 %v10761_v15, 0.0  ;;  %v10778_v8 = vmax.f32 %v10762_v60, 0.0  ;;  %v10779_v22 = vmax.f32 %v10763_v3, 0.0 }
 0x755   : > { %10790 = vst [vmem:[%s13553_s24 + $0x28] sm:$0xff] %v10774_v1  ;;  %10791 = vst [vmem:[%s13553_s24 + $0x30] sm:$0xff] %v10775_v53  ;;  %v10780_v32 = vmax.f32 %v10764_v16, 0.0  ;;  %v10781_v2 = vmax.f32 %v10765_v17, 0.0  ;;  %v10782_v12 = vmax.f32 %v10766_v47, 0.0  ;;  %v10783_v21 = vmax.f32 %v10767_v36, 0.0 }
 0x756   : > { %10792 = vst [vmem:[%s13553_s24 + $0x38] sm:$0xff] %v10776_v63  ;;  %v10784_v26 = vmax.f32 %v10768_v4, 0.0  ;;  %10793 = vst [vmem:[%s13553_s24 + $0x40] sm:$0xff] %v10777_v33 }
 0x757   : > { %10794 = vst [vmem:[%s13553_s24 + $0x48] sm:$0xff] %v10778_v8  ;;  %10795 = vst [vmem:[%s13553_s24 + $0x50] sm:$0xff] %v10779_v22 }
 0x758   : > { %10796 = vst [vmem:[%s13553_s24 + $0x58] sm:$0xff] %v10780_v32  ;;  %10797 = vst [vmem:[%s13553_s24 + $0x60] sm:$0xff] %v10781_v2 }
 0x759   : > { %10798 = vst [vmem:[%s13553_s24 + $0x68] sm:$0xff] %v10782_v12  ;;  %10799 = vst [vmem:[%s13553_s24 + $0x70] sm:$0xff] %v10783_v21 }
 0x75a   : > { %10800 = vst [vmem:[%s13553_s24 + $0x78] sm:$0xff] %v10784_v26 }
 0x75b   : > { %12457 = shalt.err (!%p12454_p2)
}
 0x75c   : > { %s12458_s17 = scalar_lea.hbm %s13567_s22, 2048  ;;  %s12462_s30 = scalar_lea.hbm %s13624_s3, 4096 }
 0x75d   : > { %p12459_p13 = scmp.ne.s32.totalorder %s13567_s22, %s12458_s17  ;;  %p12463_p4 = scmp.lt.u32.totalorder %s13567_s22, %s13624_s3 }
 0x75e   : > { %p12464_p7 = scmp.lt.u32.totalorder %s12462_s30, %s12458_s17  ;;  %p12466_p11 = scmp.lt.u32.totalorder %s12458_s17, %s13567_s22 }
 0x75f   : > { %p12460_p6 = pnand %p12459_p13, %p13913_p0 }
 0x760   : > { %p12465_p8 = por %p12464_p7, %p12463_p4 }
 0x761   : > { %p12461_p10 = pneg %p12460_p6 }
 0x762   : > { %p12467_p1 = por %p12466_p11, %p12465_p8 }
 0x764   : > { %p12468_p3 = pnand %p12467_p1, %p12461_p10 }
 0x766   : > { %12471 = shalt.err (!%p12468_p3)
}
 0x767   : > { %s12527_s18 = smov 1024   ;;  %s12528_s20 = smov 64  }
 0x768   : > { %12266 = dma.vmem_to_hbm [thread:$0]  (%p13913_p0), %s13569_s27, 2048, %s13567_s22, %s10802_s7, %s12527_s18, %s12527_s18, %s12528_s20  }
 0x769 PF: > { %s10830_s24 = sand.u32 1, %s12502_s12   ;;  %p13914_p5 = scmp.ne.s32.totalorder %s13702_s19, 0 }
 0x76a   : > { %p13915_p9 = scmp.ge.s32.totalorder %s12514_s15, 2  ;;  %s10831_s16 = scalar_lea.sflag [#allocation5], %s10830_s24 }
 0x76c   : > { %p12280_p12 = pnand %p13915_p9, %p13914_p5 }
 0x76e   : > { %12497 = dma.done.wait (!%p12280_p12), %s10831_s16, 2048  }
 0x76f   : > { %12499 = vsyncadd (!%p12280_p12), %s10831_s16, 4294965248  ;;  %p17_p2 = scmp.ge.s32.totalorder %s12659_s6, 4   ;;  %s13916_s12 = smov %s12506_s13 }
 0x770   : > { %s13917_s13 = smov %s12510_s14  ;;  %s13918_s14 = smov %s12668_s9 }
 0x771   : > { %s13919_s15 = smov %s12659_s6  ;;  %19 = sbr.rel (!%p17_p2) target bundleno = 6 (0x6), region = 94 }
 0x778   :  { %10836 = vsyncpa [#allocation4], 1 }
 0x779   :  { %10838 = vsyncpa [#allocation4 + $0x1], 1 }
 0x77a   :  { %10839 = vsyncpa [#allocation7], 1 }
 0x77b   :  { %10840 = vsyncpa [#allocation5], 1 }
 0x77c   :  { %10842 = vsyncpa [#allocation5 + $0x1], 1 }

</bundles_post_ra>
